<compile_context>
chip_gen: v7x
topology: tpu7x:2x2x1
jax: 0.10.0
libtpu: 0.0.40
codegen_flags: <defaults>
</compile_context>

<pallas_src>
import functools

import jax
import jax.numpy as jnp
from jax.experimental import pallas as pl
from jax.experimental.pallas import tpu as pltpu


HIDDEN = 768          # hidden_size hardcoded in the module
NUM_CLASSES = 2
OUT_PAD = 128         # lane-dense padded logits width

_TB_TARGET = 64                       # batch-tile target (rows)
_TS_CAP = 64                          # seq-tile cap (rows)
_HIDDEN_BUF_BUDGET = 24 * 1024 * 1024  # 2 inputs x 2 pipeline buffers of tiles
_VMEM_LIMIT = 48 * 1024 * 1024         # safe on v5e/v6e (128 MiB) & v7x (64 MiB)


def _round_up(x, m):
    return ((x + m - 1) // m) * m


def _derive_tiles(batch, seq, itemsize):
    """Tile sizes from the actual dtype bytes; >=2 batch tiles when possible."""
    tb = min(_TB_TARGET, _round_up(batch, 8))
    if _round_up(batch, 8) >= 16:
        # Keep at least two batch tiles so the "parallel" grid axis can shard
        # across both TensorCores on dual-TC parts (v7x).
        tb = min(tb, max(8, _round_up(-(-batch // 2), 8)))
    per_tile_bytes = _HIDDEN_BUF_BUDGET // 4          # 2 inputs x 2 buffers
    ts_budget = per_tile_bytes // (tb * HIDDEN * itemsize)
    ts_budget = max(16, (ts_budget // 16) * 16)       # bf16 sublane packing
    ts = min(ts_budget, _TS_CAP, _round_up(seq, 16))
    return tb, ts


def _resident_spec(shape):
    """Constant-index resident block; single-buffered when supported."""
    index_map = lambda b, s: (0,) * len(shape)
    try:
        return pl.BlockSpec(shape, index_map, pipeline_mode=pl.Buffered(1))
    except (AttributeError, TypeError):
        return pl.BlockSpec(shape, index_map)


def _relation_head_kernel(code_ref, text_ref, w1_ref, b1_ref, w2_ref, b2_ref,
                          out_ref, acc_code_ref, acc_text_ref, *, inv_s):
    s = pl.program_id(1)

    @pl.when(s == 0)
    def _():
        acc_code_ref[...] = jnp.zeros_like(acc_code_ref)
        acc_text_ref[...] = jnp.zeros_like(acc_text_ref)

    tb, ts, h = code_ref.shape  # static

    # Hot loop: accumulate sublane-group partial sums (tb, 8, H) with pure VPU
    # adds on static 8-row slices -- no cross-sublane XLU reduce per step and
    # no full-tile f32 temporary.
    code_acc = acc_code_ref[...]
    text_acc = acc_text_ref[...]
    for g in range(ts // 8):
        sl = pl.ds(g * 8, 8)
        code_acc = code_acc + code_ref[:, sl, :].astype(jnp.float32)
        text_acc = text_acc + text_ref[:, sl, :].astype(jnp.float32)
    acc_code_ref[...] = code_acc
    acc_text_ref[...] = text_acc

    @pl.when(s == pl.num_programs(1) - 1)
    def _():
        # Collapse the 8 sublane groups once, then divide by the FULL
        # (unpadded) sequence length passed from the wrapper.
        pool_code = jnp.sum(acc_code_ref[...], axis=1) * jnp.float32(inv_s)
        pool_text = jnp.sum(acc_text_ref[...], axis=1) * jnp.float32(inv_s)
        diff = jnp.abs(pool_code - pool_text)                    # (tb, H)

        # dense(concat([code, text, diff])) as a single fused
        # (tb, 3H) @ (3H, H) MXU pass: bf16 operands, f32 accumulation.
        feat = jnp.concatenate(
            [pool_code.astype(jnp.bfloat16),
             pool_text.astype(jnp.bfloat16),
             diff.astype(jnp.bfloat16)], axis=1)                 # (tb, 3H)
        x = jnp.tanh(
            jnp.dot(feat, w1_ref[...], preferred_element_type=jnp.float32)
            + b1_ref[...])                                       # (tb, H)
        # Dropout(p=0.1) is identity at inference.

        # Lane-dense padded projection: (tb, H) @ (H, 128) -> (tb, 128).
        logits = (jnp.dot(x.astype(jnp.bfloat16), w2_ref[...],
                          preferred_element_type=jnp.float32)
                  + b2_ref[...])
        out_ref[...] = logits.astype(out_ref.dtype)


def relation_classify_head(code_hidden, text_hidden, params):
    """code_hidden, text_hidden: (B, S, 768) bf16/f32. Returns (B, 2) f32 logits."""
    B, S, H = code_hidden.shape
    assert H == HIDDEN
    assert text_hidden.shape == (B, S, H)

    itemsize = max(jnp.dtype(code_hidden.dtype).itemsize,
                   jnp.dtype(text_hidden.dtype).itemsize)
    tb, ts = _derive_tiles(B, S, itemsize)

    # Zero-pad to tile multiples.  Exact: padded tokens add 0 to the token sum
    # (the mean divides by the ORIGINAL S), padded batch rows are sliced off.
    Bp = _round_up(B, tb)
    Sp = _round_up(S, ts)
    if (Bp, Sp) != (B, S):
        pad = ((0, Bp - B), (0, Sp - S), (0, 0))
        code_hidden = jnp.pad(code_hidden, pad)
        text_hidden = jnp.pad(text_hidden, pad)

    grid = (Bp // tb, Sp // ts)

    # Weights: bf16 MXU operands, f32 biases.  Output weight/bias padded to a
    # lane-dense 128-wide slab (zeros beyond column NUM_CLASSES).
    w1 = params["dense_w"].astype(jnp.bfloat16)                    # (3H, H)
    b1 = params["dense_b"].reshape(1, H).astype(jnp.float32)
    w2 = jnp.zeros((H, OUT_PAD), jnp.float32)
    w2 = w2.at[:, :NUM_CLASSES].set(params["out_w"]).astype(jnp.bfloat16)
    b2 = jnp.zeros((1, OUT_PAD), jnp.float32)
    b2 = b2.at[:, :NUM_CLASSES].set(params["out_b"].reshape(1, NUM_CLASSES))

    hidden_spec = pl.BlockSpec((tb, ts, H), lambda b, s: (b, s, 0))

    kernel = functools.partial(_relation_head_kernel, inv_s=1.0 / S)

    padded = pl.pallas_call(
        kernel,
        out_shape=jax.ShapeDtypeStruct((Bp, OUT_PAD), jnp.float32),
        grid_spec=pltpu.PrefetchScalarGridSpec(
            num_scalar_prefetch=0,
            grid=grid,
            in_specs=[
                hidden_spec,                        # code_hidden tile (streamed)
                hidden_spec,                        # text_hidden tile (streamed)
                _resident_spec((3 * H, H)),         # dense weight (W^T), resident
                _resident_spec((1, H)),             # dense bias
                _resident_spec((H, OUT_PAD)),       # padded output weight (W^T)
                _resident_spec((1, OUT_PAD)),       # padded output bias
            ],
            out_specs=pl.BlockSpec((tb, OUT_PAD), lambda b, s: (b, 0)),
            scratch_shapes=[
                pltpu.VMEM((tb, 8, H), jnp.float32),  # code sublane-group sums
                pltpu.VMEM((tb, 8, H), jnp.float32),  # text sublane-group sums
            ],
        ),
        compiler_params=pltpu.CompilerParams(
            dimension_semantics=("parallel", "arbitrary"),
            vmem_limit_bytes=_VMEM_LIMIT),
    )(code_hidden, text_hidden, w1, b1, w2, b2)

    return padded[:B, :NUM_CLASSES]


def init_params(key):
    """Deterministic synthetic parameters matching the module's shapes."""
    k1, k2, k3, k4 = jax.random.split(key, 4)
    scale1 = 1.0 / jnp.sqrt(3 * HIDDEN)
    scale2 = 1.0 / jnp.sqrt(HIDDEN)
    return {
        # Stored transposed relative to torch.nn.Linear (out, in) convention.
        "dense_w": jax.random.uniform(k1, (3 * HIDDEN, HIDDEN), jnp.float32,
                                      -scale1, scale1),
        "dense_b": jax.random.uniform(k2, (HIDDEN,), jnp.float32,
                                      -scale1, scale1),
        "out_w": jax.random.uniform(k3, (HIDDEN, NUM_CLASSES), jnp.float32,
                                    -scale2, scale2),
        "out_b": jax.random.uniform(k4, (NUM_CLASSES,), jnp.float32,
                                    -scale2, scale2),
    }


def _reference_f32(code_hidden, text_hidden, params):
    """Pure float32 reference matching the PyTorch module exactly."""
    pool_code = jnp.mean(code_hidden.astype(jnp.float32), axis=1)
    pool_text = jnp.mean(text_hidden.astype(jnp.float32), axis=1)
    diff = jnp.abs(pool_code - pool_text)
    feat = jnp.concatenate([pool_code, pool_text, diff], axis=1)
    x = jnp.tanh(feat @ params["dense_w"] + params["dense_b"])
    return x @ params["out_w"] + params["out_b"]


def _reference_bf16(code_hidden, text_hidden, params):
    """Reference mirroring the kernel's precision (bf16 MXU operands, f32 acc)."""
    pool_code = jnp.mean(code_hidden.astype(jnp.float32), axis=1)
    pool_text = jnp.mean(text_hidden.astype(jnp.float32), axis=1)
    diff = jnp.abs(pool_code - pool_text)
    feat = jnp.concatenate([pool_code, pool_text, diff], axis=1)
    x = jnp.tanh(jnp.dot(feat.astype(jnp.bfloat16),
                         params["dense_w"].astype(jnp.bfloat16),
                         preferred_element_type=jnp.float32)
                 + params["dense_b"])
    return (jnp.dot(x.astype(jnp.bfloat16),
                    params["out_w"].astype(jnp.bfloat16),
                    preferred_element_type=jnp.float32)
            + params["out_b"])


if __name__ == "__main__":
    key = jax.random.PRNGKey(0)
    k_code, k_text, k_params, k_code2, k_text2 = jax.random.split(key, 5)
    params = init_params(k_params)

    # Primary small shape implied by the module: batch=2, seq=8, hidden=768.
    B, S = 2, 8
    code_f32 = jax.random.normal(k_code, (B, S, HIDDEN), jnp.float32)
    text_f32 = jax.random.normal(k_text, (B, S, HIDDEN), jnp.float32)
    code_bf16 = code_f32.astype(jnp.bfloat16)
    text_bf16 = text_f32.astype(jnp.bfloat16)

    logits = jax.block_until_ready(
        relation_classify_head(code_bf16, text_bf16, params))
    assert logits.shape == (B, NUM_CLASSES)
    ref_bf16 = _reference_bf16(code_bf16, text_bf16, params)
    ref_f32 = _reference_f32(code_bf16, text_bf16, params)
    assert jnp.allclose(logits, ref_bf16, atol=5e-3, rtol=5e-3), \
        float(jnp.max(jnp.abs(logits - ref_bf16)))
    assert jnp.allclose(logits, ref_f32, atol=5e-2, rtol=5e-2), \
        float(jnp.max(jnp.abs(logits - ref_f32)))

    # f32 inputs: tile sizes are derived from the dtype; semantics unchanged.
    logits_f32_in = jax.block_until_ready(
        relation_classify_head(code_f32, text_f32, params))
    ref_f32_in = _reference_bf16(code_f32, text_f32, params)
    assert jnp.allclose(logits_f32_in, ref_f32_in, atol=5e-3, rtol=5e-3), \
        float(jnp.max(jnp.abs(logits_f32_in - ref_f32_in)))

    # Larger shape exercises >=2 batch tiles, multi-step seq accumulation and
    # the zero-padding path (B 24->32, S 96->128 with tb=16, ts=64).
    B2, S2 = 24, 96
    code2 = jax.random.normal(
        k_code2, (B2, S2, HIDDEN), jnp.float32).astype(jnp.bfloat16)
    text2 = jax.random.normal(
        k_text2, (B2, S2, HIDDEN), jnp.float32).astype(jnp.bfloat16)
    logits2 = jax.block_until_ready(
        relation_classify_head(code2, text2, params))
    ref2 = _reference_bf16(code2, text2, params)
    assert logits2.shape == (B2, NUM_CLASSES)
    assert jnp.allclose(logits2, ref2, atol=5e-3, rtol=5e-3), \
        float(jnp.max(jnp.abs(logits2 - ref2)))

    print("KERNEL_OK")
</pallas_src>

<mosaic_0001>
module attributes {stable_mosaic.version = 11 : i64} {
  func.func @_relation_head_kernel(%arg0: i32, %arg1: i32, %arg2: memref<8x16x768xbf16, #tpu.memory_space<vmem>>, %arg3: memref<8x16x768xbf16, #tpu.memory_space<vmem>>, %arg4: memref<2304x768xbf16, #tpu.memory_space<vmem>>, %arg5: memref<1x768xf32, #tpu.memory_space<vmem>>, %arg6: memref<768x128xbf16, #tpu.memory_space<vmem>>, %arg7: memref<1x128xf32, #tpu.memory_space<vmem>>, %arg8: memref<8x128xf32, #tpu.memory_space<vmem>>, %arg9: memref<8x8x768xf32, #tpu.memory_space<vmem>>, %arg10: memref<8x8x768xf32, #tpu.memory_space<vmem>>) attributes {dimension_semantics = [#tpu.dimension_semantics<parallel>, #tpu.dimension_semantics<arbitrary>], iteration_bounds = array<i64: 1, 1>, scalar_prefetch = 0 : i64, scratch_operands = 2 : i64, tpu.core_type = #tpu.core_type<tc>, window_params = [{transform_indices = @transform_0, window_bounds = array<i64: 8, 16, 768>}, {transform_indices = @transform_1, window_bounds = array<i64: 8, 16, 768>}, {pipeline_mode = #tpu.pipeline_mode<synchronous>, transform_indices = @transform_2, window_bounds = array<i64: 2304, 768>}, {pipeline_mode = #tpu.pipeline_mode<synchronous>, transform_indices = @transform_3, window_bounds = array<i64: 1, 768>}, {pipeline_mode = #tpu.pipeline_mode<synchronous>, transform_indices = @transform_4, window_bounds = array<i64: 768, 128>}, {pipeline_mode = #tpu.pipeline_mode<synchronous>, transform_indices = @transform_5, window_bounds = array<i64: 1, 128>}, {transform_indices = @transform_6, window_bounds = array<i64: 8, 128>}]} {
    %c0_i32 = arith.constant 0 : i32
    %0 = arith.cmpi eq, %arg1, %c0_i32 : i32
    %1 = arith.extui %0 : i1 to i32
    %c0_i32_0 = arith.constant 0 : i32
    %2 = arith.cmpi ne, %1, %c0_i32_0 : i32
    scf.if %2 {
      %cst = arith.constant 0.000000e+00 : f32
      %22 = vector.broadcast %cst : f32 to vector<8x8x768xf32>
      %c0_25 = arith.constant 0 : index
      %c0_26 = arith.constant 0 : index
      %c0_27 = arith.constant 0 : index
      %23 = vector.load %arg9[%c0_25, %c0_26, %c0_27] : memref<8x8x768xf32, #tpu.memory_space<vmem>>, vector<8x8x768xf32>
      tpu.vector_store %arg9[%c0_25, %c0_26, %c0_27], %22 {strides = array<i32>} : memref<8x8x768xf32, #tpu.memory_space<vmem>>, vector<8x8x768xf32>,
      %cst_28 = arith.constant 0.000000e+00 : f32
      %24 = vector.broadcast %cst_28 : f32 to vector<8x8x768xf32>
      %c0_29 = arith.constant 0 : index
      %c0_30 = arith.constant 0 : index
      %c0_31 = arith.constant 0 : index
      %25 = vector.load %arg10[%c0_29, %c0_30, %c0_31] : memref<8x8x768xf32, #tpu.memory_space<vmem>>, vector<8x8x768xf32>
      tpu.vector_store %arg10[%c0_29, %c0_30, %c0_31], %24 {strides = array<i32>} : memref<8x8x768xf32, #tpu.memory_space<vmem>>, vector<8x8x768xf32>,
    } else {
    }
    %c0 = arith.constant 0 : index
    %c0_1 = arith.constant 0 : index
    %c0_2 = arith.constant 0 : index
    %3 = vector.load %arg9[%c0, %c0_1, %c0_2] : memref<8x8x768xf32, #tpu.memory_space<vmem>>, vector<8x8x768xf32>
    %c0_3 = arith.constant 0 : index
    %c0_4 = arith.constant 0 : index
    %c0_5 = arith.constant 0 : index
    %4 = vector.load %arg10[%c0_3, %c0_4, %c0_5] : memref<8x8x768xf32, #tpu.memory_space<vmem>>, vector<8x8x768xf32>
    %c0_6 = arith.constant 0 : index
    %c0_7 = arith.constant 0 : index
    %c0_8 = arith.constant 0 : index
    %5 = vector.load %arg2[%c0_6, %c0_7, %c0_8] : memref<8x16x768xbf16, #tpu.memory_space<vmem>>, vector<8x8x768xbf16>
    %6 = arith.extf %5 : vector<8x8x768xbf16> to vector<8x8x768xf32>
    %7 = arith.addf %3, %6 : vector<8x8x768xf32>
    %c0_9 = arith.constant 0 : index
    %c0_10 = arith.constant 0 : index
    %c0_11 = arith.constant 0 : index
    %8 = vector.load %arg3[%c0_9, %c0_10, %c0_11] : memref<8x16x768xbf16, #tpu.memory_space<vmem>>, vector<8x8x768xbf16>
    %9 = arith.extf %8 : vector<8x8x768xbf16> to vector<8x8x768xf32>
    %10 = arith.addf %4, %9 : vector<8x8x768xf32>
    %c0_12 = arith.constant 0 : index
    %c8 = arith.constant 8 : index
    %c0_13 = arith.constant 0 : index
    %11 = vector.load %arg2[%c0_12, %c8, %c0_13] : memref<8x16x768xbf16, #tpu.memory_space<vmem>>, vector<8x8x768xbf16>
    %12 = arith.extf %11 : vector<8x8x768xbf16> to vector<8x8x768xf32>
    %13 = arith.addf %7, %12 : vector<8x8x768xf32>
    %c0_14 = arith.constant 0 : index
    %c8_15 = arith.constant 8 : index
    %c0_16 = arith.constant 0 : index
    %14 = vector.load %arg3[%c0_14, %c8_15, %c0_16] : memref<8x16x768xbf16, #tpu.memory_space<vmem>>, vector<8x8x768xbf16>
    %15 = arith.extf %14 : vector<8x8x768xbf16> to vector<8x8x768xf32>
    %16 = arith.addf %10, %15 : vector<8x8x768xf32>
    %c0_17 = arith.constant 0 : index
    %c0_18 = arith.constant 0 : index
    %c0_19 = arith.constant 0 : index
    %17 = vector.load %arg9[%c0_17, %c0_18, %c0_19] : memref<8x8x768xf32, #tpu.memory_space<vmem>>, vector<8x8x768xf32>
    tpu.vector_store %arg9[%c0_17, %c0_18, %c0_19], %13 {strides = array<i32>} : memref<8x8x768xf32, #tpu.memory_space<vmem>>, vector<8x8x768xf32>,
    %c0_20 = arith.constant 0 : index
    %c0_21 = arith.constant 0 : index
    %c0_22 = arith.constant 0 : index
    %18 = vector.load %arg10[%c0_20, %c0_21, %c0_22] : memref<8x8x768xf32, #tpu.memory_space<vmem>>, vector<8x8x768xf32>
    tpu.vector_store %arg10[%c0_20, %c0_21, %c0_22], %16 {strides = array<i32>} : memref<8x8x768xf32, #tpu.memory_space<vmem>>, vector<8x8x768xf32>,
    %c0_i32_23 = arith.constant 0 : i32
    %19 = arith.cmpi eq, %arg1, %c0_i32_23 : i32
    %20 = arith.extui %19 : i1 to i32
    %c0_i32_24 = arith.constant 0 : i32
    %21 = arith.cmpi ne, %20, %c0_i32_24 : i32
    scf.if %21 {
      %c0_25 = arith.constant 0 : index
      %c0_26 = arith.constant 0 : index
      %c0_27 = arith.constant 0 : index
      %22 = vector.load %arg9[%c0_25, %c0_26, %c0_27] : memref<8x8x768xf32, #tpu.memory_space<vmem>>, vector<8x8x768xf32>
      %cst = arith.constant dense<0.000000e+00> : vector<8x768xf32>
      %23 = vector.multi_reduction <add>, %22, %cst [1] : vector<8x8x768xf32> to vector<8x768xf32>
      %cst_28 = arith.constant 1.250000e-01 : f32
      %24 = vector.broadcast %cst_28 : f32 to vector<8x768xf32>
      %25 = arith.mulf %23, %24 : vector<8x768xf32>
      %c0_29 = arith.constant 0 : index
      %c0_30 = arith.constant 0 : index
      %c0_31 = arith.constant 0 : index
      %26 = vector.load %arg10[%c0_29, %c0_30, %c0_31] : memref<8x8x768xf32, #tpu.memory_space<vmem>>, vector<8x8x768xf32>
      %cst_32 = arith.constant dense<0.000000e+00> : vector<8x768xf32>
      %27 = vector.multi_reduction <add>, %26, %cst_32 [1] : vector<8x8x768xf32> to vector<8x768xf32>
      %cst_33 = arith.constant 1.250000e-01 : f32
      %28 = vector.broadcast %cst_33 : f32 to vector<8x768xf32>
      %29 = arith.mulf %27, %28 : vector<8x768xf32>
      %30 = arith.subf %25, %29 : vector<8x768xf32>
      %31 = math.absf %30 : vector<8x768xf32>
      %32 = arith.truncf %25 : vector<8x768xf32> to vector<8x768xbf16>
      %33 = arith.truncf %29 : vector<8x768xf32> to vector<8x768xbf16>
      %34 = arith.truncf %31 : vector<8x768xf32> to vector<8x768xbf16>
      %35 = tpu.concatenate %32, %33, %34 in 1 : vector<8x768xbf16>, vector<8x768xbf16>, vector<8x768xbf16> -> vector<8x2304xbf16>
      %c0_34 = arith.constant 0 : index
      %c0_35 = arith.constant 0 : index
      %36 = vector.load %arg4[%c0_34, %c0_35] : memref<2304x768xbf16, #tpu.memory_space<vmem>>, vector<2304x768xbf16>
      %cst_36 = arith.constant dense<0.000000e+00> : vector<8x768xf32>
      %37 = tpu.matmul %35, %36, %cst_36 {dimension_numbers = #tpu.dot_dimension_numbers<[1], [0], [0], [1], [0, 0, 1, 1], [], []>} : vector<8x2304xbf16>, vector<2304x768xbf16>, vector<8x768xf32> -> vector<8x768xf32>
      %c0_37 = arith.constant 0 : index
      %c0_38 = arith.constant 0 : index
      %38 = vector.load %arg5[%c0_37, %c0_38] : memref<1x768xf32, #tpu.memory_space<vmem>>, vector<1x768xf32>
      %39 = vector.broadcast %38 : vector<1x768xf32> to vector<8x768xf32>
      %40 = arith.addf %37, %39 : vector<8x768xf32>
      %41 = math.tanh %40 : vector<8x768xf32>
      %42 = arith.truncf %41 : vector<8x768xf32> to vector<8x768xbf16>
      %c0_39 = arith.constant 0 : index
      %c0_40 = arith.constant 0 : index
      %43 = vector.load %arg6[%c0_39, %c0_40] : memref<768x128xbf16, #tpu.memory_space<vmem>>, vector<768x128xbf16>
      %cst_41 = arith.constant dense<0.000000e+00> : vector<8x128xf32>
      %44 = tpu.matmul %42, %43, %cst_41 {dimension_numbers = #tpu.dot_dimension_numbers<[1], [0], [0], [1], [0, 0, 1, 1], [], []>} : vector<8x768xbf16>, vector<768x128xbf16>, vector<8x128xf32> -> vector<8x128xf32>
      %c0_42 = arith.constant 0 : index
      %c0_43 = arith.constant 0 : index
      %45 = vector.load %arg7[%c0_42, %c0_43] : memref<1x128xf32, #tpu.memory_space<vmem>>, vector<1x128xf32>
      %46 = vector.broadcast %45 : vector<1x128xf32> to vector<8x128xf32>
      %47 = arith.addf %44, %46 : vector<8x128xf32>
      %c0_44 = arith.constant 0 : index
      %c0_45 = arith.constant 0 : index
      %48 = vector.load %arg8[%c0_44, %c0_45] : memref<8x128xf32, #tpu.memory_space<vmem>>, vector<8x128xf32>
      tpu.vector_store %arg8[%c0_44, %c0_45], %47 {strides = array<i32>} : memref<8x128xf32, #tpu.memory_space<vmem>>, vector<8x128xf32>,
    } else {
    }
    return
  }
  func.func @transform_0(%arg0: i32, %arg1: i32) -> (i32, i32, i32) {
    %c0_i32 = arith.constant 0 : i32
    %c0_i32_0 = arith.constant 0 : i32
    return %arg0, %arg1, %c0_i32 : i32, i32, i32
  }
  func.func @transform_1(%arg0: i32, %arg1: i32) -> (i32, i32, i32) {
    %c0_i32 = arith.constant 0 : i32
    %c0_i32_0 = arith.constant 0 : i32
    return %arg0, %arg1, %c0_i32 : i32, i32, i32
  }
  func.func @transform_2(%arg0: i32, %arg1: i32) -> (i32, i32) {
    %c0_i32 = arith.constant 0 : i32
    %c0_i32_0 = arith.constant 0 : i32
    %c0_i32_1 = arith.constant 0 : i32
    return %c0_i32, %c0_i32_0 : i32, i32
  }
  func.func @transform_3(%arg0: i32, %arg1: i32) -> (i32, i32) {
    %c0_i32 = arith.constant 0 : i32
    %c0_i32_0 = arith.constant 0 : i32
    %c0_i32_1 = arith.constant 0 : i32
    return %c0_i32, %c0_i32_0 : i32, i32
  }
  func.func @transform_4(%arg0: i32, %arg1: i32) -> (i32, i32) {
    %c0_i32 = arith.constant 0 : i32
    %c0_i32_0 = arith.constant 0 : i32
    %c0_i32_1 = arith.constant 0 : i32
    return %c0_i32, %c0_i32_0 : i32, i32
  }
  func.func @transform_5(%arg0: i32, %arg1: i32) -> (i32, i32) {
    %c0_i32 = arith.constant 0 : i32
    %c0_i32_0 = arith.constant 0 : i32
    %c0_i32_1 = arith.constant 0 : i32
    return %c0_i32, %c0_i32_0 : i32, i32
  }
  func.func @transform_6(%arg0: i32, %arg1: i32) -> (i32, i32) {
    %c0_i32 = arith.constant 0 : i32
    %c0_i32_0 = arith.constant 0 : i32
    return %arg0, %c0_i32 : i32, i32
  }
}

</mosaic_0001>

<bundles_post_ra>
// kernel: tpu_custom_call.1
= control target key start
LH: loop header
LB: loop body
LE: loop exit
PB: predicated region body
PF: predicated region fallthrough
CT: control target
= control target key end

     0   :  { %11 = vsyncpa [#allocation5], 0  ;;  %s13255_s0 = inlined_call_operand.hbm [shape: bf16[8,16,768], index: 0, kind: input, shape index: {}]   ;;  %s13256_s1 = inlined_call_operand.hbm [shape: bf16[8,16,768], index: 1, kind: input, shape index: {}]   ;;  %s13257_s2 = inlined_call_operand.hbm [shape: bf16[2304,768], index: 2, kind: input, shape index: {}]   ;;  %s13258_s3 = inlined_call_operand.hbm [shape: f32[1,768], index: 3, kind: input, shape index: {}]   ;;  %s13259_s4 = inlined_call_operand.hbm [shape: bf16[768,128], index: 4, kind: input, shape index: {}]   ;;  %s13260_s5 = inlined_call_operand.hbm [shape: f32[1,128], index: 5, kind: input, shape index: {}]   ;;  %s13261_s6 = inlined_call_operand.hbm [shape: f32[8,128], index: 6, kind: output, shape index: {}]  }
   0x1   :  { %12 = vsyncpa [#allocation8], 0 }
   0x2   :  { %13 = vsyncpa [#allocation11], 0 }
   0x3   :  { %14 = vsyncpa [#allocation14], 0 }
   0x4   :  { %15 = vsyncpa [#allocation6], 0  ;;  %s11843_s21 = smov [#allocation7]   ;;  %s11844_s23 = smov [#allocation10]  }
   0x5   :  { %s33_s22 = sshll.u32 %s11843_s21, 4  ;;  %s58_s24 = sshll.u32 %s11844_s23, 4  ;;  %s34_s22 = int_to_ptr.vmem [resolvable:$true] %s33_s22  ;;  %s59_s24 = int_to_ptr.vmem [resolvable:$true] %s58_s24 }
   0x6   :  { %s11679_s27 = scalar_lea.hbm %s13256_s1, 6144 }
   0x7   :  { %p11680_p0 = scmp.ne.s32.totalorder %s13256_s1, %s11679_s27  ;;  %p11683_p1 = scmp.lt.u32.totalorder %s11679_s27, %s13256_s1 }
   0x9   :  { %p11685_p2 = pnand %p11683_p1, %p11680_p0 }
   0xb   :  { %11688 = shalt.err (!%p11685_p2)
}
   0xc   :  { %s11689_s8 = scalar_lea.vmem %s34_s22, 6144  ;;  %p11694_p4 = scmp.lt.s32.totalorder %s34_s22, %s34_s22 }
   0xd   :  { %p11690_p3 = scmp.ne.s32.totalorder %s34_s22, %s11689_s8  ;;  %p11695_p5 = scmp.lt.s32.totalorder %s11689_s8, %s11689_s8 }
   0xf   :  { %p11696_p6 = por %p11695_p5, %p11694_p4 }
  0x11   :  { %p11697_p7 = pnand %p11696_p6, %p11690_p3 }
  0x13   :  { %11700 = shalt.err (!%p11697_p7)
}
  0x14   :  { %s11845_s9 = smov 384   ;;  %s11846_s10 = smov 24  }
  0x15   :  { %39 = dma.hbm_to_vmem [thread:$0]  %s13256_s1, 6144, %s34_s22, [#allocation8], %s11845_s9, %s11845_s9, %s11846_s10  }
  0x16   :  { %s11701_s15 = scalar_lea.hbm %s13258_s3, 96 }
  0x17   :  { %p11702_p8 = scmp.ne.s32.totalorder %s13258_s3, %s11701_s15  ;;  %p11705_p9 = scmp.lt.u32.totalorder %s11701_s15, %s13258_s3 }
  0x19   :  { %p11707_p10 = pnand %p11705_p9, %p11702_p8 }
  0x1b   :  { %11710 = shalt.err (!%p11707_p10)
}
  0x1c   :  { %s11711_s20 = scalar_lea.vmem %s59_s24, 96  ;;  %p11716_p12 = scmp.lt.s32.totalorder %s59_s24, %s59_s24 }
  0x1d   :  { %p11712_p11 = scmp.ne.s32.totalorder %s59_s24, %s11711_s20  ;;  %p11717_p13 = scmp.lt.s32.totalorder %s11711_s20, %s11711_s20 }
  0x1f   :  { %p11718_p0 = por %p11717_p13, %p11716_p12 }
  0x21   :  { %p11719_p1 = pnand %p11718_p0, %p11712_p11 }
  0x23   :  { %11722 = shalt.err (!%p11719_p1)
}
  0x24   :  { %61 = dma.hbm_to_vmem [thread:$0]  %s13258_s3, 96, %s59_s24, [#allocation11]  }
  0x25   :  { %s11847_s22 = smov [#allocation4]   ;;  %s11848_s25 = smov [#allocation9]  }
  0x26   :  { %s21_s23 = sshll.u32 %s11847_s22, 4  ;;  %s45_s26 = sshll.u32 %s11848_s25, 4  ;;  %s22_s23 = int_to_ptr.vmem [resolvable:$true] %s21_s23  ;;  %s11916_s26 = int_to_ptr.vmem [resolvable:$true] %s45_s26 }
  0x27   :  { %s11723_s29 = scalar_lea.hbm %s13255_s0, 6144 }
  0x28   :  { %p11724_p2 = scmp.ne.s32.totalorder %s13255_s0, %s11723_s29  ;;  %p11727_p3 = scmp.lt.u32.totalorder %s11723_s29, %s13255_s0 }
  0x2a   :  { %p11729_p4 = pnand %p11727_p3, %p11724_p2 }
  0x2c   :  { %11732 = shalt.err (!%p11729_p4)
}
  0x2d   :  { %s11733_s3 = scalar_lea.vmem %s22_s23, 6144  ;;  %p11738_p6 = scmp.lt.s32.totalorder %s22_s23, %s22_s23 }
  0x2e   :  { %p11734_p5 = scmp.ne.s32.totalorder %s22_s23, %s11733_s3  ;;  %p11739_p7 = scmp.lt.s32.totalorder %s11733_s3, %s11733_s3 }
  0x30   :  { %p11740_p8 = por %p11739_p7, %p11738_p6 }
  0x32   :  { %p11741_p9 = pnand %p11740_p8, %p11734_p5 }
  0x34   :  { %11744 = shalt.err (!%p11741_p9)
}
  0x35   :  { %27 = dma.hbm_to_vmem [thread:$0]  %s13255_s0, 6144, %s22_s23, [#allocation5], %s11845_s9, %s11845_s9, %s11846_s10  }
  0x36   :  { %s11745_s15 = scalar_lea.hbm %s13257_s2, 110592 }
  0x37   :  { %p11746_p10 = scmp.ne.s32.totalorder %s13257_s2, %s11745_s15  ;;  %p11749_p11 = scmp.lt.u32.totalorder %s11745_s15, %s13257_s2 }
  0x39   :  { %p11751_p12 = pnand %p11749_p11, %p11746_p10 }
  0x3b   :  { %11754 = shalt.err (!%p11751_p12)
}
  0x3c   :  { %s11755_s20 = scalar_lea.vmem %s11916_s26, 110592  ;;  %p11760_p0 = scmp.lt.s32.totalorder %s11916_s26, %s11916_s26 }
  0x3d   :  { %p11756_p13 = scmp.ne.s32.totalorder %s11916_s26, %s11755_s20  ;;  %p11761_p1 = scmp.lt.s32.totalorder %s11755_s20, %s11755_s20 }
  0x3f   :  { %p11762_p2 = por %p11761_p1, %p11760_p0 }
  0x41   :  { %p11763_p3 = pnand %p11762_p2, %p11756_p13 }
  0x43   :  { %11766 = shalt.err (!%p11763_p3)
}
  0x44   :  { %51 = dma.hbm_to_vmem [thread:$0]  %s13257_s2, 110592, %s11916_s26, [#allocation8], %s11845_s9, %s11845_s9, %s11846_s10  }
  0x45   :  { %s11849_s21 = smov [#allocation12]   ;;  %s11767_s27 = scalar_lea.hbm %s13259_s4, 6144 }
  0x46   :  { %s67_s22 = sshll.u32 %s11849_s21, 4  ;;  %p11768_p4 = scmp.ne.s32.totalorder %s13259_s4, %s11767_s27  ;;  %s68_s22 = int_to_ptr.vmem [resolvable:$true] %s67_s22 }
  0x47   :  { %p11771_p5 = scmp.lt.u32.totalorder %s11767_s27, %s13259_s4 }
  0x49   :  { %p11773_p6 = pnand %p11771_p5, %p11768_p4 }
  0x4b   :  { %11776 = shalt.err (!%p11773_p6)
}
  0x4c   :  { %s11777_s8 = scalar_lea.vmem %s68_s22, 6144  ;;  %p11782_p8 = scmp.lt.s32.totalorder %s68_s22, %s68_s22 }
  0x4d   :  { %p11778_p7 = scmp.ne.s32.totalorder %s68_s22, %s11777_s8  ;;  %p11783_p9 = scmp.lt.s32.totalorder %s11777_s8, %s11777_s8 }
  0x4f   :  { %p11784_p10 = por %p11783_p9, %p11782_p8 }
  0x51   :  { %p11785_p11 = pnand %p11784_p10, %p11778_p7 }
  0x53   :  { %11788 = shalt.err (!%p11785_p11)
}
  0x54   :  { %s11850_s2 = smov 64   ;;  %s11851_s9 = smov 4  }
  0x55   :  { %73 = dma.hbm_to_vmem [thread:$0]  %s13259_s4, 6144, %s68_s22, [#allocation11], %s11850_s2, %s11850_s2, %s11851_s9  }
  0x56   :  { %s11852_s11 = smov [#allocation13]   ;;  %s11789_s13 = scalar_lea.hbm %s13260_s5, 16 }
  0x57   :  { %s80_s3 = sshll.u32 %s11852_s11, 4  ;;  %p11790_p12 = scmp.ne.s32.totalorder %s13260_s5, %s11789_s13  ;;  %s81_s3 = int_to_ptr.vmem [resolvable:$true] %s80_s3 }
  0x58   :  { %p11793_p13 = scmp.lt.u32.totalorder %s11789_s13, %s13260_s5 }
  0x5a   :  { %p11795_p0 = pnand %p11793_p13, %p11790_p12 }
  0x5c   :  { %11798 = shalt.err (!%p11795_p0)
}
  0x5d   :  { %s11799_s18 = scalar_lea.vmem %s81_s3, 16  ;;  %s11803_s4 = scalar_lea.vmem %s81_s3, 32 }
  0x5e   :  { %p11800_p1 = scmp.ne.s32.totalorder %s81_s3, %s11799_s18  ;;  %p11804_p2 = scmp.lt.s32.totalorder %s81_s3, %s81_s3 }
  0x5f   :  { %p11805_p3 = scmp.lt.s32.totalorder %s11803_s4, %s11799_s18 }
  0x61   :  { %p11806_p4 = por %p11805_p3, %p11804_p2 }
  0x63   :  { %p11807_p5 = pnand %p11806_p4, %p11800_p1 }
  0x65   :  { %11810 = shalt.err (!%p11807_p5)
}
  0x66   :  { %83 = dma.hbm_to_vmem [thread:$0]  %s13260_s5, 16, %s81_s3, [#allocation14]  }
  0x67   :  { %11833 = dma.done.wait [#allocation5], 6144  }
  0x68   :  { %11834 = vsyncadd [#allocation5], 4294961152 }
  0x69   :  { %11835 = dma.done.wait [#allocation8], 116736  }
  0x6a   :  { %11836 = vsyncadd [#allocation8], 4294850560 }
  0x6b   :  { %11837 = dma.done.wait [#allocation11], 6240  }
  0x6c   :  { %11838 = vsyncadd [#allocation11], 4294961056 }
  0x6d   :  { %11839 = dma.done.wait [#allocation14], 16  }
  0x6e   :  { %11840 = vsyncadd [#allocation14], 4294967280  ;;  %v10298_v0 = vld [vmem:[#allocation9 + $0x4] ss:$24 sps:$4 sm:$0xff]   ;;  %v10302_v2 = vld [vmem:[#allocation9] ss:$24 sps:$4 sm:$0xff]  }
  0x6f   :  { %v10300_v1 = vld [vmem:[#allocation9 + $0xc04] ss:$24 sps:$4 sm:$0xff]   ;;  %7559 = vmatprep.subr.bf16.mxu1 %v10298_v0  ;;  %v10303_v3 = vld [vmem:[#allocation9 + $0xc00] ss:$24 sps:$4 sm:$0xff]   ;;  %v10304_v4 = vld [vmem:[#allocation9 + $0x34] ss:$24 sps:$4 sm:$0xff]  }
  0x70   :  { %7723 = vmatprep.subr.bf16.mxu0 %v10300_v1  ;;  %7560 = vmatpush1.bf16.msra.mxu1 %v10302_v2  ;;  %v10306_v5 = vld [vmem:[#allocation9 + $0xc34] ss:$24 sps:$4 sm:$0xff]   ;;  %v10308_v6 = vld [vmem:[#allocation9 + $0x30] ss:$24 sps:$4 sm:$0xff]   ;;  %v10310_v8 = vld [vmem:[#allocation9 + $0x64] ss:$24 sps:$4 sm:$0xff]  }
  0x71   :  { %7724 = vmatpush1.bf16.msra.mxu0 %v10303_v3  ;;  %7561 = vmatprep.subr.bf16.mxu1 %v10304_v4  ;;  %v10309_v7 = vld [vmem:[#allocation9 + $0xc30] ss:$24 sps:$4 sm:$0xff]   ;;  %v10312_v9 = vld [vmem:[#allocation9 + $0xc64] ss:$24 sps:$4 sm:$0xff]   ;;  %v10314_v10 = vld [vmem:[#allocation9 + $0x60] ss:$24 sps:$4 sm:$0xff]  }
  0x72   :  { %7725 = vmatprep.subr.bf16.mxu0 %v10306_v5  ;;  %v10315_v11 = vld [vmem:[#allocation9 + $0xc60] ss:$24 sps:$4 sm:$0xff]   ;;  %v10316_v12 = vld [vmem:[#allocation9 + $0x94] ss:$24 sps:$4 sm:$0xff]   ;;  %v10320_v14 = vld [vmem:[#allocation9 + $0x90] ss:$24 sps:$4 sm:$0xff]  }
  0x73   :  { %v10318_v13 = vld [vmem:[#allocation9 + $0xc94] ss:$24 sps:$4 sm:$0xff]   ;;  %v10321_v15 = vld [vmem:[#allocation9 + $0xc90] ss:$24 sps:$4 sm:$0xff]   ;;  %v10322_v16 = vld [vmem:[#allocation9 + $0xc4] ss:$24 sps:$4 sm:$0xff]  }
  0x74   :  { %7562 = vmatpush1.bf16.msra.mxu1 %v10308_v6  ;;  %v10324_v17 = vld [vmem:[#allocation9 + $0xcc4] ss:$24 sps:$4 sm:$0xff]   ;;  %v10326_v18 = vld [vmem:[#allocation9 + $0xc0] ss:$24 sps:$4 sm:$0xff]   ;;  %v10328_v20 = vld [vmem:[#allocation9 + $0xf4] ss:$24 sps:$4 sm:$0xff]  }
  0x75   :  { %7726 = vmatpush1.bf16.msra.mxu0 %v10309_v7  ;;  %7563 = vmatprep.subr.bf16.mxu1 %v10310_v8  ;;  %v10327_v19 = vld [vmem:[#allocation9 + $0xcc0] ss:$24 sps:$4 sm:$0xff]   ;;  %v10330_v21 = vld [vmem:[#allocation9 + $0xcf4] ss:$24 sps:$4 sm:$0xff]   ;;  %v10332_v22 = vld [vmem:[#allocation9 + $0xf0] ss:$24 sps:$4 sm:$0xff]  }
  0x76   :  { %7727 = vmatprep.subr.bf16.mxu0 %v10312_v9  ;;  %v10333_v23 = vld [vmem:[#allocation9 + $0xcf0] ss:$24 sps:$4 sm:$0xff]   ;;  %v10334_v24 = vld [vmem:[#allocation9 + $0x124] ss:$24 sps:$4 sm:$0xff]   ;;  %v10338_v26 = vld [vmem:[#allocation9 + $0x120] ss:$24 sps:$4 sm:$0xff]  }
  0x77   :  { %v10336_v25 = vld [vmem:[#allocation9 + $0xd24] ss:$24 sps:$4 sm:$0xff]   ;;  %v10339_v27 = vld [vmem:[#allocation9 + $0xd20] ss:$24 sps:$4 sm:$0xff]   ;;  %v10340_v28 = vld [vmem:[#allocation9 + $0x154] ss:$24 sps:$4 sm:$0xff]  }
  0x78   :  { %7564 = vmatpush1.bf16.msra.mxu1 %v10314_v10  ;;  %v10342_v29 = vld [vmem:[#allocation9 + $0xd54] ss:$24 sps:$4 sm:$0xff]   ;;  %v10344_v30 = vld [vmem:[#allocation9 + $0x150] ss:$24 sps:$4 sm:$0xff]   ;;  %v10346_v32 = vld [vmem:[#allocation9 + $0x184] ss:$24 sps:$4 sm:$0xff]  }
  0x79   :  { %7728 = vmatpush1.bf16.msra.mxu0 %v10315_v11  ;;  %7565 = vmatprep.subr.bf16.mxu1 %v10316_v12  ;;  %v10345_v31 = vld [vmem:[#allocation9 + $0xd50] ss:$24 sps:$4 sm:$0xff]   ;;  %v10348_v33 = vld [vmem:[#allocation9 + $0xd84] ss:$24 sps:$4 sm:$0xff]   ;;  %v10350_v34 = vld [vmem:[#allocation9 + $0x180] ss:$24 sps:$4 sm:$0xff]  }
  0x7a   :  { %7729 = vmatprep.subr.bf16.mxu0 %v10318_v13  ;;  %v10351_v35 = vld [vmem:[#allocation9 + $0xd80] ss:$24 sps:$4 sm:$0xff]   ;;  %v10352_v36 = vld [vmem:[#allocation9 + $0x1b4] ss:$24 sps:$4 sm:$0xff]   ;;  %v10356_v38 = vld [vmem:[#allocation9 + $0x1b0] ss:$24 sps:$4 sm:$0xff]  }
  0x7b   :  { %v10354_v37 = vld [vmem:[#allocation9 + $0xdb4] ss:$24 sps:$4 sm:$0xff]   ;;  %v10357_v39 = vld [vmem:[#allocation9 + $0xdb0] ss:$24 sps:$4 sm:$0xff]   ;;  %v10358_v40 = vld [vmem:[#allocation9 + $0x1e4] ss:$24 sps:$4 sm:$0xff]  }
  0x7c   :  { %7566 = vmatpush1.bf16.msra.mxu1 %v10320_v14  ;;  %v10360_v41 = vld [vmem:[#allocation9 + $0xde4] ss:$24 sps:$4 sm:$0xff]   ;;  %v10362_v42 = vld [vmem:[#allocation9 + $0x1e0] ss:$24 sps:$4 sm:$0xff]   ;;  %v10364_v44 = vld [vmem:[#allocation9 + $0x214] ss:$24 sps:$4 sm:$0xff]  }
  0x7d   :  { %7730 = vmatpush1.bf16.msra.mxu0 %v10321_v15  ;;  %7567 = vmatprep.subr.bf16.mxu1 %v10322_v16  ;;  %v10363_v43 = vld [vmem:[#allocation9 + $0xde0] ss:$24 sps:$4 sm:$0xff]   ;;  %v10366_v45 = vld [vmem:[#allocation9 + $0xe14] ss:$24 sps:$4 sm:$0xff]   ;;  %v10368_v46 = vld [vmem:[#allocation9 + $0x210] ss:$24 sps:$4 sm:$0xff]  }
  0x7e   :  { %7731 = vmatprep.subr.bf16.mxu0 %v10324_v17  ;;  %v10369_v47 = vld [vmem:[#allocation9 + $0xe10] ss:$24 sps:$4 sm:$0xff]   ;;  %v11977_v48 = vld [vmem:[#allocation4] sm:$0xff]  ;;  %v12002_v3 = vld [vmem:[#allocation4 + $0x18] sm:$0xff]  ;;  %vm1982_vm0 = vcmask 1041409   ;;  %vm1984_vm1 = vcmask 1042434  }
  0x7f   :  { %v10370_v49 = vld [vmem:[#allocation9 + $0x244] ss:$24 sps:$4 sm:$0xff]   ;;  %v11979_v51 = vld [vmem:[#allocation4 + $0x30] sm:$0xff]  ;;  %v324_v54 = vunpack.c.h.bf16 %v11977_v48  ;;  %v12004_v4 = vld [vmem:[#allocation4 + $0x48] sm:$0xff]  ;;  %v564_v11 = vunpack.c.h.bf16 %v12002_v3  ;;  %vm1986_vm2 = vcmask 1043459   ;;  %vm1988_vm3 = vcmask 1044484  }
  0x80   :  { %7568 = vmatpush1.bf16.msra.mxu1 %v10326_v18  ;;  %v10372_v50 = vld [vmem:[#allocation9 + $0xe44] ss:$24 sps:$4 sm:$0xff]   ;;  %v11983_v53 = vld [vmem:[#allocation4 + $0x90] sm:$0xff]  ;;  %v330_v59 = vunpack.c.h.bf16 %v11979_v51  ;;  %v10374_v6 = vld [vmem:[#allocation9 + $0x240] ss:$24 sps:$4 sm:$0xff]   ;;  %v570_v12 = vunpack.c.h.bf16 %v12004_v4  ;;  %vm1990_vm4 = vcmask 1045509  }
  0x81   :  { %7732 = vmatpush1.bf16.msra.mxu0 %v10327_v19  ;;  %7569 = vmatprep.subr.bf16.mxu1 %v10328_v20  ;;  %v11981_v52 = vld [vmem:[#allocation4 + $0x60] sm:$0xff]  ;;  %v11989_v57 = vld [vmem:[#allocation4 + $0xf0] sm:$0xff]  ;;  %v342_v61 = vunpack.c.h.bf16 %v11983_v53  ;;  %v12008_v8 = vld [vmem:[#allocation4 + $0x78] sm:$0xff]  ;;  %vm1992_vm5 = vcmask 1046534   ;;  %vm1994_vm6 = vcmask 1047559   ;;  %s11853_s5 = smov [#allocation15]  }
  0x82   :  { %7733 = vmatprep.subr.bf16.mxu0 %v10330_v21  ;;  %v11987_v56 = vld [vmem:[#allocation4 + $0xc0] sm:$0xff]  ;;  %v336_v60 = vunpack.c.h.bf16 %v11981_v52  ;;  %v11997_v63 = vld [vmem:[#allocation4 + $0x150] sm:$0xff]  ;;  %v354_v1 = vunpack.c.h.bf16 %v11989_v57  ;;  %v12010_v9 = vld [vmem:[#allocation4 + $0xa8] sm:$0xff]  ;;  %v576_v17 = vunpack.c.h.bf16 %v12008_v8  ;;  %s9196_s0 = sshll.u32 %s11853_s5, 4  ;;  %s9197_s0 = int_to_ptr.vmem [resolvable:$true] %s9196_s0 }
  0x83   :  { %v11991_v58 = vld [vmem:[#allocation4 + $0x120] sm:$0xff]  ;;  %v348_v0 = vunpack.c.h.bf16 %v11987_v56  ;;  %v366_v7 = vunpack.c.h.bf16 %v11997_v63  ;;  %v12012_v10 = vld [vmem:[#allocation4 + $0xd8] sm:$0xff]  ;;  %v12017_v14 = vld [vmem:[#allocation4 + $0x108] sm:$0xff]  ;;  %v582_v18 = vunpack.c.h.bf16 %v12010_v9  ;;  %s11811_s1 = scalar_lea.vmem %s9197_s0, 128  ;;  %p11816_p7 = scmp.lt.s32.totalorder %s9197_s0, %s9197_s0 }
  0x84   :  { %7570 = vmatpush1.bf16.msra.mxu1 %v10332_v22  ;;  %v360_v2 = vunpack.c.h.bf16 %v11991_v58  ;;  %v12019_v15 = vld [vmem:[#allocation4 + $0x138] sm:$0xff]  ;;  %v12021_v16 = vld [vmem:[#allocation4 + $0x168] sm:$0xff]  ;;  %v588_v19 = vunpack.c.h.bf16 %v12012_v10  ;;  %v594_v22 = vunpack.c.h.bf16 %v12017_v14  ;;  %p11812_p6 = scmp.ne.s32.totalorder %s9197_s0, %s11811_s1  ;;  %p11817_p8 = scmp.lt.s32.totalorder %s11811_s1, %s11811_s1 }
  0x85   :  { %7734 = vmatpush1.bf16.msra.mxu0 %v10333_v23  ;;  %7571 = vmatprep.subr.bf16.mxu1 %v10334_v24  ;;  %v10375_v21 = vld [vmem:[#allocation9 + $0xe40] ss:$24 sps:$4 sm:$0xff]   ;;  %v600_v23 = vunpack.c.h.bf16 %v12019_v15  ;;  %v606_v24 = vunpack.c.h.bf16 %v12021_v16 }
  0x86   :  { %7735 = vmatprep.subr.bf16.mxu0 %v10336_v25  ;;  %v612_v25 = vadd.f32 %v564_v11, %v324_v54  ;;  %p11818_p9 = por %p11817_p8, %p11816_p7 }
  0x88   :  { %7572 = vmatpush1.bf16.msra.mxu1 %v10338_v26  ;;  %v10376_v26 = vld [vmem:[#allocation9 + $0x274] ss:$24 sps:$4 sm:$0xff]   ;;  %p11819_p10 = pnand %p11818_p9, %p11812_p6 }
  0x89   :  { %7736 = vmatpush1.bf16.msra.mxu0 %v10339_v27  ;;  %7573 = vmatprep.subr.bf16.mxu1 %v10340_v28  ;;  %v10378_v27 = vld [vmem:[#allocation9 + $0xe74] ss:$24 sps:$4 sm:$0xff]   ;;  %v618_v28 = vadd.f32 %v570_v12, %v330_v59 }
  0x8a   :  { %7737 = vmatprep.subr.bf16.mxu0 %v10342_v29  ;;  %v624_v29 = vadd.f32 %v576_v17, %v336_v60 }
  0x8c   :  { %7574 = vmatpush1.bf16.msra.mxu1 %v10344_v30  ;;  %v630_v30 = vadd.f32 %v582_v18, %v342_v61  ;;  %v10386_v61 = vld [vmem:[#allocation9 + $0x2a0] ss:$24 sps:$4 sm:$0xff]  }
  0x8d   :  { %7738 = vmatpush1.bf16.msra.mxu0 %v10345_v31  ;;  %7575 = vmatprep.subr.bf16.mxu1 %v10346_v32  ;;  %v636_v32 = vadd.f32 %v588_v19, %v348_v0  ;;  %v10387_v18 = vld [vmem:[#allocation9 + $0xea0] ss:$24 sps:$4 sm:$0xff]  }
  0x8e   :  { %7739 = vmatprep.subr.bf16.mxu0 %v10348_v33  ;;  %v642_v33 = vadd.f32 %v594_v22, %v354_v1 }
  0x90   :  { %7576 = vmatpush1.bf16.msra.mxu1 %v10350_v34  ;;  %v648_v34 = vadd.f32 %v600_v23, %v360_v2 }
  0x91   :  { %7740 = vmatpush1.bf16.msra.mxu0 %v10351_v35  ;;  %7577 = vmatprep.subr.bf16.mxu1 %v10352_v36  ;;  %v654_v35 = vadd.f32 %v606_v24, %v366_v7  ;;  %v12031_v36 = vld [vmem:[#allocation7 + $0x8] sm:$0xff] }
  0x92   :  { %7741 = vmatprep.subr.bf16.mxu0 %v10354_v37  ;;  %v10380_v37 = vld [vmem:[#allocation9 + $0x270] ss:$24 sps:$4 sm:$0xff]   ;;  %v10388_v24 = vld [vmem:[#allocation9 + $0x2d4] ss:$24 sps:$4 sm:$0xff]  }
  0x94   :  { %7578 = vmatpush1.bf16.msra.mxu1 %v10356_v38  ;;  %v932_v38 = vrot.slane %v612_v25, 4 }
  0x95   :  { %7742 = vmatpush1.bf16.msra.mxu0 %v10357_v39  ;;  %7579 = vmatprep.subr.bf16.mxu1 %v10358_v40  ;;  %v968_v39 = vrot.slane %v618_v28, 4  ;;  %v1004_v40 = vrot.slane %v624_v29, 4 }
  0x96   :  { %7743 = vmatprep.subr.bf16.mxu0 %v10360_v41  ;;  %v1040_v41 = vrot.slane %v630_v30, 4 }
  0x97   :  { %v969_v54 = vadd.f32 %v968_v39, %v618_v28  ;;  %v1005_v59 = vadd.f32 %v1004_v40, %v624_v29 }
  0x98   :  { %7580 = vmatpush1.bf16.msra.mxu1 %v10362_v42  ;;  %v10381_v42 = vld [vmem:[#allocation9 + $0xe70] ss:$24 sps:$4 sm:$0xff]   ;;  %v1041_v0 = vadd.f32 %v1040_v41, %v630_v30 }
  0x99   :  { %7744 = vmatpush1.bf16.msra.mxu0 %v10363_v43  ;;  %7581 = vmatprep.subr.bf16.mxu1 %v10364_v44  ;;  %v1076_v43 = vrot.slane %v636_v32, 4  ;;  %v1112_v44 = vrot.slane %v642_v33, 4  ;;  %v970_v11 = vrot.slane %v969_v54, 2  ;;  %v1006_v12 = vrot.slane %v1005_v59, 2  ;;  %v10393_v41 = vld [vmem:[#allocation9 + $0xed0] ss:$24 sps:$4 sm:$0xff]  }
  0x9a   :  { %7745 = vmatprep.subr.bf16.mxu0 %v10366_v45  ;;  %v1148_v45 = vrot.slane %v648_v34, 4  ;;  %v1042_v19 = vrot.slane %v1041_v0, 2 }
  0x9b   :  { %v1077_v1 = vadd.f32 %v1076_v43, %v636_v32  ;;  %v1113_v2 = vadd.f32 %v1112_v44, %v642_v33  ;;  %v1007_v28 = vadd.f32 %v1006_v12, %v1005_v59  ;;  %v10399_v59 = vld [vmem:[#allocation9 + $0xf04] ss:$24 sps:$4 sm:$0xff]  }
  0x9c   :  { %7582 = vmatpush1.bf16.msra.mxu1 %v10368_v46  ;;  %v1184_v46 = vrot.slane %v654_v35, 4  ;;  %v1043_v30 = vadd.f32 %v1042_v19, %v1041_v0 }
  0x9d   :  { %7746 = vmatpush1.bf16.msra.mxu0 %v10369_v47  ;;  %7583 = vmatprep.subr.bf16.mxu1 %v10370_v49  ;;  %v10382_v47 = vld [vmem:[#allocation9 + $0x2a4] ss:$24 sps:$4 sm:$0xff]   ;;  %v1114_v22 = vrot.slane %v1113_v2, 2  ;;  %v1008_v39 = vrot.slane %v1007_v28, 1 }
  0x9e   :  { %7747 = vmatprep.subr.bf16.mxu0 %v10372_v50  ;;  %v10384_v49 = vld [vmem:[#allocation9 + $0xea4] ss:$24 sps:$4 sm:$0xff]   ;;  %v933_v50 = vadd.f32 %v932_v38, %v612_v25  ;;  %v1185_v17 = vadd.f32 %v1184_v46, %v654_v35  ;;  %v10390_v25 = vld [vmem:[#allocation9 + $0xed4] ss:$24 sps:$4 sm:$0xff]   ;;  %v10392_v35 = vld [vmem:[#allocation9 + $0x2d0] ss:$24 sps:$4 sm:$0xff]  }
  0x9f   :  { %v1115_v33 = vadd.f32 %v1114_v22, %v1113_v2  ;;  %v12048_v22 = vld [vmem:[#allocation7 + $0x38] sm:$0xff] }
  0xa0   :  { %7584 = vmatpush1.bf16.msra.mxu1 %v10374_v6  ;;  %v1149_v6 = vadd.f32 %v1148_v45, %v648_v34  ;;  %v934_v7 = vrot.slane %v933_v50, 2  ;;  %v1186_v29 = vrot.slane %v1185_v17, 2 }
  0xa1   :  { %7748 = vmatpush1.bf16.msra.mxu0 %v10375_v21  ;;  %7585 = vmatprep.subr.bf16.mxu1 %v10376_v26  ;;  %v1078_v21 = vrot.slane %v1077_v1, 2  ;;  %v1116_v44 = vrot.slane %v1115_v33, 1 }
  0xa2   :  { %7749 = vmatprep.subr.bf16.mxu0 %v10378_v27  ;;  %v1150_v23 = vrot.slane %v1149_v6, 2  ;;  %v935_v26 = vadd.f32 %v934_v7, %v933_v50  ;;  %v971_v27 = vadd.f32 %v970_v11, %v969_v54  ;;  %v1187_v40 = vadd.f32 %v1186_v29, %v1185_v17  ;;  %v10396_v54 = vld [vmem:[#allocation9 + $0x304] ss:$24 sps:$4 sm:$0xff]   ;;  %v12062_v29 = vld [vmem:[#allocation7 + $0xc8] sm:$0xff] }
  0xa3   :  { %v1079_v32 = vadd.f32 %v1078_v21, %v1077_v1  ;;  %v1117_v2 = vadd.f32 %v1116_v44, %v1115_v33  ;;  %v663_v44 = vld [vmem:[#allocation7 + $0x50] sm:$0xff] }
  0xa4   :  { %7586 = vmatpush1.bf16.msra.mxu1 %v10380_v37  ;;  %v1151_v34 = vadd.f32 %v1150_v23, %v1149_v6  ;;  %v936_v37 = vrot.slane %v935_v26, 1  ;;  %v972_v38 = vrot.slane %v971_v27, 1  ;;  %v1188_v50 = vrot.slane %v1187_v40, 1  ;;  %v12050_v23 = vld [vmem:[#allocation7 + $0x68] sm:$0xff] }
  0xa5   :  { %7750 = vmatpush1.bf16.msra.mxu0 %v10381_v42  ;;  %7587 = vmatprep.subr.bf16.mxu1 %v10382_v47  ;;  %v1044_v42 = vrot.slane %v1043_v30, 1  ;;  %v1080_v43 = vrot.slane %v1079_v32, 1  ;;  %v12044_v19 = vmul.f32 0.125, %v1117_v2  ;;  %v458_v31 = vunpack.c.h.bf16 %v12050_v23 }
  0xa6   :  { %7751 = vmatprep.subr.bf16.mxu0 %v10384_v49  ;;  %v1152_v45 = vrot.slane %v1151_v34, 1  ;;  %v937_v46 = vadd.f32 %v936_v37, %v935_v26  ;;  %v973_v47 = vadd.f32 %v972_v38, %v971_v27  ;;  %v1009_v49 = vadd.f32 %v1008_v39, %v1007_v28  ;;  %v12060_v28 = vld [vmem:[#allocation7 + $0x98] sm:$0xff]  ;;  %v12074_v37 = vld [vmem:[#allocation7 + $0x128] sm:$0xff]  ;;  %v660_v39 = vld [vmem:[#allocation7 + $0x20] sm:$0xff] }
  0xa7   :  { %v1045_v0 = vadd.f32 %v1044_v42, %v1043_v30  ;;  %v1081_v1 = vadd.f32 %v1080_v43, %v1079_v32  ;;  %v1189_v6 = vadd.f32 %v1188_v50, %v1187_v40  ;;  %13361 = vst [vmem:[#allocation26_spill] sm:$0xff] %v12044_v19  ;;  %v12064_v30 = vld [vmem:[#allocation7 + $0xf8] sm:$0xff]  ;;  %v692_v20 = vunpack.c.h.bf16 %v663_v44 }
  0xa8   :  { %7588 = vmatpush1.bf16.msra.mxu1 %v10386_v61  ;;  %v1153_v61 = vadd.f32 %v1152_v45, %v1151_v34  ;;  %v12034_v7 = vmul.f32 0.125, %v937_v46  ;;  %v12036_v11 = vmul.f32 0.125, %v973_v47  ;;  %v12038_v12 = vmul.f32 0.125, %v1009_v49  ;;  %v12076_v38 = vld [vmem:[#allocation7 + $0x158] sm:$0xff]  ;;  %v666_v45 = vld [vmem:[#allocation7 + $0x80] sm:$0xff]  ;;  %v669_v46 = vld [vmem:[#allocation7 + $0xb0] sm:$0xff] }
  0xa9   :  { %7752 = vmatpush1.bf16.msra.mxu0 %v10387_v18  ;;  %7589 = vmatprep.subr.bf16.mxu1 %v10388_v24  ;;  %v12040_v17 = vmul.f32 0.125, %v1045_v0  ;;  %v12042_v18 = vmul.f32 0.125, %v1081_v1  ;;  %v12052_v24 = vmul.f32 0.125, %v1189_v6  ;;  %v1773_v34 = vpack.c.bf16 %v12044_v19, %v12044_v19  ;;  %v675_v0 = vld [vmem:[#allocation7 + $0x110] sm:$0xff]  ;;  %v678_v1 = vld [vmem:[#allocation7 + $0x140] sm:$0xff] }
  0xaa   :  { %7753 = vmatprep.subr.bf16.mxu0 %v10390_v25  ;;  %13356 = vst [vmem:[#allocation21_spill] sm:$0xff] %v12034_v7  ;;  %13357 = vst [vmem:[#allocation22_spill] sm:$0xff] %v12036_v11  ;;  %v12046_v21 = vmul.f32 0.125, %v1153_v61  ;;  %v1743_v25 = vpack.c.bf16 %v12034_v7, %v12034_v7  ;;  %v1749_v26 = vpack.c.bf16 %v12036_v11, %v12036_v11  ;;  %v452_v6 = vunpack.c.h.bf16 %v12048_v22  ;;  %v11657_v11 = vld [vmem:[#allocation7 + $0x80] sm:$0xff] }
  0xab   :  { %13358 = vst [vmem:[#allocation23_spill] sm:$0xff] %v12038_v12  ;;  %13359 = vst [vmem:[#allocation24_spill] sm:$0xff] %v12040_v17  ;;  %v1755_v27 = vpack.c.bf16 %v12038_v12, %v12038_v12  ;;  %v1761_v32 = vpack.c.bf16 %v12040_v17, %v12040_v17  ;;  %v1767_v33 = vpack.c.bf16 %v12042_v18, %v12042_v18  ;;  %v1965_v50 = vunpack.c.l.b16 %v1773_v34  ;;  %v11656_v17 = vld [vmem:[#allocation7 + $0x50] sm:$0xff] }
  0xac   :  { %7590 = vmatpush1.bf16.msra.mxu1 %v10392_v35  ;;  %13360 = vst [vmem:[#allocation25_spill] sm:$0xff] %v12042_v18  ;;  %13362 = vst [vmem:[#allocation27_spill] sm:$0xff] %v12046_v21  ;;  %v1779_v35 = vpack.c.bf16 %v12046_v21, %v12046_v21  ;;  %v1785_v40 = vpack.c.bf16 %v12052_v24, %v12052_v24  ;;  %v1941_v42 = vunpack.c.l.b16 %v1749_v26  ;;  %v464_v26 = vunpack.c.h.bf16 %v12060_v28 }
  0xad   :  { %7754 = vmatpush1.bf16.msra.mxu0 %v10393_v41  ;;  %13363 = vst [vmem:[#allocation28_spill] sm:$0xff] %v12052_v24  ;;  %7600 = vmatprep.subr.bf16.mxu1 %v10396_v54  ;;  %v1935_v41 = vunpack.c.l.b16 %v1743_v25  ;;  %v1947_v43 = vunpack.c.l.b16 %v1755_v27  ;;  %v1953_v47 = vunpack.c.l.b16 %v1761_v32  ;;  %v1959_v49 = vunpack.c.l.b16 %v1767_v33 }
  0xae   :  { %7764 = vmatprep.subr.bf16.mxu0 %v10399_v59  ;;  %v1971_v54 = vunpack.c.l.b16 %v1779_v35  ;;  %v672_v59 = vld [vmem:[#allocation7 + $0xe0] sm:$0xff]  ;;  %v1977_v2 = vunpack.c.l.b16 %v1785_v40  ;;  %v470_v27 = vunpack.c.h.bf16 %v12062_v29  ;;  %v476_v32 = vunpack.c.h.bf16 %v12064_v30  ;;  %v12090_v40 = vld [vmem:[#allocation7 + $0x170] sm:$0xff] }
  0xaf   :  { %v1996_v61 = vsel %vm1982_vm0, %v1941_v42, %v1935_v41  ;;  %v482_v34 = vunpack.c.h.bf16 %v12074_v37  ;;  %v488_v35 = vunpack.c.h.bf16 %v12076_v38  ;;  %v686_v41 = vunpack.c.h.bf16 %v660_v39 }
  0xb0   :  { %v1997_v25 = vsel %vm1984_vm1, %v1947_v43, %v1996_v61  ;;  %v698_v13 = vunpack.c.h.bf16 %v666_v45  ;;  %v704_v43 = vunpack.c.h.bf16 %v669_v46  ;;  %v710_v5 = vunpack.c.h.bf16 %v672_v59 }
  0xb1   :  { %v1998_v33 = vsel %vm1986_vm2, %v1953_v47, %v1997_v25  ;;  %v716_v62 = vunpack.c.h.bf16 %v675_v0  ;;  %v722_v55 = vunpack.c.h.bf16 %v678_v1  ;;  %v728_v47 = vunpack.c.h.bf16 %v12090_v40 }
  0xb2   :  { %v1999_v42 = vsel %vm1988_vm3, %v1959_v49, %v1998_v33  ;;  %v13364_v25 = vunpack.c.h.bf16 %v12031_v36  ;;  %v740_v21 = vadd.f32 %v692_v20, %v452_v6  ;;  %v746_v19 = vadd.f32 %v698_v13, %v458_v31 }
  0xb3   :  { %v2000_v61 = vsel %vm1990_vm4, %v1965_v50, %v1999_v42  ;;  %v752_v49 = vadd.f32 %v704_v43, %v464_v26  ;;  %v758_v44 = vadd.f32 %v710_v5, %v470_v27  ;;  %v764_v46 = vadd.f32 %v716_v62, %v476_v32 }
  0xb4   :  { %v2001_v60 = vsel %vm1992_vm5, %v1971_v54, %v2000_v61  ;;  %v734_v24 = vadd.f32 %v686_v41, %v13364_v25  ;;  %v770_v50 = vadd.f32 %v722_v55, %v482_v34  ;;  %v776_v59 = vadd.f32 %v728_v47, %v488_v35 }
  0xb5   :  { %v2002_v39 = vsel %vm1994_vm6, %v1977_v2, %v2001_v60  ;;  %v1364_v1 = vrot.slane %v740_v21, 4  ;;  %v1400_v33 = vrot.slane %v746_v19, 4  ;;  %v1436_v54 = vrot.slane %v752_v49, 4 }
  0xb6   :  { %v12099_v45 = vpack.c.b16 %v2002_v39, %v2002_v39  ;;  %v1328_v0 = vrot.slane %v734_v24, 4  ;;  %v1472_v42 = vrot.slane %v758_v44, 4  ;;  %v1508_v36 = vrot.slane %v764_v46, 4 }
  0xb7   :  { %v1544_v41 = vrot.slane %v770_v50, 4  ;;  %v1580_v20 = vrot.slane %v776_v59, 4  ;;  %v1365_v60 = vadd.f32 %v1364_v1, %v740_v21  ;;  %v1401_v13 = vadd.f32 %v1400_v33, %v746_v19 }
  0xb8   :  { %13365 = vst [vmem:[#allocation29_spill] sm:$0xff] %v12099_v45  ;;  %7591 = vmatprep.mubr.bf16.mxu1 %v12099_v45  ;;  %v1329_v6 = vadd.f32 %v1328_v0, %v734_v24  ;;  %v1437_v31 = vadd.f32 %v1436_v54, %v752_v49  ;;  %v1473_v5 = vadd.f32 %v1472_v42, %v758_v44  ;;  %v691_v12 = vunpack.c.l.bf16 %v11656_v17 }
  0xb9   :  { %v1509_v2 = vadd.f32 %v1508_v36, %v764_v46  ;;  %v1545_v26 = vadd.f32 %v1544_v41, %v770_v50  ;;  %v1581_v62 = vadd.f32 %v1580_v20, %v776_v59  ;;  %v1366_v27 = vrot.slane %v1365_v60, 2 }
  0xba   :  { %v1330_v55 = vrot.slane %v1329_v6, 2  ;;  %v1402_v32 = vrot.slane %v1401_v13, 2  ;;  %v1438_v34 = vrot.slane %v1437_v31, 2  ;;  %v1474_v35 = vrot.slane %v1473_v5, 2 }
  0xbb   :  { %v1510_v43 = vrot.slane %v1509_v2, 2  ;;  %v1546_v61 = vrot.slane %v1545_v26, 2  ;;  %v1582_v47 = vrot.slane %v1581_v62, 2  ;;  %v1367_v39 = vadd.f32 %v1366_v27, %v1365_v60 }
  0xbc   :  { %v1331_v25 = vadd.f32 %v1330_v55, %v1329_v6  ;;  %v1403_v45 = vadd.f32 %v1402_v32, %v1401_v13  ;;  %v1439_v18 = vadd.f32 %v1438_v34, %v1437_v31  ;;  %v1475_v24 = vadd.f32 %v1474_v35, %v1473_v5 }
  0xbd   :  { %v1511_v21 = vadd.f32 %v1510_v43, %v1509_v2  ;;  %v1547_v19 = vadd.f32 %v1546_v61, %v1545_v26  ;;  %v1583_v49 = vadd.f32 %v1582_v47, %v1581_v62  ;;  %v1368_v46 = vrot.slane %v1367_v39, 1  ;;  %v12128_v47 = vld [vmem:[#allocation7 + $0x30] sm:$0xff] }
  0xbe   :  { %v1332_v44 = vrot.slane %v1331_v25, 1  ;;  %v1404_v50 = vrot.slane %v1403_v45, 1  ;;  %v1440_v59 = vrot.slane %v1439_v18, 1  ;;  %v1476_v0 = vrot.slane %v1475_v24, 1 }
  0xbf   :  { %v1512_v1 = vrot.slane %v1511_v21, 1  ;;  %v1548_v33 = vrot.slane %v1547_v19, 1  ;;  %v1584_v54 = vrot.slane %v1583_v49, 1  ;;  %v1369_v36 = vadd.f32 %v1368_v46, %v1367_v39  ;;  %v12132_v39 = vld [vmem:[#allocation7 + $0x90] sm:$0xff] }
  0xc0   :  { %v1333_v42 = vadd.f32 %v1332_v44, %v1331_v25  ;;  %v1405_v41 = vadd.f32 %v1404_v50, %v1403_v45  ;;  %v1441_v20 = vadd.f32 %v1440_v59, %v1439_v18  ;;  %v1477_v6 = vadd.f32 %v1476_v0, %v1475_v24  ;;  %v12118_v18 = vld [vmem:[#allocation7] sm:$0xff]  ;;  %v12144_v46 = vld [vmem:[#allocation7 + $0xf0] sm:$0xff] }
  0xc1   :  { %v1513_v60 = vadd.f32 %v1512_v1, %v1511_v21  ;;  %v1549_v13 = vadd.f32 %v1548_v33, %v1547_v19  ;;  %v1585_v31 = vadd.f32 %v1584_v54, %v1583_v49  ;;  %v12104_v2 = vmul.f32 0.125, %v1369_v36  ;;  %v12130_v25 = vld [vmem:[#allocation7 + $0x60] sm:$0xff] }
  0xc2   :  { %v12102_v5 = vmul.f32 0.125, %v1333_v42  ;;  %v12106_v26 = vmul.f32 0.125, %v1405_v41  ;;  %v12108_v62 = vmul.f32 0.125, %v1441_v20  ;;  %v12110_v55 = vmul.f32 0.125, %v1477_v6  ;;  %v12142_v44 = vld [vmem:[#allocation7 + $0xc0] sm:$0xff] }
  0xc3   :  { %13367 = vst [vmem:[#allocation31_spill] sm:$0xff] %v12104_v2  ;;  %v12112_v27 = vmul.f32 0.125, %v1513_v60  ;;  %v12114_v32 = vmul.f32 0.125, %v1549_v13  ;;  %v12116_v45 = vmul.f32 0.125, %v1585_v31  ;;  %v1799_v35 = vpack.c.bf16 %v12104_v2, %v12104_v2  ;;  %v12146_v50 = vld [vmem:[#allocation7 + $0x120] sm:$0xff]  ;;  %v440_v13 = vld [vmem:[#allocation7 + $0x150] sm:$0xff] }
  0xc4   :  { %13366 = vst [vmem:[#allocation30_spill] sm:$0xff] %v12102_v5  ;;  %13368 = vst [vmem:[#allocation32_spill] sm:$0xff] %v12106_v26  ;;  %v1793_v34 = vpack.c.bf16 %v12102_v5, %v12102_v5  ;;  %v1805_v43 = vpack.c.bf16 %v12106_v26, %v12106_v26  ;;  %v1811_v61 = vpack.c.bf16 %v12108_v62, %v12108_v62  ;;  %v359_v6 = vunpack.c.l.bf16 %v11991_v58  ;;  %v10394_v26 = vld [vmem:[#allocation9 + $0x300] ss:$24 sps:$4 sm:$0xff]  }
  0xc5   :  { %13369 = vst [vmem:[#allocation33_spill] sm:$0xff] %v12108_v62  ;;  %13370 = vst [vmem:[#allocation34_spill] sm:$0xff] %v12110_v55  ;;  %v1817_v24 = vpack.c.bf16 %v12110_v55, %v12110_v55  ;;  %v1823_v21 = vpack.c.bf16 %v12112_v27, %v12112_v27  ;;  %v1829_v19 = vpack.c.bf16 %v12114_v32, %v12114_v32  ;;  %v2100_v0 = vunpack.c.l.b16 %v1799_v35  ;;  %v12326_v62 = vld [vmem:[#allocation4 + $0x170] sm:$0xff] }
  0xc6   :  { %13371 = vst [vmem:[#allocation35_spill] sm:$0xff] %v12112_v27  ;;  %13372 = vst [vmem:[#allocation36_spill] sm:$0xff] %v12114_v32  ;;  %v1835_v49 = vpack.c.bf16 %v12116_v45, %v12116_v45  ;;  %v2094_v59 = vunpack.c.l.b16 %v1793_v34  ;;  %v2106_v1 = vunpack.c.l.b16 %v1805_v43  ;;  %v2112_v33 = vunpack.c.l.b16 %v1811_v61  ;;  %v11654_v27 = vld [vmem:[#allocation7 + $0x8] sm:$0xff] }
  0xc7   :  { %13373 = vst [vmem:[#allocation37_spill] sm:$0xff] %v12116_v45  ;;  %v2118_v54 = vunpack.c.l.b16 %v1817_v24  ;;  %v2124_v42 = vunpack.c.l.b16 %v1823_v21  ;;  %v2130_v36 = vunpack.c.l.b16 %v1829_v19  ;;  %v365_v60 = vunpack.c.l.bf16 %v11997_v63 }
  0xc8   :  { %v2136_v41 = vunpack.c.l.b16 %v1835_v49  ;;  %v2160_v20 = vsel %vm1982_vm0, %v2100_v0, %v2094_v59  ;;  %v443_v31 = vunpack.c.l.bf16 %v12118_v18  ;;  %v449_v34 = vunpack.c.l.bf16 %v12128_v47  ;;  %v659_v47 = vld [vmem:[#allocation7 + $0x18] sm:$0xff]  ;;  %v662_v59 = vld [vmem:[#allocation7 + $0x48] sm:$0xff] }
  0xc9   :  { %v2161_v45 = vsel %vm1984_vm1, %v2106_v1, %v2160_v20  ;;  %v455_v35 = vunpack.c.l.bf16 %v12130_v25  ;;  %v461_v43 = vunpack.c.l.bf16 %v12132_v39  ;;  %v467_v24 = vunpack.c.l.bf16 %v12142_v44  ;;  %v668_v0 = vld [vmem:[#allocation7 + $0xa8] sm:$0xff]  ;;  %v677_v20 = vld [vmem:[#allocation7 + $0x138] sm:$0xff] }
  0xca   :  { %v2162_v61 = vsel %vm1986_vm2, %v2112_v33, %v2161_v45  ;;  %v473_v21 = vunpack.c.l.bf16 %v12144_v46  ;;  %v479_v58 = vunpack.c.l.bf16 %v12146_v50  ;;  %v485_v19 = vunpack.c.l.bf16 %v440_v13  ;;  %v665_v46 = vld [vmem:[#allocation7 + $0x78] sm:$0xff]  ;;  %v674_v1 = vld [vmem:[#allocation7 + $0x108] sm:$0xff] }
  0xcb   :  { %v2163_v63 = vsel %vm1988_vm3, %v2118_v54, %v2162_v61  ;;  %v563_v18 = vunpack.c.l.bf16 %v12002_v3  ;;  %v569_v49 = vunpack.c.l.bf16 %v12004_v4  ;;  %v575_v39 = vunpack.c.l.bf16 %v12008_v8  ;;  %v671_v50 = vld [vmem:[#allocation7 + $0xd8] sm:$0xff] }
  0xcc   :  { %v2164_v25 = vsel %vm1990_vm4, %v2124_v42, %v2163_v63  ;;  %v581_v45 = vunpack.c.l.bf16 %v12010_v9  ;;  %v587_v44 = vunpack.c.l.bf16 %v12012_v10  ;;  %v593_v3 = vunpack.c.l.bf16 %v12017_v14 }
  0xcd   :  { %v2165_v33 = vsel %vm1992_vm5, %v2130_v36, %v2164_v25  ;;  %v599_v4 = vunpack.c.l.bf16 %v12019_v15  ;;  %v605_v54 = vunpack.c.l.bf16 %v12021_v16  ;;  %v13374_v8 = vunpack.c.l.bf16 %v11977_v48 }
  0xce   :  { %v2166_v42 = vsel %vm1994_vm6, %v2136_v41, %v2165_v33  ;;  %v13375_v10 = vunpack.c.l.bf16 %v11979_v51  ;;  %v13376_v61 = vunpack.c.l.bf16 %v11981_v52  ;;  %v13378_v14 = vunpack.c.l.bf16 %v11983_v53  ;;  %v680_v33 = vld [vmem:[#allocation7 + $0x168] sm:$0xff] }
  0xcf   :  { %v611_v9 = vadd.f32 %v563_v18, %v13374_v8  ;;  %v12178_v32 = vpack.c.b16 %v2166_v42, %v2166_v42  ;;  %v13379_v15 = vunpack.c.l.bf16 %v11987_v56  ;;  %v13380_v25 = vunpack.c.l.bf16 %v11989_v57 }
  0xd0   :  { %v617_v13 = vadd.f32 %v569_v49, %v13375_v10  ;;  %v623_v63 = vadd.f32 %v575_v39, %v13376_v61  ;;  %v629_v36 = vadd.f32 %v581_v45, %v13378_v14  ;;  %v647_v48 = vadd.f32 %v599_v4, %v359_v6 }
  0xd1   :  { %13377 = vst [vmem:[#allocation38_spill] sm:$0xff] %v12178_v32  ;;  %v635_v16 = vadd.f32 %v587_v44, %v13379_v15  ;;  %v641_v41 = vadd.f32 %v593_v3, %v13380_v25  ;;  %v653_v18 = vadd.f32 %v605_v54, %v365_v60  ;;  %v683_v8 = vunpack.c.l.bf16 %v659_v47  ;;  %7755 = vmatprep.mubr.bf16.mxu0 %v12178_v32 }
  0xd2   :  { %v689_v51 = vunpack.c.l.bf16 %v662_v59  ;;  %v695_v52 = vunpack.c.l.bf16 %v665_v46  ;;  %v701_v49 = vunpack.c.l.bf16 %v668_v0  ;;  %v707_v39 = vunpack.c.l.bf16 %v671_v50 }
  0xd3   :  { %v713_v42 = vunpack.c.l.bf16 %v674_v1  ;;  %v719_v10 = vunpack.c.l.bf16 %v677_v20  ;;  %v725_v53 = vunpack.c.l.bf16 %v680_v33  ;;  %v12187_v45 = vadd.f32 %v683_v8, %v443_v31 }
  0xd4   :  { %v12189_v56 = vadd.f32 %v689_v51, %v449_v34  ;;  %v12191_v44 = vadd.f32 %v695_v52, %v455_v35  ;;  %v12193_v57 = vadd.f32 %v701_v49, %v461_v43  ;;  %v12195_v6 = vadd.f32 %v707_v39, %v467_v24 }
  0xd5   :  { %v12197_v60 = vadd.f32 %v713_v42, %v473_v21  ;;  %v12199_v47 = vadd.f32 %v719_v10, %v479_v58  ;;  %v12201_v59 = vadd.f32 %v725_v53, %v485_v19  ;;  %v926_v46 = vrot.slane %v611_v9, 4 }
  0xd6   :  { %v962_v0 = vrot.slane %v617_v13, 4  ;;  %v998_v50 = vrot.slane %v623_v63, 4  ;;  %v1034_v1 = vrot.slane %v629_v36, 4  ;;  %v1070_v31 = vrot.slane %v635_v16, 4 }
  0xd7   :  { %v1106_v3 = vrot.slane %v641_v41, 4  ;;  %v927_v34 = vadd.f32 %v926_v46, %v611_v9  ;;  %v1142_v35 = vrot.slane %v647_v48, 4  ;;  %v1178_v54 = vrot.slane %v653_v18, 4 }
  0xd8   :  { %v963_v4 = vadd.f32 %v962_v0, %v617_v13  ;;  %v999_v43 = vadd.f32 %v998_v50, %v623_v63  ;;  %v1035_v20 = vadd.f32 %v1034_v1, %v629_v36  ;;  %v1071_v24 = vadd.f32 %v1070_v31, %v635_v16 }
  0xd9   :  { %v1107_v61 = vadd.f32 %v1106_v3, %v641_v41  ;;  %v928_v21 = vrot.slane %v927_v34, 2  ;;  %v1143_v58 = vadd.f32 %v1142_v35, %v647_v48  ;;  %v1179_v15 = vadd.f32 %v1178_v54, %v653_v18 }
  0xda   :  { %v964_v14 = vrot.slane %v963_v4, 2  ;;  %v1000_v19 = vrot.slane %v999_v43, 2  ;;  %v1036_v25 = vrot.slane %v1035_v20, 2  ;;  %v1072_v33 = vrot.slane %v1071_v24, 2 }
  0xdb   :  { %v1108_v8 = vrot.slane %v1107_v61, 2  ;;  %v929_v51 = vadd.f32 %v928_v21, %v927_v34  ;;  %v1144_v49 = vrot.slane %v1143_v58, 2  ;;  %v1180_v39 = vrot.slane %v1179_v15, 2 }
  0xdc   :  { %v965_v52 = vadd.f32 %v964_v14, %v963_v4  ;;  %v1001_v9 = vadd.f32 %v1000_v19, %v999_v43  ;;  %v1037_v13 = vadd.f32 %v1036_v25, %v1035_v20  ;;  %v1073_v42 = vadd.f32 %v1072_v33, %v1071_v24 }
  0xdd   :  { %v1109_v10 = vadd.f32 %v1108_v8, %v1107_v61  ;;  %v930_v63 = vrot.slane %v929_v51, 1  ;;  %v1145_v16 = vadd.f32 %v1144_v49, %v1143_v58  ;;  %v1181_v41 = vadd.f32 %v1180_v39, %v1179_v15 }
  0xde   :  { %v966_v36 = vrot.slane %v965_v52, 1  ;;  %v1002_v53 = vrot.slane %v1001_v9, 1  ;;  %v1038_v46 = vrot.slane %v1037_v13, 1  ;;  %v1074_v48 = vrot.slane %v1073_v42, 1 }
  0xdf   :  { %v1110_v18 = vrot.slane %v1109_v10, 1  ;;  %v931_v0 = vadd.f32 %v930_v63, %v929_v51  ;;  %v1146_v1 = vrot.slane %v1145_v16, 1  ;;  %v1182_v31 = vrot.slane %v1181_v41, 1 }
  0xe0   :  { %v967_v50 = vadd.f32 %v966_v36, %v965_v52  ;;  %v1003_v3 = vadd.f32 %v1002_v53, %v1001_v9  ;;  %v1039_v34 = vadd.f32 %v1038_v46, %v1037_v13  ;;  %v1075_v4 = vadd.f32 %v1074_v48, %v1073_v42 }
  0xe1   :  { %v1111_v35 = vadd.f32 %v1110_v18, %v1109_v10  ;;  %v1147_v54 = vadd.f32 %v1146_v1, %v1145_v16  ;;  %v1183_v43 = vadd.f32 %v1182_v31, %v1181_v41  ;;  %v12203_v20 = vmul.f32 0.125, %v931_v0 }
  0xe2   :  { %v12205_v24 = vmul.f32 0.125, %v967_v50  ;;  %v12207_v61 = vmul.f32 0.125, %v1003_v3  ;;  %v12209_v21 = vmul.f32 0.125, %v1039_v34  ;;  %v12211_v14 = vmul.f32 0.125, %v1075_v4 }
  0xe3   :  { %v12213_v58 = vmul.f32 0.125, %v1111_v35  ;;  %v12215_v15 = vmul.f32 0.125, %v1147_v54  ;;  %v12217_v19 = vmul.f32 0.125, %v1183_v43  ;;  %v1310_v25 = vrot.slane %v12187_v45, 4 }
  0xe4   :  { %13381 = vst [vmem:[#allocation39_spill] sm:$0xff] %v12207_v61  ;;  %13382 = vst [vmem:[#allocation40_spill] sm:$0xff] %v12209_v21  ;;  %v1346_v33 = vrot.slane %v12189_v56, 4  ;;  %v1382_v8 = vrot.slane %v12191_v44, 4  ;;  %v1418_v51 = vrot.slane %v12193_v57, 4  ;;  %v1454_v52 = vrot.slane %v12195_v6, 4 }
  0xe5   :  { %13383 = vst [vmem:[#allocation41_spill] sm:$0xff] %v12211_v14  ;;  %13384 = vst [vmem:[#allocation42_spill] sm:$0xff] %v12213_v58  ;;  %v1490_v49 = vrot.slane %v12197_v60, 4  ;;  %v1311_v39 = vadd.f32 %v1310_v25, %v12187_v45  ;;  %v1526_v13 = vrot.slane %v12199_v47, 4  ;;  %v1562_v42 = vrot.slane %v12201_v59, 4 }
  0xe6   :  { %13385 = vst [vmem:[#allocation43_spill] sm:$0xff] %v12215_v15  ;;  %13386 = vst [vmem:[#allocation44_spill] sm:$0xff] %v12217_v19  ;;  %v1347_v9 = vadd.f32 %v1346_v33, %v12189_v56  ;;  %v1383_v10 = vadd.f32 %v1382_v8, %v12191_v44  ;;  %v1419_v63 = vadd.f32 %v1418_v51, %v12193_v57  ;;  %v445_v55 = vunpack.c.l.bf16 %v11654_v27 }
  0xe7   :  { %v1455_v36 = vadd.f32 %v1454_v52, %v12195_v6  ;;  %v1491_v16 = vadd.f32 %v1490_v49, %v12197_v60  ;;  %v1312_v41 = vrot.slane %v1311_v39, 2  ;;  %v1527_v46 = vadd.f32 %v1526_v13, %v12199_v47 }
  0xe8   :  { %v1348_v53 = vrot.slane %v1347_v9, 2  ;;  %v1563_v45 = vadd.f32 %v1562_v42, %v12201_v59  ;;  %v1384_v48 = vrot.slane %v1383_v10, 2  ;;  %v1420_v56 = vrot.slane %v1419_v63, 2 }
  0xe9   :  { %v1456_v18 = vrot.slane %v1455_v36, 2  ;;  %v1492_v0 = vrot.slane %v1491_v16, 2  ;;  %v1313_v50 = vadd.f32 %v1312_v41, %v1311_v39  ;;  %v1528_v31 = vrot.slane %v1527_v46, 2 }
  0xea   :  { %v1349_v1 = vadd.f32 %v1348_v53, %v1347_v9  ;;  %v1564_v44 = vrot.slane %v1563_v45, 2  ;;  %v1385_v3 = vadd.f32 %v1384_v48, %v1383_v10  ;;  %v1421_v57 = vadd.f32 %v1420_v56, %v1419_v63 }
  0xeb   :  { %v1457_v34 = vadd.f32 %v1456_v18, %v1455_v36  ;;  %v1493_v6 = vadd.f32 %v1492_v0, %v1491_v16  ;;  %v1314_v4 = vrot.slane %v1313_v50, 1  ;;  %v1529_v35 = vadd.f32 %v1528_v31, %v1527_v46 }
  0xec   :  { %v1350_v60 = vrot.slane %v1349_v1, 1  ;;  %v1565_v54 = vadd.f32 %v1564_v44, %v1563_v45  ;;  %v1386_v43 = vrot.slane %v1385_v3, 1  ;;  %v1422_v47 = vrot.slane %v1421_v57, 1  ;;  %v12263_v44 = vld [vmem:[#allocation4 + $0x8] sm:$0xff] }
  0xed   :  { %v1458_v25 = vrot.slane %v1457_v34, 1  ;;  %v1494_v59 = vrot.slane %v1493_v6, 1  ;;  %v1315_v33 = vadd.f32 %v1314_v4, %v1313_v50  ;;  %v1530_v51 = vrot.slane %v1529_v35, 1  ;;  %v12273_v4 = vld [vmem:[#allocation4 + $0x38] sm:$0xff] }
  0xee   :  { %v1351_v8 = vadd.f32 %v1350_v60, %v1349_v1  ;;  %v1566_v52 = vrot.slane %v1565_v54, 1  ;;  %v1387_v49 = vadd.f32 %v1386_v43, %v1385_v3  ;;  %v1423_v39 = vadd.f32 %v1422_v47, %v1421_v57  ;;  %v12275_v60 = vld [vmem:[#allocation4 + $0x68] sm:$0xff] }
  0xef   :  { %v1459_v9 = vadd.f32 %v1458_v25, %v1457_v34  ;;  %v1495_v13 = vadd.f32 %v1494_v59, %v1493_v6  ;;  %v1531_v42 = vadd.f32 %v1530_v51, %v1529_v35  ;;  %v12235_v63 = vmul.f32 0.125, %v1315_v33  ;;  %v12277_v35 = vld [vmem:[#allocation4 + $0x98] sm:$0xff]  ;;  %v12287_v59 = vld [vmem:[#allocation4 + $0xc8] sm:$0xff] }
  0xf0   :  { %v1567_v10 = vadd.f32 %v1566_v52, %v1565_v54  ;;  %v12237_v36 = vmul.f32 0.125, %v1351_v8  ;;  %v12239_v16 = vmul.f32 0.125, %v1387_v49  ;;  %v12241_v41 = vmul.f32 0.125, %v1423_v39  ;;  %v12289_v33 = vld [vmem:[#allocation4 + $0xf8] sm:$0xff]  ;;  %v12291_v8 = vld [vmem:[#allocation4 + $0x128] sm:$0xff] }
  0xf1   :  { %v12243_v53 = vmul.f32 0.125, %v1459_v9  ;;  %v12245_v46 = vmul.f32 0.125, %v1495_v13  ;;  %v12247_v45 = vmul.f32 0.125, %v1531_v42  ;;  %v1742_v34 = vpack.c.bf16 %v12203_v20, %v12203_v20  ;;  %v12297_v9 = vld [vmem:[#allocation4 + $0x158] sm:$0xff] }
  0xf2   :  { %13387 = vst [vmem:[#allocation45_spill] sm:$0xff] %v12237_v36  ;;  %13388 = vst [vmem:[#allocation46_spill] sm:$0xff] %v12239_v16  ;;  %v12249_v48 = vmul.f32 0.125, %v1567_v10  ;;  %v1748_v6 = vpack.c.bf16 %v12205_v24, %v12205_v24  ;;  %v1754_v54 = vpack.c.bf16 %v12207_v61, %v12207_v61  ;;  %v1760_v43 = vpack.c.bf16 %v12209_v21, %v12209_v21  ;;  %v11655_v16 = vld [vmem:[#allocation7 + $0x20] sm:$0xff]  ;;  %v11658_v36 = vld [vmem:[#allocation7 + $0xb0] sm:$0xff] }
  0xf3   :  { %13389 = vst [vmem:[#allocation47_spill] sm:$0xff] %v12241_v41  ;;  %13390 = vst [vmem:[#allocation48_spill] sm:$0xff] %v12243_v53  ;;  %v1766_v47 = vpack.c.bf16 %v12211_v14, %v12211_v14  ;;  %v1772_v25 = vpack.c.bf16 %v12213_v58, %v12213_v58  ;;  %v1778_v51 = vpack.c.bf16 %v12215_v15, %v12215_v15  ;;  %v1934_v49 = vunpack.c.l.b16 %v1742_v34  ;;  %v10408_v14 = vld [vmem:[#allocation9 + $0x364] ss:$24 sps:$4 sm:$0xff]  }
  0xf4   :  { %13391 = vst [vmem:[#allocation49_spill] sm:$0xff] %v12245_v46  ;;  %13392 = vst [vmem:[#allocation50_spill] sm:$0xff] %v12247_v45  ;;  %v1784_v52 = vpack.c.bf16 %v12217_v19, %v12217_v19  ;;  %v1940_v39 = vunpack.c.l.b16 %v1748_v6  ;;  %v1946_v13 = vunpack.c.l.b16 %v1754_v54  ;;  %v1952_v42 = vunpack.c.l.b16 %v1760_v43  ;;  %v12305_v6 = vld [vmem:[#allocation4 + $0x20] sm:$0xff]  ;;  %v12307_v54 = vld [vmem:[#allocation4 + $0x50] sm:$0xff] }
  0xf5   :  { %13393 = vst [vmem:[#allocation51_spill] sm:$0xff] %v12249_v48  ;;  %v1958_v10 = vunpack.c.l.b16 %v1766_v47  ;;  %v1964_v57 = vunpack.c.l.b16 %v1772_v25  ;;  %v1970_v3 = vunpack.c.l.b16 %v1778_v51  ;;  %v325_v50 = vunpack.c.l.bf16 %v12263_v44  ;;  %v12309_v43 = vld [vmem:[#allocation4 + $0x80] sm:$0xff]  ;;  %v10402_v45 = vld [vmem:[#allocation9 + $0x334] ss:$24 sps:$4 sm:$0xff]  }
  0xf6   :  { %v1976_v31 = vunpack.c.l.b16 %v1784_v52  ;;  %v1983_v1 = vsel %vm1982_vm0, %v1940_v39, %v1934_v49  ;;  %v331_v18 = vunpack.c.l.bf16 %v12273_v4  ;;  %v337_v56 = vunpack.c.l.bf16 %v12275_v60  ;;  %v12315_v52 = vld [vmem:[#allocation4 + $0xb0] sm:$0xff]  ;;  %v12317_v49 = vld [vmem:[#allocation4 + $0xe0] sm:$0xff] }
  0xf7   :  { %v1985_v0 = vsel %vm1984_vm1, %v1946_v13, %v1983_v1  ;;  %v343_v34 = vunpack.c.l.bf16 %v12277_v35  ;;  %v349_v25 = vunpack.c.l.bf16 %v12287_v59  ;;  %v355_v51 = vunpack.c.l.bf16 %v12289_v33  ;;  %v12319_v39 = vld [vmem:[#allocation4 + $0x110] sm:$0xff] }
  0xf8   :  { %v1987_v47 = vsel %vm1986_vm2, %v1952_v42, %v1985_v0  ;;  %v361_v1 = vunpack.c.l.bf16 %v12291_v8  ;;  %v367_v32 = vunpack.c.l.bf16 %v12297_v9  ;;  %v451_v0 = vunpack.c.l.bf16 %v12048_v22  ;;  %v12324_v42 = vld [vmem:[#allocation4 + $0x140] sm:$0xff] }
  0xf9   :  { %v1989_v13 = vsel %vm1988_vm3, %v1958_v10, %v1987_v47  ;;  %v457_v5 = vunpack.c.l.bf16 %v12050_v23  ;;  %v463_v48 = vunpack.c.l.bf16 %v12060_v28  ;;  %v469_v19 = vunpack.c.l.bf16 %v12062_v29 }
  0xfa   :  { %v1991_v2 = vsel %vm1990_vm4, %v1964_v57, %v1989_v13  ;;  %v475_v47 = vunpack.c.l.bf16 %v12064_v30  ;;  %v481_v27 = vunpack.c.l.bf16 %v12074_v37  ;;  %v487_v22 = vunpack.c.l.bf16 %v12076_v38  ;;  %v10400_v13 = vld [vmem:[#allocation9 + $0x330] ss:$24 sps:$4 sm:$0xff]  }
  0xfb   :  { %v1993_v10 = vsel %vm1992_vm5, %v1970_v3, %v1991_v2  ;;  %v565_v46 = vunpack.c.l.bf16 %v12305_v6  ;;  %v571_v57 = vunpack.c.l.bf16 %v12307_v54  ;;  %v577_v23 = vunpack.c.l.bf16 %v12309_v43 }
  0xfc   :  { %v1995_v15 = vsel %vm1994_vm6, %v1976_v31, %v1993_v10  ;;  %v583_v29 = vunpack.c.l.bf16 %v12315_v52  ;;  %v589_v2 = vunpack.c.l.bf16 %v12317_v49  ;;  %v595_v30 = vunpack.c.l.bf16 %v12319_v39 }
  0xfd   :  { %v12340_v28 = vpack.c.b16 %v1995_v15, %v1995_v15  ;;  %v601_v37 = vunpack.c.l.bf16 %v12324_v42  ;;  %v607_v38 = vunpack.c.l.bf16 %v12326_v62  ;;  %v613_v3 = vadd.f32 %v565_v46, %v325_v50 }
  0xfe   :  { %v619_v31 = vadd.f32 %v571_v57, %v331_v18  ;;  %v625_v10 = vadd.f32 %v577_v23, %v337_v56  ;;  %v631_v58 = vadd.f32 %v583_v29, %v343_v34  ;;  %v637_v53 = vadd.f32 %v589_v2, %v349_v25  ;;  %v11659_v18 = vld [vmem:[#allocation7 + $0xe0] sm:$0xff]  ;;  %v11660_v57 = vld [vmem:[#allocation7 + $0x110] sm:$0xff] }
  0xff   :  { %13394 = vst [vmem:[#allocation52_spill] sm:$0xff] %v12340_v28  ;;  %7592 = vmatmul.mubr.bf16.vlgmr.msra.gmra.mrb[0].mxu1 %v12340_v28  ;;  %v643_v15 = vadd.f32 %v595_v30, %v355_v51  ;;  %v649_v41 = vadd.f32 %v601_v37, %v361_v1  ;;  %v655_v21 = vadd.f32 %v607_v38, %v367_v32  ;;  %v685_v61 = vunpack.c.l.bf16 %v11655_v16  ;;  %v11661_v56 = vld [vmem:[#allocation7 + $0x140] sm:$0xff]  ;;  %v10412_v30 = vld [vmem:[#allocation9 + $0x390] ss:$24 sps:$4 sm:$0xff]  }
 0x100   :  { %7601 = vmatpush1.bf16.msra.mxu1 %v10394_v26  ;;  %v697_v7 = vunpack.c.l.bf16 %v11657_v11  ;;  %v703_v46 = vunpack.c.l.bf16 %v11658_v36  ;;  %v709_v50 = vunpack.c.l.bf16 %v11659_v18  ;;  %v715_v28 = vunpack.c.l.bf16 %v11660_v57  ;;  %v10406_v51 = vld [vmem:[#allocation9 + $0x360] ss:$24 sps:$4 sm:$0xff]  }
 0x101   :  { %7602 = vmatprep.subr.bf16.mxu1 %v10402_v45  ;;  %v721_v34 = vunpack.c.l.bf16 %v11661_v56  ;;  %v727_v25 = vunpack.c.l.bf16 %v12090_v40  ;;  %v12349_v26 = vadd.f32 %v685_v61, %v445_v55  ;;  %v12351_v32 = vadd.f32 %v691_v12, %v451_v0  ;;  %v10414_v40 = vld [vmem:[#allocation9 + $0x394] ss:$24 sps:$4 sm:$0xff]  }
 0x102   :  { %v12353_v16 = vadd.f32 %v697_v7, %v457_v5  ;;  %v12355_v17 = vadd.f32 %v703_v46, %v463_v48  ;;  %v12357_v11 = vadd.f32 %v709_v50, %v469_v19  ;;  %v12359_v36 = vadd.f32 %v715_v28, %v475_v47 }
 0x103   :  { %v12361_v1 = vadd.f32 %v721_v34, %v481_v27  ;;  %v12363_v45 = vadd.f32 %v727_v25, %v487_v22  ;;  %v938_v23 = vrot.slane %v613_v3, 4  ;;  %v974_v29 = vrot.slane %v619_v31, 4  ;;  %v10418_v25 = vld [vmem:[#allocation9 + $0x3c0] ss:$24 sps:$4 sm:$0xff]  }
 0x104   :  { %7603 = vmatpush1.bf16.msra.mxu1 %v10400_v13  ;;  %v1010_v55 = vrot.slane %v625_v10, 4  ;;  %v1046_v12 = vrot.slane %v631_v58, 4  ;;  %v1082_v61 = vrot.slane %v637_v53, 4  ;;  %v1118_v7 = vrot.slane %v643_v15, 4  ;;  %v10420_v13 = vld [vmem:[#allocation9 + $0x3c4] ss:$24 sps:$4 sm:$0xff]  }
 0x105   :  { %7604 = vmatprep.subr.bf16.mxu1 %v10408_v14  ;;  %v939_v5 = vadd.f32 %v938_v23, %v613_v3  ;;  %v975_v48 = vadd.f32 %v974_v29, %v619_v31  ;;  %v1154_v19 = vrot.slane %v649_v41, 4  ;;  %v1190_v0 = vrot.slane %v655_v21, 4 }
 0x106   :  { %v1011_v47 = vadd.f32 %v1010_v55, %v625_v10  ;;  %v1047_v28 = vadd.f32 %v1046_v12, %v631_v58  ;;  %v1083_v2 = vadd.f32 %v1082_v61, %v637_v53  ;;  %v1119_v27 = vadd.f32 %v1118_v7, %v643_v15 }
 0x107   :  { %v940_v22 = vrot.slane %v939_v5, 2  ;;  %v976_v37 = vrot.slane %v975_v48, 2  ;;  %v1155_v38 = vadd.f32 %v1154_v19, %v649_v41  ;;  %v1191_v46 = vadd.f32 %v1190_v0, %v655_v21 }
 0x108   :  { %7605 = vmatpush1.bf16.msra.mxu1 %v10406_v51  ;;  %v1012_v18 = vrot.slane %v1011_v47, 2  ;;  %v1048_v50 = vrot.slane %v1047_v28, 2  ;;  %v1084_v57 = vrot.slane %v1083_v2, 2  ;;  %v1120_v56 = vrot.slane %v1119_v27, 2  ;;  %v10426_v51 = vld [vmem:[#allocation9 + $0x3f4] ss:$24 sps:$4 sm:$0xff]  }
 0x109   :  { %7606 = vmatprep.subr.bf16.mxu1 %v10414_v40  ;;  %v941_v14 = vadd.f32 %v940_v22, %v939_v5  ;;  %v977_v3 = vadd.f32 %v976_v37, %v975_v48  ;;  %v1156_v31 = vrot.slane %v1155_v38, 2  ;;  %v1192_v34 = vrot.slane %v1191_v46, 2 }
 0x10a   :  { %v1013_v10 = vadd.f32 %v1012_v18, %v1011_v47  ;;  %v1049_v58 = vadd.f32 %v1048_v50, %v1047_v28  ;;  %v1085_v53 = vadd.f32 %v1084_v57, %v1083_v2  ;;  %v1121_v15 = vadd.f32 %v1120_v56, %v1119_v27  ;;  %v10424_v27 = vld [vmem:[#allocation9 + $0x3f0] ss:$24 sps:$4 sm:$0xff]  }
 0x10b   :  { %v942_v23 = vrot.slane %v941_v14, 1  ;;  %v978_v29 = vrot.slane %v977_v3, 1  ;;  %v1157_v41 = vadd.f32 %v1156_v31, %v1155_v38  ;;  %v1193_v21 = vadd.f32 %v1192_v34, %v1191_v46  ;;  %v10432_v46 = vld [vmem:[#allocation9 + $0x424] ss:$24 sps:$4 sm:$0xff]  }
 0x10c   :  { %7607 = vmatpush1.bf16.msra.mxu1 %v10412_v30  ;;  %v1014_v55 = vrot.slane %v1013_v10, 1  ;;  %v1050_v12 = vrot.slane %v1049_v58, 1  ;;  %v1086_v61 = vrot.slane %v1085_v53, 1  ;;  %v1122_v7 = vrot.slane %v1121_v15, 1 }
 0x10d   :  { %7608 = vmatprep.subr.bf16.mxu1 %v10420_v13  ;;  %v943_v40 = vadd.f32 %v942_v23, %v941_v14  ;;  %v979_v5 = vadd.f32 %v978_v29, %v977_v3  ;;  %v1158_v48 = vrot.slane %v1157_v41, 1  ;;  %v1194_v19 = vrot.slane %v1193_v21, 1 }
 0x10e   :  { %v1015_v0 = vadd.f32 %v1014_v55, %v1013_v10  ;;  %v1051_v47 = vadd.f32 %v1050_v12, %v1049_v58  ;;  %v1087_v28 = vadd.f32 %v1086_v61, %v1085_v53  ;;  %v1123_v2 = vadd.f32 %v1122_v7, %v1121_v15  ;;  %v10438_v61 = vld [vmem:[#allocation9 + $0x454] ss:$24 sps:$4 sm:$0xff]  }
 0x10f   :  { %v1159_v22 = vadd.f32 %v1158_v48, %v1157_v41  ;;  %v1195_v37 = vadd.f32 %v1194_v19, %v1193_v21  ;;  %v12365_v38 = vmul.f32 0.125, %v943_v40  ;;  %v12367_v30 = vmul.f32 0.125, %v979_v5  ;;  %v10430_v41 = vld [vmem:[#allocation9 + $0x420] ss:$24 sps:$4 sm:$0xff]  }
 0x110   :  { %7609 = vmatpush1.bf16.msra.mxu1 %v10418_v25  ;;  %v12369_v18 = vmul.f32 0.125, %v1015_v0  ;;  %v12371_v13 = vmul.f32 0.125, %v1051_v47  ;;  %v12373_v50 = vmul.f32 0.125, %v1087_v28  ;;  %v12375_v57 = vmul.f32 0.125, %v1123_v2 }
 0x111   :  { %7610 = vmatprep.subr.bf16.mxu1 %v10426_v51  ;;  %v12377_v56 = vmul.f32 0.125, %v1159_v22  ;;  %v12379_v14 = vmul.f32 0.125, %v1195_v37  ;;  %v1322_v3 = vrot.slane %v12349_v26, 4  ;;  %v1358_v31 = vrot.slane %v12351_v32, 4  ;;  %v10444_v37 = vld [vmem:[#allocation9 + $0x484] ss:$24 sps:$4 sm:$0xff]  }
 0x112   :  { %v1394_v34 = vrot.slane %v12353_v16, 4  ;;  %v1430_v10 = vrot.slane %v12355_v17, 4  ;;  %v1466_v58 = vrot.slane %v12357_v11, 4  ;;  %v1502_v53 = vrot.slane %v12359_v36, 4 }
 0x113   :  { %v1323_v15 = vadd.f32 %v1322_v3, %v12349_v26  ;;  %v1359_v25 = vadd.f32 %v1358_v31, %v12351_v32  ;;  %v1538_v23 = vrot.slane %v12361_v1, 4  ;;  %v1574_v29 = vrot.slane %v12363_v45, 4 }
 0x114   :  { %7611 = vmatpush1.bf16.msra.mxu1 %v10424_v27  ;;  %v1395_v21 = vadd.f32 %v1394_v34, %v12353_v16  ;;  %v1431_v51 = vadd.f32 %v1430_v10, %v12355_v17  ;;  %v1467_v55 = vadd.f32 %v1466_v58, %v12357_v11  ;;  %v1503_v12 = vadd.f32 %v1502_v53, %v12359_v36  ;;  %v10436_v11 = vld [vmem:[#allocation9 + $0x450] ss:$24 sps:$4 sm:$0xff]  }
 0x115   :  { %7612 = vmatprep.subr.bf16.mxu1 %v10432_v46  ;;  %v1324_v7 = vrot.slane %v1323_v15, 2  ;;  %v1360_v26 = vrot.slane %v1359_v25, 2  ;;  %v1539_v32 = vadd.f32 %v1538_v23, %v12361_v1  ;;  %v1575_v40 = vadd.f32 %v1574_v29, %v12363_v45  ;;  %v10442_v29 = vld [vmem:[#allocation9 + $0x480] ss:$24 sps:$4 sm:$0xff]  }
 0x116   :  { %v1396_v5 = vrot.slane %v1395_v21, 2  ;;  %v1432_v48 = vrot.slane %v1431_v51, 2  ;;  %v1468_v19 = vrot.slane %v1467_v55, 2  ;;  %v1504_v0 = vrot.slane %v1503_v12, 2 }
 0x117   :  { %v1325_v47 = vadd.f32 %v1324_v7, %v1323_v15  ;;  %v1361_v16 = vadd.f32 %v1360_v26, %v1359_v25  ;;  %v1540_v28 = vrot.slane %v1539_v32, 2  ;;  %v1576_v17 = vrot.slane %v1575_v40, 2 }
 0x118   :  { %7613 = vmatpush1.bf16.msra.mxu1 %v10430_v41  ;;  %v1397_v2 = vadd.f32 %v1396_v5, %v1395_v21  ;;  %v1433_v36 = vadd.f32 %v1432_v48, %v1431_v51  ;;  %v1469_v27 = vadd.f32 %v1468_v19, %v1467_v55  ;;  %v1505_v22 = vadd.f32 %v1504_v0, %v1503_v12  ;;  %v10450_v12 = vld [vmem:[#allocation9 + $0x4b4] ss:$24 sps:$4 sm:$0xff]  }
 0x119   :  { %7614 = vmatprep.subr.bf16.mxu1 %v10438_v61  ;;  %v1326_v46 = vrot.slane %v1325_v47, 1  ;;  %v1362_v1 = vrot.slane %v1361_v16, 1  ;;  %v1541_v3 = vadd.f32 %v1540_v28, %v1539_v32  ;;  %v1577_v45 = vadd.f32 %v1576_v17, %v1575_v40  ;;  %v10448_v17 = vld [vmem:[#allocation9 + $0x4b0] ss:$24 sps:$4 sm:$0xff]  }
 0x11a   :  { %v1398_v31 = vrot.slane %v1397_v2, 1  ;;  %v1434_v34 = vrot.slane %v1433_v36, 1  ;;  %v1470_v10 = vrot.slane %v1469_v27, 1  ;;  %v1506_v58 = vrot.slane %v1505_v22, 1 }
 0x11b   :  { %v1327_v53 = vadd.f32 %v1326_v46, %v1325_v47  ;;  %v1363_v15 = vadd.f32 %v1362_v1, %v1361_v16  ;;  %v1542_v25 = vrot.slane %v1541_v3, 1  ;;  %v1578_v23 = vrot.slane %v1577_v45, 1 }
 0x11c   :  { %7615 = vmatpush1.bf16.msra.mxu1 %v10436_v11  ;;  %v1399_v41 = vadd.f32 %v1398_v31, %v1397_v2  ;;  %v1435_v21 = vadd.f32 %v1434_v34, %v1433_v36  ;;  %v1471_v51 = vadd.f32 %v1470_v10, %v1469_v27  ;;  %v1507_v55 = vadd.f32 %v1506_v58, %v1505_v22  ;;  %v10456_v22 = vld [vmem:[#allocation9 + $0x4e4] ss:$24 sps:$4 sm:$0xff]  }
 0x11d   :  { %7616 = vmatprep.subr.bf16.mxu1 %v10444_v37  ;;  %v1543_v61 = vadd.f32 %v1542_v25, %v1541_v3  ;;  %v1579_v7 = vadd.f32 %v1578_v23, %v1577_v45  ;;  %v12397_v26 = vmul.f32 0.125, %v1327_v53  ;;  %v12399_v32 = vmul.f32 0.125, %v1363_v15  ;;  %v10454_v23 = vld [vmem:[#allocation9 + $0x4e0] ss:$24 sps:$4 sm:$0xff]  }
 0x11e   :  { %v12401_v40 = vmul.f32 0.125, %v1399_v41  ;;  %v12403_v5 = vmul.f32 0.125, %v1435_v21  ;;  %v12405_v48 = vmul.f32 0.125, %v1471_v51  ;;  %v12407_v19 = vmul.f32 0.125, %v1507_v55  ;;  %v10462_v55 = vld [vmem:[#allocation9 + $0x514] ss:$24 sps:$4 sm:$0xff]  }
 0x11f   :  { %13395 = vst [vmem:[#allocation53_spill] sm:$0xff] %v12397_v26  ;;  %13396 = vst [vmem:[#allocation54_spill] sm:$0xff] %v12399_v32  ;;  %v12409_v0 = vmul.f32 0.125, %v1543_v61  ;;  %v12411_v47 = vmul.f32 0.125, %v1579_v7  ;;  %v1792_v1 = vpack.c.bf16 %v12397_v26, %v12397_v26  ;;  %v1798_v3 = vpack.c.bf16 %v12399_v32, %v12399_v32  ;;  %v12539_v11 = vld [vmem:[#allocation7 + $0xb8] sm:$0xff] }
 0x120   :  { %13397 = vst [vmem:[#allocation55_spill] sm:$0xff] %v12401_v40  ;;  %13398 = vst [vmem:[#allocation56_spill] sm:$0xff] %v12403_v5  ;;  %7617 = vmatpush1.bf16.msra.mxu1 %v10442_v29  ;;  %v1804_v45 = vpack.c.bf16 %v12401_v40, %v12401_v40  ;;  %v1810_v31 = vpack.c.bf16 %v12403_v5, %v12403_v5  ;;  %v1816_v34 = vpack.c.bf16 %v12405_v48, %v12405_v48  ;;  %v10453_v40 = vld [vmem:[#allocation9 + $0x10b4] ss:$24 sps:$4 sm:$0xff]  }
 0x121   :  { %13399 = vst [vmem:[#allocation57_spill] sm:$0xff] %v12405_v48  ;;  %13400 = vst [vmem:[#allocation58_spill] sm:$0xff] %v12407_v19  ;;  %7618 = vmatprep.subr.bf16.mxu1 %v10450_v12  ;;  %v1822_v10 = vpack.c.bf16 %v12407_v19, %v12407_v19  ;;  %v1828_v58 = vpack.c.bf16 %v12409_v0, %v12409_v0  ;;  %v1834_v53 = vpack.c.bf16 %v12411_v47, %v12411_v47 }
 0x122   :  { %13401 = vst [vmem:[#allocation59_spill] sm:$0xff] %v12409_v0  ;;  %13402 = vst [vmem:[#allocation60_spill] sm:$0xff] %v12411_v47  ;;  %v2093_v15 = vunpack.c.l.b16 %v1792_v1  ;;  %v2099_v25 = vunpack.c.l.b16 %v1798_v3  ;;  %v2105_v29 = vunpack.c.l.b16 %v1804_v45  ;;  %v2111_v41 = vunpack.c.l.b16 %v1810_v31  ;;  %v10460_v45 = vld [vmem:[#allocation9 + $0x510] ss:$24 sps:$4 sm:$0xff]  }
 0x123   :  { %v2117_v21 = vunpack.c.l.b16 %v1816_v34  ;;  %v2123_v51 = vunpack.c.l.b16 %v1822_v10  ;;  %v2129_v12 = vunpack.c.l.b16 %v1828_v58  ;;  %v2135_v61 = vunpack.c.l.b16 %v1834_v53  ;;  %v10468_v10 = vld [vmem:[#allocation9 + $0x544] ss:$24 sps:$4 sm:$0xff]   ;;  %v10397_v53 = vld [vmem:[#allocation9 + $0xf00] ss:$24 sps:$4 sm:$0xff]   ;;  %v10451_v0 = vld [vmem:[#allocation9 + $0x10b0] ss:$24 sps:$4 sm:$0xff]  }
 0x124   :  { %7619 = vmatpush1.bf16.msra.mxu1 %v10448_v17  ;;  %v2153_v7 = vsel %vm1982_vm0, %v2099_v25, %v2093_v15  ;;  %v326_v46 = vunpack.c.h.bf16 %v12263_v44  ;;  %v332_v27 = vunpack.c.h.bf16 %v12273_v4  ;;  %v338_v1 = vunpack.c.h.bf16 %v12275_v60  ;;  %v10405_v15 = vld [vmem:[#allocation9 + $0xf34] ss:$24 sps:$4 sm:$0xff]   ;;  %v10466_v25 = vld [vmem:[#allocation9 + $0x540] ss:$24 sps:$4 sm:$0xff]  }
 0x125   :  { %7620 = vmatprep.subr.bf16.mxu1 %v10456_v22  ;;  %v2154_v37 = vsel %vm1984_vm1, %v2105_v29, %v2153_v7  ;;  %v344_v17 = vunpack.c.h.bf16 %v12277_v35  ;;  %v350_v22 = vunpack.c.h.bf16 %v12287_v59  ;;  %v356_v31 = vunpack.c.h.bf16 %v12289_v33  ;;  %v10474_v29 = vld [vmem:[#allocation9 + $0x574] ss:$24 sps:$4 sm:$0xff]  }
 0x126   :  { %v2155_v3 = vsel %vm1986_vm2, %v2111_v41, %v2154_v37  ;;  %v362_v34 = vunpack.c.h.bf16 %v12291_v8  ;;  %v368_v4 = vunpack.c.h.bf16 %v12297_v9  ;;  %v566_v60 = vunpack.c.h.bf16 %v12305_v6 }
 0x127   :  { %v2156_v44 = vsel %vm1988_vm3, %v2117_v21, %v2155_v3  ;;  %v572_v35 = vunpack.c.h.bf16 %v12307_v54  ;;  %v578_v58 = vunpack.c.h.bf16 %v12309_v43  ;;  %v584_v59 = vunpack.c.h.bf16 %v12315_v52  ;;  %v12468_v21 = vld [vmem:[#allocation7 + $0x10] sm:$0xff] }
 0x128   :  { %7621 = vmatpush1.bf16.msra.mxu1 %v10454_v23  ;;  %v2157_v37 = vsel %vm1990_vm4, %v2123_v51, %v2156_v44  ;;  %v590_v33 = vunpack.c.h.bf16 %v12317_v49  ;;  %v596_v23 = vunpack.c.h.bf16 %v12319_v39  ;;  %v602_v9 = vunpack.c.h.bf16 %v12324_v42  ;;  %v10472_v44 = vld [vmem:[#allocation9 + $0x570] ss:$24 sps:$4 sm:$0xff]  }
 0x129   :  { %7622 = vmatprep.subr.bf16.mxu1 %v10462_v55  ;;  %v2158_v8 = vsel %vm1992_vm5, %v2129_v12, %v2157_v37  ;;  %v608_v6 = vunpack.c.h.bf16 %v12326_v62  ;;  %v614_v43 = vadd.f32 %v566_v60, %v326_v46  ;;  %v620_v41 = vadd.f32 %v572_v35, %v332_v27  ;;  %v10403_v62 = vld [vmem:[#allocation9 + $0xf30] ss:$24 sps:$4 sm:$0xff]  }
 0x12a   :  { %v2159_v54 = vsel %vm1994_vm6, %v2135_v61, %v2158_v8  ;;  %v626_v52 = vadd.f32 %v578_v58, %v338_v1  ;;  %v632_v51 = vadd.f32 %v584_v59, %v344_v17  ;;  %v638_v55 = vadd.f32 %v590_v33, %v350_v22  ;;  %v10411_v1 = vld [vmem:[#allocation9 + $0xf64] ss:$24 sps:$4 sm:$0xff]  }
 0x12b   :  { %v12470_v49 = vpack.c.b16 %v2159_v54, %v2159_v54  ;;  %v644_v12 = vadd.f32 %v596_v23, %v356_v31  ;;  %v650_v39 = vadd.f32 %v602_v9, %v362_v34  ;;  %v656_v7 = vadd.f32 %v608_v6, %v368_v4  ;;  %v10480_v31 = vld [vmem:[#allocation9 + $0x5a4] ss:$24 sps:$4 sm:$0xff]   ;;  %v10417_v54 = vld [vmem:[#allocation9 + $0xf94] ss:$24 sps:$4 sm:$0xff]  }
 0x12c   :  { %7623 = vmatpush1.bf16.msra.mxu1 %v10460_v45  ;;  %v944_v42 = vrot.slane %v614_v43, 4  ;;  %v980_v3 = vrot.slane %v620_v41, 4  ;;  %v1016_v61 = vrot.slane %v626_v52, 4  ;;  %v1052_v45 = vrot.slane %v632_v51, 4 }
 0x12d   :  { %13403 = vst [vmem:[#allocation61_spill] sm:$0xff] %v12470_v49  ;;  %7624 = vmatprep.subr.bf16.mxu1 %v10468_v10  ;;  %7756 = vmatmul.mubr.bf16.vlgmr.msra.gmra.mrb[0].mxu0 %v12470_v49  ;;  %v1088_v46 = vrot.slane %v638_v55, 4  ;;  %v1124_v27 = vrot.slane %v644_v12, 4  ;;  %v1160_v17 = vrot.slane %v650_v39, 4  ;;  %v1196_v22 = vrot.slane %v656_v7, 4 }
 0x12e   :  { %7765 = vmatpush1.bf16.msra.mxu0 %v10397_v53  ;;  %v945_v60 = vadd.f32 %v944_v42, %v614_v43  ;;  %v981_v10 = vadd.f32 %v980_v3, %v620_v41  ;;  %v1017_v34 = vadd.f32 %v1016_v61, %v626_v52  ;;  %v1053_v4 = vadd.f32 %v1052_v45, %v632_v51  ;;  %v10409_v53 = vld [vmem:[#allocation9 + $0xf60] ss:$24 sps:$4 sm:$0xff]   ;;  %v10486_v51 = vld [vmem:[#allocation9 + $0x5d4] ss:$24 sps:$4 sm:$0xff]  }
 0x12f   :  { %7766 = vmatprep.subr.bf16.mxu0 %v10405_v15  ;;  %v1089_v35 = vadd.f32 %v1088_v46, %v638_v55  ;;  %v1125_v33 = vadd.f32 %v1124_v27, %v644_v12  ;;  %v1161_v8 = vadd.f32 %v1160_v17, %v650_v39  ;;  %v1197_v6 = vadd.f32 %v1196_v22, %v656_v7  ;;  %v10478_v15 = vld [vmem:[#allocation9 + $0x5a0] ss:$24 sps:$4 sm:$0xff]   ;;  %v10415_v7 = vld [vmem:[#allocation9 + $0xf90] ss:$24 sps:$4 sm:$0xff]  }
 0x130   :  { %7625 = vmatpush1.bf16.msra.mxu1 %v10466_v25  ;;  %v946_v58 = vrot.slane %v945_v60, 2  ;;  %v982_v59 = vrot.slane %v981_v10, 2  ;;  %v1018_v23 = vrot.slane %v1017_v34, 2  ;;  %v1054_v25 = vrot.slane %v1053_v4, 2 }
 0x131   :  { %7626 = vmatprep.subr.bf16.mxu1 %v10474_v29  ;;  %v1090_v9 = vrot.slane %v1089_v35, 2  ;;  %v1126_v41 = vrot.slane %v1125_v33, 2  ;;  %v1162_v52 = vrot.slane %v1161_v8, 2  ;;  %v1198_v39 = vrot.slane %v1197_v6, 2 }
 0x132   :  { %7767 = vmatpush1.bf16.msra.mxu0 %v10403_v62  ;;  %v947_v29 = vadd.f32 %v946_v58, %v945_v60  ;;  %v983_v43 = vadd.f32 %v982_v59, %v981_v10  ;;  %v1019_v55 = vadd.f32 %v1018_v23, %v1017_v34  ;;  %v1055_v42 = vadd.f32 %v1054_v25, %v1053_v4  ;;  %v10423_v60 = vld [vmem:[#allocation9 + $0xfc4] ss:$24 sps:$4 sm:$0xff]   ;;  %v10484_v10 = vld [vmem:[#allocation9 + $0x5d0] ss:$24 sps:$4 sm:$0xff]  }
 0x133   :  { %7768 = vmatprep.subr.bf16.mxu0 %v10411_v1  ;;  %v1091_v12 = vadd.f32 %v1090_v9, %v1089_v35  ;;  %v1127_v45 = vadd.f32 %v1126_v41, %v1125_v33  ;;  %v1163_v46 = vadd.f32 %v1162_v52, %v1161_v8  ;;  %v1199_v17 = vadd.f32 %v1198_v39, %v1197_v6  ;;  %v10492_v33 = vld [vmem:[#allocation9 + $0x604] ss:$24 sps:$4 sm:$0xff]  }
 0x134   :  { %7627 = vmatpush1.bf16.msra.mxu1 %v10472_v44  ;;  %v948_v3 = vrot.slane %v947_v29, 1  ;;  %v984_v61 = vrot.slane %v983_v43, 1  ;;  %v1020_v62 = vrot.slane %v1019_v55, 1  ;;  %v1056_v27 = vrot.slane %v1055_v42, 1 }
 0x135   :  { %7628 = vmatprep.subr.bf16.mxu1 %v10480_v31  ;;  %v1092_v44 = vrot.slane %v1091_v12, 1  ;;  %v1128_v31 = vrot.slane %v1127_v45, 1  ;;  %v1164_v34 = vrot.slane %v1163_v46, 1  ;;  %v1200_v59 = vrot.slane %v1199_v17, 1 }
 0x136   :  { %7769 = vmatpush1.bf16.msra.mxu0 %v10409_v53  ;;  %v949_v1 = vadd.f32 %v948_v3, %v947_v29  ;;  %v985_v22 = vadd.f32 %v984_v61, %v983_v43  ;;  %v1021_v4 = vadd.f32 %v1020_v62, %v1019_v55  ;;  %v1057_v35 = vadd.f32 %v1056_v27, %v1055_v42  ;;  %v10421_v53 = vld [vmem:[#allocation9 + $0xfc0] ss:$24 sps:$4 sm:$0xff]  }
 0x137   :  { %7770 = vmatprep.subr.bf16.mxu0 %v10417_v54  ;;  %v1093_v58 = vadd.f32 %v1092_v44, %v1091_v12  ;;  %v1129_v8 = vadd.f32 %v1128_v31, %v1127_v45  ;;  %v1165_v23 = vadd.f32 %v1164_v34, %v1163_v46  ;;  %v1201_v6 = vadd.f32 %v1200_v59, %v1199_v17  ;;  %v10429_v54 = vld [vmem:[#allocation9 + $0xff4] ss:$24 sps:$4 sm:$0xff]   ;;  %v12492_v42 = vld [vmem:[#allocation7 + $0x40] sm:$0xff] }
 0x138   :  { %7629 = vmatpush1.bf16.msra.mxu1 %v10478_v15  ;;  %v12474_v25 = vmul.f32 0.125, %v949_v1  ;;  %v12476_v9 = vmul.f32 0.125, %v985_v22  ;;  %v12478_v15 = vmul.f32 0.125, %v1021_v4  ;;  %v12480_v29 = vmul.f32 0.125, %v1057_v35  ;;  %v12502_v45 = vld [vmem:[#allocation7 + $0x70] sm:$0xff]  ;;  %v12504_v46 = vld [vmem:[#allocation7 + $0xa0] sm:$0xff] }
 0x139   :  { %7630 = vmatprep.subr.bf16.mxu1 %v10486_v51  ;;  %v12482_v43 = vmul.f32 0.125, %v1093_v58  ;;  %v12484_v41 = vmul.f32 0.125, %v1129_v8  ;;  %v12486_v52 = vmul.f32 0.125, %v1165_v23  ;;  %v12494_v12 = vmul.f32 0.125, %v1201_v6  ;;  %v12512_v34 = vld [vmem:[#allocation7 + $0xd0] sm:$0xff]  ;;  %v12514_v4 = vld [vmem:[#allocation7 + $0x100] sm:$0xff] }
 0x13a   :  { %13404 = vst [vmem:[#allocation62_spill] sm:$0xff] %v12474_v25  ;;  %13405 = vst [vmem:[#allocation63_spill] sm:$0xff] %v12476_v9  ;;  %7771 = vmatpush1.bf16.msra.mxu0 %v10415_v7  ;;  %v1745_v51 = vpack.c.bf16 %v12474_v25, %v12474_v25  ;;  %v1751_v55 = vpack.c.bf16 %v12476_v9, %v12476_v9  ;;  %v1757_v39 = vpack.c.bf16 %v12478_v15, %v12478_v15  ;;  %v10427_v7 = vld [vmem:[#allocation9 + $0xff0] ss:$24 sps:$4 sm:$0xff]   ;;  %v12519_v8 = vld [vmem:[#allocation7 + $0x160] sm:$0xff] }
 0x13b   :  { %13406 = vst [vmem:[#allocation64_spill] sm:$0xff] %v12478_v15  ;;  %13407 = vst [vmem:[#allocation65_spill] sm:$0xff] %v12480_v29  ;;  %7772 = vmatprep.subr.bf16.mxu0 %v10423_v60  ;;  %v1763_v3 = vpack.c.bf16 %v12480_v29, %v12480_v29  ;;  %v1769_v61 = vpack.c.bf16 %v12482_v43, %v12482_v43  ;;  %v1775_v62 = vpack.c.bf16 %v12484_v41, %v12484_v41  ;;  %v10435_v60 = vld [vmem:[#allocation9 + $0x1024] ss:$24 sps:$4 sm:$0xff]  }
 0x13c   :  { %13408 = vst [vmem:[#allocation66_spill] sm:$0xff] %v12482_v43  ;;  %7631 = vmatpush1.bf16.msra.mxu1 %v10484_v10  ;;  %13409 = vst [vmem:[#allocation67_spill] sm:$0xff] %v12484_v41  ;;  %v1781_v27 = vpack.c.bf16 %v12486_v52, %v12486_v52  ;;  %v1937_v44 = vunpack.c.l.b16 %v1745_v51  ;;  %v1943_v17 = vunpack.c.l.b16 %v1751_v55  ;;  %v1787_v10 = vpack.c.bf16 %v12494_v12, %v12494_v12 }
 0x13d   :  { %13410 = vst [vmem:[#allocation68_spill] sm:$0xff] %v12486_v52  ;;  %13411 = vst [vmem:[#allocation69_spill] sm:$0xff] %v12494_v12  ;;  %7641 = vmatprep.subr.bf16.mxu1 %v10492_v33  ;;  %v1949_v1 = vunpack.c.l.b16 %v1757_v39  ;;  %v1955_v22 = vunpack.c.l.b16 %v1763_v3  ;;  %v1961_v31 = vunpack.c.l.b16 %v1769_v61  ;;  %v1967_v35 = vunpack.c.l.b16 %v1775_v62  ;;  %v12517_v33 = vld [vmem:[#allocation7 + $0x130] sm:$0xff]  ;;  %v12525_v3 = vld [vmem:[#allocation7 + $0x28] sm:$0xff] }
 0x13e   :  { %7773 = vmatpush1.bf16.msra.mxu0 %v10421_v53  ;;  %v1973_v58 = vunpack.c.l.b16 %v1781_v27  ;;  %v2010_v59 = vsel %vm1982_vm0, %v1943_v17, %v1937_v44  ;;  %v448_v23 = vunpack.c.h.bf16 %v12468_v21  ;;  %v1979_v6 = vunpack.c.l.b16 %v1787_v10  ;;  %v12527_v53 = vld [vmem:[#allocation7 + $0x58] sm:$0xff]  ;;  %v12533_v17 = vld [vmem:[#allocation7 + $0x88] sm:$0xff] }
 0x13f   :  { %7774 = vmatprep.subr.bf16.mxu0 %v10429_v54  ;;  %v2011_v51 = vsel %vm1984_vm1, %v1949_v1, %v2010_v59  ;;  %v454_v39 = vunpack.c.h.bf16 %v12492_v42  ;;  %v10433_v61 = vld [vmem:[#allocation9 + $0x1020] ss:$24 sps:$4 sm:$0xff]   ;;  %v460_v44 = vunpack.c.h.bf16 %v12502_v45  ;;  %v10441_v10 = vld [vmem:[#allocation9 + $0x1054] ss:$24 sps:$4 sm:$0xff]   ;;  %v466_v59 = vunpack.c.h.bf16 %v12504_v46 }
 0x140   :  { %v2012_v62 = vsel %vm1986_vm2, %v1955_v22, %v2011_v51  ;;  %v472_v2 = vunpack.c.h.bf16 %v12512_v34  ;;  %v12541_v22 = vld [vmem:[#allocation7 + $0xe8] sm:$0xff]  ;;  %v478_v16 = vunpack.c.h.bf16 %v12514_v4  ;;  %v484_v27 = vunpack.c.h.bf16 %v12517_v33 }
 0x141   :  { %v2013_v1 = vsel %vm1988_vm3, %v1961_v31, %v2012_v62  ;;  %v12547_v31 = vld [vmem:[#allocation7 + $0x118] sm:$0xff]  ;;  %v12549_v62 = vld [vmem:[#allocation7 + $0x148] sm:$0xff]  ;;  %v688_v37 = vunpack.c.h.bf16 %v12525_v3  ;;  %v700_v55 = vunpack.c.h.bf16 %v12533_v17  ;;  %v712_v54 = vunpack.c.h.bf16 %v12541_v22 }
 0x142   :  { %7775 = vmatpush1.bf16.msra.mxu0 %v10427_v7  ;;  %v2014_v51 = vsel %vm1990_vm4, %v1967_v35, %v2013_v1  ;;  %v490_v7 = vunpack.c.h.bf16 %v12519_v8  ;;  %v12555_v35 = vld [vmem:[#allocation7 + $0x178] sm:$0xff]  ;;  %v10439_v1 = vld [vmem:[#allocation9 + $0x1050] ss:$24 sps:$4 sm:$0xff]   ;;  %v718_v49 = vunpack.c.h.bf16 %v12547_v31  ;;  %v724_v19 = vunpack.c.h.bf16 %v12549_v62 }
 0x143   :  { %7776 = vmatprep.subr.bf16.mxu0 %v10435_v60  ;;  %v2015_v36 = vsel %vm1992_vm5, %v1973_v58, %v2014_v51  ;;  %v10447_v60 = vld [vmem:[#allocation9 + $0x1084] ss:$24 sps:$4 sm:$0xff]   ;;  %v694_v58 = vunpack.c.h.bf16 %v12527_v53  ;;  %v730_v48 = vunpack.c.h.bf16 %v12555_v35  ;;  %v736_v5 = vadd.f32 %v688_v37, %v448_v23 }
 0x144   :  { %v2016_v28 = vsel %vm1994_vm6, %v1979_v6, %v2015_v36  ;;  %v706_v36 = vunpack.c.h.bf16 %v12539_v11  ;;  %v748_v32 = vadd.f32 %v700_v55, %v460_v44  ;;  %v760_v26 = vadd.f32 %v712_v54, %v472_v2 }
 0x145   :  { %v12561_v47 = vpack.c.b16 %v2016_v28, %v2016_v28  ;;  %v742_v6 = vadd.f32 %v694_v58, %v454_v39  ;;  %v772_v28 = vadd.f32 %v724_v19, %v484_v27  ;;  %v778_v12 = vadd.f32 %v730_v48, %v490_v7  ;;  %v10459_v39 = vld [vmem:[#allocation9 + $0x10e4] ss:$24 sps:$4 sm:$0xff]  }
 0x146   :  { %7777 = vmatpush1.bf16.msra.mxu0 %v10433_v61  ;;  %v10445_v61 = vld [vmem:[#allocation9 + $0x1080] ss:$24 sps:$4 sm:$0xff]   ;;  %v1340_v52 = vrot.slane %v736_v5, 4  ;;  %v1412_v51 = vrot.slane %v748_v32, 4  ;;  %v1484_v29 = vrot.slane %v760_v26, 4 }
 0x147   :  { %13412 = vst [vmem:[#allocation70_spill] sm:$0xff] %v12561_v47  ;;  %7778 = vmatprep.subr.bf16.mxu0 %v10441_v10  ;;  %7632 = vmatprep.mubr.bf16.mxu1 %v12561_v47  ;;  %v754_v10 = vadd.f32 %v706_v36, %v466_v59  ;;  %v766_v47 = vadd.f32 %v718_v49, %v478_v16  ;;  %v1376_v41 = vrot.slane %v742_v6, 4  ;;  %v1556_v37 = vrot.slane %v772_v28, 4  ;;  %v10465_v36 = vld [vmem:[#allocation9 + $0x1114] ss:$24 sps:$4 sm:$0xff]  }
 0x148   :  { %v1341_v9 = vadd.f32 %v1340_v52, %v736_v5  ;;  %v1592_v23 = vrot.slane %v778_v12, 4  ;;  %v1413_v55 = vadd.f32 %v1412_v51, %v748_v32  ;;  %v1485_v2 = vadd.f32 %v1484_v29, %v760_v26 }
 0x149   :  { %v1448_v43 = vrot.slane %v754_v10, 4  ;;  %v1520_v15 = vrot.slane %v766_v47, 4  ;;  %v1377_v25 = vadd.f32 %v1376_v41, %v742_v6  ;;  %v1557_v49 = vadd.f32 %v1556_v37, %v772_v28 }
 0x14a   :  { %7779 = vmatpush1.bf16.msra.mxu0 %v10439_v1  ;;  %v1342_v19 = vrot.slane %v1341_v9, 2  ;;  %v1593_v27 = vadd.f32 %v1592_v23, %v778_v12  ;;  %v1414_v54 = vrot.slane %v1413_v55, 2  ;;  %v1486_v7 = vrot.slane %v1485_v2, 2 }
 0x14b   :  { %7780 = vmatprep.subr.bf16.mxu0 %v10447_v60  ;;  %v1449_v44 = vadd.f32 %v1448_v43, %v754_v10  ;;  %v1521_v16 = vadd.f32 %v1520_v15, %v766_v47  ;;  %v1378_v48 = vrot.slane %v1377_v25, 2  ;;  %v10457_v60 = vld [vmem:[#allocation9 + $0x10e0] ss:$24 sps:$4 sm:$0xff]   ;;  %v1558_v52 = vrot.slane %v1557_v49, 2  ;;  %v10463_v10 = vld [vmem:[#allocation9 + $0x1110] ss:$24 sps:$4 sm:$0xff]  }
 0x14c   :  { %v1343_v5 = vadd.f32 %v1342_v19, %v1341_v9  ;;  %v1594_v58 = vrot.slane %v1593_v27, 2  ;;  %v1415_v32 = vadd.f32 %v1414_v54, %v1413_v55  ;;  %v1487_v26 = vadd.f32 %v1486_v7, %v1485_v2  ;;  %v10471_v19 = vld [vmem:[#allocation9 + $0x1144] ss:$24 sps:$4 sm:$0xff]  }
 0x14d   :  { %v1450_v59 = vrot.slane %v1449_v44, 2  ;;  %v1522_v1 = vrot.slane %v1521_v16, 2  ;;  %v1379_v41 = vadd.f32 %v1378_v48, %v1377_v25  ;;  %v1559_v51 = vadd.f32 %v1558_v52, %v1557_v49 }
 0x14e   :  { %7781 = vmatpush1.bf16.msra.mxu0 %v10445_v61  ;;  %v1344_v15 = vrot.slane %v1343_v5, 1  ;;  %v1595_v12 = vadd.f32 %v1594_v58, %v1593_v27  ;;  %v1488_v28 = vrot.slane %v1487_v26, 1  ;;  %v10477_v58 = vld [vmem:[#allocation9 + $0x1174] ss:$24 sps:$4 sm:$0xff]  }
 0x14f   :  { %7782 = vmatprep.subr.bf16.mxu0 %v10453_v40  ;;  %v1451_v43 = vadd.f32 %v1450_v59, %v1449_v44  ;;  %v1523_v47 = vadd.f32 %v1522_v1, %v1521_v16  ;;  %v1380_v29 = vrot.slane %v1379_v41, 1  ;;  %v1416_v40 = vrot.slane %v1415_v32, 1  ;;  %v10469_v1 = vld [vmem:[#allocation9 + $0x1140] ss:$24 sps:$4 sm:$0xff]  }
 0x150   :  { %v1345_v9 = vadd.f32 %v1344_v15, %v1343_v5  ;;  %v1560_v37 = vrot.slane %v1559_v51, 1  ;;  %v1596_v23 = vrot.slane %v1595_v12, 1  ;;  %v1489_v2 = vadd.f32 %v1488_v28, %v1487_v26 }
 0x151   :  { %v1452_v6 = vrot.slane %v1451_v43, 1  ;;  %v1524_v61 = vrot.slane %v1523_v47, 1  ;;  %v1381_v25 = vadd.f32 %v1380_v29, %v1379_v41  ;;  %v1417_v55 = vadd.f32 %v1416_v40, %v1415_v32 }
 0x152   :  { %7783 = vmatpush1.bf16.msra.mxu0 %v10451_v0  ;;  %v1561_v0 = vadd.f32 %v1560_v37, %v1559_v51  ;;  %v1597_v48 = vadd.f32 %v1596_v23, %v1595_v12  ;;  %v12577_v49 = vmul.f32 0.125, %v1345_v9  ;;  %v12585_v59 = vmul.f32 0.125, %v1489_v2  ;;  %v10483_v23 = vld [vmem:[#allocation9 + $0x11a4] ss:$24 sps:$4 sm:$0xff]  }
 0x153   :  { %7784 = vmatprep.subr.bf16.mxu0 %v10459_v39  ;;  %v1453_v44 = vadd.f32 %v1452_v6, %v1451_v43  ;;  %v1525_v16 = vadd.f32 %v1524_v61, %v1523_v47  ;;  %v12579_v39 = vmul.f32 0.125, %v1381_v25  ;;  %v12581_v27 = vmul.f32 0.125, %v1417_v55  ;;  %v10475_v61 = vld [vmem:[#allocation9 + $0x1170] ss:$24 sps:$4 sm:$0xff]  }
 0x154   :  { %13413 = vst [vmem:[#allocation71_spill] sm:$0xff] %v12577_v49  ;;  %13417 = vst [vmem:[#allocation75_spill] sm:$0xff] %v12585_v59  ;;  %v12589_v5 = vmul.f32 0.125, %v1561_v0  ;;  %v12591_v41 = vmul.f32 0.125, %v1597_v48  ;;  %v1819_v43 = vpack.c.bf16 %v12585_v59, %v12585_v59  ;;  %v1762_v2 = vpack.c.bf16 %v12371_v13, %v12371_v13 }
 0x155   :  { %13414 = vst [vmem:[#allocation72_spill] sm:$0xff] %v12579_v39  ;;  %13415 = vst [vmem:[#allocation73_spill] sm:$0xff] %v12581_v27  ;;  %v12583_v54 = vmul.f32 0.125, %v1453_v44  ;;  %v12587_v7 = vmul.f32 0.125, %v1525_v16  ;;  %v1801_v52 = vpack.c.bf16 %v12579_v39, %v12579_v39  ;;  %v1750_v44 = vpack.c.bf16 %v12367_v30, %v12367_v30 }
 0x156   :  { %7785 = vmatpush1.bf16.msra.mxu0 %v10457_v60  ;;  %13419 = vst [vmem:[#allocation77_spill] sm:$0xff] %v12589_v5  ;;  %13420 = vst [vmem:[#allocation78_spill] sm:$0xff] %v12591_v41  ;;  %v1795_v60 = vpack.c.bf16 %v12577_v49, %v12577_v49  ;;  %v1831_v47 = vpack.c.bf16 %v12589_v5, %v12589_v5  ;;  %v1837_v15 = vpack.c.bf16 %v12591_v41, %v12591_v41 }
 0x157   :  { %7786 = vmatprep.subr.bf16.mxu0 %v10465_v36  ;;  %13416 = vst [vmem:[#allocation74_spill] sm:$0xff] %v12583_v54  ;;  %13418 = vst [vmem:[#allocation76_spill] sm:$0xff] %v12587_v7  ;;  %v1807_v36 = vpack.c.bf16 %v12581_v27, %v12581_v27  ;;  %v1813_v32 = vpack.c.bf16 %v12583_v54, %v12583_v54  ;;  %v1825_v26 = vpack.c.bf16 %v12587_v7, %v12587_v7  ;;  %v10534_v7 = vld [vmem:[#allocation9 + $0x754] ss:$24 sps:$4 sm:$0xff]  }
 0x158   :  { %v2096_v29 = vunpack.c.l.b16 %v1795_v60  ;;  %v2102_v51 = vunpack.c.l.b16 %v1801_v52  ;;  %v2120_v6 = vunpack.c.l.b16 %v1819_v43  ;;  %v2132_v9 = vunpack.c.l.b16 %v1831_v47 }
 0x159   :  { %v2108_v12 = vunpack.c.l.b16 %v1807_v36  ;;  %v2114_v40 = vunpack.c.l.b16 %v1813_v32  ;;  %v2126_v28 = vunpack.c.l.b16 %v1825_v26  ;;  %v2138_v25 = vunpack.c.l.b16 %v1837_v15 }
 0x15a   :  { %7787 = vmatpush1.bf16.msra.mxu0 %v10463_v10  ;;  %v2174_v37 = vsel %vm1982_vm0, %v2102_v51, %v2096_v29  ;;  %v1744_v10 = vpack.c.bf16 %v12365_v38, %v12365_v38  ;;  %v1768_v0 = vpack.c.bf16 %v12373_v50, %v12373_v50  ;;  %v1774_v48 = vpack.c.bf16 %v12375_v57, %v12375_v57  ;;  %v10489_v51 = vld [vmem:[#allocation9 + $0x11d4] ss:$24 sps:$4 sm:$0xff]  }
 0x15b   :  { %7788 = vmatprep.subr.bf16.mxu0 %v10471_v19  ;;  %v2175_v55 = vsel %vm1984_vm1, %v2108_v12, %v2174_v37  ;;  %v1756_v19 = vpack.c.bf16 %v12369_v18, %v12369_v18  ;;  %v1780_v60 = vpack.c.bf16 %v12377_v56, %v12377_v56  ;;  %v1786_v36 = vpack.c.bf16 %v12379_v14, %v12379_v14 }
 0x15c   :  { %v2176_v16 = vsel %vm1986_vm2, %v2114_v40, %v2175_v55  ;;  %v1936_v32 = vunpack.c.l.b16 %v1744_v10  ;;  %v1942_v43 = vunpack.c.l.b16 %v1750_v44  ;;  %v1954_v15 = vunpack.c.l.b16 %v1762_v2 }
 0x15d   :  { %v2177_v52 = vsel %vm1988_vm3, %v2120_v6, %v2176_v16  ;;  %v1948_v47 = vunpack.c.l.b16 %v1756_v19  ;;  %v1960_v29 = vunpack.c.l.b16 %v1768_v0  ;;  %v1966_v40 = vunpack.c.l.b16 %v1774_v48 }
 0x15e   :  { %7789 = vmatpush1.bf16.msra.mxu0 %v10469_v1  ;;  %v10481_v1 = vld [vmem:[#allocation9 + $0x11a0] ss:$24 sps:$4 sm:$0xff]   ;;  %v2178_v26 = vsel %vm1990_vm4, %v2126_v28, %v2177_v52  ;;  %v1972_v37 = vunpack.c.l.b16 %v1780_v60  ;;  %v1978_v55 = vunpack.c.l.b16 %v1786_v36  ;;  %v2003_v6 = vsel %vm1982_vm0, %v1942_v43, %v1936_v32  ;;  %v10487_v52 = vld [vmem:[#allocation9 + $0x11d0] ss:$24 sps:$4 sm:$0xff]  }
 0x15f   :  { %7790 = vmatprep.subr.bf16.mxu0 %v10477_v58  ;;  %v2179_v12 = vsel %vm1992_vm5, %v2132_v9, %v2178_v26  ;;  %v13421_v10 = vunpack.c.l.bf16 %v12468_v21  ;;  %v13422_v44 = vunpack.c.l.bf16 %v12525_v3  ;;  %v13423_v28 = vunpack.c.l.bf16 %v12492_v42 }
 0x160   :  { %v2180_v58 = vsel %vm1994_vm6, %v2138_v25, %v2179_v12  ;;  %v13424_v19 = vunpack.c.l.bf16 %v12527_v53  ;;  %v2004_v0 = vsel %vm1984_vm1, %v1948_v47, %v2003_v6  ;;  %v13427_v25 = vunpack.c.l.bf16 %v12533_v17 }
 0x161   :  { %v735_v16 = vadd.f32 %v13422_v44, %v13421_v10  ;;  %v12641_v9 = vpack.c.b16 %v2180_v58, %v2180_v58  ;;  %v13428_v21 = vunpack.c.l.bf16 %v12504_v46  ;;  %v13429_v3 = vunpack.c.l.bf16 %v12539_v11  ;;  %v10495_v11 = vld [vmem:[#allocation9 + $0x1204] ss:$24 sps:$4 sm:$0xff]  }
 0x162   :  { %7791 = vmatpush1.bf16.msra.mxu0 %v10475_v61  ;;  %v741_v2 = vadd.f32 %v13424_v19, %v13423_v28  ;;  %v13426_v61 = vunpack.c.l.bf16 %v12502_v45  ;;  %v2005_v42 = vsel %vm1986_vm2, %v1954_v15, %v2004_v0  ;;  %v13430_v53 = vunpack.c.l.bf16 %v12512_v34 }
 0x163   :  { %7792 = vmatprep.subr.bf16.mxu0 %v10483_v23  ;;  %13425 = vst [vmem:[#allocation79_spill] sm:$0xff] %v12641_v9  ;;  %v753_v60 = vadd.f32 %v13429_v3, %v13428_v21  ;;  %v13431_v23 = vunpack.c.l.bf16 %v12541_v22  ;;  %v13432_v32 = vunpack.c.l.bf16 %v12514_v4  ;;  %v13433_v45 = vunpack.c.l.bf16 %v12547_v31  ;;  %7796 = vmatprep.mubr.bf16.mxu0 %v12641_v9  ;;  %v10498_v21 = vld [vmem:[#allocation9 + $0x634] ss:$24 sps:$4 sm:$0xff]  }
 0x164   :  { %v747_v48 = vadd.f32 %v13427_v25, %v13426_v61  ;;  %v13434_v17 = vunpack.c.l.bf16 %v12517_v33  ;;  %v13435_v46 = vunpack.c.l.bf16 %v12549_v62  ;;  %v2006_v47 = vsel %vm1988_vm3, %v1960_v29, %v2005_v42  ;;  %v10490_v29 = vld [vmem:[#allocation9 + $0x600] ss:$24 sps:$4 sm:$0xff]  }
 0x165   :  { %v759_v36 = vadd.f32 %v13431_v23, %v13430_v53  ;;  %v765_v43 = vadd.f32 %v13433_v45, %v13432_v32  ;;  %v13436_v34 = vunpack.c.l.bf16 %v12519_v8  ;;  %v13437_v22 = vunpack.c.l.bf16 %v12555_v35  ;;  %v10496_v32 = vld [vmem:[#allocation9 + $0x630] ss:$24 sps:$4 sm:$0xff]  }
 0x166   :  { %v771_v26 = vadd.f32 %v13435_v46, %v13434_v17  ;;  %v1334_v12 = vrot.slane %v735_v16, 4  ;;  %v1370_v4 = vrot.slane %v741_v2, 4  ;;  %7793 = vmatpush1.bf16.msra.mxu0 %v10481_v1  ;;  %v2007_v31 = vsel %vm1990_vm4, %v1966_v40, %v2006_v47  ;;  %v10504_v46 = vld [vmem:[#allocation9 + $0x664] ss:$24 sps:$4 sm:$0xff]  }
 0x167   :  { %v777_v15 = vadd.f32 %v13437_v22, %v13436_v34  ;;  %v1406_v58 = vrot.slane %v747_v48, 4  ;;  %v1442_v33 = vrot.slane %v753_v60, 4  ;;  %v1478_v6 = vrot.slane %v759_v36, 4  ;;  %7794 = vmatprep.subr.bf16.mxu0 %v10489_v51 }
 0x168   :  { %v2008_v62 = vsel %vm1992_vm5, %v1972_v37, %v2007_v31  ;;  %v1335_v10 = vadd.f32 %v1334_v12, %v735_v16  ;;  %v1371_v44 = vadd.f32 %v1370_v4, %v741_v2  ;;  %v1514_v28 = vrot.slane %v765_v43, 4 }
 0x169   :  { %v2009_v8 = vsel %vm1994_vm6, %v1978_v55, %v2008_v62  ;;  %v1407_v19 = vadd.f32 %v1406_v58, %v747_v48  ;;  %v1443_v35 = vadd.f32 %v1442_v33, %v753_v60  ;;  %v1479_v0 = vadd.f32 %v1478_v6, %v759_v36 }
 0x16a   :  { %v12674_v61 = vpack.c.b16 %v2009_v8, %v2009_v8  ;;  %v1336_v1 = vrot.slane %v1335_v10, 2  ;;  %v1372_v25 = vrot.slane %v1371_v44, 2  ;;  %v1515_v40 = vadd.f32 %v1514_v28, %v765_v43  ;;  %7795 = vmatpush1.bf16.msra.mxu0 %v10487_v52  ;;  %v10510_v8 = vld [vmem:[#allocation9 + $0x694] ss:$24 sps:$4 sm:$0xff]  }
 0x16b   :  { %v1408_v3 = vrot.slane %v1407_v19, 2  ;;  %v1444_v51 = vrot.slane %v1443_v35, 2  ;;  %v1480_v42 = vrot.slane %v1479_v0, 2  ;;  %v1550_v37 = vrot.slane %v771_v26, 4  ;;  %7805 = vmatprep.subr.bf16.mxu0 %v10495_v11 }
 0x16c   :  { %13438 = vst [vmem:[#allocation80_spill] sm:$0xff] %v12674_v61  ;;  %7633 = vmatmul.mubr.bf16.vlgmr.msra.gmra.mrb[0].mxu1 %v12674_v61  ;;  %v1337_v16 = vadd.f32 %v1336_v1, %v1335_v10  ;;  %v1373_v2 = vadd.f32 %v1372_v25, %v1371_v44  ;;  %v1516_v55 = vrot.slane %v1515_v40, 2  ;;  %v1586_v48 = vrot.slane %v777_v15, 4  ;;  %v10508_v25 = vld [vmem:[#allocation9 + $0x690] ss:$24 sps:$4 sm:$0xff]  }
 0x16d   :  { %7642 = vmatpush1.bf16.msra.mxu1 %v10490_v29  ;;  %v1409_v60 = vadd.f32 %v1408_v3, %v1407_v19  ;;  %v1445_v53 = vadd.f32 %v1444_v51, %v1443_v35  ;;  %v1481_v23 = vadd.f32 %v1480_v42, %v1479_v0  ;;  %v1551_v36 = vadd.f32 %v1550_v37, %v771_v26  ;;  %v10502_v26 = vld [vmem:[#allocation9 + $0x660] ss:$24 sps:$4 sm:$0xff]   ;;  %v10516_v42 = vld [vmem:[#allocation9 + $0x6c4] ss:$24 sps:$4 sm:$0xff]  }
 0x16e   :  { %v1338_v45 = vrot.slane %v1337_v16, 1  ;;  %v1374_v43 = vrot.slane %v1373_v2, 1  ;;  %v1517_v52 = vadd.f32 %v1516_v55, %v1515_v40  ;;  %v1587_v17 = vadd.f32 %v1586_v48, %v777_v15  ;;  %7643 = vmatprep.subr.bf16.mxu1 %v10498_v21  ;;  %v12699_v48 = vld [vmem:[#allocation4 + $0x10] sm:$0xff] }
 0x16f   :  { %v1410_v47 = vrot.slane %v1409_v60, 1  ;;  %v1446_v11 = vrot.slane %v1445_v53, 1  ;;  %v1482_v34 = vrot.slane %v1481_v23, 1  ;;  %v1552_v22 = vrot.slane %v1551_v36, 2 }
 0x170   :  { %v1339_v12 = vadd.f32 %v1338_v45, %v1337_v16  ;;  %v1375_v4 = vadd.f32 %v1374_v43, %v1373_v2  ;;  %v1518_v31 = vrot.slane %v1517_v52, 1  ;;  %v1588_v58 = vrot.slane %v1587_v17, 2  ;;  %v12707_v43 = vld [vmem:[#allocation4 + $0xa0] sm:$0xff] }
 0x171   :  { %v1411_v33 = vadd.f32 %v1410_v47, %v1409_v60  ;;  %v1447_v6 = vadd.f32 %v1446_v11, %v1445_v53  ;;  %v1483_v62 = vadd.f32 %v1482_v34, %v1481_v23  ;;  %v1553_v10 = vadd.f32 %v1552_v22, %v1551_v36  ;;  %7644 = vmatpush1.bf16.msra.mxu1 %v10496_v32  ;;  %v12701_v60 = vld [vmem:[#allocation4 + $0x40] sm:$0xff]  ;;  %v12703_v53 = vld [vmem:[#allocation4 + $0x70] sm:$0xff] }
 0x172   :  { %v1519_v44 = vadd.f32 %v1518_v31, %v1517_v52  ;;  %v1589_v28 = vadd.f32 %v1588_v58, %v1587_v17  ;;  %v12677_v29 = vmul.f32 0.125, %v1339_v12  ;;  %v12679_v15 = vmul.f32 0.125, %v1375_v4  ;;  %7645 = vmatprep.subr.bf16.mxu1 %v10504_v46  ;;  %v10514_v11 = vld [vmem:[#allocation9 + $0x6c0] ss:$24 sps:$4 sm:$0xff]   ;;  %v10522_v4 = vld [vmem:[#allocation9 + $0x6f4] ss:$24 sps:$4 sm:$0xff]  }
 0x173   :  { %v1554_v19 = vrot.slane %v1553_v10, 1  ;;  %v12681_v35 = vmul.f32 0.125, %v1411_v33  ;;  %v12683_v0 = vmul.f32 0.125, %v1447_v6  ;;  %v12685_v1 = vmul.f32 0.125, %v1483_v62  ;;  %v12718_v6 = vld [vmem:[#allocation4 + $0xd0] sm:$0xff]  ;;  %v12720_v62 = vld [vmem:[#allocation4 + $0x100] sm:$0xff] }
 0x174   :  { %13439 = vst [vmem:[#allocation81_spill] sm:$0xff] %v12677_v29  ;;  %13440 = vst [vmem:[#allocation82_spill] sm:$0xff] %v12679_v15  ;;  %v1590_v40 = vrot.slane %v1589_v28, 1  ;;  %v12687_v21 = vmul.f32 0.125, %v1519_v44  ;;  %v1794_v3 = vpack.c.bf16 %v12677_v29, %v12677_v29  ;;  %v1800_v51 = vpack.c.bf16 %v12679_v15, %v12679_v15  ;;  %v10507_v44 = vld [vmem:[#allocation9 + $0x1264] ss:$24 sps:$4 sm:$0xff]  }
 0x175   :  { %13441 = vst [vmem:[#allocation83_spill] sm:$0xff] %v12681_v35  ;;  %13442 = vst [vmem:[#allocation84_spill] sm:$0xff] %v12683_v0  ;;  %v1555_v37 = vadd.f32 %v1554_v19, %v1553_v10  ;;  %v1806_v16 = vpack.c.bf16 %v12681_v35, %v12681_v35  ;;  %v1812_v2 = vpack.c.bf16 %v12683_v0, %v12683_v0  ;;  %7646 = vmatpush1.bf16.msra.mxu1 %v10502_v26  ;;  %v12722_v10 = vld [vmem:[#allocation4 + $0x130] sm:$0xff]  ;;  %v12729_v19 = vld [vmem:[#allocation4 + $0x160] sm:$0xff] }
 0x176   :  { %13443 = vst [vmem:[#allocation85_spill] sm:$0xff] %v12685_v1  ;;  %13444 = vst [vmem:[#allocation86_spill] sm:$0xff] %v12687_v21  ;;  %v1818_v55 = vpack.c.bf16 %v12685_v1, %v12685_v1  ;;  %v1591_v23 = vadd.f32 %v1590_v40, %v1589_v28  ;;  %v1824_v36 = vpack.c.bf16 %v12687_v21, %v12687_v21  ;;  %v2095_v32 = vunpack.c.l.b16 %v1794_v3  ;;  %v12733_v3 = vld [vmem:[#allocation4 + $0x28] sm:$0xff] }
 0x177   :  { %v2101_v45 = vunpack.c.l.b16 %v1800_v51  ;;  %7647 = vmatprep.subr.bf16.mxu1 %v10510_v8  ;;  %v12709_v52 = vmul.f32 0.125, %v1555_v37  ;;  %v2107_v17 = vunpack.c.l.b16 %v1806_v16  ;;  %v2113_v46 = vunpack.c.l.b16 %v1812_v2  ;;  %v10520_v16 = vld [vmem:[#allocation9 + $0x6f0] ss:$24 sps:$4 sm:$0xff]  }
 0x178   :  { %v2119_v47 = vunpack.c.l.b16 %v1818_v55  ;;  %v12711_v34 = vmul.f32 0.125, %v1591_v23  ;;  %v2125_v22 = vunpack.c.l.b16 %v1824_v36  ;;  %v340_v2 = vunpack.c.h.bf16 %v12703_v53  ;;  %v12738_v23 = vld [vmem:[#allocation4 + $0x58] sm:$0xff]  ;;  %v12740_v36 = vld [vmem:[#allocation4 + $0x88] sm:$0xff] }
 0x179   :  { %13445 = vst [vmem:[#allocation87_spill] sm:$0xff] %v12709_v52  ;;  %v2167_v12 = vsel %vm1982_vm0, %v2101_v45, %v2095_v32  ;;  %v1830_v58 = vpack.c.bf16 %v12709_v52, %v12709_v52  ;;  %7648 = vmatpush1.bf16.msra.mxu1 %v10508_v25  ;;  %v334_v25 = vunpack.c.h.bf16 %v12701_v60  ;;  %v358_v40 = vunpack.c.h.bf16 %v12720_v62  ;;  %v10532_v15 = vld [vmem:[#allocation9 + $0x750] ss:$24 sps:$4 sm:$0xff]  }
 0x17a   :  { %13446 = vst [vmem:[#allocation88_spill] sm:$0xff] %v12711_v34  ;;  %v2168_v33 = vsel %vm1984_vm1, %v2107_v17, %v2167_v12  ;;  %v1836_v28 = vpack.c.bf16 %v12711_v34, %v12711_v34  ;;  %7649 = vmatprep.subr.bf16.mxu1 %v10516_v42  ;;  %v10493_v42 = vld [vmem:[#allocation9 + $0x1200] ss:$24 sps:$4 sm:$0xff]   ;;  %v10528_v17 = vld [vmem:[#allocation9 + $0x724] ss:$24 sps:$4 sm:$0xff]   ;;  %v370_v31 = vunpack.c.h.bf16 %v12729_v19  ;;  %v568_v9 = vunpack.c.h.bf16 %v12733_v3 }
 0x17b   :  { %v2169_v8 = vsel %vm1986_vm2, %v2113_v46, %v2168_v33  ;;  %v2131_v51 = vunpack.c.l.b16 %v1830_v58  ;;  %v346_v46 = vunpack.c.h.bf16 %v12707_v43  ;;  %v12745_v58 = vld [vmem:[#allocation4 + $0xb8] sm:$0xff]  ;;  %v10501_v33 = vld [vmem:[#allocation9 + $0x1234] ss:$24 sps:$4 sm:$0xff]   ;;  %v13448_v5 = vunpack.c.h.bf16 %v12699_v48 }
 0x17c   :  { %v2170_v37 = vsel %vm1988_vm3, %v2119_v47, %v2169_v8  ;;  %v2137_v32 = vunpack.c.l.b16 %v1836_v28  ;;  %v352_v8 = vunpack.c.h.bf16 %v12718_v6  ;;  %v12751_v28 = vld [vmem:[#allocation4 + $0xe8] sm:$0xff]  ;;  %v586_v26 = vunpack.c.h.bf16 %v12745_v58 }
 0x17d   :  { %v2171_v45 = vsel %vm1990_vm4, %v2125_v22, %v2170_v37  ;;  %7650 = vmatpush1.bf16.msra.mxu1 %v10514_v11  ;;  %v12753_v22 = vld [vmem:[#allocation4 + $0x118] sm:$0xff]  ;;  %v12755_v37 = vld [vmem:[#allocation4 + $0x148] sm:$0xff]  ;;  %v592_v61 = vunpack.c.h.bf16 %v12751_v28  ;;  %v616_v21 = vadd.f32 %v568_v9, %v13448_v5 }
 0x17e   :  { %v2172_v47 = vsel %vm1992_vm5, %v2131_v51, %v2171_v45  ;;  %7651 = vmatprep.subr.bf16.mxu1 %v10522_v4  ;;  %v364_v51 = vunpack.c.h.bf16 %v12722_v10  ;;  %v12761_v45 = vld [vmem:[#allocation4 + $0x178] sm:$0xff]  ;;  %v574_v4 = vunpack.c.h.bf16 %v12738_v23  ;;  %v10499_v11 = vld [vmem:[#allocation9 + $0x1230] ss:$24 sps:$4 sm:$0xff]   ;;  %v598_v34 = vunpack.c.h.bf16 %v12753_v22  ;;  %v10513_v5 = vld [vmem:[#allocation9 + $0x1294] ss:$24 sps:$4 sm:$0xff]  }
 0x17f   :  { %v2173_v12 = vsel %vm1994_vm6, %v2137_v32, %v2172_v47  ;;  %v580_v47 = vunpack.c.h.bf16 %v12740_v36  ;;  %v610_v52 = vunpack.c.h.bf16 %v12761_v45  ;;  %v640_v0 = vadd.f32 %v592_v61, %v352_v8  ;;  %v10505_v32 = vld [vmem:[#allocation9 + $0x1260] ss:$24 sps:$4 sm:$0xff]  }
 0x180   :  { %v12763_v55 = vpack.c.b16 %v2173_v12, %v2173_v12  ;;  %v10526_v12 = vld [vmem:[#allocation9 + $0x720] ss:$24 sps:$4 sm:$0xff]   ;;  %v622_v1 = vadd.f32 %v574_v4, %v334_v25  ;;  %v646_v35 = vadd.f32 %v598_v34, %v358_v40  ;;  %v956_v59 = vrot.slane %v616_v21, 4  ;;  %v10546_v4 = vld [vmem:[#allocation9 + $0x7b4] ss:$24 sps:$4 sm:$0xff]  }
 0x181   :  { %7652 = vmatpush1.bf16.msra.mxu1 %v10520_v16  ;;  %v604_v16 = vunpack.c.h.bf16 %v12755_v37  ;;  %v1100_v39 = vrot.slane %v640_v0, 4 }
 0x182   :  { %13447 = vst [vmem:[#allocation89_spill] sm:$0xff] %v12763_v55  ;;  %7797 = vmatmul.mubr.bf16.vlgmr.msra.gmra.mrb[0].mxu0 %v12763_v55  ;;  %7653 = vmatprep.subr.bf16.mxu1 %v10528_v17  ;;  %v634_v17 = vadd.f32 %v586_v26, %v346_v46  ;;  %v658_v55 = vadd.f32 %v610_v52, %v370_v31  ;;  %v992_v54 = vrot.slane %v622_v1, 4  ;;  %v1136_v49 = vrot.slane %v646_v35, 4  ;;  %v10511_v52 = vld [vmem:[#allocation9 + $0x1290] ss:$24 sps:$4 sm:$0xff]  }
 0x183   :  { %7806 = vmatpush1.bf16.msra.mxu0 %v10493_v42  ;;  %v628_v42 = vadd.f32 %v580_v47, %v340_v2  ;;  %v652_v29 = vadd.f32 %v604_v16, %v364_v51  ;;  %v957_v9 = vadd.f32 %v956_v59, %v616_v21  ;;  %v1101_v2 = vadd.f32 %v1100_v39, %v640_v0  ;;  %v10538_v31 = vld [vmem:[#allocation9 + $0x780] ss:$24 sps:$4 sm:$0xff]  }
 0x184   :  { %7807 = vmatprep.subr.bf16.mxu0 %v10501_v33  ;;  %v10540_v33 = vld [vmem:[#allocation9 + $0x784] ss:$24 sps:$4 sm:$0xff]   ;;  %v1064_v27 = vrot.slane %v634_v17, 4  ;;  %v993_v26 = vadd.f32 %v992_v54, %v622_v1  ;;  %v1208_v34 = vrot.slane %v658_v55, 4  ;;  %v1137_v46 = vadd.f32 %v1136_v49, %v646_v35 }
 0x185   :  { %7654 = vmatpush1.bf16.msra.mxu1 %v10526_v12  ;;  %v1028_v41 = vrot.slane %v628_v42, 4  ;;  %v1172_v61 = vrot.slane %v652_v29, 4  ;;  %v958_v8 = vrot.slane %v957_v9, 2  ;;  %v1102_v59 = vrot.slane %v1101_v2, 2  ;;  %v10519_v1 = vld [vmem:[#allocation9 + $0x12c4] ss:$24 sps:$4 sm:$0xff]  }
 0x186   :  { %7655 = vmatprep.subr.bf16.mxu1 %v10534_v7  ;;  %v1065_v40 = vadd.f32 %v1064_v27, %v634_v17  ;;  %v994_v7 = vrot.slane %v993_v26, 2  ;;  %v1138_v54 = vrot.slane %v1137_v46, 2  ;;  %v10517_v12 = vld [vmem:[#allocation9 + $0x12c0] ss:$24 sps:$4 sm:$0xff]   ;;  %v10552_v17 = vld [vmem:[#allocation9 + $0x7e4] ss:$24 sps:$4 sm:$0xff]  }
 0x187   :  { %7808 = vmatpush1.bf16.msra.mxu0 %v10499_v11  ;;  %v1029_v25 = vadd.f32 %v1028_v41, %v628_v42  ;;  %v1173_v51 = vadd.f32 %v1172_v61, %v652_v29  ;;  %v1209_v11 = vadd.f32 %v1208_v34, %v658_v55  ;;  %v959_v41 = vadd.f32 %v958_v8, %v957_v9  ;;  %v10544_v29 = vld [vmem:[#allocation9 + $0x7b0] ss:$24 sps:$4 sm:$0xff]   ;;  %v10525_v61 = vld [vmem:[#allocation9 + $0x12f4] ss:$24 sps:$4 sm:$0xff]  }
 0x188   :  { %7809 = vmatprep.subr.bf16.mxu0 %v10507_v44  ;;  %v1066_v47 = vrot.slane %v1065_v40, 2  ;;  %v995_v27 = vadd.f32 %v994_v7, %v993_v26  ;;  %v1103_v0 = vadd.f32 %v1102_v59, %v1101_v2  ;;  %v1139_v21 = vadd.f32 %v1138_v54, %v1137_v46  ;;  %v10558_v59 = vld [vmem:[#allocation9 + $0x814] ss:$24 sps:$4 sm:$0xff]  }
 0x189   :  { %7656 = vmatpush1.bf16.msra.mxu1 %v10532_v15  ;;  %v1030_v44 = vrot.slane %v1029_v25, 2  ;;  %v1174_v39 = vrot.slane %v1173_v51, 2  ;;  %v1210_v49 = vrot.slane %v1209_v11, 2  ;;  %v960_v55 = vrot.slane %v959_v41, 1 }
 0x18a   :  { %7657 = vmatprep.subr.bf16.mxu1 %v10540_v33  ;;  %v1067_v15 = vadd.f32 %v1066_v47, %v1065_v40  ;;  %v1104_v9 = vrot.slane %v1103_v0, 1  ;;  %v1140_v26 = vrot.slane %v1139_v21, 1 }
 0x18b   :  { %7810 = vmatpush1.bf16.msra.mxu0 %v10505_v32  ;;  %v1031_v35 = vadd.f32 %v1030_v44, %v1029_v25  ;;  %v996_v32 = vrot.slane %v995_v27, 1  ;;  %v1175_v16 = vadd.f32 %v1174_v39, %v1173_v51  ;;  %v1211_v42 = vadd.f32 %v1210_v49, %v1209_v11  ;;  %v10523_v44 = vld [vmem:[#allocation9 + $0x12f0] ss:$24 sps:$4 sm:$0xff]   ;;  %v10550_v51 = vld [vmem:[#allocation9 + $0x7e0] ss:$24 sps:$4 sm:$0xff]  }
 0x18c   :  { %7811 = vmatprep.subr.bf16.mxu0 %v10513_v5  ;;  %v1068_v5 = vrot.slane %v1067_v15, 1  ;;  %v961_v34 = vadd.f32 %v960_v55, %v959_v41  ;;  %v1105_v8 = vadd.f32 %v1104_v9, %v1103_v0  ;;  %v1141_v7 = vadd.f32 %v1140_v26, %v1139_v21  ;;  %v10531_v39 = vld [vmem:[#allocation9 + $0x1324] ss:$24 sps:$4 sm:$0xff]  }
 0x18d   :  { %7658 = vmatpush1.bf16.msra.mxu1 %v10538_v31  ;;  %v1032_v33 = vrot.slane %v1031_v35, 1  ;;  %v997_v25 = vadd.f32 %v996_v32, %v995_v27  ;;  %v1176_v40 = vrot.slane %v1175_v16, 1  ;;  %v1212_v2 = vrot.slane %v1211_v42, 1  ;;  %v10529_v32 = vld [vmem:[#allocation9 + $0x1320] ss:$24 sps:$4 sm:$0xff]  }
 0x18e   :  { %7659 = vmatprep.subr.bf16.mxu1 %v10546_v4  ;;  %v1069_v31 = vadd.f32 %v1068_v5, %v1067_v15  ;;  %v12785_v4 = vmul.f32 0.125, %v961_v34  ;;  %v12793_v41 = vmul.f32 0.125, %v1105_v8  ;;  %v12795_v27 = vmul.f32 0.125, %v1141_v7  ;;  %v10564_v26 = vld [vmem:[#allocation9 + $0x844] ss:$24 sps:$4 sm:$0xff]  }
 0x18f   :  { %7812 = vmatpush1.bf16.msra.mxu0 %v10511_v52  ;;  %v1033_v46 = vadd.f32 %v1032_v33, %v1031_v35  ;;  %v1177_v52 = vadd.f32 %v1176_v40, %v1175_v16  ;;  %v1213_v11 = vadd.f32 %v1212_v2, %v1211_v42  ;;  %v12787_v47 = vmul.f32 0.125, %v997_v25  ;;  %v10537_v16 = vld [vmem:[#allocation9 + $0x1354] ss:$24 sps:$4 sm:$0xff]   ;;  %v10556_v42 = vld [vmem:[#allocation9 + $0x810] ss:$24 sps:$4 sm:$0xff]   ;;  %v11662_v8 = vld [vmem:[#allocation7] sm:$0xff] }
 0x190   :  { %7813 = vmatprep.subr.bf16.mxu0 %v10519_v1  ;;  %13449 = vst [vmem:[#allocation90_spill] sm:$0xff] %v12785_v4  ;;  %v12791_v1 = vmul.f32 0.125, %v1069_v31  ;;  %13453 = vst [vmem:[#allocation94_spill] sm:$0xff] %v12793_v41  ;;  %v1747_v15 = vpack.c.bf16 %v12785_v4, %v12785_v4  ;;  %v1777_v55 = vpack.c.bf16 %v12795_v27, %v12795_v27  ;;  %v444_v7 = vunpack.c.h.bf16 %v11662_v8  ;;  %v11669_v8 = vld [vmem:[#allocation7 + $0x150] sm:$0xff] }
 0x191   :  { %7660 = vmatpush1.bf16.msra.mxu1 %v10544_v29  ;;  %13450 = vst [vmem:[#allocation91_spill] sm:$0xff] %v12787_v47  ;;  %v12789_v54 = vmul.f32 0.125, %v1033_v46  ;;  %13454 = vst [vmem:[#allocation95_spill] sm:$0xff] %v12795_v27  ;;  %v12797_v49 = vmul.f32 0.125, %v1177_v52  ;;  %v12799_v35 = vmul.f32 0.125, %v1213_v11  ;;  %v1753_v0 = vpack.c.bf16 %v12787_v47, %v12787_v47  ;;  %v11663_v52 = vld [vmem:[#allocation7 + $0x30] sm:$0xff] }
 0x192   :  { %7661 = vmatprep.subr.bf16.mxu1 %v10552_v17  ;;  %13452 = vst [vmem:[#allocation93_spill] sm:$0xff] %v12791_v1  ;;  %v1771_v29 = vpack.c.bf16 %v12793_v41, %v12793_v41  ;;  %v1939_v5 = vunpack.c.l.b16 %v1747_v15  ;;  %v1969_v40 = vunpack.c.l.b16 %v1777_v55  ;;  %v450_v11 = vunpack.c.h.bf16 %v11663_v52  ;;  %v11664_v15 = vld [vmem:[#allocation7 + $0x60] sm:$0xff]  ;;  %v11667_v55 = vld [vmem:[#allocation7 + $0xf0] sm:$0xff]  ;;  %v11675_v41 = vld [vmem:[#allocation7 + $0x108] sm:$0xff] }
 0x193   :  { %7814 = vmatpush1.bf16.msra.mxu0 %v10517_v12  ;;  %13451 = vst [vmem:[#allocation92_spill] sm:$0xff] %v12789_v54  ;;  %13455 = vst [vmem:[#allocation96_spill] sm:$0xff] %v12797_v49  ;;  %v1759_v21 = vpack.c.bf16 %v12789_v54, %v12789_v54  ;;  %v1765_v12 = vpack.c.bf16 %v12791_v1, %v12791_v1  ;;  %v1783_v17 = vpack.c.bf16 %v12797_v49, %v12797_v49 }
 0x194   :  { %7815 = vmatprep.subr.bf16.mxu0 %v10525_v61  ;;  %13456 = vst [vmem:[#allocation97_spill] sm:$0xff] %v12799_v35  ;;  %v1789_v33 = vpack.c.bf16 %v12799_v35, %v12799_v35  ;;  %v1945_v9 = vunpack.c.l.b16 %v1753_v0  ;;  %v1963_v25 = vunpack.c.l.b16 %v1771_v29  ;;  %v456_v0 = vunpack.c.h.bf16 %v11664_v15  ;;  %v10535_v35 = vld [vmem:[#allocation9 + $0x1350] ss:$24 sps:$4 sm:$0xff]   ;;  %v11670_v15 = vld [vmem:[#allocation7 + $0x18] sm:$0xff] }
 0x195   :  { %7662 = vmatpush1.bf16.msra.mxu1 %v10550_v51  ;;  %v1951_v61 = vunpack.c.l.b16 %v1759_v21  ;;  %v1957_v34 = vunpack.c.l.b16 %v1765_v12  ;;  %v1975_v2 = vunpack.c.l.b16 %v1783_v17  ;;  %v10562_v21 = vld [vmem:[#allocation9 + $0x840] ss:$24 sps:$4 sm:$0xff]   ;;  %v474_v17 = vunpack.c.h.bf16 %v11667_v55  ;;  %v11673_v55 = vld [vmem:[#allocation7 + $0xa8] sm:$0xff] }
 0x196   :  { %7663 = vmatprep.subr.bf16.mxu1 %v10558_v59  ;;  %v1981_v46 = vunpack.c.l.b16 %v1789_v33  ;;  %v2024_v31 = vsel %vm1982_vm0, %v1945_v9, %v1939_v5  ;;  %v11668_v33 = vld [vmem:[#allocation7 + $0x120] sm:$0xff]  ;;  %v486_v52 = vunpack.c.h.bf16 %v11669_v8  ;;  %v702_v27 = vunpack.c.h.bf16 %v11673_v55  ;;  %v11677_v8 = vld [vmem:[#allocation7 + $0x168] sm:$0xff] }
 0x197   :  { %7816 = vmatpush1.bf16.msra.mxu0 %v10523_v44  ;;  %v2025_v51 = vsel %vm1984_vm1, %v1951_v61, %v2024_v31  ;;  %v11665_v44 = vld [vmem:[#allocation7 + $0x90] sm:$0xff]  ;;  %v480_v5 = vunpack.c.h.bf16 %v11668_v33  ;;  %v10543_v9 = vld [vmem:[#allocation9 + $0x1384] ss:$24 sps:$4 sm:$0xff]   ;;  %v714_v1 = vunpack.c.h.bf16 %v11675_v41  ;;  %v726_v54 = vunpack.c.h.bf16 %v11677_v8 }
 0x198   :  { %7817 = vmatprep.subr.bf16.mxu0 %v10531_v39  ;;  %v462_v59 = vunpack.c.h.bf16 %v11665_v44  ;;  %v2026_v12 = vsel %vm1986_vm2, %v1957_v34, %v2025_v51  ;;  %v11666_v39 = vld [vmem:[#allocation7 + $0xc0] sm:$0xff]  ;;  %v10570_v61 = vld [vmem:[#allocation9 + $0x874] ss:$24 sps:$4 sm:$0xff]   ;;  %v684_v44 = vunpack.c.h.bf16 %v11670_v15  ;;  %v11672_v51 = vld [vmem:[#allocation7 + $0x78] sm:$0xff] }
 0x199   :  { %7664 = vmatpush1.bf16.msra.mxu1 %v10556_v42  ;;  %v468_v29 = vunpack.c.h.bf16 %v11666_v39  ;;  %v2027_v31 = vsel %vm1988_vm3, %v1963_v25, %v2026_v12  ;;  %v11671_v42 = vld [vmem:[#allocation7 + $0x48] sm:$0xff]  ;;  %v696_v39 = vunpack.c.h.bf16 %v11672_v51  ;;  %v11674_v33 = vld [vmem:[#allocation7 + $0xd8] sm:$0xff] }
 0x19a   :  { %7665 = vmatprep.subr.bf16.mxu1 %v10564_v26  ;;  %v690_v49 = vunpack.c.h.bf16 %v11671_v42  ;;  %v2028_v34 = vsel %vm1990_vm4, %v1969_v40, %v2027_v31  ;;  %v11676_v25 = vld [vmem:[#allocation7 + $0x138] sm:$0xff]  ;;  %v10568_v42 = vld [vmem:[#allocation9 + $0x870] ss:$24 sps:$4 sm:$0xff]   ;;  %v732_v40 = vadd.f32 %v684_v44, %v444_v7  ;;  %v10549_v55 = vld [vmem:[#allocation9 + $0x13b4] ss:$24 sps:$4 sm:$0xff]  }
 0x19b   :  { %7818 = vmatpush1.bf16.msra.mxu0 %v10529_v32  ;;  %v708_v32 = vunpack.c.h.bf16 %v11674_v33  ;;  %v2029_v26 = vsel %vm1992_vm5, %v1975_v2, %v2028_v34  ;;  %v720_v12 = vunpack.c.h.bf16 %v11676_v25  ;;  %v10541_v15 = vld [vmem:[#allocation9 + $0x1380] ss:$24 sps:$4 sm:$0xff]   ;;  %v744_v51 = vadd.f32 %v696_v39, %v456_v0  ;;  %v10576_v33 = vld [vmem:[#allocation9 + $0x8a4] ss:$24 sps:$4 sm:$0xff]  }
 0x19c   :  { %7819 = vmatprep.subr.bf16.mxu0 %v10537_v16  ;;  %v2030_v16 = vsel %vm1994_vm6, %v1981_v46, %v2029_v26  ;;  %v738_v31 = vadd.f32 %v690_v49, %v450_v11  ;;  %v750_v2 = vadd.f32 %v702_v27, %v462_v59  ;;  %v13458_v34 = vsub.f32 %v12203_v20, %v12235_v63  ;;  %v10547_v20 = vld [vmem:[#allocation9 + $0x13b0] ss:$24 sps:$4 sm:$0xff]  }
 0x19d   :  { %7666 = vmatpush1.bf16.msra.mxu1 %v10562_v21  ;;  %v12824_v47 = vpack.c.b16 %v2030_v16, %v2030_v16  ;;  %v756_v41 = vadd.f32 %v708_v32, %v468_v29  ;;  %v762_v21 = vadd.f32 %v714_v1, %v474_v17  ;;  %v768_v8 = vadd.f32 %v720_v12, %v480_v5  ;;  %v13459_v5 = vld [vmem:[#allocation45_spill] sm:$0xff]  ;;  %v10555_v32 = vld [vmem:[#allocation9 + $0x13e4] ss:$24 sps:$4 sm:$0xff]  }
 0x19e   :  { %7667 = vmatprep.subr.bf16.mxu1 %v10570_v61  ;;  %v12829_v25 = vand.u32 2147483647, %v13458_v34  ;;  %v774_v46 = vadd.f32 %v726_v54, %v486_v52  ;;  %v1316_v7 = vrot.slane %v732_v40, 4  ;;  %v1352_v49 = vrot.slane %v738_v31, 4  ;;  %v10574_v61 = vld [vmem:[#allocation9 + $0x8a0] ss:$24 sps:$4 sm:$0xff]  }
 0x19f   :  { %7820 = vmatpush1.bf16.msra.mxu0 %v10535_v35  ;;  %13457 = vst [vmem:[#allocation98_spill] sm:$0xff] %v12824_v47  ;;  %7673 = vmatprep.mubr.bf16.mxu1 %v12824_v47  ;;  %v1388_v35 = vrot.slane %v744_v51, 4  ;;  %v1424_v11 = vrot.slane %v750_v2, 4  ;;  %v1460_v0 = vrot.slane %v756_v41, 4  ;;  %v1496_v59 = vrot.slane %v762_v21, 4 }
 0x1a0   :  { %7821 = vmatprep.subr.bf16.mxu0 %v10543_v9  ;;  %v1317_v27 = vadd.f32 %v1316_v7, %v732_v40  ;;  %v1532_v29 = vrot.slane %v768_v8, 4  ;;  %v1568_v44 = vrot.slane %v774_v46, 4  ;;  %v10582_v9 = vld [vmem:[#allocation9 + $0x8d4] ss:$24 sps:$4 sm:$0xff]   ;;  %v1353_v1 = vadd.f32 %v1352_v49, %v738_v31 }
 0x1a1   :  { %7668 = vmatpush1.bf16.msra.mxu1 %v10568_v42  ;;  %v1389_v17 = vadd.f32 %v1388_v35, %v744_v51  ;;  %v1425_v54 = vadd.f32 %v1424_v11, %v750_v2  ;;  %v13460_v52 = vsub.f32 %v12205_v24, %v13459_v5  ;;  %v1461_v12 = vadd.f32 %v1460_v0, %v756_v41  ;;  %v10553_v24 = vld [vmem:[#allocation9 + $0x13e0] ss:$24 sps:$4 sm:$0xff]   ;;  %v10588_v35 = vld [vmem:[#allocation9 + $0x904] ss:$24 sps:$4 sm:$0xff]  }
 0x1a2   :  { %7669 = vmatprep.subr.bf16.mxu1 %v10576_v33  ;;  %v1318_v26 = vrot.slane %v1317_v27, 2  ;;  %v1497_v42 = vadd.f32 %v1496_v59, %v762_v21  ;;  %v1533_v16 = vadd.f32 %v1532_v29, %v768_v8  ;;  %v1354_v40 = vrot.slane %v1353_v1, 2  ;;  %v10580_v33 = vld [vmem:[#allocation9 + $0x8d0] ss:$24 sps:$4 sm:$0xff]   ;;  %v10561_v21 = vld [vmem:[#allocation9 + $0x1414] ss:$24 sps:$4 sm:$0xff]  }
 0x1a3   :  { %7822 = vmatpush1.bf16.msra.mxu0 %v10541_v15  ;;  %v12835_v39 = vand.u32 2147483647, %v13460_v52  ;;  %v1390_v34 = vrot.slane %v1389_v17, 2  ;;  %v1426_v15 = vrot.slane %v1425_v54, 2  ;;  %v1569_v7 = vadd.f32 %v1568_v44, %v774_v46 }
 0x1a4   :  { %7823 = vmatprep.subr.bf16.mxu0 %v10549_v55  ;;  %v1319_v31 = vadd.f32 %v1318_v26, %v1317_v27  ;;  %v1462_v51 = vrot.slane %v1461_v12, 2  ;;  %v1498_v2 = vrot.slane %v1497_v42, 2  ;;  %v1534_v49 = vrot.slane %v1533_v16, 2 }
 0x1a5   :  { %7670 = vmatpush1.bf16.msra.mxu1 %v10574_v61  ;;  %v1355_v55 = vadd.f32 %v1354_v40, %v1353_v1  ;;  %v1391_v11 = vadd.f32 %v1390_v34, %v1389_v17  ;;  %v1427_v52 = vadd.f32 %v1426_v15, %v1425_v54  ;;  %v1570_v41 = vrot.slane %v1569_v7, 2  ;;  %v10559_v1 = vld [vmem:[#allocation9 + $0x1410] ss:$24 sps:$4 sm:$0xff]  }
 0x1a6   :  { %7671 = vmatprep.subr.bf16.mxu1 %v10582_v9  ;;  %v1320_v8 = vrot.slane %v1319_v31, 1  ;;  %v1463_v0 = vadd.f32 %v1462_v51, %v1461_v12  ;;  %v1499_v59 = vadd.f32 %v1498_v2, %v1497_v42  ;;  %v1535_v46 = vadd.f32 %v1534_v49, %v1533_v16  ;;  %v10567_v12 = vld [vmem:[#allocation9 + $0x1444] ss:$24 sps:$4 sm:$0xff]  }
 0x1a7   :  { %7824 = vmatpush1.bf16.msra.mxu0 %v10547_v20  ;;  %v1356_v61 = vrot.slane %v1355_v55, 1  ;;  %v1392_v29 = vrot.slane %v1391_v11, 1  ;;  %v1428_v27 = vrot.slane %v1427_v52, 1  ;;  %v1571_v44 = vadd.f32 %v1570_v41, %v1569_v7 }
 0x1a8   :  { %7825 = vmatprep.subr.bf16.mxu0 %v10555_v32  ;;  %v1321_v26 = vadd.f32 %v1320_v8, %v1319_v31  ;;  %v1464_v20 = vrot.slane %v1463_v0, 1  ;;  %v1500_v47 = vrot.slane %v1499_v59, 1  ;;  %v1536_v9 = vrot.slane %v1535_v46, 1 }
 0x1a9   :  { %7672 = vmatpush1.bf16.msra.mxu1 %v10580_v33  ;;  %v1357_v17 = vadd.f32 %v1356_v61, %v1355_v55  ;;  %v1393_v54 = vadd.f32 %v1392_v29, %v1391_v11  ;;  %v1429_v32 = vadd.f32 %v1428_v27, %v1427_v52  ;;  %v1572_v40 = vrot.slane %v1571_v44, 1  ;;  %v13462_v52 = vld [vmem:[#allocation22_spill] sm:$0xff]  ;;  %v13465_v61 = vld [vmem:[#allocation25_spill] sm:$0xff] }
 0x1aa   :  { %7682 = vmatprep.subr.bf16.mxu1 %v10588_v35  ;;  %v1465_v42 = vadd.f32 %v1464_v20, %v1463_v0  ;;  %v1501_v16 = vadd.f32 %v1500_v47, %v1499_v59  ;;  %v1537_v34 = vadd.f32 %v1536_v9, %v1535_v46  ;;  %v12837_v15 = vmul.f32 0.125, %v1321_v26  ;;  %v13461_v35 = vld [vmem:[#allocation21_spill] sm:$0xff]  ;;  %v10565_v47 = vld [vmem:[#allocation9 + $0x1440] ss:$24 sps:$4 sm:$0xff]   ;;  %v13464_v0 = vld [vmem:[#allocation24_spill] sm:$0xff] }
 0x1ab   :  { %7826 = vmatpush1.bf16.msra.mxu0 %v10553_v24  ;;  %v1573_v7 = vadd.f32 %v1572_v40, %v1571_v44  ;;  %v12839_v33 = vmul.f32 0.125, %v1357_v17  ;;  %v12841_v31 = vmul.f32 0.125, %v1393_v54  ;;  %v12843_v51 = vmul.f32 0.125, %v1429_v32  ;;  %v10573_v46 = vld [vmem:[#allocation9 + $0x1474] ss:$24 sps:$4 sm:$0xff]   ;;  %v13466_v27 = vld [vmem:[#allocation26_spill] sm:$0xff] }
 0x1ac   :  { %7827 = vmatprep.subr.bf16.mxu0 %v10561_v21  ;;  %v12845_v2 = vmul.f32 0.125, %v1465_v42  ;;  %v12847_v49 = vmul.f32 0.125, %v1501_v16  ;;  %v12849_v24 = vmul.f32 0.125, %v1537_v34  ;;  %v1647_v55 = vsub.f32 %v13461_v35, %v12837_v15  ;;  %v13463_v21 = vld [vmem:[#allocation23_spill] sm:$0xff] }
 0x1ad   :  { %v12853_v11 = vmul.f32 0.125, %v1573_v7  ;;  %v1653_v41 = vsub.f32 %v13462_v52, %v12839_v33  ;;  %v1659_v8 = vsub.f32 %v13463_v21, %v12841_v31  ;;  %v1665_v59 = vsub.f32 %v13464_v0, %v12843_v51  ;;  %v13467_v26 = vld [vmem:[#allocation27_spill] sm:$0xff]  ;;  %v10571_v7 = vld [vmem:[#allocation9 + $0x1470] ss:$24 sps:$4 sm:$0xff]  }
 0x1ae   :  { %v1671_v29 = vsub.f32 %v13465_v61, %v12845_v2  ;;  %v1677_v44 = vsub.f32 %v13466_v27, %v12847_v49  ;;  %v1683_v20 = vsub.f32 %v13467_v26, %v12849_v24  ;;  %v1695_v9 = vand.u32 2147483647, %v1647_v55  ;;  %v10579_v61 = vld [vmem:[#allocation9 + $0x14a4] ss:$24 sps:$4 sm:$0xff]  }
 0x1af   :  { %7828 = vmatpush1.bf16.msra.mxu0 %v10559_v1  ;;  %v13468_v1 = vld [vmem:[#allocation28_spill] sm:$0xff]  ;;  %v1701_v54 = vand.u32 2147483647, %v1653_v41  ;;  %v1707_v32 = vand.u32 2147483647, %v1659_v8 }
 0x1b0   :  { %7829 = vmatprep.subr.bf16.mxu0 %v10567_v12  ;;  %v1689_v17 = vsub.f32 %v13468_v1, %v12853_v11  ;;  %v1713_v40 = vand.u32 2147483647, %v1665_v59  ;;  %v1719_v42 = vand.u32 2147483647, %v1671_v29  ;;  %v1725_v16 = vand.u32 2147483647, %v1677_v44 }
 0x1b1   :  { %v1731_v12 = vand.u32 2147483647, %v1683_v20  ;;  %v1839_v34 = vpack.c.bf16 %v1695_v9, %v1695_v9  ;;  %v1845_v52 = vpack.c.bf16 %v1701_v54, %v1701_v54  ;;  %v1851_v21 = vpack.c.bf16 %v1707_v32, %v1707_v32  ;;  %v10577_v54 = vld [vmem:[#allocation9 + $0x14a0] ss:$24 sps:$4 sm:$0xff]  }
 0x1b2   :  { %v1737_v35 = vand.u32 2147483647, %v1689_v17  ;;  %v1857_v0 = vpack.c.bf16 %v1713_v40, %v1713_v40  ;;  %v1863_v27 = vpack.c.bf16 %v1719_v42, %v1719_v42  ;;  %v1869_v55 = vpack.c.bf16 %v1725_v16, %v1725_v16 }
 0x1b3   :  { %7830 = vmatpush1.bf16.msra.mxu0 %v10565_v47  ;;  %v1875_v26 = vpack.c.bf16 %v1731_v12, %v1731_v12  ;;  %v2242_v4 = vunpack.c.l.b16 %v1839_v34  ;;  %v2248_v41 = vunpack.c.l.b16 %v1845_v52  ;;  %v2254_v8 = vunpack.c.l.b16 %v1851_v21 }
 0x1b4   :  { %7831 = vmatprep.subr.bf16.mxu0 %v10573_v46  ;;  %v1881_v1 = vpack.c.bf16 %v1737_v35, %v1737_v35  ;;  %v2260_v59 = vunpack.c.l.b16 %v1857_v0  ;;  %v2266_v29 = vunpack.c.l.b16 %v1863_v27  ;;  %v2272_v44 = vunpack.c.l.b16 %v1869_v55  ;;  %v10585_v46 = vld [vmem:[#allocation9 + $0x14d4] ss:$24 sps:$4 sm:$0xff]  }
 0x1b5   :  { %v2278_v20 = vunpack.c.l.b16 %v1875_v26  ;;  %v13469_v47 = vunpack.c.l.bf16 %v12699_v48  ;;  %v13470_v9 = vunpack.c.l.bf16 %v12733_v3  ;;  %v2296_v40 = vsel %vm1982_vm0, %v2248_v41, %v2242_v4 }
 0x1b6   :  { %v2284_v32 = vunpack.c.l.b16 %v1881_v1  ;;  %v13471_v42 = vunpack.c.l.bf16 %v12701_v60  ;;  %v13472_v16 = vunpack.c.l.bf16 %v12738_v23  ;;  %v13473_v34 = vunpack.c.l.bf16 %v12703_v53 }
 0x1b7   :  { %v615_v17 = vadd.f32 %v13470_v9, %v13469_v47  ;;  %7832 = vmatpush1.bf16.msra.mxu0 %v10571_v7  ;;  %v13474_v35 = vunpack.c.l.bf16 %v12740_v36  ;;  %v2297_v48 = vsel %vm1984_vm1, %v2254_v8, %v2296_v40  ;;  %v13475_v3 = vunpack.c.l.bf16 %v12707_v43 }
 0x1b8   :  { %v621_v12 = vadd.f32 %v13472_v16, %v13471_v42  ;;  %7833 = vmatprep.subr.bf16.mxu0 %v10579_v61  ;;  %v13476_v7 = vunpack.c.l.bf16 %v12745_v58  ;;  %v13477_v4 = vunpack.c.l.bf16 %v12718_v6  ;;  %v13478_v60 = vunpack.c.l.bf16 %v12751_v28 }
 0x1b9   :  { %v627_v52 = vadd.f32 %v13474_v35, %v13473_v34  ;;  %v13479_v23 = vunpack.c.l.bf16 %v12720_v62  ;;  %v13480_v53 = vunpack.c.l.bf16 %v12753_v22  ;;  %v2298_v36 = vsel %vm1986_vm2, %v2260_v59, %v2297_v48  ;;  %v10583_v22 = vld [vmem:[#allocation9 + $0x14d0] ss:$24 sps:$4 sm:$0xff]  }
 0x1ba   :  { %v633_v21 = vadd.f32 %v13476_v7, %v13475_v3  ;;  %v639_v0 = vadd.f32 %v13478_v60, %v13477_v4  ;;  %v13481_v61 = vunpack.c.l.bf16 %v12722_v10  ;;  %v13482_v55 = vunpack.c.l.bf16 %v12755_v37 }
 0x1bb   :  { %v645_v27 = vadd.f32 %v13480_v53, %v13479_v23  ;;  %v13483_v58 = vunpack.c.l.bf16 %v12729_v19  ;;  %v13484_v26 = vunpack.c.l.bf16 %v12761_v45  ;;  %v950_v1 = vrot.slane %v615_v17, 4  ;;  %7834 = vmatpush1.bf16.msra.mxu0 %v10577_v54  ;;  %v10591_v19 = vld [vmem:[#allocation9 + $0x1504] ss:$24 sps:$4 sm:$0xff]  }
 0x1bc   :  { %v651_v43 = vadd.f32 %v13482_v55, %v13481_v61  ;;  %v2299_v28 = vsel %vm1988_vm3, %v2266_v29, %v2298_v36  ;;  %v986_v41 = vrot.slane %v621_v12, 4  ;;  %v1022_v62 = vrot.slane %v627_v52, 4  ;;  %7835 = vmatprep.subr.bf16.mxu0 %v10585_v46 }
 0x1bd   :  { %v657_v6 = vadd.f32 %v13484_v26, %v13483_v58  ;;  %v1058_v8 = vrot.slane %v633_v21, 4  ;;  %v2300_v59 = vsel %vm1990_vm4, %v2272_v44, %v2299_v28  ;;  %v951_v47 = vadd.f32 %v950_v1, %v615_v17 }
 0x1be   :  { %v1094_v10 = vrot.slane %v639_v0, 4  ;;  %v1130_v9 = vrot.slane %v645_v27, 4  ;;  %v2301_v37 = vsel %vm1992_vm5, %v2278_v20, %v2300_v59  ;;  %v987_v40 = vadd.f32 %v986_v41, %v621_v12 }
 0x1bf   :  { %v1023_v45 = vadd.f32 %v1022_v62, %v627_v52  ;;  %v1059_v42 = vadd.f32 %v1058_v8, %v633_v21  ;;  %v2302_v16 = vsel %vm1994_vm6, %v2284_v32, %v2301_v37  ;;  %v952_v29 = vrot.slane %v951_v47, 2  ;;  %7836 = vmatpush1.bf16.msra.mxu0 %v10583_v22 }
 0x1c0   :  { %v1095_v34 = vadd.f32 %v1094_v10, %v639_v0  ;;  %v1131_v35 = vadd.f32 %v1130_v9, %v645_v27  ;;  %v12908_v48 = vpack.c.b16 %v2302_v16, %v2302_v16  ;;  %v988_v54 = vrot.slane %v987_v40, 2  ;;  %7846 = vmatprep.subr.bf16.mxu0 %v10591_v19 }
 0x1c1   :  { %v1024_v3 = vrot.slane %v1023_v45, 2  ;;  %v1060_v44 = vrot.slane %v1059_v42, 2  ;;  %v953_v17 = vadd.f32 %v952_v29, %v951_v47  ;;  %v1166_v4 = vrot.slane %v651_v43, 4 }
 0x1c2   :  { %v1096_v7 = vrot.slane %v1095_v34, 2  ;;  %v1132_v46 = vrot.slane %v1131_v35, 2  ;;  %7837 = vmatprep.mubr.bf16.mxu0 %v12908_v48  ;;  %v989_v20 = vadd.f32 %v988_v54, %v987_v40  ;;  %v1202_v32 = vrot.slane %v657_v6, 4 }
 0x1c3   :  { %v1025_v12 = vadd.f32 %v1024_v3, %v1023_v45  ;;  %v1061_v52 = vadd.f32 %v1060_v44, %v1059_v42  ;;  %v954_v21 = vrot.slane %v953_v17, 1  ;;  %v1167_v23 = vadd.f32 %v1166_v4, %v651_v43 }
 0x1c4   :  { %v1097_v60 = vadd.f32 %v1096_v7, %v1095_v34  ;;  %v1133_v0 = vadd.f32 %v1132_v46, %v1131_v35  ;;  %v990_v53 = vrot.slane %v989_v20, 1  ;;  %v1203_v61 = vadd.f32 %v1202_v32, %v657_v6 }
 0x1c5   :  { %v1026_v27 = vrot.slane %v1025_v12, 1  ;;  %v1062_v36 = vrot.slane %v1061_v52, 1  ;;  %v955_v55 = vadd.f32 %v954_v21, %v953_v17  ;;  %v1168_v1 = vrot.slane %v1167_v23, 2  ;;  %v13485_v21 = vld [vmem:[#allocation39_spill] sm:$0xff] }
 0x1c6   :  { %v1098_v58 = vrot.slane %v1097_v60, 1  ;;  %v1134_v26 = vrot.slane %v1133_v0, 1  ;;  %v991_v28 = vadd.f32 %v990_v53, %v989_v20  ;;  %v1204_v8 = vrot.slane %v1203_v61, 2 }
 0x1c7   :  { %v1027_v41 = vadd.f32 %v1026_v27, %v1025_v12  ;;  %v1063_v62 = vadd.f32 %v1062_v36, %v1061_v52  ;;  %v1169_v47 = vadd.f32 %v1168_v1, %v1167_v23  ;;  %v12911_v10 = vmul.f32 0.125, %v955_v55  ;;  %v13488_v36 = vld [vmem:[#allocation40_spill] sm:$0xff] }
 0x1c8   :  { %v1099_v22 = vadd.f32 %v1098_v58, %v1097_v60  ;;  %v1135_v59 = vadd.f32 %v1134_v26, %v1133_v0  ;;  %v1205_v9 = vadd.f32 %v1204_v8, %v1203_v61  ;;  %v12913_v37 = vmul.f32 0.125, %v991_v28  ;;  %v13486_v60 = vld [vmem:[#allocation46_spill] sm:$0xff]  ;;  %v13489_v61 = vld [vmem:[#allocation47_spill] sm:$0xff]  ;;  %v13491_v26 = vld [vmem:[#allocation41_spill] sm:$0xff] }
 0x1c9   :  { %v12915_v43 = vmul.f32 0.125, %v1027_v41  ;;  %v12917_v19 = vmul.f32 0.125, %v1063_v62  ;;  %v1170_v6 = vrot.slane %v1169_v47, 1  ;;  %v1746_v42 = vpack.c.bf16 %v12911_v10, %v12911_v10  ;;  %v13492_v1 = vld [vmem:[#allocation48_spill] sm:$0xff] }
 0x1ca   :  { %v12919_v40 = vmul.f32 0.125, %v1099_v22  ;;  %v12921_v45 = vmul.f32 0.125, %v1135_v59  ;;  %v1206_v16 = vrot.slane %v1205_v9, 1  ;;  %v1752_v29 = vpack.c.bf16 %v12913_v37, %v12913_v37  ;;  %v13494_v22 = vld [vmem:[#allocation42_spill] sm:$0xff]  ;;  %v13495_v59 = vld [vmem:[#allocation49_spill] sm:$0xff] }
 0x1cb   :  { %v1758_v34 = vpack.c.bf16 %v12915_v43, %v12915_v43  ;;  %v1764_v35 = vpack.c.bf16 %v12917_v19, %v12917_v19  ;;  %v1171_v54 = vadd.f32 %v1170_v6, %v1169_v47  ;;  %v1938_v17 = vunpack.c.l.b16 %v1746_v42  ;;  %v13497_v6 = vld [vmem:[#allocation43_spill] sm:$0xff]  ;;  %v13498_v42 = vld [vmem:[#allocation50_spill] sm:$0xff] }
 0x1cc   :  { %v1770_v3 = vpack.c.bf16 %v12919_v40, %v12919_v40  ;;  %v1776_v44 = vpack.c.bf16 %v12921_v45, %v12921_v45  ;;  %v1207_v7 = vadd.f32 %v1206_v16, %v1205_v9  ;;  %v1944_v46 = vunpack.c.l.b16 %v1752_v29 }
 0x1cd   :  { %v1950_v4 = vunpack.c.l.b16 %v1758_v34  ;;  %v1956_v20 = vunpack.c.l.b16 %v1764_v35  ;;  %v12935_v12 = vmul.f32 0.125, %v1171_v54  ;;  %v13487_v0 = vsub.f32 %v13485_v21, %v13486_v60  ;;  %v13500_v54 = vld [vmem:[#allocation44_spill] sm:$0xff] }
 0x1ce   :  { %v1962_v52 = vunpack.c.l.b16 %v1770_v3  ;;  %v1968_v32 = vunpack.c.l.b16 %v1776_v44  ;;  %v12940_v53 = vmul.f32 0.125, %v1207_v7  ;;  %v2017_v27 = vsel %vm1982_vm0, %v1944_v46, %v1938_v17  ;;  %v13501_v3 = vld [vmem:[#allocation51_spill] sm:$0xff] }
 0x1cf   :  { %v1706_v23 = vand.u32 2147483647, %v13487_v0  ;;  %v13490_v55 = vsub.f32 %v13488_v36, %v13489_v61  ;;  %v13493_v28 = vsub.f32 %v13491_v26, %v13492_v1  ;;  %v1782_v62 = vpack.c.bf16 %v12935_v12, %v12935_v12 }
 0x1d0   :  { %v2018_v8 = vsel %vm1984_vm1, %v1950_v4, %v2017_v27  ;;  %v13496_v47 = vsub.f32 %v13494_v22, %v13495_v59  ;;  %v13499_v16 = vsub.f32 %v13497_v6, %v13498_v42  ;;  %v1788_v34 = vpack.c.bf16 %v12940_v53, %v12940_v53 }
 0x1d1   :  { %v1712_v58 = vand.u32 2147483647, %v13490_v55  ;;  %v1718_v41 = vand.u32 2147483647, %v13493_v28  ;;  %v2019_v35 = vsel %vm1986_vm2, %v1956_v20, %v2018_v8  ;;  %v13502_v44 = vsub.f32 %v13500_v54, %v13501_v3 }
 0x1d2   :  { %v1724_v9 = vand.u32 2147483647, %v13496_v47  ;;  %v1730_v29 = vand.u32 2147483647, %v13499_v16  ;;  %v1838_v7 = vpack.c.bf16 %v12829_v25, %v12829_v25  ;;  %v1974_v46 = vunpack.c.l.b16 %v1782_v62  ;;  %v10586_v47 = vld [vmem:[#allocation9 + $0x900] ss:$24 sps:$4 sm:$0xff]  }
 0x1d3   :  { %v1736_v17 = vand.u32 2147483647, %v13502_v44  ;;  %v2020_v4 = vsel %vm1988_vm3, %v1962_v52, %v2019_v35  ;;  %v1844_v21 = vpack.c.bf16 %v12835_v39, %v12835_v39  ;;  %v1850_v0 = vpack.c.bf16 %v1706_v23, %v1706_v23 }
 0x1d4   :  { %v1980_v27 = vunpack.c.l.b16 %v1788_v34  ;;  %v2021_v36 = vsel %vm1990_vm4, %v1968_v32, %v2020_v4  ;;  %v1856_v55 = vpack.c.bf16 %v1712_v58, %v1712_v58  ;;  %v1862_v26 = vpack.c.bf16 %v1718_v41, %v1718_v41  ;;  %v10594_v34 = vld [vmem:[#allocation9 + $0x934] ss:$24 sps:$4 sm:$0xff]  }
 0x1d5   :  { %v2022_v20 = vsel %vm1992_vm5, %v1974_v46, %v2021_v36  ;;  %v1868_v28 = vpack.c.bf16 %v1724_v9, %v1724_v9  ;;  %v1874_v8 = vpack.c.bf16 %v1730_v29, %v1730_v29  ;;  %v1880_v22 = vpack.c.bf16 %v1736_v17, %v1736_v17  ;;  %v10592_v46 = vld [vmem:[#allocation9 + $0x930] ss:$24 sps:$4 sm:$0xff]  }
 0x1d6   :  { %v2023_v25 = vsel %vm1994_vm6, %v1980_v27, %v2022_v20  ;;  %v2241_v62 = vunpack.c.l.b16 %v1838_v7  ;;  %v2247_v6 = vunpack.c.l.b16 %v1844_v21  ;;  %v2253_v52 = vunpack.c.l.b16 %v1850_v0  ;;  %v10589_v27 = vld [vmem:[#allocation9 + $0x1500] ss:$24 sps:$4 sm:$0xff]  }
 0x1d7   :  { %v12972_v16 = vpack.c.b16 %v2023_v25, %v2023_v25  ;;  %v2259_v39 = vunpack.c.l.b16 %v1856_v55  ;;  %v2265_v23 = vunpack.c.l.b16 %v1862_v26  ;;  %v2271_v35 = vunpack.c.l.b16 %v1868_v28  ;;  %v10598_v55 = vld [vmem:[#allocation9 + $0x960] ss:$24 sps:$4 sm:$0xff]   ;;  %v10597_v25 = vld [vmem:[#allocation9 + $0x1534] ss:$24 sps:$4 sm:$0xff]  }
 0x1d8   :  { %v2277_v32 = vunpack.c.l.b16 %v1874_v8  ;;  %v2289_v58 = vsel %vm1982_vm0, %v2247_v6, %v2241_v62  ;;  %v1791_v41 = vpack.c.bf16 %v12837_v15, %v12837_v15  ;;  %v1797_v29 = vpack.c.bf16 %v12839_v33, %v12839_v33  ;;  %v10600_v33 = vld [vmem:[#allocation9 + $0x964] ss:$24 sps:$4 sm:$0xff]   ;;  %v10606_v62 = vld [vmem:[#allocation9 + $0x994] ss:$24 sps:$4 sm:$0xff]  }
 0x1d9   :  { %7674 = vmatmul.mubr.bf16.vlgmr.msra.gmra.mrb[0].mxu1 %v12972_v16  ;;  %v2290_v9 = vsel %vm1984_vm1, %v2253_v52, %v2289_v58  ;;  %v1803_v54 = vpack.c.bf16 %v12841_v31, %v12841_v31  ;;  %v1809_v44 = vpack.c.bf16 %v12843_v51, %v12843_v51  ;;  %v2283_v17 = vunpack.c.l.b16 %v1880_v22 }
 0x1da   :  { %7683 = vmatpush1.bf16.msra.mxu1 %v10586_v47  ;;  %v2291_v7 = vsel %vm1986_vm2, %v2259_v39, %v2290_v9  ;;  %v1815_v15 = vpack.c.bf16 %v12845_v2, %v12845_v2  ;;  %v1821_v4 = vpack.c.bf16 %v12847_v49, %v12847_v49  ;;  %v1827_v31 = vpack.c.bf16 %v12849_v24, %v12849_v24 }
 0x1db   :  { %v2292_v21 = vsel %vm1988_vm3, %v2265_v23, %v2291_v7  ;;  %7684 = vmatprep.subr.bf16.mxu1 %v10594_v34  ;;  %v2092_v0 = vunpack.c.l.b16 %v1791_v41  ;;  %v2098_v51 = vunpack.c.l.b16 %v1797_v29  ;;  %v1833_v26 = vpack.c.bf16 %v12853_v11, %v12853_v11  ;;  %v10595_v34 = vld [vmem:[#allocation9 + $0x1530] ss:$24 sps:$4 sm:$0xff]   ;;  %v10612_v41 = vld [vmem:[#allocation9 + $0x9c4] ss:$24 sps:$4 sm:$0xff]  }
 0x1dc   :  { %v2293_v36 = vsel %vm1990_vm4, %v2271_v35, %v2292_v21  ;;  %v2104_v2 = vunpack.c.l.b16 %v1803_v54  ;;  %v2110_v20 = vunpack.c.l.b16 %v1809_v44  ;;  %v2116_v28 = vunpack.c.l.b16 %v1815_v15  ;;  %v10603_v35 = vld [vmem:[#allocation9 + $0x1564] ss:$24 sps:$4 sm:$0xff]   ;;  %v13507_v21 = vld [vmem:[#allocation32_spill] sm:$0xff] }
 0x1dd   :  { %v2294_v49 = vsel %vm1992_vm5, %v2277_v32, %v2293_v36  ;;  %v2122_v22 = vunpack.c.l.b16 %v1821_v4  ;;  %v2146_v24 = vsel %vm1982_vm0, %v2098_v51, %v2092_v0  ;;  %v2128_v6 = vunpack.c.l.b16 %v1827_v31  ;;  %v10604_v32 = vld [vmem:[#allocation9 + $0x990] ss:$24 sps:$4 sm:$0xff]   ;;  %v13503_v54 = vld [vmem:[#allocation30_spill] sm:$0xff]  ;;  %v13505_v7 = vld [vmem:[#allocation31_spill] sm:$0xff] }
 0x1de   :  { %v2295_v8 = vsel %vm1994_vm6, %v2283_v17, %v2294_v49  ;;  %7685 = vmatpush1.bf16.msra.mxu1 %v10592_v46  ;;  %v2147_v52 = vsel %vm1984_vm1, %v2104_v2, %v2146_v24  ;;  %v2134_v11 = vunpack.c.l.b16 %v1833_v26  ;;  %v13504_v44 = vld [vmem:[#allocation62_spill] sm:$0xff]  ;;  %v13506_v46 = vld [vmem:[#allocation63_spill] sm:$0xff]  ;;  %v13509_v0 = vld [vmem:[#allocation33_spill] sm:$0xff] }
 0x1df   :  { %v12999_v47 = vpack.c.b16 %v2295_v8, %v2295_v8  ;;  %7686 = vmatprep.subr.bf16.mxu1 %v10600_v33  ;;  %v2148_v39 = vsel %vm1986_vm2, %v2110_v20, %v2147_v52  ;;  %v1649_v17 = vsub.f32 %v13504_v44, %v13503_v54  ;;  %v1655_v15 = vsub.f32 %v13506_v46, %v13505_v7  ;;  %v13508_v33 = vld [vmem:[#allocation64_spill] sm:$0xff]  ;;  %v13510_v51 = vld [vmem:[#allocation65_spill] sm:$0xff]  ;;  %v10601_v36 = vld [vmem:[#allocation9 + $0x1560] ss:$24 sps:$4 sm:$0xff]  }
 0x1e0   :  { %v2149_v23 = vsel %vm1988_vm3, %v2116_v28, %v2148_v39  ;;  %v1661_v31 = vsub.f32 %v13508_v33, %v13507_v21  ;;  %v13511_v26 = vld [vmem:[#allocation34_spill] sm:$0xff]  ;;  %v13513_v49 = vld [vmem:[#allocation35_spill] sm:$0xff]  ;;  %v10609_v24 = vld [vmem:[#allocation9 + $0x1594] ss:$24 sps:$4 sm:$0xff]  }
 0x1e1   :  { %7838 = vmatmul.mubr.bf16.vlgmr.msra.gmra.mrb[0].mxu0 %v12999_v47  ;;  %v2150_v58 = vsel %vm1990_vm4, %v2122_v22, %v2149_v23  ;;  %v13512_v2 = vld [vmem:[#allocation66_spill] sm:$0xff]  ;;  %v13514_v28 = vld [vmem:[#allocation67_spill] sm:$0xff]  ;;  %v1697_v22 = vand.u32 2147483647, %v1649_v17  ;;  %v13518_v39 = vld [vmem:[#allocation69_spill] sm:$0xff] }
 0x1e2   :  { %7847 = vmatpush1.bf16.msra.mxu0 %v10589_v27  ;;  %7687 = vmatpush1.bf16.msra.mxu1 %v10598_v55  ;;  %v2151_v9 = vsel %vm1992_vm5, %v2128_v6, %v2150_v58  ;;  %v1667_v27 = vsub.f32 %v13510_v51, %v13509_v0  ;;  %v10610_v55 = vld [vmem:[#allocation9 + $0x9c0] ss:$24 sps:$4 sm:$0xff]   ;;  %v1673_v20 = vsub.f32 %v13512_v2, %v13511_v26  ;;  %v13516_v6 = vld [vmem:[#allocation68_spill] sm:$0xff]  ;;  %v1709_v58 = vand.u32 2147483647, %v1661_v31 }
 0x1e3   :  { %7848 = vmatprep.subr.bf16.mxu0 %v10597_v25  ;;  %7688 = vmatprep.subr.bf16.mxu1 %v10606_v62  ;;  %v2152_v29 = vsel %vm1994_vm6, %v2134_v11, %v2151_v9  ;;  %v1679_v8 = vsub.f32 %v13514_v28, %v13513_v49  ;;  %v10618_v25 = vld [vmem:[#allocation9 + $0x9f4] ss:$24 sps:$4 sm:$0xff]   ;;  %v10607_v17 = vld [vmem:[#allocation9 + $0x1590] ss:$24 sps:$4 sm:$0xff]   ;;  %v10615_v7 = vld [vmem:[#allocation9 + $0x15c4] ss:$24 sps:$4 sm:$0xff]   ;;  %v1841_v21 = vpack.c.bf16 %v1697_v22, %v1697_v22 }
 0x1e4   :  { %v13012_v4 = vpack.c.b16 %v2152_v29, %v2152_v29  ;;  %v13515_v62 = vld [vmem:[#allocation36_spill] sm:$0xff]  ;;  %v13517_v11 = vld [vmem:[#allocation37_spill] sm:$0xff]  ;;  %v1715_v9 = vand.u32 2147483647, %v1667_v27  ;;  %v1721_v29 = vand.u32 2147483647, %v1673_v20  ;;  %v1853_v0 = vpack.c.bf16 %v1709_v58, %v1709_v58 }
 0x1e5   :  { %v1685_v52 = vsub.f32 %v13516_v6, %v13515_v62  ;;  %v1691_v23 = vsub.f32 %v13518_v39, %v13517_v11  ;;  %v10616_v46 = vld [vmem:[#allocation9 + $0x9f0] ss:$24 sps:$4 sm:$0xff]   ;;  %v10624_v31 = vld [vmem:[#allocation9 + $0xa24] ss:$24 sps:$4 sm:$0xff]   ;;  %v2244_v22 = vunpack.c.l.b16 %v1841_v21  ;;  %v10621_v11 = vld [vmem:[#allocation9 + $0x15f4] ss:$24 sps:$4 sm:$0xff]  }
 0x1e6   :  { %7849 = vmatpush1.bf16.msra.mxu0 %v10595_v34  ;;  %7689 = vmatpush1.bf16.msra.mxu1 %v10604_v32  ;;  %v1703_v34 = vand.u32 2147483647, %v1655_v15  ;;  %v1790_v32 = vpack.c.bf16 %v12235_v63, %v12235_v63  ;;  %v1802_v15 = vpack.c.bf16 %v13486_v60, %v13486_v60  ;;  %v1859_v51 = vpack.c.bf16 %v1715_v9, %v1715_v9  ;;  %v13519_v27 = vld [vmem:[#allocation53_spill] sm:$0xff]  ;;  %v10622_v39 = vld [vmem:[#allocation9 + $0xa20] ss:$24 sps:$4 sm:$0xff]  }
 0x1e7   :  { %7850 = vmatprep.subr.bf16.mxu0 %v10603_v35  ;;  %7690 = vmatprep.subr.bf16.mxu1 %v10612_v41  ;;  %v1796_v35 = vpack.c.bf16 %v13459_v5, %v13459_v5  ;;  %v1727_v41 = vand.u32 2147483647, %v1679_v8  ;;  %v1733_v54 = vand.u32 2147483647, %v1685_v52  ;;  %v1739_v44 = vand.u32 2147483647, %v1691_v23 }
 0x1e8   :  { %7714 = vmatprep.mubr.bf16.mxu1 %v13012_v4  ;;  %v1847_v33 = vpack.c.bf16 %v1703_v34, %v1703_v34  ;;  %v13520_v26 = vsub.f32 %v12365_v38, %v13519_v27  ;;  %v1865_v28 = vpack.c.bf16 %v1721_v29, %v1721_v29  ;;  %v10630_v23 = vld [vmem:[#allocation9 + $0xa54] ss:$24 sps:$4 sm:$0xff]   ;;  %v13523_v29 = vld [vmem:[#allocation55_spill] sm:$0xff]  ;;  %v13529_v27 = vld [vmem:[#allocation58_spill] sm:$0xff]  ;;  %v1808_v5 = vpack.c.bf16 %v13489_v61, %v13489_v61 }
 0x1e9   :  { %v1871_v8 = vpack.c.bf16 %v1727_v41, %v1727_v41  ;;  %v1877_v62 = vpack.c.bf16 %v1733_v54, %v1733_v54  ;;  %v1883_v6 = vpack.c.bf16 %v1739_v44, %v1739_v44  ;;  %v13524_v41 = vsub.f32 %v12369_v18, %v13523_v29  ;;  %v13525_v44 = vld [vmem:[#allocation56_spill] sm:$0xff] }
 0x1ea   :  { %7851 = vmatpush1.bf16.msra.mxu0 %v10601_v36  ;;  %7691 = vmatpush1.bf16.msra.mxu1 %v10610_v55  ;;  %v1696_v2 = vand.u32 2147483647, %v13520_v26  ;;  %v13521_v36 = vld [vmem:[#allocation54_spill] sm:$0xff]  ;;  %v2250_v52 = vunpack.c.l.b16 %v1847_v33  ;;  %v2268_v38 = vunpack.c.l.b16 %v1865_v28  ;;  %v13526_v21 = vsub.f32 %v12371_v13, %v13525_v44  ;;  %v13531_v26 = vld [vmem:[#allocation59_spill] sm:$0xff]  ;;  %v13533_v18 = vld [vmem:[#allocation60_spill] sm:$0xff] }
 0x1eb   :  { %7852 = vmatprep.subr.bf16.mxu0 %v10609_v24  ;;  %7692 = vmatprep.subr.bf16.mxu1 %v10618_v25  ;;  %v13522_v20 = vsub.f32 %v12367_v30, %v13521_v36  ;;  %v10613_v55 = vld [vmem:[#allocation9 + $0x15c0] ss:$24 sps:$4 sm:$0xff]   ;;  %v2256_v24 = vunpack.c.l.b16 %v1853_v0  ;;  %v2262_v25 = vunpack.c.l.b16 %v1859_v51  ;;  %v2274_v34 = vunpack.c.l.b16 %v1871_v8  ;;  %v10642_v63 = vld [vmem:[#allocation9 + $0xab4] ss:$24 sps:$4 sm:$0xff]  }
 0x1ec   :  { %v2280_v58 = vunpack.c.l.b16 %v1877_v62  ;;  %v2286_v9 = vunpack.c.l.b16 %v1883_v6  ;;  %v2310_v30 = vsel %vm1982_vm0, %v2250_v52, %v2244_v22  ;;  %v1708_v54 = vand.u32 2147483647, %v13524_v41  ;;  %v10619_v22 = vld [vmem:[#allocation9 + $0x15f0] ss:$24 sps:$4 sm:$0xff]   ;;  %v10627_v52 = vld [vmem:[#allocation9 + $0x1624] ss:$24 sps:$4 sm:$0xff]  }
 0x1ed   :  { %v1702_v49 = vand.u32 2147483647, %v13522_v20  ;;  %v2311_v51 = vsel %vm1984_vm1, %v2256_v24, %v2310_v30  ;;  %v13532_v36 = vsub.f32 %v12377_v56, %v13531_v26  ;;  %v13534_v28 = vsub.f32 %v12379_v14, %v13533_v18  ;;  %v10628_v24 = vld [vmem:[#allocation9 + $0xa50] ss:$24 sps:$4 sm:$0xff]   ;;  %v10636_v56 = vld [vmem:[#allocation9 + $0xa84] ss:$24 sps:$4 sm:$0xff]  }
 0x1ee   :  { %7853 = vmatpush1.bf16.msra.mxu0 %v10607_v17  ;;  %7693 = vmatpush1.bf16.msra.mxu1 %v10616_v46  ;;  %v1714_v17 = vand.u32 2147483647, %v13526_v21  ;;  %v13527_v46 = vld [vmem:[#allocation57_spill] sm:$0xff]  ;;  %v2312_v13 = vsel %vm1986_vm2, %v2262_v25, %v2311_v51  ;;  %v1840_v62 = vpack.c.bf16 %v1696_v2, %v1696_v2 }
 0x1ef   :  { %7854 = vmatprep.subr.bf16.mxu0 %v10615_v7  ;;  %7694 = vmatprep.subr.bf16.mxu1 %v10624_v31  ;;  %v13528_v33 = vsub.f32 %v12373_v50, %v13527_v46  ;;  %v13530_v7 = vsub.f32 %v12375_v57, %v13529_v27  ;;  %v1732_v20 = vand.u32 2147483647, %v13532_v36  ;;  %v1738_v8 = vand.u32 2147483647, %v13534_v28  ;;  %v10640_v26 = vld [vmem:[#allocation9 + $0xab0] ss:$24 sps:$4 sm:$0xff]  }
 0x1f0   :  { %v1846_v6 = vpack.c.bf16 %v1702_v49, %v1702_v49  ;;  %v1852_v50 = vpack.c.bf16 %v1708_v54, %v1708_v54  ;;  %v2313_v57 = vsel %vm1988_vm3, %v2268_v38, %v2312_v13  ;;  %v1858_v30 = vpack.c.bf16 %v1714_v17, %v1714_v17  ;;  %v10633_v17 = vld [vmem:[#allocation9 + $0x1654] ss:$24 sps:$4 sm:$0xff]   ;;  %v13535_v28 = vld [vmem:[#allocation71_spill] sm:$0xff] }
 0x1f1   :  { %v1720_v0 = vand.u32 2147483647, %v13528_v33  ;;  %v1726_v31 = vand.u32 2147483647, %v13530_v7  ;;  %v2314_v14 = vsel %vm1990_vm4, %v2274_v34, %v2313_v57  ;;  %v1876_v44 = vpack.c.bf16 %v1732_v20, %v1732_v20  ;;  %v10634_v34 = vld [vmem:[#allocation9 + $0xa80] ss:$24 sps:$4 sm:$0xff]  }
 0x1f2   :  { %7855 = vmatpush1.bf16.msra.mxu0 %v10613_v55  ;;  %7695 = vmatpush1.bf16.msra.mxu1 %v10622_v39  ;;  %v2243_v25 = vunpack.c.l.b16 %v1840_v62  ;;  %v2315_v2 = vsel %vm1992_vm5, %v2280_v58, %v2314_v14  ;;  %v1882_v49 = vpack.c.bf16 %v1738_v8, %v1738_v8  ;;  %v2249_v55 = vunpack.c.l.b16 %v1846_v6  ;;  %v13536_v8 = vld [vmem:[#allocation90_spill] sm:$0xff]  ;;  %v13537_v6 = vld [vmem:[#allocation72_spill] sm:$0xff] }
 0x1f3   :  { %v1864_v29 = vpack.c.bf16 %v1720_v0, %v1720_v0  ;;  %7856 = vmatprep.subr.bf16.mxu0 %v10621_v11  ;;  %7696 = vmatprep.subr.bf16.mxu1 %v10630_v23  ;;  %v1870_v41 = vpack.c.bf16 %v1726_v31, %v1726_v31  ;;  %v2255_v54 = vunpack.c.l.b16 %v1852_v50  ;;  %v2091_v39 = vunpack.c.l.b16 %v1790_v32  ;;  %v10625_v23 = vld [vmem:[#allocation9 + $0x1620] ss:$24 sps:$4 sm:$0xff]   ;;  %v10631_v31 = vld [vmem:[#allocation9 + $0x1650] ss:$24 sps:$4 sm:$0xff]   ;;  %v10639_v13 = vld [vmem:[#allocation9 + $0x1684] ss:$24 sps:$4 sm:$0xff]  }
 0x1f4   :  { %v2316_v38 = vsel %vm1994_vm6, %v2286_v9, %v2315_v2  ;;  %v2261_v21 = vunpack.c.l.b16 %v1858_v30  ;;  %v2097_v58 = vunpack.c.l.b16 %v1796_v35  ;;  %v2303_v0 = vsel %vm1982_vm0, %v2249_v55, %v2243_v25  ;;  %v13538_v50 = vld [vmem:[#allocation91_spill] sm:$0xff] }
 0x1f5   :  { %v2267_v11 = vunpack.c.l.b16 %v1864_v29  ;;  %v13070_v46 = vpack.c.b16 %v2316_v38, %v2316_v38  ;;  %v2273_v33 = vunpack.c.l.b16 %v1870_v41  ;;  %v2279_v32 = vunpack.c.l.b16 %v1876_v44  ;;  %v13541_v29 = vld [vmem:[#allocation74_spill] sm:$0xff]  ;;  %v10645_v44 = vld [vmem:[#allocation9 + $0x16b4] ss:$24 sps:$4 sm:$0xff]   ;;  %v13543_v2 = vld [vmem:[#allocation75_spill] sm:$0xff] }
 0x1f6   :  { %7857 = vmatpush1.bf16.msra.mxu0 %v10619_v22  ;;  %7697 = vmatpush1.bf16.msra.mxu1 %v10628_v24  ;;  %v2304_v9 = vsel %vm1984_vm1, %v2255_v54, %v2303_v0  ;;  %v2285_v51 = vunpack.c.l.b16 %v1882_v49  ;;  %v1814_v35 = vpack.c.bf16 %v13492_v1, %v13492_v1  ;;  %v2103_v36 = vunpack.c.l.b16 %v1802_v15  ;;  %v10648_v1 = vld [vmem:[#allocation9 + $0xae4] ss:$24 sps:$4 sm:$0xff]   ;;  %v13540_v24 = vld [vmem:[#allocation92_spill] sm:$0xff]  ;;  %v10637_v41 = vld [vmem:[#allocation9 + $0x1680] ss:$24 sps:$4 sm:$0xff]  }
 0x1f7   :  { %7858 = vmatprep.subr.bf16.mxu0 %v10627_v52  ;;  %7698 = vmatprep.subr.bf16.mxu1 %v10636_v56  ;;  %v2305_v27 = vsel %vm1986_vm2, %v2261_v21, %v2304_v9  ;;  %v2139_v20 = vsel %vm1982_vm0, %v2097_v58, %v2091_v39  ;;  %v1651_v61 = vsub.f32 %v13536_v8, %v13535_v28  ;;  %v13539_v52 = vld [vmem:[#allocation73_spill] sm:$0xff]  ;;  %v2109_v25 = vunpack.c.l.b16 %v1808_v5  ;;  %v13544_v49 = vld [vmem:[#allocation94_spill] sm:$0xff] }
 0x1f8   :  { %7878 = vmatprep.mubr.bf16.mxu0 %v13070_v46  ;;  %v2306_v7 = vsel %vm1988_vm3, %v2267_v11, %v2305_v27  ;;  %v1657_v22 = vsub.f32 %v13538_v50, %v13537_v6  ;;  %v1663_v60 = vsub.f32 %v13540_v24, %v13539_v52  ;;  %v1820_v15 = vpack.c.bf16 %v13495_v59, %v13495_v59  ;;  %v13542_v56 = vld [vmem:[#allocation93_spill] sm:$0xff]  ;;  %v10646_v54 = vld [vmem:[#allocation9 + $0xae0] ss:$24 sps:$4 sm:$0xff]   ;;  %v10651_v28 = vld [vmem:[#allocation9 + $0x16e4] ss:$24 sps:$4 sm:$0xff]  }
 0x1f9   :  { %v2307_v18 = vsel %vm1990_vm4, %v2273_v33, %v2306_v7  ;;  %v1826_v57 = vpack.c.bf16 %v13498_v42, %v13498_v42  ;;  %v1669_v14 = vsub.f32 %v13542_v56, %v13541_v29  ;;  %v1675_v55 = vsub.f32 %v13544_v49, %v13543_v2  ;;  %v10654_v39 = vld [vmem:[#allocation9 + $0xb14] ss:$24 sps:$4 sm:$0xff]   ;;  %v13546_v9 = vld [vmem:[#allocation82_spill] sm:$0xff]  ;;  %v13547_v27 = vld [vmem:[#allocation83_spill] sm:$0xff] }
 0x1fa   :  { %7859 = vmatpush1.bf16.msra.mxu0 %v10625_v23  ;;  %7699 = vmatpush1.bf16.msra.mxu1 %v10634_v34  ;;  %v2308_v62 = vsel %vm1992_vm5, %v2279_v32, %v2307_v18  ;;  %v2140_v59 = vsel %vm1984_vm1, %v2103_v36, %v2139_v20  ;;  %v1699_v38 = vand.u32 2147483647, %v1651_v61  ;;  %v1832_v42 = vpack.c.bf16 %v13501_v3, %v13501_v3  ;;  %v13545_v33 = vld [vmem:[#allocation81_spill] sm:$0xff]  ;;  %v10660_v8 = vld [vmem:[#allocation9 + $0xb44] ss:$24 sps:$4 sm:$0xff]   ;;  %v13552_v50 = vld [vmem:[#allocation88_spill] sm:$0xff] }
 0x1fb   :  { %7860 = vmatprep.subr.bf16.mxu0 %v10633_v17  ;;  %7700 = vmatprep.subr.bf16.mxu1 %v10642_v63  ;;  %v13098_v30 = vsel %vm1994_vm6, %v2285_v51, %v2308_v62  ;;  %v2115_v21 = vunpack.c.l.b16 %v1814_v35  ;;  %v1705_v11 = vand.u32 2147483647, %v1657_v22  ;;  %v13107_v23 = vand.u32 2147483647, %v1663_v60  ;;  %v10643_v35 = vld [vmem:[#allocation9 + $0x16b0] ss:$24 sps:$4 sm:$0xff]  }
 0x1fc   :  { %v13109_v17 = vunpack.c.l.b16 %v1820_v15  ;;  %v13111_v34 = vunpack.c.l.b16 %v1826_v57  ;;  %v13113_v58 = vand.u32 2147483647, %v1669_v14  ;;  %v1650_v0 = vsub.f32 %v12911_v10, %v13545_v33  ;;  %v10652_v7 = vld [vmem:[#allocation9 + $0xb10] ss:$24 sps:$4 sm:$0xff]   ;;  %v13550_v61 = vld [vmem:[#allocation86_spill] sm:$0xff]  ;;  %v13554_v24 = vld [vmem:[#allocation95_spill] sm:$0xff] }
 0x1fd   :  { %v2141_v63 = vsel %vm1986_vm2, %v2109_v25, %v2140_v59  ;;  %v13118_v32 = vand.u32 2147483647, %v1675_v55  ;;  %v1656_v51 = vsub.f32 %v12913_v37, %v13546_v9  ;;  %v1662_v5 = vsub.f32 %v12915_v43, %v13547_v27  ;;  %v13549_v20 = vld [vmem:[#allocation85_spill] sm:$0xff]  ;;  %v13553_v52 = vld [vmem:[#allocation76_spill] sm:$0xff]  ;;  %v10649_v56 = vld [vmem:[#allocation9 + $0x16e0] ss:$24 sps:$4 sm:$0xff]  }
 0x1fe   :  { %7861 = vmatpush1.bf16.msra.mxu0 %v10631_v31  ;;  %7701 = vmatpush1.bf16.msra.mxu1 %v10640_v26  ;;  %v1843_v31 = vpack.c.bf16 %v1699_v38, %v1699_v38  ;;  %v13548_v26 = vld [vmem:[#allocation84_spill] sm:$0xff]  ;;  %v1674_v10 = vsub.f32 %v12919_v40, %v13549_v20  ;;  %v1698_v18 = vand.u32 2147483647, %v1650_v0  ;;  %v1849_v37 = vpack.c.bf16 %v1705_v11, %v1705_v11  ;;  %v10663_v9 = vld [vmem:[#allocation9 + $0x1744] ss:$24 sps:$4 sm:$0xff]   ;;  %v13555_v27 = vld [vmem:[#allocation77_spill] sm:$0xff] }
 0x1ff   :  { %7862 = vmatprep.subr.bf16.mxu0 %v10639_v13  ;;  %7702 = vmatprep.subr.bf16.mxu1 %v10648_v1  ;;  %v1668_v36 = vsub.f32 %v12917_v19, %v13548_v26  ;;  %v1680_v43 = vsub.f32 %v12921_v45, %v13550_v61  ;;  %v13551_v13 = vld [vmem:[#allocation87_spill] sm:$0xff]  ;;  %v1704_v62 = vand.u32 2147483647, %v1656_v51  ;;  %v2142_v6 = vsel %vm1988_vm3, %v2115_v21, %v2141_v63  ;;  %v10666_v25 = vld [vmem:[#allocation9 + $0xb74] ss:$24 sps:$4 sm:$0xff]  }
 0x200   :  { %v1686_v1 = vsub.f32 %v12935_v12, %v13551_v13  ;;  %v1692_v19 = vsub.f32 %v12940_v53, %v13552_v50  ;;  %v1710_v22 = vand.u32 2147483647, %v1662_v5  ;;  %v1681_v60 = vsub.f32 %v13554_v24, %v13553_v52  ;;  %v10658_v45 = vld [vmem:[#allocation9 + $0xb40] ss:$24 sps:$4 sm:$0xff]   ;;  %v10657_v53 = vld [vmem:[#allocation9 + $0x1714] ss:$24 sps:$4 sm:$0xff]  }
 0x201   :  { %v1716_v40 = vand.u32 2147483647, %v1668_v36  ;;  %v1722_v15 = vand.u32 2147483647, %v1674_v10  ;;  %v1728_v57 = vand.u32 2147483647, %v1680_v43  ;;  %v1855_v12 = vpack.c.bf16 %v13107_v23, %v13107_v23 }
 0x202   :  { %7863 = vmatpush1.bf16.msra.mxu0 %v10637_v41  ;;  %7703 = vmatpush1.bf16.msra.mxu1 %v10646_v54  ;;  %v1734_v29 = vand.u32 2147483647, %v1686_v1  ;;  %v1740_v14 = vand.u32 2147483647, %v1692_v19  ;;  %v1842_v41 = vpack.c.bf16 %v1698_v18, %v1698_v18  ;;  %v2246_v2 = vunpack.c.l.b16 %v1843_v31  ;;  %v10655_v63 = vld [vmem:[#allocation9 + $0x1710] ss:$24 sps:$4 sm:$0xff]  }
 0x203   :  { %7864 = vmatprep.subr.bf16.mxu0 %v10645_v44  ;;  %7704 = vmatprep.subr.bf16.mxu1 %v10654_v39  ;;  %v1848_v44 = vpack.c.bf16 %v1704_v62, %v1704_v62  ;;  %v2252_v49 = vunpack.c.l.b16 %v1849_v37  ;;  %v1854_v55 = vpack.c.bf16 %v1710_v22, %v1710_v22  ;;  %v1860_v54 = vpack.c.bf16 %v1716_v40, %v1716_v40  ;;  %v10664_v51 = vld [vmem:[#allocation9 + $0xb70] ss:$24 sps:$4 sm:$0xff]   ;;  %v13557_v13 = vld [vmem:[#allocation78_spill] sm:$0xff]  ;;  %v10669_v40 = vld [vmem:[#allocation9 + $0x1774] ss:$24 sps:$4 sm:$0xff]  }
 0x204   :  { %v1861_v39 = vpack.c.bf16 %v13113_v58, %v13113_v58  ;;  %v1866_v59 = vpack.c.bf16 %v1722_v15, %v1722_v15  ;;  %v1872_v38 = vpack.c.bf16 %v1728_v57, %v1728_v57  ;;  %v1878_v21 = vpack.c.bf16 %v1734_v29, %v1734_v29  ;;  %v13556_v5 = vld [vmem:[#allocation96_spill] sm:$0xff]  ;;  %v10672_v58 = vld [vmem:[#allocation9 + $0xba4] ss:$24 sps:$4 sm:$0xff]   ;;  %v13558_v1 = vld [vmem:[#allocation97_spill] sm:$0xff] }
 0x205   :  { %v1884_v11 = vpack.c.bf16 %v1740_v14, %v1740_v14  ;;  %v2245_v33 = vunpack.c.l.b16 %v1842_v41  ;;  %v2251_v23 = vunpack.c.l.b16 %v1848_v44  ;;  %v2257_v0 = vunpack.c.l.b16 %v1854_v55  ;;  %v10670_v52 = vld [vmem:[#allocation9 + $0xba0] ss:$24 sps:$4 sm:$0xff]   ;;  %v10667_v14 = vld [vmem:[#allocation9 + $0x1770] ss:$24 sps:$4 sm:$0xff]   ;;  %v10675_v41 = vld [vmem:[#allocation9 + $0x17a4] ss:$24 sps:$4 sm:$0xff]  }
 0x206   :  { %7865 = vmatpush1.bf16.msra.mxu0 %v10643_v35  ;;  %7705 = vmatpush1.bf16.msra.mxu1 %v10652_v7  ;;  %v1687_v35 = vsub.f32 %v13556_v5, %v13555_v27  ;;  %v2258_v7 = vunpack.c.l.b16 %v1855_v12  ;;  %v2263_v31 = vunpack.c.l.b16 %v1860_v54  ;;  %v2269_v26 = vunpack.c.l.b16 %v1866_v59  ;;  %v10676_v44 = vld [vmem:[#allocation9 + $0xbd0] ss:$24 sps:$4 sm:$0xff]   ;;  %v10681_v59 = vld [vmem:[#allocation9 + $0x17d4] ss:$24 sps:$4 sm:$0xff]  }
 0x207   :  { %7866 = vmatprep.subr.bf16.mxu0 %v10651_v28  ;;  %7706 = vmatprep.subr.bf16.mxu1 %v10660_v8  ;;  %v1729_v36 = vand.u32 2147483647, %v1681_v60  ;;  %v2324_v20 = vsel %vm1982_vm0, %v2252_v49, %v2246_v2  ;;  %v2275_v10 = vunpack.c.l.b16 %v1872_v38  ;;  %v2317_v18 = vsel %vm1982_vm0, %v2251_v23, %v2245_v33  ;;  %v10661_v28 = vld [vmem:[#allocation9 + $0x1740] ss:$24 sps:$4 sm:$0xff]   ;;  %v10678_v60 = vld [vmem:[#allocation9 + $0xbd4] ss:$24 sps:$4 sm:$0xff]  }
 0x208   :  { %v2143_v8 = vsel %vm1990_vm4, %v13109_v17, %v2142_v6  ;;  %v1867_v37 = vpack.c.bf16 %v13118_v32, %v13118_v32  ;;  %v2281_v61 = vunpack.c.l.b16 %v1878_v21  ;;  %v2318_v43 = vsel %vm1984_vm1, %v2257_v0, %v2317_v18  ;;  %v10685_v38 = vld [vmem:[#allocation9 + $0x8] ss:$24 sps:$4 sm:$0xff]   ;;  %v10699_v27 = vld [vmem:[#allocation9 + $0x6c] ss:$24 sps:$4 sm:$0xff]   ;;  %v13559_v5 = vld [vmem:[#allocation29_spill] sm:$0xff] }
 0x209   :  { %v1693_v62 = vsub.f32 %v13558_v1, %v13557_v13  ;;  %v2264_v50 = vunpack.c.l.b16 %v1861_v39  ;;  %v2287_v19 = vunpack.c.l.b16 %v1884_v11  ;;  %v2319_v22 = vsel %vm1986_vm2, %v2263_v31, %v2318_v43  ;;  %v10673_v39 = vld [vmem:[#allocation9 + $0x17a0] ss:$24 sps:$4 sm:$0xff]   ;;  %v10693_v11 = vld [vmem:[#allocation9 + $0x3c] ss:$24 sps:$4 sm:$0xff]   ;;  %v10679_v0 = vld [vmem:[#allocation9 + $0x17d0] ss:$24 sps:$4 sm:$0xff]  }
 0x20a   :  { %7867 = vmatpush1.bf16.msra.mxu0 %v10649_v56  ;;  %7707 = vmatpush1.bf16.msra.mxu1 %v10658_v45  ;;  %v2133_v17 = vunpack.c.l.b16 %v1832_v42  ;;  %v1735_v6 = vand.u32 2147483647, %v1687_v35  ;;  %v2325_v32 = vsel %vm1984_vm1, %v2258_v7, %v2324_v20  ;;  %v2320_v24 = vsel %vm1988_vm3, %v2269_v26, %v2319_v22  ;;  %v10682_v31 = vld [vmem:[#allocation9 + $0x1800] ss:$24 sps:$4 sm:$0xff]   ;;  %v10690_v26 = vld [vmem:[#allocation9 + $0x1834] ss:$24 sps:$4 sm:$0xff]  }
 0x20b   :  { %7868 = vmatprep.subr.bf16.mxu0 %v10657_v53  ;;  %7708 = vmatprep.subr.bf16.mxu1 %v10666_v25  ;;  %v2144_v15 = vsel %vm1992_vm5, %v13111_v34, %v2143_v8  ;;  %v1873_v57 = vpack.c.bf16 %v1729_v36, %v1729_v36  ;;  %v2321_v29 = vsel %vm1990_vm4, %v2275_v10, %v2320_v24  ;;  %v2270_v56 = vunpack.c.l.b16 %v1867_v37  ;;  %v10687_v25 = vld [vmem:[#allocation9 + $0xc] ss:$24 sps:$4 sm:$0xff]   ;;  %v10705_v36 = vld [vmem:[#allocation9 + $0x9c] ss:$24 sps:$4 sm:$0xff]   ;;  %v10688_v10 = vld [vmem:[#allocation9 + $0x1830] ss:$24 sps:$4 sm:$0xff]  }
 0x20c   :  { %v2322_v45 = vsel %vm1992_vm5, %v2281_v61, %v2321_v29  ;;  %v1741_v12 = vand.u32 2147483647, %v1693_v62  ;;  %v2326_v3 = vsel %vm1986_vm2, %v2264_v50, %v2325_v32  ;;  %v2145_v53 = vsel %vm1994_vm6, %v2133_v17, %v2144_v15  ;;  %v10696_v18 = vld [vmem:[#allocation9 + $0x1864] ss:$24 sps:$4 sm:$0xff]   ;;  %v10694_v8 = vld [vmem:[#allocation9 + $0x1860] ss:$24 sps:$4 sm:$0xff]  }
 0x20d   :  { %v13164_v42 = vsel %vm1994_vm6, %v2287_v19, %v2322_v45  ;;  %v1879_v34 = vpack.c.bf16 %v1735_v6, %v1735_v6  ;;  %v2276_v2 = vunpack.c.l.b16 %v1873_v57  ;;  %v2327_v49 = vsel %vm1988_vm3, %v2270_v56, %v2326_v3  ;;  %v10702_v37 = vld [vmem:[#allocation9 + $0x1894] ss:$24 sps:$4 sm:$0xff]   ;;  %v10709_v61 = vld [vmem:[#allocation9 + $0xc8] ss:$24 sps:$4 sm:$0xff]   ;;  %v10708_v1 = vld [vmem:[#allocation9 + $0x18c4] ss:$24 sps:$4 sm:$0xff]  }
 0x20e   :  { %7869 = vmatpush1.bf16.msra.mxu0 %v10655_v63  ;;  %7709 = vmatpush1.bf16.msra.mxu1 %v10664_v51  ;;  %v13168_v55 = vpack.c.b16 %v2145_v53, %v2145_v53  ;;  %v1885_v54 = vpack.c.bf16 %v1741_v12, %v1741_v12  ;;  %v10684_v63 = vld [vmem:[#allocation9 + $0x1804] ss:$24 sps:$4 sm:$0xff]   ;;  %v13176_v35 = vpack.c.b16 %v13098_v30, %v13098_v30  ;;  %v10703_v30 = vld [vmem:[#allocation9 + $0x98] ss:$24 sps:$4 sm:$0xff]   ;;  %v10714_v22 = vld [vmem:[#allocation9 + $0x18f4] ss:$24 sps:$4 sm:$0xff]  }
 0x20f   :  { %7870 = vmatprep.subr.bf16.mxu0 %v10663_v9  ;;  %7710 = vmatprep.subr.bf16.mxu1 %v10672_v58  ;;  %v2282_v21 = vunpack.c.l.b16 %v1879_v34  ;;  %v2328_v33 = vsel %vm1990_vm4, %v2276_v2, %v2327_v49  ;;  %v10691_v9 = vld [vmem:[#allocation9 + $0x38] ss:$24 sps:$4 sm:$0xff]   ;;  %v10697_v58 = vld [vmem:[#allocation9 + $0x68] ss:$24 sps:$4 sm:$0xff]   ;;  %v10717_v43 = vld [vmem:[#allocation9 + $0xfc] ss:$24 sps:$4 sm:$0xff]  }
 0x210   :  { %v2288_v23 = vunpack.c.l.b16 %v1885_v54  ;;  %v10700_v13 = vld [vmem:[#allocation9 + $0x1890] ss:$24 sps:$4 sm:$0xff]   ;;  %v10723_v50 = vld [vmem:[#allocation9 + $0x12c] ss:$24 sps:$4 sm:$0xff]   ;;  %v10706_v19 = vld [vmem:[#allocation9 + $0x18c0] ss:$24 sps:$4 sm:$0xff]  }
 0x211   :  { %v2329_v51 = vsel %vm1992_vm5, %v2282_v21, %v2328_v33  ;;  %v10715_v62 = vld [vmem:[#allocation9 + $0xf8] ss:$24 sps:$4 sm:$0xff]   ;;  %v10720_v6 = vld [vmem:[#allocation9 + $0x1924] ss:$24 sps:$4 sm:$0xff]   ;;  %v10726_v15 = vld [vmem:[#allocation9 + $0x1954] ss:$24 sps:$4 sm:$0xff]  }
 0x212   :  { %7871 = vmatpush1.bf16.msra.mxu0 %v10661_v28  ;;  %7711 = vmatpush1.bf16.msra.mxu1 %v10670_v52  ;;  %v2330_v7 = vsel %vm1994_vm6, %v2288_v23, %v2329_v51  ;;  %v10711_v28 = vld [vmem:[#allocation9 + $0xcc] ss:$24 sps:$4 sm:$0xff]   ;;  %v10729_v52 = vld [vmem:[#allocation9 + $0x15c] ss:$24 sps:$4 sm:$0xff]   ;;  %v10712_v17 = vld [vmem:[#allocation9 + $0x18f0] ss:$24 sps:$4 sm:$0xff]  }
 0x213   :  { %7872 = vmatprep.subr.bf16.mxu0 %v10669_v40  ;;  %7712 = vmatprep.subr.bf16.mxu1 %v10678_v60  ;;  %v13179_v20 = vpack.c.b16 %v2330_v7, %v2330_v7  ;;  %v10721_v40 = vld [vmem:[#allocation9 + $0x128] ss:$24 sps:$4 sm:$0xff]   ;;  %v10727_v32 = vld [vmem:[#allocation9 + $0x158] ss:$24 sps:$4 sm:$0xff]   ;;  %v10735_v24 = vld [vmem:[#allocation9 + $0x18c] ss:$24 sps:$4 sm:$0xff]  }
 0x214   :  { %v10718_v60 = vld [vmem:[#allocation9 + $0x1920] ss:$24 sps:$4 sm:$0xff]   ;;  %v10741_v29 = vld [vmem:[#allocation9 + $0x1bc] ss:$24 sps:$4 sm:$0xff]   ;;  %v10724_v56 = vld [vmem:[#allocation9 + $0x1950] ss:$24 sps:$4 sm:$0xff]  }
 0x215   :  { %v10733_v57 = vld [vmem:[#allocation9 + $0x188] ss:$24 sps:$4 sm:$0xff]   ;;  %v10732_v45 = vld [vmem:[#allocation9 + $0x1984] ss:$24 sps:$4 sm:$0xff]   ;;  %v10739_v12 = vld [vmem:[#allocation9 + $0x1b8] ss:$24 sps:$4 sm:$0xff]  }
 0x216   :  { %7873 = vmatpush1.bf16.msra.mxu0 %v10667_v14  ;;  %7713 = vmatpush1.bf16.msra.mxu1 %v10676_v44  ;;  %v10747_v3 = vld [vmem:[#allocation9 + $0x1ec] ss:$24 sps:$4 sm:$0xff]   ;;  %v10730_v14 = vld [vmem:[#allocation9 + $0x1980] ss:$24 sps:$4 sm:$0xff]   ;;  %v10753_v53 = vld [vmem:[#allocation9 + $0x21c] ss:$24 sps:$4 sm:$0xff]  }
 0x217   :  { %7874 = vmatprep.subr.bf16.mxu0 %v10675_v41  ;;  %7928 = vmatprep.subr.bf16.mxu1 %v10687_v25  ;;  %v10738_v41 = vld [vmem:[#allocation9 + $0x19b4] ss:$24 sps:$4 sm:$0xff]   ;;  %v10745_v44 = vld [vmem:[#allocation9 + $0x1e8] ss:$24 sps:$4 sm:$0xff]   ;;  %v10744_v25 = vld [vmem:[#allocation9 + $0x19e4] ss:$24 sps:$4 sm:$0xff]  }
 0x218   :  { %v10736_v34 = vld [vmem:[#allocation9 + $0x19b0] ss:$24 sps:$4 sm:$0xff]   ;;  %v10759_v49 = vld [vmem:[#allocation9 + $0x24c] ss:$24 sps:$4 sm:$0xff]   ;;  %v10742_v54 = vld [vmem:[#allocation9 + $0x19e0] ss:$24 sps:$4 sm:$0xff]  }
 0x219   :  { %7715 = vmatmul.mubr.bf16.vlgmr.msra.gmra.mrb[0].mxu1 %v13168_v55  ;;  %v10751_v2 = vld [vmem:[#allocation9 + $0x218] ss:$24 sps:$4 sm:$0xff]   ;;  %v10771_v23 = vld [vmem:[#allocation9 + $0x2ac] ss:$24 sps:$4 sm:$0xff]   ;;  %v10777_v51 = vld [vmem:[#allocation9 + $0x2dc] ss:$24 sps:$4 sm:$0xff]  }
 0x21a   :  { %7875 = vmatpush1.bf16.msra.mxu0 %v10673_v39  ;;  %7929 = vmatpush1.bf16.msra.mxu1 %v10685_v38  ;;  %v10750_v39 = vld [vmem:[#allocation9 + $0x1a14] ss:$24 sps:$4 sm:$0xff]   ;;  %v10748_v21 = vld [vmem:[#allocation9 + $0x1a10] ss:$24 sps:$4 sm:$0xff]   ;;  %v10768_v7 = vld [vmem:[#allocation9 + $0x1aa4] ss:$24 sps:$4 sm:$0xff]  }
 0x21b   :  { %7876 = vmatprep.subr.bf16.mxu0 %v10681_v59  ;;  %7930 = vmatprep.subr.bf16.mxu1 %v10693_v11  ;;  %v10757_v59 = vld [vmem:[#allocation9 + $0x248] ss:$24 sps:$4 sm:$0xff]   ;;  %v10765_v38 = vld [vmem:[#allocation9 + $0x27c] ss:$24 sps:$4 sm:$0xff]   ;;  %v10763_v33 = vld [vmem:[#allocation9 + $0x278] ss:$24 sps:$4 sm:$0xff]  }
 0x21c   :  { %7960 = vmatprep.mubr.bf16.mxu1 %v13559_v5  ;;  %v10756_v11 = vld [vmem:[#allocation9 + $0x1a44] ss:$24 sps:$4 sm:$0xff]  }
 0x21e   :  { %7877 = vmatpush1.bf16.msra.mxu0 %v10679_v0  ;;  %7931 = vmatpush1.bf16.msra.mxu1 %v10691_v9  ;;  %v10754_v0 = vld [vmem:[#allocation9 + $0x1a40] ss:$24 sps:$4 sm:$0xff]  }
 0x21f   :  { %7887 = vmatprep.subr.bf16.mxu0 %v10684_v63  ;;  %7932 = vmatprep.subr.bf16.mxu1 %v10699_v27  ;;  %v10762_v63 = vld [vmem:[#allocation9 + $0x1a74] ss:$24 sps:$4 sm:$0xff]   ;;  %v10769_v9 = vld [vmem:[#allocation9 + $0x2a8] ss:$24 sps:$4 sm:$0xff]  }
 0x220   :  { %v10760_v27 = vld [vmem:[#allocation9 + $0x1a70] ss:$24 sps:$4 sm:$0xff]  }
 0x221   :  { %7879 = vmatmul.mubr.bf16.vlgmr.msra.gmra.mrb[0].mxu0 %v13176_v35 }
 0x222   :  { %7888 = vmatpush1.bf16.msra.mxu0 %v10682_v31  ;;  %7933 = vmatpush1.bf16.msra.mxu1 %v10697_v58  ;;  %v10775_v31 = vld [vmem:[#allocation9 + $0x2d8] ss:$24 sps:$4 sm:$0xff]  }
 0x223   :  { %7889 = vmatprep.subr.bf16.mxu0 %v10690_v26  ;;  %7934 = vmatprep.subr.bf16.mxu1 %v10705_v36  ;;  %v10780_v26 = vld [vmem:[#allocation9 + $0x30c] ss:$24 sps:$4 sm:$0xff]   ;;  %v10766_v58 = vld [vmem:[#allocation9 + $0x1aa0] ss:$24 sps:$4 sm:$0xff]  }
 0x224   :  { %7919 = vmatprep.mubr.bf16.mxu0 %v13179_v20  ;;  %v10774_v36 = vld [vmem:[#allocation9 + $0x1ad4] ss:$24 sps:$4 sm:$0xff]  }
 0x226   :  { %7890 = vmatpush1.bf16.msra.mxu0 %v10688_v10  ;;  %7935 = vmatpush1.bf16.msra.mxu1 %v10703_v30  ;;  %v10778_v10 = vld [vmem:[#allocation9 + $0x308] ss:$24 sps:$4 sm:$0xff]  }
 0x227   :  { %7891 = vmatprep.subr.bf16.mxu0 %v10696_v18  ;;  %7936 = vmatprep.subr.bf16.mxu1 %v10711_v28  ;;  %v10786_v18 = vld [vmem:[#allocation9 + $0x33c] ss:$24 sps:$4 sm:$0xff]   ;;  %v13560_v30 = vld [vmem:[#allocation52_spill] sm:$0xff] }
 0x228   :  { %v10772_v28 = vld [vmem:[#allocation9 + $0x1ad0] ss:$24 sps:$4 sm:$0xff]  }
 0x22a   :  { %7892 = vmatpush1.bf16.msra.mxu0 %v10694_v8  ;;  %7937 = vmatpush1.bf16.msra.mxu1 %v10709_v61  ;;  %v10783_v8 = vld [vmem:[#allocation9 + $0x14] ss:$24 sps:$4 sm:$0xff]  }
 0x22b   :  { %7893 = vmatprep.subr.bf16.mxu0 %v10702_v37  ;;  %7938 = vmatprep.subr.bf16.mxu1 %v10717_v43  ;;  %v10784_v37 = vld [vmem:[#allocation9 + $0x338] ss:$24 sps:$4 sm:$0xff]   ;;  %v10792_v61 = vld [vmem:[#allocation9 + $0x36c] ss:$24 sps:$4 sm:$0xff]  }
 0x22c   :  { %v13561_v43 = vld [vmem:[#allocation70_spill] sm:$0xff] }
 0x22e   :  { %7894 = vmatpush1.bf16.msra.mxu0 %v10700_v13  ;;  %7939 = vmatpush1.bf16.msra.mxu1 %v10715_v62  ;;  %v13187_v13 = vpack.c.b16 %v13164_v42, %v13164_v42  ;;  %v10789_v62 = vld [vmem:[#allocation9 + $0x44] ss:$24 sps:$4 sm:$0xff]   ;;  %v10793_v42 = vld [vmem:[#allocation9 + $0x70] ss:$24 sps:$4 sm:$0xff]  }
 0x22f   :  { %7895 = vmatprep.subr.bf16.mxu0 %v10708_v1  ;;  %7940 = vmatprep.subr.bf16.mxu1 %v10723_v50  ;;  %v10781_v1 = vld [vmem:[#allocation9 + $0x10] ss:$24 sps:$4 sm:$0xff]  }
 0x230   :  { %v10790_v50 = vld [vmem:[#allocation9 + $0x368] ss:$24 sps:$4 sm:$0xff]  }
 0x232   :  { %7896 = vmatpush1.bf16.msra.mxu0 %v10706_v19  ;;  %7941 = vmatpush1.bf16.msra.mxu1 %v10721_v40  ;;  %v10798_v19 = vld [vmem:[#allocation9 + $0x39c] ss:$24 sps:$4 sm:$0xff]  }
 0x233   :  { %7897 = vmatprep.subr.bf16.mxu0 %v10714_v22  ;;  %7942 = vmatprep.subr.bf16.mxu1 %v10729_v52  ;;  %v10787_v22 = vld [vmem:[#allocation9 + $0x40] ss:$24 sps:$4 sm:$0xff]   ;;  %v10795_v40 = vld [vmem:[#allocation9 + $0x74] ss:$24 sps:$4 sm:$0xff]  }
 0x234   :  { %v10796_v52 = vld [vmem:[#allocation9 + $0x398] ss:$24 sps:$4 sm:$0xff]  }
 0x236   :  { %7898 = vmatpush1.bf16.msra.mxu0 %v10712_v17  ;;  %7943 = vmatpush1.bf16.msra.mxu1 %v10727_v32  ;;  %v10804_v17 = vld [vmem:[#allocation9 + $0x3cc] ss:$24 sps:$4 sm:$0xff]   ;;  %v10802_v32 = vld [vmem:[#allocation9 + $0x3c8] ss:$24 sps:$4 sm:$0xff]  }
 0x237   :  { %7899 = vmatprep.subr.bf16.mxu0 %v10720_v6  ;;  %7944 = vmatprep.subr.bf16.mxu1 %v10735_v24  ;;  %v10801_v6 = vld [vmem:[#allocation9 + $0xa4] ss:$24 sps:$4 sm:$0xff]  }
 0x238   :  { %v10810_v24 = vld [vmem:[#allocation9 + $0x3fc] ss:$24 sps:$4 sm:$0xff]  }
 0x23a   :  { %7900 = vmatpush1.bf16.msra.mxu0 %v10718_v60  ;;  %7945 = vmatpush1.bf16.msra.mxu1 %v10733_v57  ;;  %v10799_v60 = vld [vmem:[#allocation9 + $0xa0] ss:$24 sps:$4 sm:$0xff]  }
 0x23b   :  { %7901 = vmatprep.subr.bf16.mxu0 %v10726_v15  ;;  %7946 = vmatprep.subr.bf16.mxu1 %v10741_v29  ;;  %v10807_v15 = vld [vmem:[#allocation9 + $0xd4] ss:$24 sps:$4 sm:$0xff]   ;;  %v10808_v57 = vld [vmem:[#allocation9 + $0x3f8] ss:$24 sps:$4 sm:$0xff]  }
 0x23c   :  { %v10816_v29 = vld [vmem:[#allocation9 + $0x42c] ss:$24 sps:$4 sm:$0xff]  }
 0x23e   :  { %7902 = vmatpush1.bf16.msra.mxu0 %v10724_v56  ;;  %7947 = vmatpush1.bf16.msra.mxu1 %v10739_v12  ;;  %v10805_v56 = vld [vmem:[#allocation9 + $0xd0] ss:$24 sps:$4 sm:$0xff]   ;;  %v10822_v12 = vld [vmem:[#allocation9 + $0x45c] ss:$24 sps:$4 sm:$0xff]  }
 0x23f   :  { %7903 = vmatprep.subr.bf16.mxu0 %v10732_v45  ;;  %7948 = vmatprep.subr.bf16.mxu1 %v10747_v3  ;;  %v10813_v45 = vld [vmem:[#allocation9 + $0x104] ss:$24 sps:$4 sm:$0xff]   ;;  %v10811_v3 = vld [vmem:[#allocation9 + $0x100] ss:$24 sps:$4 sm:$0xff]  }
 0x242   :  { %7904 = vmatpush1.bf16.msra.mxu0 %v10730_v14  ;;  %7949 = vmatpush1.bf16.msra.mxu1 %v10745_v44  ;;  %v10820_v14 = vld [vmem:[#allocation9 + $0x458] ss:$24 sps:$4 sm:$0xff]   ;;  %v10828_v44 = vld [vmem:[#allocation9 + $0x48c] ss:$24 sps:$4 sm:$0xff]  }
 0x243   :  { %7905 = vmatprep.subr.bf16.mxu0 %v10738_v41  ;;  %7950 = vmatprep.subr.bf16.mxu1 %v10753_v53  ;;  %v10819_v41 = vld [vmem:[#allocation9 + $0x134] ss:$24 sps:$4 sm:$0xff]   ;;  %v10817_v53 = vld [vmem:[#allocation9 + $0x130] ss:$24 sps:$4 sm:$0xff]  }
 0x246   :  { %7906 = vmatpush1.bf16.msra.mxu0 %v10736_v34  ;;  %7951 = vmatpush1.bf16.msra.mxu1 %v10751_v2  ;;  %v10825_v34 = vld [vmem:[#allocation9 + $0x164] ss:$24 sps:$4 sm:$0xff]  }
 0x247   :  { %7907 = vmatprep.subr.bf16.mxu0 %v10744_v25  ;;  %7952 = vmatprep.subr.bf16.mxu1 %v10759_v49  ;;  %v10826_v25 = vld [vmem:[#allocation9 + $0x488] ss:$24 sps:$4 sm:$0xff]   ;;  %v10834_v2 = vld [vmem:[#allocation9 + $0x4bc] ss:$24 sps:$4 sm:$0xff]  }
 0x248   :  { %v10823_v49 = vld [vmem:[#allocation9 + $0x160] ss:$24 sps:$4 sm:$0xff]  }
 0x24a   :  { %7908 = vmatpush1.bf16.msra.mxu0 %v10742_v54  ;;  %7953 = vmatpush1.bf16.msra.mxu1 %v10757_v59  ;;  %v10831_v54 = vld [vmem:[#allocation9 + $0x194] ss:$24 sps:$4 sm:$0xff]  }
 0x24b   :  { %7909 = vmatprep.subr.bf16.mxu0 %v10750_v39  ;;  %7954 = vmatprep.subr.bf16.mxu1 %v10765_v38  ;;  %v10832_v39 = vld [vmem:[#allocation9 + $0x4b8] ss:$24 sps:$4 sm:$0xff]   ;;  %v10840_v59 = vld [vmem:[#allocation9 + $0x4ec] ss:$24 sps:$4 sm:$0xff]  }
 0x24c   :  { %v10829_v38 = vld [vmem:[#allocation9 + $0x190] ss:$24 sps:$4 sm:$0xff]  }
 0x24e   :  { %7910 = vmatpush1.bf16.msra.mxu0 %v10748_v21  ;;  %7955 = vmatpush1.bf16.msra.mxu1 %v10763_v33  ;;  %v10837_v21 = vld [vmem:[#allocation9 + $0x1c4] ss:$24 sps:$4 sm:$0xff]  }
 0x24f   :  { %7911 = vmatprep.subr.bf16.mxu0 %v10756_v11  ;;  %7956 = vmatprep.subr.bf16.mxu1 %v10771_v23  ;;  %v10838_v11 = vld [vmem:[#allocation9 + $0x4e8] ss:$24 sps:$4 sm:$0xff]   ;;  %v10846_v33 = vld [vmem:[#allocation9 + $0x51c] ss:$24 sps:$4 sm:$0xff]  }
 0x250   :  { %v10835_v23 = vld [vmem:[#allocation9 + $0x1c0] ss:$24 sps:$4 sm:$0xff]  }
 0x252   :  { %7912 = vmatpush1.bf16.msra.mxu0 %v10754_v0  ;;  %7957 = vmatpush1.bf16.msra.mxu1 %v10769_v9  ;;  %v10843_v0 = vld [vmem:[#allocation9 + $0x1f4] ss:$24 sps:$4 sm:$0xff]  }
 0x253   :  { %7913 = vmatprep.subr.bf16.mxu0 %v10762_v63  ;;  %7958 = vmatprep.subr.bf16.mxu1 %v10777_v51  ;;  %v10844_v63 = vld [vmem:[#allocation9 + $0x518] ss:$24 sps:$4 sm:$0xff]   ;;  %v10852_v9 = vld [vmem:[#allocation9 + $0x54c] ss:$24 sps:$4 sm:$0xff]  }
 0x254   :  { %v10841_v51 = vld [vmem:[#allocation9 + $0x1f0] ss:$24 sps:$4 sm:$0xff]  }
 0x256   :  { %7914 = vmatpush1.bf16.msra.mxu0 %v10760_v27  ;;  %7959 = vmatpush1.bf16.msra.mxu1 %v10775_v31  ;;  %v10849_v27 = vld [vmem:[#allocation9 + $0x224] ss:$24 sps:$4 sm:$0xff]  }
 0x257   :  { %7915 = vmatprep.subr.bf16.mxu0 %v10768_v7  ;;  %7969 = vmatprep.subr.bf16.mxu1 %v10780_v26  ;;  %v10850_v7 = vld [vmem:[#allocation9 + $0x548] ss:$24 sps:$4 sm:$0xff]   ;;  %v10858_v31 = vld [vmem:[#allocation9 + $0x57c] ss:$24 sps:$4 sm:$0xff]  }
 0x258   :  { %v10847_v26 = vld [vmem:[#allocation9 + $0x220] ss:$24 sps:$4 sm:$0xff]  }
 0x259   :  { %7961 = vmatmul.mubr.bf16.vlgmr.msra.gmra.mrb[4].mxu1 %v13560_v30 }
 0x25a   :  { %7916 = vmatpush1.bf16.msra.mxu0 %v10766_v58  ;;  %7970 = vmatpush1.bf16.msra.mxu1 %v10778_v10  ;;  %v10855_v58 = vld [vmem:[#allocation9 + $0x254] ss:$24 sps:$4 sm:$0xff]  }
 0x25b   :  { %7917 = vmatprep.subr.bf16.mxu0 %v10774_v36  ;;  %7971 = vmatprep.subr.bf16.mxu1 %v10786_v18  ;;  %v10856_v36 = vld [vmem:[#allocation9 + $0x578] ss:$24 sps:$4 sm:$0xff]   ;;  %v10864_v10 = vld [vmem:[#allocation9 + $0x5ac] ss:$24 sps:$4 sm:$0xff]  }
 0x25c   :  { %8001 = vmatprep.mubr.bf16.mxu1 %v13561_v43  ;;  %v10853_v18 = vld [vmem:[#allocation9 + $0x250] ss:$24 sps:$4 sm:$0xff]  }
 0x25e   :  { %7918 = vmatpush1.bf16.msra.mxu0 %v10772_v28  ;;  %7972 = vmatpush1.bf16.msra.mxu1 %v10784_v37  ;;  %v10861_v28 = vld [vmem:[#allocation9 + $0x284] ss:$24 sps:$4 sm:$0xff]  }
 0x25f   :  { %8297 = vmatprep.subr.bf16.mxu0 %v10783_v8  ;;  %7973 = vmatprep.subr.bf16.mxu1 %v10792_v61  ;;  %v10862_v8 = vld [vmem:[#allocation9 + $0x5a8] ss:$24 sps:$4 sm:$0xff]   ;;  %v10870_v37 = vld [vmem:[#allocation9 + $0x5dc] ss:$24 sps:$4 sm:$0xff]  }
 0x260   :  { %v10859_v61 = vld [vmem:[#allocation9 + $0x280] ss:$24 sps:$4 sm:$0xff]  }
 0x261   :  { %7920 = vmatmul.mubr.bf16.vlgmr.msra.gmra.mrb[0].mxu0 %v13187_v13 }
 0x262   :  { %8298 = vmatpush1.bf16.msra.mxu0 %v10781_v1  ;;  %7974 = vmatpush1.bf16.msra.mxu1 %v10790_v50  ;;  %v10867_v1 = vld [vmem:[#allocation9 + $0x2b4] ss:$24 sps:$4 sm:$0xff]  }
 0x263   :  { %8299 = vmatprep.subr.bf16.mxu0 %v10789_v62  ;;  %7975 = vmatprep.subr.bf16.mxu1 %v10798_v19  ;;  %v10868_v62 = vld [vmem:[#allocation9 + $0x5d8] ss:$24 sps:$4 sm:$0xff]   ;;  %v10876_v50 = vld [vmem:[#allocation9 + $0x60c] ss:$24 sps:$4 sm:$0xff]  }
 0x264   :  { %8329 = vmatprep.mubr.bf16.mxu0 %v13559_v5  ;;  %v10814_v5 = vld [vmem:[#allocation9 + $0x428] ss:$24 sps:$4 sm:$0xff]  }
 0x265   :  { %v10865_v19 = vld [vmem:[#allocation9 + $0x2b0] ss:$24 sps:$4 sm:$0xff]  }
 0x266   :  { %8300 = vmatpush1.bf16.msra.mxu0 %v10787_v22  ;;  %7976 = vmatpush1.bf16.msra.mxu1 %v10796_v52  ;;  %v10873_v22 = vld [vmem:[#allocation9 + $0x2e4] ss:$24 sps:$4 sm:$0xff]  }
 0x267   :  { %8301 = vmatprep.subr.bf16.mxu0 %v10795_v40  ;;  %7977 = vmatprep.subr.bf16.mxu1 %v10804_v17  ;;  %v10874_v40 = vld [vmem:[#allocation9 + $0x608] ss:$24 sps:$4 sm:$0xff]   ;;  %v10882_v52 = vld [vmem:[#allocation9 + $0x63c] ss:$24 sps:$4 sm:$0xff]  }
 0x268   :  { %v13562_v17 = vld [vmem:[#allocation80_spill] sm:$0xff] }
 0x26a   :  { %8302 = vmatpush1.bf16.msra.mxu0 %v10793_v42  ;;  %7978 = vmatpush1.bf16.msra.mxu1 %v10802_v32  ;;  %v10871_v42 = vld [vmem:[#allocation9 + $0x2e0] ss:$24 sps:$4 sm:$0xff]  }
 0x26b   :  { %8303 = vmatprep.subr.bf16.mxu0 %v10801_v6  ;;  %7979 = vmatprep.subr.bf16.mxu1 %v10810_v24  ;;  %v10879_v6 = vld [vmem:[#allocation9 + $0x314] ss:$24 sps:$4 sm:$0xff]   ;;  %v10880_v32 = vld [vmem:[#allocation9 + $0x638] ss:$24 sps:$4 sm:$0xff]  }
 0x26c   :  { %v10888_v24 = vld [vmem:[#allocation9 + $0x66c] ss:$24 sps:$4 sm:$0xff]  }
 0x26e   :  { %8304 = vmatpush1.bf16.msra.mxu0 %v10799_v60  ;;  %7980 = vmatpush1.bf16.msra.mxu1 %v10808_v57  ;;  %v13563_v60 = vld [vmem:[#allocation98_spill] sm:$0xff] }
 0x26f   :  { %8305 = vmatprep.subr.bf16.mxu0 %v10807_v15  ;;  %7981 = vmatprep.subr.bf16.mxu1 %v10816_v29  ;;  %v10877_v15 = vld [vmem:[#allocation9 + $0x310] ss:$24 sps:$4 sm:$0xff]   ;;  %v10885_v57 = vld [vmem:[#allocation9 + $0x344] ss:$24 sps:$4 sm:$0xff]  }
 0x270   :  { %v10886_v29 = vld [vmem:[#allocation9 + $0x668] ss:$24 sps:$4 sm:$0xff]  }
 0x272   :  { %8306 = vmatpush1.bf16.msra.mxu0 %v10805_v56  ;;  %7982 = vmatpush1.bf16.msra.mxu1 %v10814_v5  ;;  %v10894_v56 = vld [vmem:[#allocation9 + $0x69c] ss:$24 sps:$4 sm:$0xff]  }
 0x273   :  { %8307 = vmatprep.subr.bf16.mxu0 %v10813_v45  ;;  %7983 = vmatprep.subr.bf16.mxu1 %v10822_v12  ;;  %v10883_v45 = vld [vmem:[#allocation9 + $0x340] ss:$24 sps:$4 sm:$0xff]   ;;  %v10891_v5 = vld [vmem:[#allocation9 + $0x374] ss:$24 sps:$4 sm:$0xff]  }
 0x274   :  { %v10892_v12 = vld [vmem:[#allocation9 + $0x698] ss:$24 sps:$4 sm:$0xff]  }
 0x276   :  { %8308 = vmatpush1.bf16.msra.mxu0 %v10811_v3  ;;  %7984 = vmatpush1.bf16.msra.mxu1 %v10820_v14  ;;  %v10900_v3 = vld [vmem:[#allocation9 + $0x6cc] ss:$24 sps:$4 sm:$0xff]   ;;  %v10889_v14 = vld [vmem:[#allocation9 + $0x370] ss:$24 sps:$4 sm:$0xff]  }
 0x277   :  { %8309 = vmatprep.subr.bf16.mxu0 %v10819_v41  ;;  %7985 = vmatprep.subr.bf16.mxu1 %v10828_v44  ;;  %v10897_v41 = vld [vmem:[#allocation9 + $0x3a4] ss:$24 sps:$4 sm:$0xff]   ;;  %v10898_v44 = vld [vmem:[#allocation9 + $0x6c8] ss:$24 sps:$4 sm:$0xff]  }
 0x27a   :  { %8310 = vmatpush1.bf16.msra.mxu0 %v10817_v53  ;;  %7986 = vmatpush1.bf16.msra.mxu1 %v10826_v25  ;;  %v10906_v53 = vld [vmem:[#allocation9 + $0x6fc] ss:$24 sps:$4 sm:$0xff]  }
 0x27b   :  { %8311 = vmatprep.subr.bf16.mxu0 %v10825_v34  ;;  %7987 = vmatprep.subr.bf16.mxu1 %v10834_v2  ;;  %v10904_v34 = vld [vmem:[#allocation9 + $0x6f8] ss:$24 sps:$4 sm:$0xff]   ;;  %v10903_v25 = vld [vmem:[#allocation9 + $0x3d4] ss:$24 sps:$4 sm:$0xff]  }
 0x27c   :  { %v10912_v2 = vld [vmem:[#allocation9 + $0x72c] ss:$24 sps:$4 sm:$0xff]  }
 0x27e   :  { %8312 = vmatpush1.bf16.msra.mxu0 %v10823_v49  ;;  %7988 = vmatpush1.bf16.msra.mxu1 %v10832_v39  ;;  %v10901_v49 = vld [vmem:[#allocation9 + $0x3d0] ss:$24 sps:$4 sm:$0xff]   ;;  %v10918_v39 = vld [vmem:[#allocation9 + $0x75c] ss:$24 sps:$4 sm:$0xff]  }
 0x27f   :  { %8313 = vmatprep.subr.bf16.mxu0 %v10831_v54  ;;  %7989 = vmatprep.subr.bf16.mxu1 %v10840_v59  ;;  %v10909_v54 = vld [vmem:[#allocation9 + $0x404] ss:$24 sps:$4 sm:$0xff]   ;;  %v10907_v59 = vld [vmem:[#allocation9 + $0x400] ss:$24 sps:$4 sm:$0xff]  }
 0x282   :  { %8314 = vmatpush1.bf16.msra.mxu0 %v10829_v38  ;;  %7990 = vmatpush1.bf16.msra.mxu1 %v10838_v11  ;;  %v10916_v38 = vld [vmem:[#allocation9 + $0x758] ss:$24 sps:$4 sm:$0xff]   ;;  %v10924_v11 = vld [vmem:[#allocation9 + $0x78c] ss:$24 sps:$4 sm:$0xff]  }
 0x283   :  { %8315 = vmatprep.subr.bf16.mxu0 %v10837_v21  ;;  %7991 = vmatprep.subr.bf16.mxu1 %v10846_v33  ;;  %v10915_v21 = vld [vmem:[#allocation9 + $0x434] ss:$24 sps:$4 sm:$0xff]   ;;  %v10913_v33 = vld [vmem:[#allocation9 + $0x430] ss:$24 sps:$4 sm:$0xff]  }
 0x286   :  { %8316 = vmatpush1.bf16.msra.mxu0 %v10835_v23  ;;  %7992 = vmatpush1.bf16.msra.mxu1 %v10844_v63  ;;  %v10922_v23 = vld [vmem:[#allocation9 + $0x788] ss:$24 sps:$4 sm:$0xff]   ;;  %v10930_v63 = vld [vmem:[#allocation9 + $0x7bc] ss:$24 sps:$4 sm:$0xff]  }
 0x287   :  { %8317 = vmatprep.subr.bf16.mxu0 %v10843_v0  ;;  %7993 = vmatprep.subr.bf16.mxu1 %v10852_v9  ;;  %v10921_v0 = vld [vmem:[#allocation9 + $0x464] ss:$24 sps:$4 sm:$0xff]   ;;  %v10919_v9 = vld [vmem:[#allocation9 + $0x460] ss:$24 sps:$4 sm:$0xff]  }
 0x28a   :  { %8318 = vmatpush1.bf16.msra.mxu0 %v10841_v51  ;;  %7994 = vmatpush1.bf16.msra.mxu1 %v10850_v7  ;;  %v10928_v51 = vld [vmem:[#allocation9 + $0x7b8] ss:$24 sps:$4 sm:$0xff]   ;;  %v10936_v7 = vld [vmem:[#allocation9 + $0x7ec] ss:$24 sps:$4 sm:$0xff]  }
 0x28b   :  { %8319 = vmatprep.subr.bf16.mxu0 %v10849_v27  ;;  %7995 = vmatprep.subr.bf16.mxu1 %v10858_v31  ;;  %v10927_v27 = vld [vmem:[#allocation9 + $0x494] ss:$24 sps:$4 sm:$0xff]   ;;  %v10925_v31 = vld [vmem:[#allocation9 + $0x490] ss:$24 sps:$4 sm:$0xff]  }
 0x28e   :  { %8320 = vmatpush1.bf16.msra.mxu0 %v10847_v26  ;;  %7996 = vmatpush1.bf16.msra.mxu1 %v10856_v36  ;;  %v10934_v26 = vld [vmem:[#allocation9 + $0x7e8] ss:$24 sps:$4 sm:$0xff]   ;;  %v10942_v36 = vld [vmem:[#allocation9 + $0x81c] ss:$24 sps:$4 sm:$0xff]  }
 0x28f   :  { %8321 = vmatprep.subr.bf16.mxu0 %v10855_v58  ;;  %7997 = vmatprep.subr.bf16.mxu1 %v10864_v10  ;;  %v10933_v58 = vld [vmem:[#allocation9 + $0x4c4] ss:$24 sps:$4 sm:$0xff]   ;;  %v10931_v10 = vld [vmem:[#allocation9 + $0x4c0] ss:$24 sps:$4 sm:$0xff]  }
 0x292   :  { %8322 = vmatpush1.bf16.msra.mxu0 %v10853_v18  ;;  %7998 = vmatpush1.bf16.msra.mxu1 %v10862_v8  ;;  %v10940_v18 = vld [vmem:[#allocation9 + $0x818] ss:$24 sps:$4 sm:$0xff]   ;;  %v10948_v8 = vld [vmem:[#allocation9 + $0x84c] ss:$24 sps:$4 sm:$0xff]  }
 0x293   :  { %8323 = vmatprep.subr.bf16.mxu0 %v10861_v28  ;;  %7999 = vmatprep.subr.bf16.mxu1 %v10870_v37  ;;  %v10939_v28 = vld [vmem:[#allocation9 + $0x4f4] ss:$24 sps:$4 sm:$0xff]   ;;  %v10937_v37 = vld [vmem:[#allocation9 + $0x4f0] ss:$24 sps:$4 sm:$0xff]  }
 0x296   :  { %8324 = vmatpush1.bf16.msra.mxu0 %v10859_v61  ;;  %8000 = vmatpush1.bf16.msra.mxu1 %v10868_v62  ;;  %v10946_v61 = vld [vmem:[#allocation9 + $0x848] ss:$24 sps:$4 sm:$0xff]   ;;  %v10954_v62 = vld [vmem:[#allocation9 + $0x87c] ss:$24 sps:$4 sm:$0xff]  }
 0x297   :  { %8325 = vmatprep.subr.bf16.mxu0 %v10867_v1  ;;  %8010 = vmatprep.subr.bf16.mxu1 %v10876_v50  ;;  %v10945_v1 = vld [vmem:[#allocation9 + $0x524] ss:$24 sps:$4 sm:$0xff]   ;;  %v10943_v50 = vld [vmem:[#allocation9 + $0x520] ss:$24 sps:$4 sm:$0xff]  }
 0x299   :  { %8002 = vmatmul.mubr.bf16.vlgmr.msra.gmra.mrb[4].mxu1 %v13562_v17 }
 0x29a   :  { %8326 = vmatpush1.bf16.msra.mxu0 %v10865_v19  ;;  %8011 = vmatpush1.bf16.msra.mxu1 %v10874_v40  ;;  %v10952_v19 = vld [vmem:[#allocation9 + $0x878] ss:$24 sps:$4 sm:$0xff]   ;;  %v10960_v40 = vld [vmem:[#allocation9 + $0x8ac] ss:$24 sps:$4 sm:$0xff]  }
 0x29b   :  { %8327 = vmatprep.subr.bf16.mxu0 %v10873_v22  ;;  %8012 = vmatprep.subr.bf16.mxu1 %v10882_v52  ;;  %v10951_v22 = vld [vmem:[#allocation9 + $0x554] ss:$24 sps:$4 sm:$0xff]   ;;  %v10949_v52 = vld [vmem:[#allocation9 + $0x550] ss:$24 sps:$4 sm:$0xff]  }
 0x29c   :  { %8042 = vmatprep.mubr.bf16.mxu1 %v13563_v60 }
 0x29e   :  { %8328 = vmatpush1.bf16.msra.mxu0 %v10871_v42  ;;  %8013 = vmatpush1.bf16.msra.mxu1 %v10880_v32  ;;  %v10958_v42 = vld [vmem:[#allocation9 + $0x8a8] ss:$24 sps:$4 sm:$0xff]   ;;  %v10966_v32 = vld [vmem:[#allocation9 + $0x8dc] ss:$24 sps:$4 sm:$0xff]  }
 0x29f   :  { %8338 = vmatprep.subr.bf16.mxu0 %v10879_v6  ;;  %8014 = vmatprep.subr.bf16.mxu1 %v10888_v24  ;;  %v10957_v6 = vld [vmem:[#allocation9 + $0x584] ss:$24 sps:$4 sm:$0xff]   ;;  %v10955_v24 = vld [vmem:[#allocation9 + $0x580] ss:$24 sps:$4 sm:$0xff]  }
 0x2a1   :  { %8330 = vmatmul.mubr.bf16.vlgmr.msra.gmra.mrb[4].mxu0 %v13560_v30  ;;  %v10895_v30 = vld [vmem:[#allocation9 + $0x3a0] ss:$24 sps:$4 sm:$0xff]  }
 0x2a2   :  { %8339 = vmatpush1.bf16.msra.mxu0 %v10877_v15  ;;  %8015 = vmatpush1.bf16.msra.mxu1 %v10886_v29  ;;  %v10964_v15 = vld [vmem:[#allocation9 + $0x8d8] ss:$24 sps:$4 sm:$0xff]   ;;  %v10972_v29 = vld [vmem:[#allocation9 + $0x90c] ss:$24 sps:$4 sm:$0xff]  }
 0x2a3   :  { %8340 = vmatprep.subr.bf16.mxu0 %v10885_v57  ;;  %8016 = vmatprep.subr.bf16.mxu1 %v10894_v56  ;;  %v10963_v57 = vld [vmem:[#allocation9 + $0x5b4] ss:$24 sps:$4 sm:$0xff]   ;;  %v10961_v56 = vld [vmem:[#allocation9 + $0x5b0] ss:$24 sps:$4 sm:$0xff]  }
 0x2a4   :  { %8370 = vmatprep.mubr.bf16.mxu0 %v13561_v43  ;;  %v10910_v43 = vld [vmem:[#allocation9 + $0x728] ss:$24 sps:$4 sm:$0xff]  }
 0x2a6   :  { %8341 = vmatpush1.bf16.msra.mxu0 %v10883_v45  ;;  %8017 = vmatpush1.bf16.msra.mxu1 %v10892_v12  ;;  %v10970_v45 = vld [vmem:[#allocation9 + $0x908] ss:$24 sps:$4 sm:$0xff]   ;;  %v10978_v12 = vld [vmem:[#allocation9 + $0x93c] ss:$24 sps:$4 sm:$0xff]  }
 0x2a7   :  { %8342 = vmatprep.subr.bf16.mxu0 %v10891_v5  ;;  %8018 = vmatprep.subr.bf16.mxu1 %v10900_v3  ;;  %v10969_v5 = vld [vmem:[#allocation9 + $0x5e4] ss:$24 sps:$4 sm:$0xff]   ;;  %v10967_v3 = vld [vmem:[#allocation9 + $0x5e0] ss:$24 sps:$4 sm:$0xff]  }
 0x2aa   :  { %8343 = vmatpush1.bf16.msra.mxu0 %v10889_v14  ;;  %8019 = vmatpush1.bf16.msra.mxu1 %v10898_v44  ;;  %v10976_v14 = vld [vmem:[#allocation9 + $0x938] ss:$24 sps:$4 sm:$0xff]   ;;  %v10984_v44 = vld [vmem:[#allocation9 + $0x96c] ss:$24 sps:$4 sm:$0xff]  }
 0x2ab   :  { %8344 = vmatprep.subr.bf16.mxu0 %v10897_v41  ;;  %8020 = vmatprep.subr.bf16.mxu1 %v10906_v53  ;;  %v10975_v41 = vld [vmem:[#allocation9 + $0x614] ss:$24 sps:$4 sm:$0xff]   ;;  %v10973_v53 = vld [vmem:[#allocation9 + $0x610] ss:$24 sps:$4 sm:$0xff]  }
 0x2ae   :  { %8345 = vmatpush1.bf16.msra.mxu0 %v10895_v30  ;;  %8021 = vmatpush1.bf16.msra.mxu1 %v10904_v34  ;;  %v10982_v30 = vld [vmem:[#allocation9 + $0x968] ss:$24 sps:$4 sm:$0xff]   ;;  %v10981_v34 = vld [vmem:[#allocation9 + $0x644] ss:$24 sps:$4 sm:$0xff]  }
 0x2af   :  { %8346 = vmatprep.subr.bf16.mxu0 %v10903_v25  ;;  %8022 = vmatprep.subr.bf16.mxu1 %v10912_v2  ;;  %v10990_v25 = vld [vmem:[#allocation9 + $0x99c] ss:$24 sps:$4 sm:$0xff]   ;;  %v10979_v2 = vld [vmem:[#allocation9 + $0x640] ss:$24 sps:$4 sm:$0xff]  }
 0x2b2   :  { %8347 = vmatpush1.bf16.msra.mxu0 %v10901_v49  ;;  %8023 = vmatpush1.bf16.msra.mxu1 %v10910_v43  ;;  %v10988_v49 = vld [vmem:[#allocation9 + $0x998] ss:$24 sps:$4 sm:$0xff]   ;;  %v10987_v43 = vld [vmem:[#allocation9 + $0x674] ss:$24 sps:$4 sm:$0xff]  }
 0x2b3   :  { %8348 = vmatprep.subr.bf16.mxu0 %v10909_v54  ;;  %8024 = vmatprep.subr.bf16.mxu1 %v10918_v39  ;;  %v10996_v54 = vld [vmem:[#allocation9 + $0x9cc] ss:$24 sps:$4 sm:$0xff]   ;;  %v10985_v39 = vld [vmem:[#allocation9 + $0x670] ss:$24 sps:$4 sm:$0xff]  }
 0x2b6   :  { %8349 = vmatpush1.bf16.msra.mxu0 %v10907_v59  ;;  %8025 = vmatpush1.bf16.msra.mxu1 %v10916_v38  ;;  %v10994_v59 = vld [vmem:[#allocation9 + $0x9c8] ss:$24 sps:$4 sm:$0xff]   ;;  %v10993_v38 = vld [vmem:[#allocation9 + $0x6a4] ss:$24 sps:$4 sm:$0xff]  }
 0x2b7   :  { %8350 = vmatprep.subr.bf16.mxu0 %v10915_v21  ;;  %8026 = vmatprep.subr.bf16.mxu1 %v10924_v11  ;;  %v11002_v21 = vld [vmem:[#allocation9 + $0x9fc] ss:$24 sps:$4 sm:$0xff]   ;;  %v11000_v11 = vld [vmem:[#allocation9 + $0x9f8] ss:$24 sps:$4 sm:$0xff]  }
 0x2ba   :  { %8351 = vmatpush1.bf16.msra.mxu0 %v10913_v33  ;;  %8027 = vmatpush1.bf16.msra.mxu1 %v10922_v23  ;;  %v10999_v33 = vld [vmem:[#allocation9 + $0x6d4] ss:$24 sps:$4 sm:$0xff]  }
 0x2bb   :  { %8352 = vmatprep.subr.bf16.mxu0 %v10921_v0  ;;  %8028 = vmatprep.subr.bf16.mxu1 %v10930_v63  ;;  %v11008_v23 = vld [vmem:[#allocation9 + $0xa2c] ss:$24 sps:$4 sm:$0xff]  }
 0x2be   :  { %8353 = vmatpush1.bf16.msra.mxu0 %v10919_v9  ;;  %8029 = vmatpush1.bf16.msra.mxu1 %v10928_v51  ;;  %v11006_v51 = vld [vmem:[#allocation9 + $0xa28] ss:$24 sps:$4 sm:$0xff]  }
 0x2bf   :  { %8354 = vmatprep.subr.bf16.mxu0 %v10927_v27  ;;  %8030 = vmatprep.subr.bf16.mxu1 %v10936_v7  ;;  %v11005_v27 = vld [vmem:[#allocation9 + $0x704] ss:$24 sps:$4 sm:$0xff]  }
 0x2c2   :  { %8355 = vmatpush1.bf16.msra.mxu0 %v10925_v31  ;;  %8031 = vmatpush1.bf16.msra.mxu1 %v10934_v26  ;;  %v11014_v31 = vld [vmem:[#allocation9 + $0xa5c] ss:$24 sps:$4 sm:$0xff]   ;;  %v11003_v26 = vld [vmem:[#allocation9 + $0x700] ss:$24 sps:$4 sm:$0xff]  }
 0x2c3   :  { %8356 = vmatprep.subr.bf16.mxu0 %v10933_v58  ;;  %8032 = vmatprep.subr.bf16.mxu1 %v10942_v36  ;;  %v11012_v58 = vld [vmem:[#allocation9 + $0xa58] ss:$24 sps:$4 sm:$0xff]   ;;  %v11011_v36 = vld [vmem:[#allocation9 + $0x734] ss:$24 sps:$4 sm:$0xff]  }
 0x2c6   :  { %8357 = vmatpush1.bf16.msra.mxu0 %v10931_v10  ;;  %8033 = vmatpush1.bf16.msra.mxu1 %v10940_v18  ;;  %v11020_v10 = vld [vmem:[#allocation9 + $0xa8c] ss:$24 sps:$4 sm:$0xff]   ;;  %v11009_v18 = vld [vmem:[#allocation9 + $0x730] ss:$24 sps:$4 sm:$0xff]  }
 0x2c7   :  { %8358 = vmatprep.subr.bf16.mxu0 %v10939_v28  ;;  %8034 = vmatprep.subr.bf16.mxu1 %v10948_v8  ;;  %v11018_v28 = vld [vmem:[#allocation9 + $0xa88] ss:$24 sps:$4 sm:$0xff]   ;;  %v11017_v8 = vld [vmem:[#allocation9 + $0x764] ss:$24 sps:$4 sm:$0xff]  }
 0x2ca   :  { %8359 = vmatpush1.bf16.msra.mxu0 %v10937_v37  ;;  %8035 = vmatpush1.bf16.msra.mxu1 %v10946_v61  ;;  %v11026_v37 = vld [vmem:[#allocation9 + $0xabc] ss:$24 sps:$4 sm:$0xff]   ;;  %v11015_v61 = vld [vmem:[#allocation9 + $0x760] ss:$24 sps:$4 sm:$0xff]  }
 0x2cb   :  { %8360 = vmatprep.subr.bf16.mxu0 %v10945_v1  ;;  %8036 = vmatprep.subr.bf16.mxu1 %v10954_v62  ;;  %v11024_v1 = vld [vmem:[#allocation9 + $0xab8] ss:$24 sps:$4 sm:$0xff]   ;;  %v11023_v62 = vld [vmem:[#allocation9 + $0x794] ss:$24 sps:$4 sm:$0xff]  }
 0x2ce   :  { %8361 = vmatpush1.bf16.msra.mxu0 %v10943_v50  ;;  %8037 = vmatpush1.bf16.msra.mxu1 %v10952_v19  ;;  %v11032_v50 = vld [vmem:[#allocation9 + $0xaec] ss:$24 sps:$4 sm:$0xff]   ;;  %v11021_v19 = vld [vmem:[#allocation9 + $0x790] ss:$24 sps:$4 sm:$0xff]  }
 0x2cf   :  { %8362 = vmatprep.subr.bf16.mxu0 %v10951_v22  ;;  %8038 = vmatprep.subr.bf16.mxu1 %v10960_v40  ;;  %v11030_v22 = vld [vmem:[#allocation9 + $0xae8] ss:$24 sps:$4 sm:$0xff]   ;;  %v11029_v40 = vld [vmem:[#allocation9 + $0x7c4] ss:$24 sps:$4 sm:$0xff]  }
 0x2d2   :  { %8363 = vmatpush1.bf16.msra.mxu0 %v10949_v52  ;;  %8039 = vmatpush1.bf16.msra.mxu1 %v10958_v42  ;;  %v11038_v52 = vld [vmem:[#allocation9 + $0xb1c] ss:$24 sps:$4 sm:$0xff]   ;;  %v11027_v42 = vld [vmem:[#allocation9 + $0x7c0] ss:$24 sps:$4 sm:$0xff]  }
 0x2d3   :  { %8364 = vmatprep.subr.bf16.mxu0 %v10957_v6  ;;  %8040 = vmatprep.subr.bf16.mxu1 %v10966_v32  ;;  %v11036_v6 = vld [vmem:[#allocation9 + $0xb18] ss:$24 sps:$4 sm:$0xff]   ;;  %v11035_v32 = vld [vmem:[#allocation9 + $0x7f4] ss:$24 sps:$4 sm:$0xff]  }
 0x2d6   :  { %8365 = vmatpush1.bf16.msra.mxu0 %v10955_v24  ;;  %8041 = vmatpush1.bf16.msra.mxu1 %v10964_v15  ;;  %v11044_v24 = vld [vmem:[#allocation9 + $0xb4c] ss:$24 sps:$4 sm:$0xff]   ;;  %v11033_v15 = vld [vmem:[#allocation9 + $0x7f0] ss:$24 sps:$4 sm:$0xff]  }
 0x2d7   :  { %8366 = vmatprep.subr.bf16.mxu0 %v10963_v57  ;;  %8051 = vmatprep.subr.bf16.mxu1 %v10972_v29  ;;  %v11042_v57 = vld [vmem:[#allocation9 + $0xb48] ss:$24 sps:$4 sm:$0xff]   ;;  %v11041_v29 = vld [vmem:[#allocation9 + $0x824] ss:$24 sps:$4 sm:$0xff]  }
 0x2d9   :  { %8043 = vmatmul.mubr.bf16.vlgmr.msra.gmra.mrb[4].mxu1 %v12972_v16 }
 0x2da   :  { %8367 = vmatpush1.bf16.msra.mxu0 %v10961_v56  ;;  %8052 = vmatpush1.bf16.msra.mxu1 %v10970_v45  ;;  %v11050_v56 = vld [vmem:[#allocation9 + $0xb7c] ss:$24 sps:$4 sm:$0xff]   ;;  %v11039_v45 = vld [vmem:[#allocation9 + $0x820] ss:$24 sps:$4 sm:$0xff]  }
 0x2db   :  { %8368 = vmatprep.subr.bf16.mxu0 %v10969_v5  ;;  %8053 = vmatprep.subr.bf16.mxu1 %v10978_v12  ;;  %v11048_v5 = vld [vmem:[#allocation9 + $0xb78] ss:$24 sps:$4 sm:$0xff]   ;;  %v11047_v12 = vld [vmem:[#allocation9 + $0x854] ss:$24 sps:$4 sm:$0xff]  }
 0x2dc   :  { %8083 = vmatprep.mubr.bf16.mxu1 %v13012_v4 }
 0x2de   :  { %8369 = vmatpush1.bf16.msra.mxu0 %v10967_v3  ;;  %8054 = vmatpush1.bf16.msra.mxu1 %v10976_v14  ;;  %v11056_v3 = vld [vmem:[#allocation9 + $0xbac] ss:$24 sps:$4 sm:$0xff]   ;;  %v11045_v14 = vld [vmem:[#allocation9 + $0x850] ss:$24 sps:$4 sm:$0xff]  }
 0x2df   :  { %8379 = vmatprep.subr.bf16.mxu0 %v10975_v41  ;;  %8055 = vmatprep.subr.bf16.mxu1 %v10984_v44  ;;  %v11054_v41 = vld [vmem:[#allocation9 + $0xba8] ss:$24 sps:$4 sm:$0xff]   ;;  %v11053_v44 = vld [vmem:[#allocation9 + $0x884] ss:$24 sps:$4 sm:$0xff]  }
 0x2e1   :  { %8371 = vmatmul.mubr.bf16.vlgmr.msra.gmra.mrb[4].mxu0 %v13562_v17  ;;  %v10991_v17 = vld [vmem:[#allocation9 + $0x6a0] ss:$24 sps:$4 sm:$0xff]  }
 0x2e2   :  { %8380 = vmatpush1.bf16.msra.mxu0 %v10973_v53  ;;  %8056 = vmatpush1.bf16.msra.mxu1 %v10982_v30  ;;  %v11062_v53 = vld [vmem:[#allocation9 + $0xbdc] ss:$24 sps:$4 sm:$0xff]   ;;  %v11051_v30 = vld [vmem:[#allocation9 + $0x880] ss:$24 sps:$4 sm:$0xff]  }
 0x2e3   :  { %8381 = vmatprep.subr.bf16.mxu0 %v10981_v34  ;;  %8057 = vmatprep.subr.bf16.mxu1 %v10990_v25  ;;  %v11060_v34 = vld [vmem:[#allocation9 + $0xbd8] ss:$24 sps:$4 sm:$0xff]   ;;  %v11059_v25 = vld [vmem:[#allocation9 + $0x8b4] ss:$24 sps:$4 sm:$0xff]  }
 0x2e4   :  { %8411 = vmatprep.mubr.bf16.mxu0 %v13563_v60  ;;  %v10997_v60 = vld [vmem:[#allocation9 + $0x6d0] ss:$24 sps:$4 sm:$0xff]  }
 0x2e6   :  { %8382 = vmatpush1.bf16.msra.mxu0 %v10979_v2  ;;  %8058 = vmatpush1.bf16.msra.mxu1 %v10988_v49  ;;  %v11068_v2 = vld [vmem:[#allocation9 + $0xc0c] ss:$24 sps:$4 sm:$0xff]   ;;  %v11057_v49 = vld [vmem:[#allocation9 + $0x8b0] ss:$24 sps:$4 sm:$0xff]  }
 0x2e7   :  { %8383 = vmatprep.subr.bf16.mxu0 %v10987_v43  ;;  %8059 = vmatprep.subr.bf16.mxu1 %v10996_v54  ;;  %v11066_v43 = vld [vmem:[#allocation9 + $0xc08] ss:$24 sps:$4 sm:$0xff]   ;;  %v11065_v54 = vld [vmem:[#allocation9 + $0x8e4] ss:$24 sps:$4 sm:$0xff]  }
 0x2ea   :  { %8384 = vmatpush1.bf16.msra.mxu0 %v10985_v39  ;;  %8060 = vmatpush1.bf16.msra.mxu1 %v10994_v59  ;;  %v11074_v39 = vld [vmem:[#allocation9 + $0xc3c] ss:$24 sps:$4 sm:$0xff]   ;;  %v11063_v59 = vld [vmem:[#allocation9 + $0x8e0] ss:$24 sps:$4 sm:$0xff]  }
 0x2eb   :  { %8385 = vmatprep.subr.bf16.mxu0 %v10993_v38  ;;  %8061 = vmatprep.subr.bf16.mxu1 %v11002_v21  ;;  %v11072_v38 = vld [vmem:[#allocation9 + $0xc38] ss:$24 sps:$4 sm:$0xff]   ;;  %v11071_v21 = vld [vmem:[#allocation9 + $0x914] ss:$24 sps:$4 sm:$0xff]  }
 0x2ec   :  { %v13199_v0 = vpop.f32.mrb[0].mxu1 }
 0x2ed   :  { %v13201_v63 = vpop.f32.mrb[1].mxu1 }
 0x2ee   :  { %8386 = vmatpush1.bf16.msra.mxu0 %v10991_v17  ;;  %v7720_v9 = vpop.f32.mrb[2].mxu1  ;;  %8062 = vmatpush1.bf16.msra.mxu1 %v11000_v11  ;;  %v11080_v17 = vld [vmem:[#allocation9 + $0xc6c] ss:$24 sps:$4 sm:$0xff]   ;;  %v13564_v11 = vld [vmem:[#allocation38_spill] sm:$0xff] }
 0x2ef   :  { %8387 = vmatprep.subr.bf16.mxu0 %v10999_v33  ;;  %v7721_v7 = vpop.f32.mrb[3].mxu1  ;;  %8063 = vmatprep.subr.bf16.mxu1 %v11008_v23  ;;  %v11069_v33 = vld [vmem:[#allocation9 + $0x910] ss:$24 sps:$4 sm:$0xff]   ;;  %v11086_v9 = vld [vmem:[#allocation9 + $0xc9c] ss:$24 sps:$4 sm:$0xff]  }
 0x2f0   :  { %v11078_v23 = vld [vmem:[#allocation9 + $0xc68] ss:$24 sps:$4 sm:$0xff]   ;;  %v3209_v7 = vlaneseq }
 0x2f2   :  { %8388 = vmatpush1.bf16.msra.mxu0 %v10997_v60  ;;  %8064 = vmatpush1.bf16.msra.mxu1 %v11006_v51  ;;  %v11077_v60 = vld [vmem:[#allocation9 + $0x944] ss:$24 sps:$4 sm:$0xff]   ;;  %v11075_v51 = vld [vmem:[#allocation9 + $0x940] ss:$24 sps:$4 sm:$0xff]  }
 0x2f3   :  { %8389 = vmatprep.subr.bf16.mxu0 %v11005_v27  ;;  %8065 = vmatprep.subr.bf16.mxu1 %v11014_v31  ;;  %v11084_v27 = vld [vmem:[#allocation9 + $0xc98] ss:$24 sps:$4 sm:$0xff]   ;;  %v11083_v31 = vld [vmem:[#allocation9 + $0x974] ss:$24 sps:$4 sm:$0xff]  }
 0x2f6   :  { %8390 = vmatpush1.bf16.msra.mxu0 %v11003_v26  ;;  %8066 = vmatpush1.bf16.msra.mxu1 %v11012_v58  ;;  %v11092_v26 = vld [vmem:[#allocation9 + $0xccc] ss:$24 sps:$4 sm:$0xff]   ;;  %v11081_v58 = vld [vmem:[#allocation9 + $0x970] ss:$24 sps:$4 sm:$0xff]  }
 0x2f7   :  { %8391 = vmatprep.subr.bf16.mxu0 %v11011_v36  ;;  %8067 = vmatprep.subr.bf16.mxu1 %v11020_v10  ;;  %v11090_v36 = vld [vmem:[#allocation9 + $0xcc8] ss:$24 sps:$4 sm:$0xff]   ;;  %v13207_v10 = vshrl.u32 %v3209_v7, 7  ;;  %v11152_v7 = vld [vmem:[#allocation9 + $0xeac] ss:$24 sps:$4 sm:$0xff]  }
 0x2fa   :  { %8392 = vmatpush1.bf16.msra.mxu0 %v11009_v18  ;;  %8068 = vmatpush1.bf16.msra.mxu1 %v11018_v28  ;;  %v11089_v18 = vld [vmem:[#allocation9 + $0x9a4] ss:$24 sps:$4 sm:$0xff]   ;;  %v11087_v28 = vld [vmem:[#allocation9 + $0x9a0] ss:$24 sps:$4 sm:$0xff]  }
 0x2fb   :  { %8393 = vmatprep.subr.bf16.mxu0 %v11017_v8  ;;  %8069 = vmatprep.subr.bf16.mxu1 %v11026_v37  ;;  %v11096_v8 = vld [vmem:[#allocation9 + $0xcf8] ss:$24 sps:$4 sm:$0xff]   ;;  %v3211_v37 = vsub.s32 0, %v13207_v10 }
 0x2fe   :  { %8394 = vmatpush1.bf16.msra.mxu0 %v11015_v61  ;;  %8070 = vmatpush1.bf16.msra.mxu1 %v11024_v1  ;;  %v11095_v61 = vld [vmem:[#allocation9 + $0x9d4] ss:$24 sps:$4 sm:$0xff]   ;;  %v3207_v1 = vld [vmem:[#allocation10] sm:$0x3f] }
 0x2ff   :  { %8395 = vmatprep.subr.bf16.mxu0 %v11023_v62  ;;  %8071 = vmatprep.subr.bf16.mxu1 %v11032_v50  ;;  %v3215_v62 = vsub.s32 1, %v13207_v10  ;;  %v11093_v50 = vld [vmem:[#allocation9 + $0x9d0] ss:$24 sps:$4 sm:$0xff]  }
 0x302   :  { %8396 = vmatpush1.bf16.msra.mxu0 %v11021_v19  ;;  %8072 = vmatpush1.bf16.msra.mxu1 %v11030_v22  ;;  %v11102_v19 = vld [vmem:[#allocation9 + $0xd28] ss:$24 sps:$4 sm:$0xff]   ;;  %v3212_v22 = vrot.slane %v3207_v1, %v3211_v37 }
 0x303   :  { %8397 = vmatprep.subr.bf16.mxu0 %v11029_v40  ;;  %8073 = vmatprep.subr.bf16.mxu1 %v11038_v52  ;;  %v11101_v40 = vld [vmem:[#allocation9 + $0xa04] ss:$24 sps:$4 sm:$0xff]   ;;  %v11153_v37 = vld [vmem:[#allocation9 + $0xbb0] ss:$24 sps:$4 sm:$0xff]  }
 0x304   :  { %v11110_v52 = vld [vmem:[#allocation9 + $0xd5c] ss:$24 sps:$4 sm:$0xff]  }
 0x306   :  { %8398 = vmatpush1.bf16.msra.mxu0 %v11027_v42  ;;  %8074 = vmatpush1.bf16.msra.mxu1 %v11036_v6  ;;  %v3216_v42 = vrot.slane %v3207_v1, %v3215_v62  ;;  %v11099_v6 = vld [vmem:[#allocation9 + $0xa00] ss:$24 sps:$4 sm:$0xff]   ;;  %v11170_v1 = vld [vmem:[#allocation9 + $0xf3c] ss:$24 sps:$4 sm:$0xff]  }
 0x307   :  { %8399 = vmatprep.subr.bf16.mxu0 %v11035_v32  ;;  %8075 = vmatprep.subr.bf16.mxu1 %v11044_v24  ;;  %v11108_v32 = vld [vmem:[#allocation9 + $0xd58] ss:$24 sps:$4 sm:$0xff]   ;;  %v10187_v24 = vadd.f32 %v13199_v0, %v3212_v22  ;;  %v11113_v0 = vld [vmem:[#allocation9 + $0xa64] ss:$24 sps:$4 sm:$0xff]   ;;  %v11167_v22 = vld [vmem:[#allocation9 + $0xc14] ss:$24 sps:$4 sm:$0xff]  }
 0x308   :  { %v13565_v62 = vld [vmem:[#allocation61_spill] sm:$0xff] }
 0x30a   :  { %8400 = vmatpush1.bf16.msra.mxu0 %v11033_v15  ;;  %8076 = vmatpush1.bf16.msra.mxu1 %v11042_v57  ;;  %v11107_v15 = vld [vmem:[#allocation9 + $0xa34] ss:$24 sps:$4 sm:$0xff]  }
 0x30b   :  { %8401 = vmatprep.subr.bf16.mxu0 %v11041_v29  ;;  %8077 = vmatprep.subr.bf16.mxu1 %v11050_v56  ;;  %v11116_v57 = vld [vmem:[#allocation9 + $0xd8c] ss:$24 sps:$4 sm:$0xff]   ;;  %v10189_v29 = vadd.f32 %v13201_v63, %v3216_v42  ;;  %v11120_v63 = vld [vmem:[#allocation9 + $0xdb8] ss:$24 sps:$4 sm:$0xff]  }
 0x30c   :  { %v11165_v42 = vld [vmem:[#allocation9 + $0xc10] ss:$24 sps:$4 sm:$0xff]  }
 0x30e   :  { %8402 = vmatpush1.bf16.msra.mxu0 %v11039_v45  ;;  %8078 = vmatpush1.bf16.msra.mxu1 %v11048_v5 }
 0x30f   :  { %8403 = vmatprep.subr.bf16.mxu0 %v11047_v12  ;;  %8079 = vmatprep.subr.bf16.mxu1 %v11056_v3 }
 0x312   :  { %8404 = vmatpush1.bf16.msra.mxu0 %v11045_v14  ;;  %8080 = vmatpush1.bf16.msra.mxu1 %v11054_v41  ;;  %v11105_v14 = vld [vmem:[#allocation9 + $0xa30] ss:$24 sps:$4 sm:$0xff]  }
 0x313   :  { %8405 = vmatprep.subr.bf16.mxu0 %v11053_v44  ;;  %8081 = vmatprep.subr.bf16.mxu1 %v11062_v53  ;;  %v11114_v41 = vld [vmem:[#allocation9 + $0xd88] ss:$24 sps:$4 sm:$0xff]   ;;  %v11122_v53 = vld [vmem:[#allocation9 + $0xdbc] ss:$24 sps:$4 sm:$0xff]  }
 0x316   :  { %8406 = vmatpush1.bf16.msra.mxu0 %v11051_v30  ;;  %8082 = vmatpush1.bf16.msra.mxu1 %v11060_v34  ;;  %v11111_v30 = vld [vmem:[#allocation9 + $0xa60] ss:$24 sps:$4 sm:$0xff]   ;;  %v11119_v34 = vld [vmem:[#allocation9 + $0xa94] ss:$24 sps:$4 sm:$0xff]  }
 0x317   :  { %8407 = vmatprep.subr.bf16.mxu0 %v11059_v25  ;;  %8092 = vmatprep.subr.bf16.mxu1 %v11068_v2  ;;  %v11128_v25 = vld [vmem:[#allocation9 + $0xdec] ss:$24 sps:$4 sm:$0xff]   ;;  %v11117_v2 = vld [vmem:[#allocation9 + $0xa90] ss:$24 sps:$4 sm:$0xff]  }
 0x319   :  { %8084 = vmatmul.mubr.bf16.vlgmr.msra.gmra.mrb[4].mxu1 %v13168_v55 }
 0x31a   :  { %8408 = vmatpush1.bf16.msra.mxu0 %v11057_v49  ;;  %8093 = vmatpush1.bf16.msra.mxu1 %v11066_v43  ;;  %v11126_v49 = vld [vmem:[#allocation9 + $0xde8] ss:$24 sps:$4 sm:$0xff]   ;;  %v11125_v43 = vld [vmem:[#allocation9 + $0xac4] ss:$24 sps:$4 sm:$0xff]  }
 0x31b   :  { %8409 = vmatprep.subr.bf16.mxu0 %v11065_v54  ;;  %8094 = vmatprep.subr.bf16.mxu1 %v11074_v39  ;;  %v11134_v54 = vld [vmem:[#allocation9 + $0xe1c] ss:$24 sps:$4 sm:$0xff]   ;;  %v11123_v39 = vld [vmem:[#allocation9 + $0xac0] ss:$24 sps:$4 sm:$0xff]  }
 0x31c   :  { %8124 = vmatprep.mubr.bf16.mxu1 %v13564_v11 }
 0x31e   :  { %8410 = vmatpush1.bf16.msra.mxu0 %v11063_v59  ;;  %8095 = vmatpush1.bf16.msra.mxu1 %v11072_v38  ;;  %v11132_v59 = vld [vmem:[#allocation9 + $0xe18] ss:$24 sps:$4 sm:$0xff]   ;;  %v11131_v38 = vld [vmem:[#allocation9 + $0xaf4] ss:$24 sps:$4 sm:$0xff]  }
 0x31f   :  { %8420 = vmatprep.subr.bf16.mxu0 %v11071_v21  ;;  %8096 = vmatprep.subr.bf16.mxu1 %v11080_v17  ;;  %v11140_v21 = vld [vmem:[#allocation9 + $0xe4c] ss:$24 sps:$4 sm:$0xff]   ;;  %v11129_v17 = vld [vmem:[#allocation9 + $0xaf0] ss:$24 sps:$4 sm:$0xff]  }
 0x321   :  { %8412 = vmatmul.mubr.bf16.vlgmr.msra.gmra.mrb[4].mxu0 %v12972_v16  ;;  %v11098_v16 = vld [vmem:[#allocation9 + $0xcfc] ss:$24 sps:$4 sm:$0xff]  }
 0x322   :  { %8421 = vmatpush1.bf16.msra.mxu0 %v11069_v33  ;;  %8097 = vmatpush1.bf16.msra.mxu1 %v11078_v23  ;;  %v11138_v33 = vld [vmem:[#allocation9 + $0xe48] ss:$24 sps:$4 sm:$0xff]   ;;  %v11137_v23 = vld [vmem:[#allocation9 + $0xb24] ss:$24 sps:$4 sm:$0xff]  }
 0x323   :  { %8422 = vmatprep.subr.bf16.mxu0 %v11077_v60  ;;  %8098 = vmatprep.subr.bf16.mxu1 %v11086_v9  ;;  %v11146_v60 = vld [vmem:[#allocation9 + $0xe7c] ss:$24 sps:$4 sm:$0xff]   ;;  %v11135_v9 = vld [vmem:[#allocation9 + $0xb20] ss:$24 sps:$4 sm:$0xff]  }
 0x324   :  { %8452 = vmatprep.mubr.bf16.mxu0 %v13012_v4  ;;  %v11104_v4 = vld [vmem:[#allocation9 + $0xd2c] ss:$24 sps:$4 sm:$0xff]  }
 0x326   :  { %8423 = vmatpush1.bf16.msra.mxu0 %v11075_v51  ;;  %8099 = vmatpush1.bf16.msra.mxu1 %v11084_v27  ;;  %v11144_v51 = vld [vmem:[#allocation9 + $0xe78] ss:$24 sps:$4 sm:$0xff]   ;;  %v11143_v27 = vld [vmem:[#allocation9 + $0xb54] ss:$24 sps:$4 sm:$0xff]  }
 0x327   :  { %8424 = vmatprep.subr.bf16.mxu0 %v11083_v31  ;;  %8100 = vmatprep.subr.bf16.mxu1 %v11092_v26  ;;  %v11141_v31 = vld [vmem:[#allocation9 + $0xb50] ss:$24 sps:$4 sm:$0xff]  }
 0x328   :  { %v11150_v26 = vld [vmem:[#allocation9 + $0xea8] ss:$24 sps:$4 sm:$0xff]  }
 0x32a   :  { %8425 = vmatpush1.bf16.msra.mxu0 %v11081_v58  ;;  %8101 = vmatpush1.bf16.msra.mxu1 %v11090_v36  ;;  %v11149_v58 = vld [vmem:[#allocation9 + $0xb84] ss:$24 sps:$4 sm:$0xff]  }
 0x32b   :  { %8426 = vmatprep.subr.bf16.mxu0 %v11089_v18  ;;  %8102 = vmatprep.subr.bf16.mxu1 %v11098_v16  ;;  %v11158_v36 = vld [vmem:[#allocation9 + $0xedc] ss:$24 sps:$4 sm:$0xff]   ;;  %v11147_v18 = vld [vmem:[#allocation9 + $0xb80] ss:$24 sps:$4 sm:$0xff]  }
 0x32c   :  { %v11156_v16 = vld [vmem:[#allocation9 + $0xed8] ss:$24 sps:$4 sm:$0xff]  }
 0x32e   :  { %8427 = vmatpush1.bf16.msra.mxu0 %v11087_v28  ;;  %8103 = vmatpush1.bf16.msra.mxu1 %v11096_v8  ;;  %v11155_v28 = vld [vmem:[#allocation9 + $0xbb4] ss:$24 sps:$4 sm:$0xff]  }
 0x32f   :  { %8428 = vmatprep.subr.bf16.mxu0 %v11095_v61  ;;  %8104 = vmatprep.subr.bf16.mxu1 %v11104_v4  ;;  %v11164_v8 = vld [vmem:[#allocation9 + $0xf0c] ss:$24 sps:$4 sm:$0xff]   ;;  %v11162_v61 = vld [vmem:[#allocation9 + $0xf08] ss:$24 sps:$4 sm:$0xff]  }
 0x330   :  { %v11161_v4 = vld [vmem:[#allocation9 + $0xbe4] ss:$24 sps:$4 sm:$0xff]  }
 0x332   :  { %8429 = vmatpush1.bf16.msra.mxu0 %v11093_v50  ;;  %8105 = vmatpush1.bf16.msra.mxu1 %v11102_v19  ;;  %v11159_v50 = vld [vmem:[#allocation9 + $0xbe0] ss:$24 sps:$4 sm:$0xff]  }
 0x333   :  { %8430 = vmatprep.subr.bf16.mxu0 %v11101_v40  ;;  %8106 = vmatprep.subr.bf16.mxu1 %v11110_v52  ;;  %v11168_v19 = vld [vmem:[#allocation9 + $0xf38] ss:$24 sps:$4 sm:$0xff]   ;;  %v11176_v40 = vld [vmem:[#allocation9 + $0xf6c] ss:$24 sps:$4 sm:$0xff]  }
 0x334   :  { %v7921_v56 = vpop.f32.mrb[0].mxu0  ;;  %v13566_v52 = vld [vmem:[#allocation79_spill] sm:$0xff] }
 0x335   :  { %v13213_v45 = vadd.f32 %v10187_v24, %v7921_v56  ;;  %v7923_v5 = vpop.f32.mrb[1].mxu0  ;;  %v11182_v24 = vld [vmem:[#allocation9 + $0xf9c] ss:$24 sps:$4 sm:$0xff]   ;;  %v11188_v56 = vld [vmem:[#allocation9 + $0xfcc] ss:$24 sps:$4 sm:$0xff]  }
 0x336   :  { %v13215_v12 = vadd.f32 %v10189_v29, %v7923_v5  ;;  %v7925_v3 = vpop.f32.mrb[2].mxu0  ;;  %8431 = vmatpush1.bf16.msra.mxu0 %v11099_v6  ;;  %8107 = vmatpush1.bf16.msra.mxu1 %v11108_v32  ;;  %v11174_v6 = vld [vmem:[#allocation9 + $0xf68] ss:$24 sps:$4 sm:$0xff]   ;;  %v11173_v32 = vld [vmem:[#allocation9 + $0xc44] ss:$24 sps:$4 sm:$0xff]  }
 0x337   :  { %v7926_v44 = vpop.f32.mrb[3].mxu0  ;;  %8432 = vmatprep.subr.bf16.mxu0 %v11107_v15  ;;  %8108 = vmatprep.subr.bf16.mxu1 %v11116_v57  ;;  %v11171_v15 = vld [vmem:[#allocation9 + $0xc40] ss:$24 sps:$4 sm:$0xff]   ;;  %v11179_v29 = vld [vmem:[#allocation9 + $0xc74] ss:$24 sps:$4 sm:$0xff]  }
 0x338   :  { %v11180_v57 = vld [vmem:[#allocation9 + $0xf98] ss:$24 sps:$4 sm:$0xff]   ;;  %v11186_v3 = vld [vmem:[#allocation9 + $0xfc8] ss:$24 sps:$4 sm:$0xff]   ;;  %11642 = vtanh.f32 %v13215_v12 }
 0x339   :  { %v11177_v5 = vld [vmem:[#allocation9 + $0xc70] ss:$24 sps:$4 sm:$0xff]   ;;  %11644 = vtanh.f32 %v13213_v45  ;;  %v11585_v45 = vld [vmem:[#allocation12 + $0x38] sm:$0xff]  }
 0x33a   :  { %8433 = vmatpush1.bf16.msra.mxu0 %v11105_v14  ;;  %8109 = vmatpush1.bf16.msra.mxu1 %v11114_v41  ;;  %v11185_v14 = vld [vmem:[#allocation9 + $0xca4] ss:$24 sps:$4 sm:$0xff]   ;;  %v11192_v44 = vld [vmem:[#allocation9 + $0xff8] ss:$24 sps:$4 sm:$0xff]  }
 0x33b   :  { %8434 = vmatprep.subr.bf16.mxu0 %v11113_v0  ;;  %8110 = vmatprep.subr.bf16.mxu1 %v11122_v53  ;;  %v11194_v41 = vld [vmem:[#allocation9 + $0xffc] ss:$24 sps:$4 sm:$0xff]   ;;  %v11200_v53 = vld [vmem:[#allocation9 + $0x102c] ss:$24 sps:$4 sm:$0xff]  }
 0x33c   :  { %v11191_v0 = vld [vmem:[#allocation9 + $0xcd4] ss:$24 sps:$4 sm:$0xff]  }
 0x33d   :  { %v11550_v12 = vld [vmem:[#allocation12] sm:$0xff]  }
 0x33e   :  { %8435 = vmatpush1.bf16.msra.mxu0 %v11111_v30  ;;  %8111 = vmatpush1.bf16.msra.mxu1 %v11120_v63  ;;  %v11189_v30 = vld [vmem:[#allocation9 + $0xcd0] ss:$24 sps:$4 sm:$0xff]   ;;  %v11197_v63 = vld [vmem:[#allocation9 + $0xd04] ss:$24 sps:$4 sm:$0xff]  }
 0x33f   :  { %8436 = vmatprep.subr.bf16.mxu0 %v11119_v34  ;;  %8112 = vmatprep.subr.bf16.mxu1 %v11128_v25  ;;  %v11206_v34 = vld [vmem:[#allocation9 + $0x105c] ss:$24 sps:$4 sm:$0xff]   ;;  %v11195_v25 = vld [vmem:[#allocation9 + $0xd00] ss:$24 sps:$4 sm:$0xff]  }
 0x342   :  { %8437 = vmatpush1.bf16.msra.mxu0 %v11117_v2  ;;  %8113 = vmatpush1.bf16.msra.mxu1 %v11126_v49  ;;  %v11204_v2 = vld [vmem:[#allocation9 + $0x1058] ss:$24 sps:$4 sm:$0xff]   ;;  %v11203_v49 = vld [vmem:[#allocation9 + $0xd34] ss:$24 sps:$4 sm:$0xff]  }
 0x343   :  { %8438 = vmatprep.subr.bf16.mxu0 %v11125_v43  ;;  %8114 = vmatprep.subr.bf16.mxu1 %v11134_v54  ;;  %v11212_v43 = vld [vmem:[#allocation9 + $0x108c] ss:$24 sps:$4 sm:$0xff]   ;;  %v11201_v54 = vld [vmem:[#allocation9 + $0xd30] ss:$24 sps:$4 sm:$0xff]  }
 0x346   :  { %8439 = vmatpush1.bf16.msra.mxu0 %v11123_v39  ;;  %8115 = vmatpush1.bf16.msra.mxu1 %v11132_v59  ;;  %v11210_v39 = vld [vmem:[#allocation9 + $0x1088] ss:$24 sps:$4 sm:$0xff]   ;;  %v11209_v59 = vld [vmem:[#allocation9 + $0xd64] ss:$24 sps:$4 sm:$0xff]  }
 0x347   :  { %8440 = vmatprep.subr.bf16.mxu0 %v11131_v38  ;;  %8116 = vmatprep.subr.bf16.mxu1 %v11140_v21  ;;  %v11218_v38 = vld [vmem:[#allocation9 + $0x10bc] ss:$24 sps:$4 sm:$0xff]   ;;  %v11207_v21 = vld [vmem:[#allocation9 + $0xd60] ss:$24 sps:$4 sm:$0xff]  }
 0x34a   :  { %8441 = vmatpush1.bf16.msra.mxu0 %v11129_v17  ;;  %8117 = vmatpush1.bf16.msra.mxu1 %v11138_v33  ;;  %v11216_v17 = vld [vmem:[#allocation9 + $0x10b8] ss:$24 sps:$4 sm:$0xff]   ;;  %v11215_v33 = vld [vmem:[#allocation9 + $0xd94] ss:$24 sps:$4 sm:$0xff]  }
 0x34b   :  { %8442 = vmatprep.subr.bf16.mxu0 %v11137_v23  ;;  %8118 = vmatprep.subr.bf16.mxu1 %v11146_v60  ;;  %v11224_v23 = vld [vmem:[#allocation9 + $0x10ec] ss:$24 sps:$4 sm:$0xff]   ;;  %v11213_v60 = vld [vmem:[#allocation9 + $0xd90] ss:$24 sps:$4 sm:$0xff]  }
 0x34e   :  { %8443 = vmatpush1.bf16.msra.mxu0 %v11135_v9  ;;  %8119 = vmatpush1.bf16.msra.mxu1 %v11144_v51  ;;  %v11222_v9 = vld [vmem:[#allocation9 + $0x10e8] ss:$24 sps:$4 sm:$0xff]   ;;  %v11221_v51 = vld [vmem:[#allocation9 + $0xdc4] ss:$24 sps:$4 sm:$0xff]  }
 0x34f   :  { %8444 = vmatprep.subr.bf16.mxu0 %v11143_v27  ;;  %8120 = vmatprep.subr.bf16.mxu1 %v11152_v7  ;;  %v11230_v27 = vld [vmem:[#allocation9 + $0x111c] ss:$24 sps:$4 sm:$0xff]   ;;  %v11219_v7 = vld [vmem:[#allocation9 + $0xdc0] ss:$24 sps:$4 sm:$0xff]  }
 0x352   :  { %8445 = vmatpush1.bf16.msra.mxu0 %v11141_v31  ;;  %8121 = vmatpush1.bf16.msra.mxu1 %v11150_v26  ;;  %v11228_v31 = vld [vmem:[#allocation9 + $0x1118] ss:$24 sps:$4 sm:$0xff]   ;;  %v11227_v26 = vld [vmem:[#allocation9 + $0xdf4] ss:$24 sps:$4 sm:$0xff]  }
 0x353   :  { %8446 = vmatprep.subr.bf16.mxu0 %v11149_v58  ;;  %8122 = vmatprep.subr.bf16.mxu1 %v11158_v36  ;;  %v11236_v58 = vld [vmem:[#allocation9 + $0x114c] ss:$24 sps:$4 sm:$0xff]   ;;  %v11225_v36 = vld [vmem:[#allocation9 + $0xdf0] ss:$24 sps:$4 sm:$0xff]  }
 0x356   :  { %8447 = vmatpush1.bf16.msra.mxu0 %v11147_v18  ;;  %8123 = vmatpush1.bf16.msra.mxu1 %v11156_v16  ;;  %v11234_v18 = vld [vmem:[#allocation9 + $0x1148] ss:$24 sps:$4 sm:$0xff]   ;;  %v11233_v16 = vld [vmem:[#allocation9 + $0xe24] ss:$24 sps:$4 sm:$0xff]  }
 0x357   :  { %8448 = vmatprep.subr.bf16.mxu0 %v11155_v28  ;;  %8133 = vmatprep.subr.bf16.mxu1 %v11164_v8  ;;  %v11242_v28 = vld [vmem:[#allocation9 + $0x117c] ss:$24 sps:$4 sm:$0xff]   ;;  %v11231_v8 = vld [vmem:[#allocation9 + $0xe20] ss:$24 sps:$4 sm:$0xff]  }
 0x359   :  { %8125 = vmatmul.mubr.bf16.vlgmr.msra.gmra.mrb[4].mxu1 %v13565_v62 }
 0x35a   :  { %8449 = vmatpush1.bf16.msra.mxu0 %v11153_v37  ;;  %8134 = vmatpush1.bf16.msra.mxu1 %v11162_v61  ;;  %v11240_v37 = vld [vmem:[#allocation9 + $0x1178] ss:$24 sps:$4 sm:$0xff]   ;;  %v11239_v61 = vld [vmem:[#allocation9 + $0xe54] ss:$24 sps:$4 sm:$0xff]  }
 0x35b   :  { %8450 = vmatprep.subr.bf16.mxu0 %v11161_v4  ;;  %8135 = vmatprep.subr.bf16.mxu1 %v11170_v1  ;;  %v11248_v4 = vld [vmem:[#allocation9 + $0x11ac] ss:$24 sps:$4 sm:$0xff]   ;;  %v11237_v1 = vld [vmem:[#allocation9 + $0xe50] ss:$24 sps:$4 sm:$0xff]  }
 0x35c   :  { %8165 = vmatprep.mubr.bf16.mxu1 %v13566_v52 }
 0x35e   :  { %8451 = vmatpush1.bf16.msra.mxu0 %v11159_v50  ;;  %8136 = vmatpush1.bf16.msra.mxu1 %v11168_v19  ;;  %v11246_v50 = vld [vmem:[#allocation9 + $0x11a8] ss:$24 sps:$4 sm:$0xff]   ;;  %v11245_v19 = vld [vmem:[#allocation9 + $0xe84] ss:$24 sps:$4 sm:$0xff]  }
 0x35f   :  { %8461 = vmatprep.subr.bf16.mxu0 %v11167_v22  ;;  %8137 = vmatprep.subr.bf16.mxu1 %v11176_v40  ;;  %v11254_v22 = vld [vmem:[#allocation9 + $0x11dc] ss:$24 sps:$4 sm:$0xff]   ;;  %v11243_v40 = vld [vmem:[#allocation9 + $0xe80] ss:$24 sps:$4 sm:$0xff]  }
 0x361   :  { %8453 = vmatmul.mubr.bf16.vlgmr.msra.gmra.mrb[4].mxu0 %v13168_v55  ;;  %v11183_v55 = vld [vmem:[#allocation9 + $0xca0] ss:$24 sps:$4 sm:$0xff]  }
 0x362   :  { %8462 = vmatpush1.bf16.msra.mxu0 %v11165_v42  ;;  %8138 = vmatpush1.bf16.msra.mxu1 %v11174_v6  ;;  %v11252_v42 = vld [vmem:[#allocation9 + $0x11d8] ss:$24 sps:$4 sm:$0xff]   ;;  %v11251_v6 = vld [vmem:[#allocation9 + $0xeb4] ss:$24 sps:$4 sm:$0xff]  }
 0x363   :  { %8463 = vmatprep.subr.bf16.mxu0 %v11173_v32  ;;  %8139 = vmatprep.subr.bf16.mxu1 %v11182_v24  ;;  %v11260_v32 = vld [vmem:[#allocation9 + $0x120c] ss:$24 sps:$4 sm:$0xff]   ;;  %v11249_v24 = vld [vmem:[#allocation9 + $0xeb0] ss:$24 sps:$4 sm:$0xff]  }
 0x364   :  { %8493 = vmatprep.mubr.bf16.mxu0 %v13564_v11  ;;  %v11198_v11 = vld [vmem:[#allocation9 + $0x1028] ss:$24 sps:$4 sm:$0xff]  }
 0x366   :  { %8464 = vmatpush1.bf16.msra.mxu0 %v11171_v15  ;;  %8140 = vmatpush1.bf16.msra.mxu1 %v11180_v57  ;;  %v11258_v15 = vld [vmem:[#allocation9 + $0x1208] ss:$24 sps:$4 sm:$0xff]   ;;  %v11257_v57 = vld [vmem:[#allocation9 + $0xee4] ss:$24 sps:$4 sm:$0xff]  }
 0x367   :  { %8465 = vmatprep.subr.bf16.mxu0 %v11179_v29  ;;  %8141 = vmatprep.subr.bf16.mxu1 %v11188_v56  ;;  %v11266_v29 = vld [vmem:[#allocation9 + $0x123c] ss:$24 sps:$4 sm:$0xff]  }
 0x368   :  { %v13567_v56 = vld [vmem:[#allocation89_spill] sm:$0xff] }
 0x36a   :  { %8466 = vmatpush1.bf16.msra.mxu0 %v11177_v5  ;;  %8142 = vmatpush1.bf16.msra.mxu1 %v11186_v3  ;;  %v11255_v5 = vld [vmem:[#allocation9 + $0xee0] ss:$24 sps:$4 sm:$0xff]  }
 0x36b   :  { %8467 = vmatprep.subr.bf16.mxu0 %v11185_v14  ;;  %8143 = vmatprep.subr.bf16.mxu1 %v11194_v41  ;;  %v11264_v3 = vld [vmem:[#allocation9 + $0x1238] ss:$24 sps:$4 sm:$0xff]   ;;  %v11263_v14 = vld [vmem:[#allocation9 + $0xf14] ss:$24 sps:$4 sm:$0xff]  }
 0x36c   :  { %v11272_v41 = vld [vmem:[#allocation9 + $0x126c] ss:$24 sps:$4 sm:$0xff]  }
 0x36e   :  { %8468 = vmatpush1.bf16.msra.mxu0 %v11183_v55  ;;  %8144 = vmatpush1.bf16.msra.mxu1 %v11192_v44  ;;  %v11261_v55 = vld [vmem:[#allocation9 + $0xf10] ss:$24 sps:$4 sm:$0xff]  }
 0x36f   :  { %8469 = vmatprep.subr.bf16.mxu0 %v11191_v0  ;;  %8145 = vmatprep.subr.bf16.mxu1 %v11200_v53  ;;  %v11270_v44 = vld [vmem:[#allocation9 + $0x1268] ss:$24 sps:$4 sm:$0xff]   ;;  %v11269_v0 = vld [vmem:[#allocation9 + $0xf44] ss:$24 sps:$4 sm:$0xff]  }
 0x370   :  { %v11278_v53 = vld [vmem:[#allocation9 + $0x129c] ss:$24 sps:$4 sm:$0xff]  }
 0x372   :  { %8470 = vmatpush1.bf16.msra.mxu0 %v11189_v30  ;;  %8146 = vmatpush1.bf16.msra.mxu1 %v11198_v11  ;;  %v11267_v30 = vld [vmem:[#allocation9 + $0xf40] ss:$24 sps:$4 sm:$0xff]  }
 0x373   :  { %8471 = vmatprep.subr.bf16.mxu0 %v11197_v63  ;;  %8147 = vmatprep.subr.bf16.mxu1 %v11206_v34  ;;  %v11276_v11 = vld [vmem:[#allocation9 + $0x1298] ss:$24 sps:$4 sm:$0xff]   ;;  %v11275_v63 = vld [vmem:[#allocation9 + $0xf74] ss:$24 sps:$4 sm:$0xff]  }
 0x374   :  { %v11284_v34 = vld [vmem:[#allocation9 + $0x12cc] ss:$24 sps:$4 sm:$0xff]  }
 0x376   :  { %8472 = vmatpush1.bf16.msra.mxu0 %v11195_v25  ;;  %8148 = vmatpush1.bf16.msra.mxu1 %v11204_v2  ;;  %v11273_v25 = vld [vmem:[#allocation9 + $0xf70] ss:$24 sps:$4 sm:$0xff]  }
 0x377   :  { %8473 = vmatprep.subr.bf16.mxu0 %v11203_v49  ;;  %8149 = vmatprep.subr.bf16.mxu1 %v11212_v43  ;;  %v11282_v2 = vld [vmem:[#allocation9 + $0x12c8] ss:$24 sps:$4 sm:$0xff]   ;;  %v11281_v49 = vld [vmem:[#allocation9 + $0xfa4] ss:$24 sps:$4 sm:$0xff]  }
 0x378   :  { %v11290_v43 = vld [vmem:[#allocation9 + $0x12fc] ss:$24 sps:$4 sm:$0xff]  }
 0x37a   :  { %8474 = vmatpush1.bf16.msra.mxu0 %v11201_v54  ;;  %8150 = vmatpush1.bf16.msra.mxu1 %v11210_v39  ;;  %v11288_v54 = vld [vmem:[#allocation9 + $0x12f8] ss:$24 sps:$4 sm:$0xff]   ;;  %v11287_v39 = vld [vmem:[#allocation9 + $0xfd4] ss:$24 sps:$4 sm:$0xff]  }
 0x37b   :  { %8475 = vmatprep.subr.bf16.mxu0 %v11209_v59  ;;  %8151 = vmatprep.subr.bf16.mxu1 %v11218_v38  ;;  %v11296_v59 = vld [vmem:[#allocation9 + $0x132c] ss:$24 sps:$4 sm:$0xff]   ;;  %v11285_v38 = vld [vmem:[#allocation9 + $0xfd0] ss:$24 sps:$4 sm:$0xff]  }
 0x37e   :  { %8476 = vmatpush1.bf16.msra.mxu0 %v11207_v21  ;;  %8152 = vmatpush1.bf16.msra.mxu1 %v11216_v17  ;;  %v11293_v21 = vld [vmem:[#allocation9 + $0x1004] ss:$24 sps:$4 sm:$0xff]  }
 0x37f   :  { %8477 = vmatprep.subr.bf16.mxu0 %v11215_v33  ;;  %8153 = vmatprep.subr.bf16.mxu1 %v11224_v23  ;;  %v11302_v17 = vld [vmem:[#allocation9 + $0x135c] ss:$24 sps:$4 sm:$0xff]   ;;  %v11291_v33 = vld [vmem:[#allocation9 + $0x1000] ss:$24 sps:$4 sm:$0xff]  }
 0x380   :  { %v11300_v23 = vld [vmem:[#allocation9 + $0x1358] ss:$24 sps:$4 sm:$0xff]  }
 0x382   :  { %8478 = vmatpush1.bf16.msra.mxu0 %v11213_v60  ;;  %8154 = vmatpush1.bf16.msra.mxu1 %v11222_v9  ;;  %v11299_v60 = vld [vmem:[#allocation9 + $0x1034] ss:$24 sps:$4 sm:$0xff]  }
 0x383   :  { %8479 = vmatprep.subr.bf16.mxu0 %v11221_v51  ;;  %8155 = vmatprep.subr.bf16.mxu1 %v11230_v27  ;;  %v11308_v9 = vld [vmem:[#allocation9 + $0x138c] ss:$24 sps:$4 sm:$0xff]   ;;  %v11297_v51 = vld [vmem:[#allocation9 + $0x1030] ss:$24 sps:$4 sm:$0xff]  }
 0x384   :  { %v11306_v27 = vld [vmem:[#allocation9 + $0x1388] ss:$24 sps:$4 sm:$0xff]  }
 0x386   :  { %8480 = vmatpush1.bf16.msra.mxu0 %v11219_v7  ;;  %8156 = vmatpush1.bf16.msra.mxu1 %v11228_v31  ;;  %v11305_v7 = vld [vmem:[#allocation9 + $0x1064] ss:$24 sps:$4 sm:$0xff]  }
 0x387   :  { %8481 = vmatprep.subr.bf16.mxu0 %v11227_v26  ;;  %8157 = vmatprep.subr.bf16.mxu1 %v11236_v58  ;;  %v11314_v31 = vld [vmem:[#allocation9 + $0x13bc] ss:$24 sps:$4 sm:$0xff]   ;;  %v11303_v26 = vld [vmem:[#allocation9 + $0x1060] ss:$24 sps:$4 sm:$0xff]  }
 0x388   :  { %v11312_v58 = vld [vmem:[#allocation9 + $0x13b8] ss:$24 sps:$4 sm:$0xff]  }
 0x38a   :  { %8482 = vmatpush1.bf16.msra.mxu0 %v11225_v36  ;;  %8158 = vmatpush1.bf16.msra.mxu1 %v11234_v18  ;;  %v11311_v36 = vld [vmem:[#allocation9 + $0x1094] ss:$24 sps:$4 sm:$0xff]  }
 0x38b   :  { %8483 = vmatprep.subr.bf16.mxu0 %v11233_v16  ;;  %8159 = vmatprep.subr.bf16.mxu1 %v11242_v28  ;;  %v11320_v18 = vld [vmem:[#allocation9 + $0x13ec] ss:$24 sps:$4 sm:$0xff]   ;;  %v11309_v16 = vld [vmem:[#allocation9 + $0x1090] ss:$24 sps:$4 sm:$0xff]  }
 0x38c   :  { %v11318_v28 = vld [vmem:[#allocation9 + $0x13e8] ss:$24 sps:$4 sm:$0xff]  }
 0x38e   :  { %8484 = vmatpush1.bf16.msra.mxu0 %v11231_v8  ;;  %8160 = vmatpush1.bf16.msra.mxu1 %v11240_v37  ;;  %v11317_v8 = vld [vmem:[#allocation9 + $0x10c4] ss:$24 sps:$4 sm:$0xff]  }
 0x38f   :  { %8485 = vmatprep.subr.bf16.mxu0 %v11239_v61  ;;  %8161 = vmatprep.subr.bf16.mxu1 %v11248_v4  ;;  %v11326_v37 = vld [vmem:[#allocation9 + $0x141c] ss:$24 sps:$4 sm:$0xff]   ;;  %v11315_v61 = vld [vmem:[#allocation9 + $0x10c0] ss:$24 sps:$4 sm:$0xff]  }
 0x390   :  { %v11324_v4 = vld [vmem:[#allocation9 + $0x1418] ss:$24 sps:$4 sm:$0xff]  }
 0x392   :  { %8486 = vmatpush1.bf16.msra.mxu0 %v11237_v1  ;;  %8162 = vmatpush1.bf16.msra.mxu1 %v11246_v50  ;;  %v11323_v1 = vld [vmem:[#allocation9 + $0x10f4] ss:$24 sps:$4 sm:$0xff]  }
 0x393   :  { %8487 = vmatprep.subr.bf16.mxu0 %v11245_v19  ;;  %8163 = vmatprep.subr.bf16.mxu1 %v11254_v22  ;;  %v11332_v50 = vld [vmem:[#allocation9 + $0x144c] ss:$24 sps:$4 sm:$0xff]   ;;  %v11321_v19 = vld [vmem:[#allocation9 + $0x10f0] ss:$24 sps:$4 sm:$0xff]  }
 0x394   :  { %v11330_v22 = vld [vmem:[#allocation9 + $0x1448] ss:$24 sps:$4 sm:$0xff]  }
 0x396   :  { %8488 = vmatpush1.bf16.msra.mxu0 %v11243_v40  ;;  %8164 = vmatpush1.bf16.msra.mxu1 %v11252_v42  ;;  %v11329_v40 = vld [vmem:[#allocation9 + $0x1124] ss:$24 sps:$4 sm:$0xff]  }
 0x397   :  { %8489 = vmatprep.subr.bf16.mxu0 %v11251_v6  ;;  %8174 = vmatprep.subr.bf16.mxu1 %v11260_v32  ;;  %v11338_v42 = vld [vmem:[#allocation9 + $0x147c] ss:$24 sps:$4 sm:$0xff]   ;;  %v11327_v6 = vld [vmem:[#allocation9 + $0x1120] ss:$24 sps:$4 sm:$0xff]  }
 0x398   :  { %v11336_v32 = vld [vmem:[#allocation9 + $0x1478] ss:$24 sps:$4 sm:$0xff]  }
 0x399   :  { %8166 = vmatmul.mubr.bf16.vlgmr.msra.gmra.mrb[4].mxu1 %v13567_v56 }
 0x39a   :  { %8490 = vmatpush1.bf16.msra.mxu0 %v11249_v24  ;;  %8175 = vmatpush1.bf16.msra.mxu1 %v11258_v15  ;;  %v11335_v24 = vld [vmem:[#allocation9 + $0x1154] ss:$24 sps:$4 sm:$0xff]  }
 0x39b   :  { %8491 = vmatprep.subr.bf16.mxu0 %v11257_v57  ;;  %8176 = vmatprep.subr.bf16.mxu1 %v11266_v29  ;;  %v11344_v15 = vld [vmem:[#allocation9 + $0x14ac] ss:$24 sps:$4 sm:$0xff]   ;;  %v11333_v57 = vld [vmem:[#allocation9 + $0x1150] ss:$24 sps:$4 sm:$0xff]  }
 0x39c   :  { %8206 = vmatprep.mubr.bf16.mxu1 %v12908_v48  ;;  %v11342_v29 = vld [vmem:[#allocation9 + $0x14a8] ss:$24 sps:$4 sm:$0xff]  }
 0x39e   :  { %8492 = vmatpush1.bf16.msra.mxu0 %v11255_v5  ;;  %8177 = vmatpush1.bf16.msra.mxu1 %v11264_v3  ;;  %v11341_v5 = vld [vmem:[#allocation9 + $0x1184] ss:$24 sps:$4 sm:$0xff]  }
 0x39f   :  { %8502 = vmatprep.subr.bf16.mxu0 %v11263_v14  ;;  %8178 = vmatprep.subr.bf16.mxu1 %v11272_v41  ;;  %v11350_v3 = vld [vmem:[#allocation9 + $0x14dc] ss:$24 sps:$4 sm:$0xff]   ;;  %v11339_v14 = vld [vmem:[#allocation9 + $0x1180] ss:$24 sps:$4 sm:$0xff]  }
 0x3a0   :  { %v11348_v41 = vld [vmem:[#allocation9 + $0x14d8] ss:$24 sps:$4 sm:$0xff]  }
 0x3a1   :  { %8494 = vmatmul.mubr.bf16.vlgmr.msra.gmra.mrb[4].mxu0 %v13565_v62  ;;  %v11279_v62 = vld [vmem:[#allocation9 + $0xfa0] ss:$24 sps:$4 sm:$0xff]  }
 0x3a2   :  { %8503 = vmatpush1.bf16.msra.mxu0 %v11261_v55  ;;  %8179 = vmatpush1.bf16.msra.mxu1 %v11270_v44  ;;  %v11347_v55 = vld [vmem:[#allocation9 + $0x11b4] ss:$24 sps:$4 sm:$0xff]  }
 0x3a3   :  { %8504 = vmatprep.subr.bf16.mxu0 %v11269_v0  ;;  %8180 = vmatprep.subr.bf16.mxu1 %v11278_v53  ;;  %v11356_v44 = vld [vmem:[#allocation9 + $0x150c] ss:$24 sps:$4 sm:$0xff]   ;;  %v11345_v0 = vld [vmem:[#allocation9 + $0x11b0] ss:$24 sps:$4 sm:$0xff]  }
 0x3a4   :  { %8534 = vmatprep.mubr.bf16.mxu0 %v13566_v52  ;;  %v11294_v52 = vld [vmem:[#allocation9 + $0x1328] ss:$24 sps:$4 sm:$0xff]  }
 0x3a5   :  { %v11354_v53 = vld [vmem:[#allocation9 + $0x1508] ss:$24 sps:$4 sm:$0xff]  }
 0x3a6   :  { %8505 = vmatpush1.bf16.msra.mxu0 %v11267_v30  ;;  %8181 = vmatpush1.bf16.msra.mxu1 %v11276_v11  ;;  %v11353_v30 = vld [vmem:[#allocation9 + $0x11e4] ss:$24 sps:$4 sm:$0xff]  }
 0x3a7   :  { %8506 = vmatprep.subr.bf16.mxu0 %v11275_v63  ;;  %8182 = vmatprep.subr.bf16.mxu1 %v11284_v34  ;;  %v11362_v11 = vld [vmem:[#allocation9 + $0x153c] ss:$24 sps:$4 sm:$0xff]   ;;  %v11351_v63 = vld [vmem:[#allocation9 + $0x11e0] ss:$24 sps:$4 sm:$0xff]  }
 0x3a8   :  { %v11360_v34 = vld [vmem:[#allocation9 + $0x1538] ss:$24 sps:$4 sm:$0xff]  }
 0x3aa   :  { %8507 = vmatpush1.bf16.msra.mxu0 %v11273_v25  ;;  %8183 = vmatpush1.bf16.msra.mxu1 %v11282_v2  ;;  %v11359_v25 = vld [vmem:[#allocation9 + $0x1214] ss:$24 sps:$4 sm:$0xff]  }
 0x3ab   :  { %8508 = vmatprep.subr.bf16.mxu0 %v11281_v49  ;;  %8184 = vmatprep.subr.bf16.mxu1 %v11290_v43  ;;  %v11368_v2 = vld [vmem:[#allocation9 + $0x156c] ss:$24 sps:$4 sm:$0xff]   ;;  %v11357_v49 = vld [vmem:[#allocation9 + $0x1210] ss:$24 sps:$4 sm:$0xff]  }
 0x3ac   :  { %v11366_v43 = vld [vmem:[#allocation9 + $0x1568] ss:$24 sps:$4 sm:$0xff]  }
 0x3ae   :  { %8509 = vmatpush1.bf16.msra.mxu0 %v11279_v62  ;;  %8185 = vmatpush1.bf16.msra.mxu1 %v11288_v54  ;;  %v11365_v62 = vld [vmem:[#allocation9 + $0x1244] ss:$24 sps:$4 sm:$0xff]  }
 0x3af   :  { %8510 = vmatprep.subr.bf16.mxu0 %v11287_v39  ;;  %8186 = vmatprep.subr.bf16.mxu1 %v11296_v59  ;;  %v11374_v54 = vld [vmem:[#allocation9 + $0x159c] ss:$24 sps:$4 sm:$0xff]   ;;  %v11363_v39 = vld [vmem:[#allocation9 + $0x1240] ss:$24 sps:$4 sm:$0xff]  }
 0x3b0   :  { %v11372_v59 = vld [vmem:[#allocation9 + $0x1598] ss:$24 sps:$4 sm:$0xff]  }
 0x3b2   :  { %8511 = vmatpush1.bf16.msra.mxu0 %v11285_v38  ;;  %8187 = vmatpush1.bf16.msra.mxu1 %v11294_v52  ;;  %v11371_v38 = vld [vmem:[#allocation9 + $0x1274] ss:$24 sps:$4 sm:$0xff]  }
 0x3b3   :  { %8512 = vmatprep.subr.bf16.mxu0 %v11293_v21  ;;  %8188 = vmatprep.subr.bf16.mxu1 %v11302_v17  ;;  %v11380_v52 = vld [vmem:[#allocation9 + $0x15cc] ss:$24 sps:$4 sm:$0xff]   ;;  %v11369_v21 = vld [vmem:[#allocation9 + $0x1270] ss:$24 sps:$4 sm:$0xff]  }
 0x3b4   :  { %v11378_v17 = vld [vmem:[#allocation9 + $0x15c8] ss:$24 sps:$4 sm:$0xff]  }
 0x3b6   :  { %8513 = vmatpush1.bf16.msra.mxu0 %v11291_v33  ;;  %8189 = vmatpush1.bf16.msra.mxu1 %v11300_v23  ;;  %v11377_v33 = vld [vmem:[#allocation9 + $0x12a4] ss:$24 sps:$4 sm:$0xff]  }
 0x3b7   :  { %8514 = vmatprep.subr.bf16.mxu0 %v11299_v60  ;;  %8190 = vmatprep.subr.bf16.mxu1 %v11308_v9  ;;  %v11386_v23 = vld [vmem:[#allocation9 + $0x15fc] ss:$24 sps:$4 sm:$0xff]   ;;  %v11384_v60 = vld [vmem:[#allocation9 + $0x15f8] ss:$24 sps:$4 sm:$0xff]  }
 0x3b8   :  { %v11383_v9 = vld [vmem:[#allocation9 + $0x12d4] ss:$24 sps:$4 sm:$0xff]  }
 0x3ba   :  { %8515 = vmatpush1.bf16.msra.mxu0 %v11297_v51  ;;  %8191 = vmatpush1.bf16.msra.mxu1 %v11306_v27  ;;  %v11392_v51 = vld [vmem:[#allocation9 + $0x162c] ss:$24 sps:$4 sm:$0xff]   ;;  %v11381_v27 = vld [vmem:[#allocation9 + $0x12d0] ss:$24 sps:$4 sm:$0xff]  }
 0x3bb   :  { %8516 = vmatprep.subr.bf16.mxu0 %v11305_v7  ;;  %8192 = vmatprep.subr.bf16.mxu1 %v11314_v31  ;;  %v11389_v7 = vld [vmem:[#allocation9 + $0x1304] ss:$24 sps:$4 sm:$0xff]  }
 0x3bc   :  { %v11398_v31 = vld [vmem:[#allocation9 + $0x165c] ss:$24 sps:$4 sm:$0xff]  }
 0x3be   :  { %8517 = vmatpush1.bf16.msra.mxu0 %v11303_v26  ;;  %8193 = vmatpush1.bf16.msra.mxu1 %v11312_v58  ;;  %v11387_v26 = vld [vmem:[#allocation9 + $0x1300] ss:$24 sps:$4 sm:$0xff]  }
 0x3bf   :  { %8518 = vmatprep.subr.bf16.mxu0 %v11311_v36  ;;  %8194 = vmatprep.subr.bf16.mxu1 %v11320_v18  ;;  %v11396_v58 = vld [vmem:[#allocation9 + $0x1658] ss:$24 sps:$4 sm:$0xff]   ;;  %v11395_v36 = vld [vmem:[#allocation9 + $0x1334] ss:$24 sps:$4 sm:$0xff]  }
 0x3c0   :  { %v11404_v18 = vld [vmem:[#allocation9 + $0x168c] ss:$24 sps:$4 sm:$0xff]  }
 0x3c2   :  { %8519 = vmatpush1.bf16.msra.mxu0 %v11309_v16  ;;  %8195 = vmatpush1.bf16.msra.mxu1 %v11318_v28  ;;  %v11393_v16 = vld [vmem:[#allocation9 + $0x1330] ss:$24 sps:$4 sm:$0xff]  }
 0x3c3   :  { %8520 = vmatprep.subr.bf16.mxu0 %v11317_v8  ;;  %8196 = vmatprep.subr.bf16.mxu1 %v11326_v37  ;;  %v11402_v28 = vld [vmem:[#allocation9 + $0x1688] ss:$24 sps:$4 sm:$0xff]   ;;  %v11401_v8 = vld [vmem:[#allocation9 + $0x1364] ss:$24 sps:$4 sm:$0xff]  }
 0x3c4   :  { %v11410_v37 = vld [vmem:[#allocation9 + $0x16bc] ss:$24 sps:$4 sm:$0xff]  }
 0x3c6   :  { %8521 = vmatpush1.bf16.msra.mxu0 %v11315_v61  ;;  %8197 = vmatpush1.bf16.msra.mxu1 %v11324_v4  ;;  %v11399_v61 = vld [vmem:[#allocation9 + $0x1360] ss:$24 sps:$4 sm:$0xff]  }
 0x3c7   :  { %8522 = vmatprep.subr.bf16.mxu0 %v11323_v1  ;;  %8198 = vmatprep.subr.bf16.mxu1 %v11332_v50  ;;  %v11408_v4 = vld [vmem:[#allocation9 + $0x16b8] ss:$24 sps:$4 sm:$0xff]   ;;  %v11407_v1 = vld [vmem:[#allocation9 + $0x1394] ss:$24 sps:$4 sm:$0xff]  }
 0x3c8   :  { %v11416_v50 = vld [vmem:[#allocation9 + $0x16ec] ss:$24 sps:$4 sm:$0xff]  }
 0x3ca   :  { %8523 = vmatpush1.bf16.msra.mxu0 %v11321_v19  ;;  %8199 = vmatpush1.bf16.msra.mxu1 %v11330_v22  ;;  %v11405_v19 = vld [vmem:[#allocation9 + $0x1390] ss:$24 sps:$4 sm:$0xff]  }
 0x3cb   :  { %8524 = vmatprep.subr.bf16.mxu0 %v11329_v40  ;;  %8200 = vmatprep.subr.bf16.mxu1 %v11338_v42  ;;  %v11414_v22 = vld [vmem:[#allocation9 + $0x16e8] ss:$24 sps:$4 sm:$0xff]   ;;  %v11413_v40 = vld [vmem:[#allocation9 + $0x13c4] ss:$24 sps:$4 sm:$0xff]  }
 0x3cc   :  { %v11422_v42 = vld [vmem:[#allocation9 + $0x171c] ss:$24 sps:$4 sm:$0xff]  }
 0x3ce   :  { %8525 = vmatpush1.bf16.msra.mxu0 %v11327_v6  ;;  %8201 = vmatpush1.bf16.msra.mxu1 %v11336_v32  ;;  %v11411_v6 = vld [vmem:[#allocation9 + $0x13c0] ss:$24 sps:$4 sm:$0xff]  }
 0x3cf   :  { %8526 = vmatprep.subr.bf16.mxu0 %v11335_v24  ;;  %8202 = vmatprep.subr.bf16.mxu1 %v11344_v15  ;;  %v11420_v32 = vld [vmem:[#allocation9 + $0x1718] ss:$24 sps:$4 sm:$0xff]   ;;  %v11419_v24 = vld [vmem:[#allocation9 + $0x13f4] ss:$24 sps:$4 sm:$0xff]  }
 0x3d0   :  { %v11428_v15 = vld [vmem:[#allocation9 + $0x174c] ss:$24 sps:$4 sm:$0xff]  }
 0x3d2   :  { %8527 = vmatpush1.bf16.msra.mxu0 %v11333_v57  ;;  %8203 = vmatpush1.bf16.msra.mxu1 %v11342_v29  ;;  %v11417_v57 = vld [vmem:[#allocation9 + $0x13f0] ss:$24 sps:$4 sm:$0xff]  }
 0x3d3   :  { %8528 = vmatprep.subr.bf16.mxu0 %v11341_v5  ;;  %8204 = vmatprep.subr.bf16.mxu1 %v11350_v3  ;;  %v11426_v29 = vld [vmem:[#allocation9 + $0x1748] ss:$24 sps:$4 sm:$0xff]   ;;  %v11425_v5 = vld [vmem:[#allocation9 + $0x1424] ss:$24 sps:$4 sm:$0xff]  }
 0x3d4   :  { %v11434_v3 = vld [vmem:[#allocation9 + $0x177c] ss:$24 sps:$4 sm:$0xff]  }
 0x3d6   :  { %8529 = vmatpush1.bf16.msra.mxu0 %v11339_v14  ;;  %8205 = vmatpush1.bf16.msra.mxu1 %v11348_v41  ;;  %v11423_v14 = vld [vmem:[#allocation9 + $0x1420] ss:$24 sps:$4 sm:$0xff]  }
 0x3d7   :  { %8530 = vmatprep.subr.bf16.mxu0 %v11347_v55  ;;  %8215 = vmatprep.subr.bf16.mxu1 %v11356_v44  ;;  %v11432_v41 = vld [vmem:[#allocation9 + $0x1778] ss:$24 sps:$4 sm:$0xff]   ;;  %v11431_v55 = vld [vmem:[#allocation9 + $0x1454] ss:$24 sps:$4 sm:$0xff]  }
 0x3d8   :  { %v11440_v44 = vld [vmem:[#allocation9 + $0x17ac] ss:$24 sps:$4 sm:$0xff]  }
 0x3d9   :  { %8207 = vmatmul.mubr.bf16.vlgmr.msra.gmra.mrb[4].mxu1 %v12999_v47 }
 0x3da   :  { %8531 = vmatpush1.bf16.msra.mxu0 %v11345_v0  ;;  %8216 = vmatpush1.bf16.msra.mxu1 %v11354_v53  ;;  %v11429_v0 = vld [vmem:[#allocation9 + $0x1450] ss:$24 sps:$4 sm:$0xff]  }
 0x3db   :  { %8532 = vmatprep.subr.bf16.mxu0 %v11353_v30  ;;  %8217 = vmatprep.subr.bf16.mxu1 %v11362_v11  ;;  %v11438_v53 = vld [vmem:[#allocation9 + $0x17a8] ss:$24 sps:$4 sm:$0xff]   ;;  %v11437_v30 = vld [vmem:[#allocation9 + $0x1484] ss:$24 sps:$4 sm:$0xff]  }
 0x3dc   :  { %8247 = vmatprep.mubr.bf16.mxu1 %v13070_v46  ;;  %v11446_v11 = vld [vmem:[#allocation9 + $0x17dc] ss:$24 sps:$4 sm:$0xff]  }
 0x3de   :  { %8533 = vmatpush1.bf16.msra.mxu0 %v11351_v63  ;;  %8218 = vmatpush1.bf16.msra.mxu1 %v11360_v34  ;;  %v11435_v63 = vld [vmem:[#allocation9 + $0x1480] ss:$24 sps:$4 sm:$0xff]  }
 0x3df   :  { %8543 = vmatprep.subr.bf16.mxu0 %v11359_v25  ;;  %8219 = vmatprep.subr.bf16.mxu1 %v11368_v2  ;;  %v11444_v34 = vld [vmem:[#allocation9 + $0x17d8] ss:$24 sps:$4 sm:$0xff]   ;;  %v11443_v25 = vld [vmem:[#allocation9 + $0x14b4] ss:$24 sps:$4 sm:$0xff]  }
 0x3e0   :  { %v11452_v2 = vld [vmem:[#allocation9 + $0x180c] ss:$24 sps:$4 sm:$0xff]  }
 0x3e1   :  { %8535 = vmatmul.mubr.bf16.vlgmr.msra.gmra.mrb[4].mxu0 %v13567_v56  ;;  %v11375_v56 = vld [vmem:[#allocation9 + $0x12a0] ss:$24 sps:$4 sm:$0xff]  }
 0x3e2   :  { %8544 = vmatpush1.bf16.msra.mxu0 %v11357_v49  ;;  %8220 = vmatpush1.bf16.msra.mxu1 %v11366_v43  ;;  %v11441_v49 = vld [vmem:[#allocation9 + $0x14b0] ss:$24 sps:$4 sm:$0xff]  }
 0x3e3   :  { %8545 = vmatprep.subr.bf16.mxu0 %v11365_v62  ;;  %8221 = vmatprep.subr.bf16.mxu1 %v11374_v54  ;;  %v11450_v43 = vld [vmem:[#allocation9 + $0x1808] ss:$24 sps:$4 sm:$0xff]   ;;  %v11449_v62 = vld [vmem:[#allocation9 + $0x14e4] ss:$24 sps:$4 sm:$0xff]  }
 0x3e4   :  { %8575 = vmatprep.mubr.bf16.mxu0 %v12908_v48  ;;  %v11390_v48 = vld [vmem:[#allocation9 + $0x1628] ss:$24 sps:$4 sm:$0xff]   ;;  %v11458_v54 = vld [vmem:[#allocation9 + $0x183c] ss:$24 sps:$4 sm:$0xff]  }
 0x3e6   :  { %8546 = vmatpush1.bf16.msra.mxu0 %v11363_v39  ;;  %8222 = vmatpush1.bf16.msra.mxu1 %v11372_v59  ;;  %v11447_v39 = vld [vmem:[#allocation9 + $0x14e0] ss:$24 sps:$4 sm:$0xff]  }
 0x3e7   :  { %8547 = vmatprep.subr.bf16.mxu0 %v11371_v38  ;;  %8223 = vmatprep.subr.bf16.mxu1 %v11380_v52  ;;  %v11456_v59 = vld [vmem:[#allocation9 + $0x1838] ss:$24 sps:$4 sm:$0xff]   ;;  %v11455_v38 = vld [vmem:[#allocation9 + $0x1514] ss:$24 sps:$4 sm:$0xff]  }
 0x3e8   :  { %v11464_v52 = vld [vmem:[#allocation9 + $0x186c] ss:$24 sps:$4 sm:$0xff]  }
 0x3ea   :  { %8548 = vmatpush1.bf16.msra.mxu0 %v11369_v21  ;;  %8224 = vmatpush1.bf16.msra.mxu1 %v11378_v17  ;;  %v11453_v21 = vld [vmem:[#allocation9 + $0x1510] ss:$24 sps:$4 sm:$0xff]  }
 0x3eb   :  { %8549 = vmatprep.subr.bf16.mxu0 %v11377_v33  ;;  %8225 = vmatprep.subr.bf16.mxu1 %v11386_v23  ;;  %v11462_v17 = vld [vmem:[#allocation9 + $0x1868] ss:$24 sps:$4 sm:$0xff]   ;;  %v11461_v33 = vld [vmem:[#allocation9 + $0x1544] ss:$24 sps:$4 sm:$0xff]  }
 0x3ec   :  { %v11470_v23 = vld [vmem:[#allocation9 + $0x189c] ss:$24 sps:$4 sm:$0xff]  }
 0x3ee   :  { %8550 = vmatpush1.bf16.msra.mxu0 %v11375_v56  ;;  %8226 = vmatpush1.bf16.msra.mxu1 %v11384_v60  ;;  %v11459_v56 = vld [vmem:[#allocation9 + $0x1540] ss:$24 sps:$4 sm:$0xff]  }
 0x3ef   :  { %8551 = vmatprep.subr.bf16.mxu0 %v11383_v9  ;;  %8227 = vmatprep.subr.bf16.mxu1 %v11392_v51  ;;  %v11468_v60 = vld [vmem:[#allocation9 + $0x1898] ss:$24 sps:$4 sm:$0xff]   ;;  %v11467_v9 = vld [vmem:[#allocation9 + $0x1574] ss:$24 sps:$4 sm:$0xff]  }
 0x3f0   :  { %v11476_v51 = vld [vmem:[#allocation9 + $0x18cc] ss:$24 sps:$4 sm:$0xff]  }
 0x3f2   :  { %8552 = vmatpush1.bf16.msra.mxu0 %v11381_v27  ;;  %8228 = vmatpush1.bf16.msra.mxu1 %v11390_v48  ;;  %v11465_v27 = vld [vmem:[#allocation9 + $0x1570] ss:$24 sps:$4 sm:$0xff]  }
 0x3f3   :  { %8553 = vmatprep.subr.bf16.mxu0 %v11389_v7  ;;  %8229 = vmatprep.subr.bf16.mxu1 %v11398_v31  ;;  %v11474_v48 = vld [vmem:[#allocation9 + $0x18c8] ss:$24 sps:$4 sm:$0xff]   ;;  %v11473_v7 = vld [vmem:[#allocation9 + $0x15a4] ss:$24 sps:$4 sm:$0xff]  }
 0x3f4   :  { %v11482_v31 = vld [vmem:[#allocation9 + $0x18fc] ss:$24 sps:$4 sm:$0xff]  }
 0x3f6   :  { %8554 = vmatpush1.bf16.msra.mxu0 %v11387_v26  ;;  %8230 = vmatpush1.bf16.msra.mxu1 %v11396_v58  ;;  %v11480_v26 = vld [vmem:[#allocation9 + $0x18f8] ss:$24 sps:$4 sm:$0xff]   ;;  %v11479_v58 = vld [vmem:[#allocation9 + $0x15d4] ss:$24 sps:$4 sm:$0xff]  }
 0x3f7   :  { %8555 = vmatprep.subr.bf16.mxu0 %v11395_v36  ;;  %8231 = vmatprep.subr.bf16.mxu1 %v11404_v18  ;;  %v11488_v36 = vld [vmem:[#allocation9 + $0x192c] ss:$24 sps:$4 sm:$0xff]   ;;  %v11477_v18 = vld [vmem:[#allocation9 + $0x15d0] ss:$24 sps:$4 sm:$0xff]  }
 0x3fa   :  { %8556 = vmatpush1.bf16.msra.mxu0 %v11393_v16  ;;  %8232 = vmatpush1.bf16.msra.mxu1 %v11402_v28  ;;  %v11485_v16 = vld [vmem:[#allocation9 + $0x1604] ss:$24 sps:$4 sm:$0xff]  }
 0x3fb   :  { %8557 = vmatprep.subr.bf16.mxu0 %v11401_v8  ;;  %8233 = vmatprep.subr.bf16.mxu1 %v11410_v37  ;;  %v11494_v28 = vld [vmem:[#allocation9 + $0x195c] ss:$24 sps:$4 sm:$0xff]   ;;  %v11483_v8 = vld [vmem:[#allocation9 + $0x1600] ss:$24 sps:$4 sm:$0xff]  }
 0x3fc   :  { %v11492_v37 = vld [vmem:[#allocation9 + $0x1958] ss:$24 sps:$4 sm:$0xff]  }
 0x3fe   :  { %8558 = vmatpush1.bf16.msra.mxu0 %v11399_v61  ;;  %8234 = vmatpush1.bf16.msra.mxu1 %v11408_v4  ;;  %v11491_v61 = vld [vmem:[#allocation9 + $0x1634] ss:$24 sps:$4 sm:$0xff]  }
 0x3ff   :  { %8559 = vmatprep.subr.bf16.mxu0 %v11407_v1  ;;  %8235 = vmatprep.subr.bf16.mxu1 %v11416_v50  ;;  %v11500_v4 = vld [vmem:[#allocation9 + $0x198c] ss:$24 sps:$4 sm:$0xff]   ;;  %v11489_v1 = vld [vmem:[#allocation9 + $0x1630] ss:$24 sps:$4 sm:$0xff]  }
 0x400   :  { %v11498_v50 = vld [vmem:[#allocation9 + $0x1988] ss:$24 sps:$4 sm:$0xff]  }
 0x402   :  { %8560 = vmatpush1.bf16.msra.mxu0 %v11405_v19  ;;  %8236 = vmatpush1.bf16.msra.mxu1 %v11414_v22  ;;  %v11497_v19 = vld [vmem:[#allocation9 + $0x1664] ss:$24 sps:$4 sm:$0xff]  }
 0x403   :  { %8561 = vmatprep.subr.bf16.mxu0 %v11413_v40  ;;  %8237 = vmatprep.subr.bf16.mxu1 %v11422_v42  ;;  %v11506_v22 = vld [vmem:[#allocation9 + $0x19bc] ss:$24 sps:$4 sm:$0xff]   ;;  %v11495_v40 = vld [vmem:[#allocation9 + $0x1660] ss:$24 sps:$4 sm:$0xff]  }
 0x404   :  { %v11504_v42 = vld [vmem:[#allocation9 + $0x19b8] ss:$24 sps:$4 sm:$0xff]  }
 0x406   :  { %8562 = vmatpush1.bf16.msra.mxu0 %v11411_v6  ;;  %8238 = vmatpush1.bf16.msra.mxu1 %v11420_v32  ;;  %v11503_v6 = vld [vmem:[#allocation9 + $0x1694] ss:$24 sps:$4 sm:$0xff]  }
 0x407   :  { %8563 = vmatprep.subr.bf16.mxu0 %v11419_v24  ;;  %8239 = vmatprep.subr.bf16.mxu1 %v11428_v15  ;;  %v11512_v32 = vld [vmem:[#allocation9 + $0x19ec] ss:$24 sps:$4 sm:$0xff]   ;;  %v11501_v24 = vld [vmem:[#allocation9 + $0x1690] ss:$24 sps:$4 sm:$0xff]  }
 0x408   :  { %v11510_v15 = vld [vmem:[#allocation9 + $0x19e8] ss:$24 sps:$4 sm:$0xff]  }
 0x40a   :  { %8564 = vmatpush1.bf16.msra.mxu0 %v11417_v57  ;;  %8240 = vmatpush1.bf16.msra.mxu1 %v11426_v29  ;;  %v11509_v57 = vld [vmem:[#allocation9 + $0x16c4] ss:$24 sps:$4 sm:$0xff]  }
 0x40b   :  { %8565 = vmatprep.subr.bf16.mxu0 %v11425_v5  ;;  %8241 = vmatprep.subr.bf16.mxu1 %v11434_v3  ;;  %v11518_v29 = vld [vmem:[#allocation9 + $0x1a1c] ss:$24 sps:$4 sm:$0xff]   ;;  %v11507_v5 = vld [vmem:[#allocation9 + $0x16c0] ss:$24 sps:$4 sm:$0xff]  }
 0x40c   :  { %v11516_v3 = vld [vmem:[#allocation9 + $0x1a18] ss:$24 sps:$4 sm:$0xff]  }
 0x40e   :  { %8566 = vmatpush1.bf16.msra.mxu0 %v11423_v14  ;;  %8242 = vmatpush1.bf16.msra.mxu1 %v11432_v41  ;;  %v11515_v14 = vld [vmem:[#allocation9 + $0x16f4] ss:$24 sps:$4 sm:$0xff]  }
 0x40f   :  { %8567 = vmatprep.subr.bf16.mxu0 %v11431_v55  ;;  %8243 = vmatprep.subr.bf16.mxu1 %v11440_v44  ;;  %v11524_v41 = vld [vmem:[#allocation9 + $0x1a4c] ss:$24 sps:$4 sm:$0xff]   ;;  %v11513_v55 = vld [vmem:[#allocation9 + $0x16f0] ss:$24 sps:$4 sm:$0xff]  }
 0x410   :  { %v11522_v44 = vld [vmem:[#allocation9 + $0x1a48] ss:$24 sps:$4 sm:$0xff]  }
 0x412   :  { %8568 = vmatpush1.bf16.msra.mxu0 %v11429_v0  ;;  %8244 = vmatpush1.bf16.msra.mxu1 %v11438_v53  ;;  %v11521_v0 = vld [vmem:[#allocation9 + $0x1724] ss:$24 sps:$4 sm:$0xff]  }
 0x413   :  { %8569 = vmatprep.subr.bf16.mxu0 %v11437_v30  ;;  %8245 = vmatprep.subr.bf16.mxu1 %v11446_v11  ;;  %v11530_v53 = vld [vmem:[#allocation9 + $0x1a7c] ss:$24 sps:$4 sm:$0xff]   ;;  %v11519_v30 = vld [vmem:[#allocation9 + $0x1720] ss:$24 sps:$4 sm:$0xff]  }
 0x414   :  { %v11528_v11 = vld [vmem:[#allocation9 + $0x1a78] ss:$24 sps:$4 sm:$0xff]  }
 0x416   :  { %8570 = vmatpush1.bf16.msra.mxu0 %v11435_v63  ;;  %8246 = vmatpush1.bf16.msra.mxu1 %v11444_v34  ;;  %v11527_v63 = vld [vmem:[#allocation9 + $0x1754] ss:$24 sps:$4 sm:$0xff]  }
 0x417   :  { %8571 = vmatprep.subr.bf16.mxu0 %v11443_v25  ;;  %8256 = vmatprep.subr.bf16.mxu1 %v11452_v2  ;;  %v11536_v34 = vld [vmem:[#allocation9 + $0x1aac] ss:$24 sps:$4 sm:$0xff]   ;;  %v11525_v25 = vld [vmem:[#allocation9 + $0x1750] ss:$24 sps:$4 sm:$0xff]  }
 0x418   :  { %v11534_v2 = vld [vmem:[#allocation9 + $0x1aa8] ss:$24 sps:$4 sm:$0xff]  }
 0x419   :  { %8248 = vmatmul.mubr.bf16.vlgmr.msra.gmra.mrb[4].mxu1 %v13176_v35 }
 0x41a   :  { %8572 = vmatpush1.bf16.msra.mxu0 %v11441_v49  ;;  %8257 = vmatpush1.bf16.msra.mxu1 %v11450_v43  ;;  %v11533_v49 = vld [vmem:[#allocation9 + $0x1784] ss:$24 sps:$4 sm:$0xff]  }
 0x41b   :  { %8573 = vmatprep.subr.bf16.mxu0 %v11449_v62  ;;  %8258 = vmatprep.subr.bf16.mxu1 %v11458_v54  ;;  %v11542_v43 = vld [vmem:[#allocation9 + $0x1adc] ss:$24 sps:$4 sm:$0xff]   ;;  %v11531_v62 = vld [vmem:[#allocation9 + $0x1780] ss:$24 sps:$4 sm:$0xff]  }
 0x41c   :  { %8288 = vmatprep.mubr.bf16.mxu1 %v13179_v20  ;;  %v11540_v54 = vld [vmem:[#allocation9 + $0x1ad8] ss:$24 sps:$4 sm:$0xff]  }
 0x41e   :  { %8574 = vmatpush1.bf16.msra.mxu0 %v11447_v39  ;;  %8259 = vmatpush1.bf16.msra.mxu1 %v11456_v59  ;;  %v11539_v39 = vld [vmem:[#allocation9 + $0x17b4] ss:$24 sps:$4 sm:$0xff]  }
 0x41f   :  { %8584 = vmatprep.subr.bf16.mxu0 %v11455_v38  ;;  %8260 = vmatprep.subr.bf16.mxu1 %v11464_v52  ;;  %v11549_v59 = vld [vmem:[#allocation12 + $0x40] sm:$0xff]   ;;  %v11643_v38 = vpop.eup %11642 }
 0x420   :  { %v11537_v52 = vld [vmem:[#allocation9 + $0x17b0] ss:$24 sps:$4 sm:$0xff]  }
 0x421   :  { %8576 = vmatmul.mubr.bf16.vlgmr.msra.gmra.mrb[4].mxu0 %v12999_v47  ;;  %v11471_v47 = vld [vmem:[#allocation9 + $0x15a0] ss:$24 sps:$4 sm:$0xff]  }
 0x422   :  { %8585 = vmatpush1.bf16.msra.mxu0 %v11453_v21  ;;  %8261 = vmatpush1.bf16.msra.mxu1 %v11462_v17  ;;  %v11545_v21 = vld [vmem:[#allocation9 + $0x17e4] ss:$24 sps:$4 sm:$0xff]   ;;  %v11554_v17 = vld [vmem:[#allocation12 + $0x48] sm:$0xff]  }
 0x423   :  { %8586 = vmatprep.subr.bf16.mxu0 %v11461_v33  ;;  %8262 = vmatprep.subr.bf16.mxu1 %v11470_v23  ;;  %v8673_v33 = vpack.c.bf16 %v11643_v38, %v11643_v38  ;;  %v11543_v23 = vld [vmem:[#allocation9 + $0x17e0] ss:$24 sps:$4 sm:$0xff]   ;;  %v11618_v38 = vld [vmem:[#allocation12 + $0xe0] sm:$0xff]  }
 0x424   :  { %8616 = vmatprep.mubr.bf16.mxu0 %v13070_v46  ;;  %v11486_v46 = vld [vmem:[#allocation9 + $0x1928] ss:$24 sps:$4 sm:$0xff]  }
 0x426   :  { %8587 = vmatpush1.bf16.msra.mxu0 %v11459_v56  ;;  %8263 = vmatpush1.bf16.msra.mxu1 %v11468_v60  ;;  %v11555_v56 = vld [vmem:[#allocation12 + $0x8] sm:$0xff]  }
 0x427   :  { %8588 = vmatprep.subr.bf16.mxu0 %v11467_v9  ;;  %8264 = vmatprep.subr.bf16.mxu1 %v11476_v51  ;;  %v11548_v60 = vld [vmem:[#allocation9 + $0x1814] ss:$24 sps:$4 sm:$0xff]   ;;  %v11546_v51 = vld [vmem:[#allocation9 + $0x1810] ss:$24 sps:$4 sm:$0xff]  }
 0x428   :  { %v11559_v9 = vld [vmem:[#allocation12 + $0x50] sm:$0xff]  }
 0x42a   :  { %8589 = vmatpush1.bf16.msra.mxu0 %v11465_v27  ;;  %8265 = vmatpush1.bf16.msra.mxu1 %v11474_v48  ;;  %v11560_v27 = vld [vmem:[#allocation12 + $0x10] sm:$0xff]  }
 0x42b   :  { %8590 = vmatprep.subr.bf16.mxu0 %v11473_v7  ;;  %8266 = vmatprep.subr.bf16.mxu1 %v11482_v31  ;;  %v11553_v48 = vld [vmem:[#allocation9 + $0x1844] ss:$24 sps:$4 sm:$0xff]   ;;  %v11551_v31 = vld [vmem:[#allocation9 + $0x1840] ss:$24 sps:$4 sm:$0xff]  }
 0x42c   :  { %v11564_v7 = vld [vmem:[#allocation12 + $0x58] sm:$0xff]  }
 0x42e   :  { %8591 = vmatpush1.bf16.msra.mxu0 %v11471_v47  ;;  %8267 = vmatpush1.bf16.msra.mxu1 %v11480_v26  ;;  %v11565_v47 = vld [vmem:[#allocation12 + $0x18] sm:$0xff]   ;;  %v11558_v26 = vld [vmem:[#allocation9 + $0x1874] ss:$24 sps:$4 sm:$0xff]  }
 0x42f   :  { %8592 = vmatprep.subr.bf16.mxu0 %v11479_v58  ;;  %8268 = vmatprep.subr.bf16.mxu1 %v11488_v36  ;;  %v11569_v58 = vld [vmem:[#allocation12 + $0x60] sm:$0xff]  }
 0x430   :  { %v11556_v36 = vld [vmem:[#allocation9 + $0x1870] ss:$24 sps:$4 sm:$0xff]  }
 0x432   :  { %8593 = vmatpush1.bf16.msra.mxu0 %v11477_v18  ;;  %8269 = vmatpush1.bf16.msra.mxu1 %v11486_v46  ;;  %v11570_v18 = vld [vmem:[#allocation12 + $0x20] sm:$0xff]  }
 0x433   :  { %8594 = vmatprep.subr.bf16.mxu0 %v11485_v16  ;;  %8270 = vmatprep.subr.bf16.mxu1 %v11494_v28  ;;  %v11563_v46 = vld [vmem:[#allocation9 + $0x18a4] ss:$24 sps:$4 sm:$0xff]   ;;  %v11574_v16 = vld [vmem:[#allocation12 + $0x68] sm:$0xff]  }
 0x434   :  { %v11575_v28 = vld [vmem:[#allocation12 + $0x28] sm:$0xff]  }
 0x436   :  { %8595 = vmatpush1.bf16.msra.mxu0 %v11483_v8  ;;  %8271 = vmatpush1.bf16.msra.mxu1 %v11492_v37  ;;  %v11568_v8 = vld [vmem:[#allocation9 + $0x18d4] ss:$24 sps:$4 sm:$0xff]  }
 0x437   :  { %8596 = vmatprep.subr.bf16.mxu0 %v11491_v61  ;;  %8272 = vmatprep.subr.bf16.mxu1 %v11500_v4  ;;  %v11579_v37 = vld [vmem:[#allocation12 + $0x70] sm:$0xff]  }
 0x438   :  { %v11580_v61 = vld [vmem:[#allocation12 + $0x30] sm:$0xff]  }
 0x439   :  { %v11573_v4 = vld [vmem:[#allocation9 + $0x1904] ss:$24 sps:$4 sm:$0xff]  }
 0x43a   :  { %8597 = vmatpush1.bf16.msra.mxu0 %v11489_v1  ;;  %8273 = vmatpush1.bf16.msra.mxu1 %v11498_v50  ;;  %v11584_v1 = vld [vmem:[#allocation12 + $0x78] sm:$0xff]  }
 0x43b   :  { %8598 = vmatprep.subr.bf16.mxu0 %v11497_v19  ;;  %8274 = vmatprep.subr.bf16.mxu1 %v11506_v22  ;;  %v11571_v50 = vld [vmem:[#allocation9 + $0x1900] ss:$24 sps:$4 sm:$0xff]   ;;  %v11578_v19 = vld [vmem:[#allocation9 + $0x1934] ss:$24 sps:$4 sm:$0xff]  }
 0x43c   :  { %v11610_v22 = vld [vmem:[#allocation12 + $0xc0] sm:$0xff]  }
 0x43e   :  { %8599 = vmatpush1.bf16.msra.mxu0 %v11495_v40  ;;  %8275 = vmatpush1.bf16.msra.mxu1 %v11504_v42  ;;  %v11645_v40 = vpop.eup %11644  ;;  %v11576_v42 = vld [vmem:[#allocation9 + $0x1930] ss:$24 sps:$4 sm:$0xff]  }
 0x43f   :  { %8600 = vmatprep.subr.bf16.mxu0 %v11503_v6  ;;  %8276 = vmatprep.subr.bf16.mxu1 %v11512_v32  ;;  %v11611_v6 = vld [vmem:[#allocation12 + $0x80] sm:$0xff]   ;;  %v8672_v32 = vpack.c.bf16 %v11645_v40, %v11645_v40 }
 0x442   :  { %8601 = vmatpush1.bf16.msra.mxu0 %v11501_v24  ;;  %8277 = vmatpush1.bf16.msra.mxu1 %v11510_v15  ;;  %v11583_v24 = vld [vmem:[#allocation9 + $0x1964] ss:$24 sps:$4 sm:$0xff]   ;;  %v11612_v15 = vld [vmem:[#allocation12 + $0xc8] sm:$0xff]  }
 0x443   :  { %8602 = vmatprep.subr.bf16.mxu0 %v11509_v57  ;;  %8278 = vmatprep.subr.bf16.mxu1 %v11518_v29  ;;  %v11581_v57 = vld [vmem:[#allocation9 + $0x1960] ss:$24 sps:$4 sm:$0xff]   ;;  %v11613_v29 = vld [vmem:[#allocation12 + $0x88] sm:$0xff]  }
 0x446   :  { %8603 = vmatpush1.bf16.msra.mxu0 %v11507_v5  ;;  %8279 = vmatpush1.bf16.msra.mxu1 %v11516_v3  ;;  %v11588_v5 = vld [vmem:[#allocation9 + $0x1994] ss:$24 sps:$4 sm:$0xff]  }
 0x447   :  { %8604 = vmatprep.subr.bf16.mxu0 %v11515_v14  ;;  %8280 = vmatprep.subr.bf16.mxu1 %v11524_v41  ;;  %v11614_v3 = vld [vmem:[#allocation12 + $0xd0] sm:$0xff]   ;;  %v11586_v14 = vld [vmem:[#allocation9 + $0x1990] ss:$24 sps:$4 sm:$0xff]  }
 0x448   :  { %v11615_v41 = vld [vmem:[#allocation12 + $0x90] sm:$0xff]  }
 0x44a   :  { %8605 = vmatpush1.bf16.msra.mxu0 %v11513_v55  ;;  %8281 = vmatpush1.bf16.msra.mxu1 %v11522_v44  ;;  %v11591_v55 = vld [vmem:[#allocation9 + $0x19c4] ss:$24 sps:$4 sm:$0xff]  }
 0x44b   :  { %8606 = vmatprep.subr.bf16.mxu0 %v11521_v0  ;;  %8282 = vmatprep.subr.bf16.mxu1 %v11530_v53  ;;  %v11616_v44 = vld [vmem:[#allocation12 + $0xd8] sm:$0xff]  }
 0x44c   :  { %v11589_v0 = vld [vmem:[#allocation9 + $0x19c0] ss:$24 sps:$4 sm:$0xff]  }
 0x44d   :  { %v11617_v53 = vld [vmem:[#allocation12 + $0x98] sm:$0xff]  }
 0x44e   :  { %8607 = vmatpush1.bf16.msra.mxu0 %v11519_v30  ;;  %8283 = vmatpush1.bf16.msra.mxu1 %v11528_v11  ;;  %v11594_v30 = vld [vmem:[#allocation9 + $0x19f4] ss:$24 sps:$4 sm:$0xff]   ;;  %v11592_v11 = vld [vmem:[#allocation9 + $0x19f0] ss:$24 sps:$4 sm:$0xff]  }
 0x44f   :  { %8608 = vmatprep.subr.bf16.mxu0 %v11527_v63  ;;  %8284 = vmatprep.subr.bf16.mxu1 %v11536_v34  ;;  %v11597_v63 = vld [vmem:[#allocation9 + $0x1a24] ss:$24 sps:$4 sm:$0xff]   ;;  %v11595_v34 = vld [vmem:[#allocation9 + $0x1a20] ss:$24 sps:$4 sm:$0xff]  }
 0x452   :  { %8609 = vmatpush1.bf16.msra.mxu0 %v11525_v25  ;;  %8285 = vmatpush1.bf16.msra.mxu1 %v11534_v2  ;;  %v11600_v25 = vld [vmem:[#allocation9 + $0x1a54] ss:$24 sps:$4 sm:$0xff]   ;;  %v11598_v2 = vld [vmem:[#allocation9 + $0x1a50] ss:$24 sps:$4 sm:$0xff]  }
 0x453   :  { %8610 = vmatprep.subr.bf16.mxu0 %v11533_v49  ;;  %8286 = vmatprep.subr.bf16.mxu1 %v11542_v43  ;;  %v11603_v49 = vld [vmem:[#allocation9 + $0x1a84] ss:$24 sps:$4 sm:$0xff]   ;;  %v11601_v43 = vld [vmem:[#allocation9 + $0x1a80] ss:$24 sps:$4 sm:$0xff]  }
 0x456   :  { %8611 = vmatpush1.bf16.msra.mxu0 %v11531_v62  ;;  %8287 = vmatpush1.bf16.msra.mxu1 %v11540_v54  ;;  %v11606_v62 = vld [vmem:[#allocation9 + $0x1ab4] ss:$24 sps:$4 sm:$0xff]   ;;  %v11604_v54 = vld [vmem:[#allocation9 + $0x1ab0] ss:$24 sps:$4 sm:$0xff]  }
 0x457   :  { %8612 = vmatprep.subr.bf16.mxu0 %v11539_v39  ;;  %10121 = vmatprep.subr.bf16.mxu1 %v11549_v59  ;;  %v11609_v39 = vld [vmem:[#allocation9 + $0x1ae4] ss:$24 sps:$4 sm:$0xff]   ;;  %v11607_v59 = vld [vmem:[#allocation9 + $0x1ae0] ss:$24 sps:$4 sm:$0xff]  }
 0x459   :  { %8289 = vmatmul.mubr.bf16.vlgmr.msra.gmra.mrb[4].mxu1 %v13187_v13 }
 0x45a   :  { %8613 = vmatpush1.bf16.msra.mxu0 %v11537_v52  ;;  %10122 = vmatpush3.bf16.msra.mxu1 %v11550_v12  ;;  %v11619_v52 = vld [vmem:[#allocation12 + $0xa0] sm:$0xff]   ;;  %v11620_v12 = vld [vmem:[#allocation12 + $0xe8] sm:$0xff]  }
 0x45b   :  { %8614 = vmatprep.subr.bf16.mxu0 %v11545_v21  ;;  %9101 = vmatprep.mubr.bf16.mxu1 %v8673_v33  ;;  %v11621_v21 = vld [vmem:[#allocation12 + $0xa8] sm:$0xff]   ;;  %v11623_v33 = vld [vmem:[#allocation12 + $0xb0] sm:$0xff]  }
 0x45c   :  { %10123 = vmatprep.subr.bf16.mxu1 %v11554_v17  ;;  %v11622_v17 = vld [vmem:[#allocation12 + $0xf0] sm:$0xff]  }
 0x45e   :  { %8615 = vmatpush1.bf16.msra.mxu0 %v11543_v23  ;;  %10124 = vmatpush3.bf16.msra.mxu1 %v11555_v56  ;;  %v11624_v23 = vld [vmem:[#allocation12 + $0xf8] sm:$0xff]  }
 0x45f   :  { %8625 = vmatprep.subr.bf16.mxu0 %v11548_v60  ;;  %10125 = vmatprep.subr.bf16.mxu1 %v11559_v9  ;;  %v11625_v56 = vld [vmem:[#allocation12 + $0xb8] sm:$0xff]   ;;  %v11626_v60 = vld [vmem:[#allocation12 + $0x140] sm:$0xff]   ;;  %v3223_v9 = vsub.s32 3, %v13207_v10 }
 0x461   :  { %8617 = vmatmul.mubr.bf16.vlgmr.msra.gmra.mrb[4].mxu0 %v13176_v35  ;;  %v11561_v35 = vld [vmem:[#allocation9 + $0x18a0] ss:$24 sps:$4 sm:$0xff]  }
 0x462   :  { %8626 = vmatpush1.bf16.msra.mxu0 %v11546_v51  ;;  %10126 = vmatpush3.bf16.msra.mxu1 %v11560_v27  ;;  %v11678_v51 = vld [vmem:[#allocation10] sm:$0x3f] }
 0x463   :  { %8627 = vmatprep.subr.bf16.mxu0 %v11553_v48  ;;  %10127 = vmatprep.subr.bf16.mxu1 %v11564_v7  ;;  %v3224_v48 = vrot.slane %v11678_v51, %v3223_v9 }
 0x464   :  { %8657 = vmatprep.mubr.bf16.mxu0 %v13179_v20  ;;  %v11566_v20 = vld [vmem:[#allocation9 + $0x18d0] ss:$24 sps:$4 sm:$0xff]  }
 0x466   :  { %8628 = vmatpush1.bf16.msra.mxu0 %v11551_v31  ;;  %10128 = vmatpush3.bf16.msra.mxu1 %v11565_v47 }
 0x467   :  { %8629 = vmatprep.subr.bf16.mxu0 %v11558_v26  ;;  %10129 = vmatprep.subr.bf16.mxu1 %v11569_v58 }
 0x46a   :  { %8630 = vmatpush1.bf16.msra.mxu0 %v11556_v36  ;;  %10130 = vmatpush3.bf16.msra.mxu1 %v11570_v18 }
 0x46b   :  { %8631 = vmatprep.subr.bf16.mxu0 %v11563_v46  ;;  %10131 = vmatprep.subr.bf16.mxu1 %v11574_v16 }
 0x46e   :  { %8632 = vmatpush1.bf16.msra.mxu0 %v11561_v35  ;;  %10132 = vmatpush3.bf16.msra.mxu1 %v11575_v28  ;;  %v11627_v35 = vld [vmem:[#allocation12 + $0x100] sm:$0xff]  }
 0x46f   :  { %8633 = vmatprep.subr.bf16.mxu0 %v11568_v8  ;;  %10133 = vmatprep.subr.bf16.mxu1 %v11579_v37  ;;  %v11628_v8 = vld [vmem:[#allocation12 + $0x148] sm:$0xff]  }
 0x470   :  { %v11629_v37 = vld [vmem:[#allocation12 + $0x108] sm:$0xff]  }
 0x472   :  { %8634 = vmatpush1.bf16.msra.mxu0 %v11566_v20  ;;  %10134 = vmatpush3.bf16.msra.mxu1 %v11580_v61  ;;  %v11630_v20 = vld [vmem:[#allocation12 + $0x150] sm:$0xff]  }
 0x473   :  { %8635 = vmatprep.subr.bf16.mxu0 %v11573_v4  ;;  %10135 = vmatprep.subr.bf16.mxu1 %v11584_v1  ;;  %v11631_v61 = vld [vmem:[#allocation12 + $0x110] sm:$0xff]   ;;  %v11632_v4 = vld [vmem:[#allocation12 + $0x158] sm:$0xff]  }
 0x474   :  { %v11633_v1 = vld [vmem:[#allocation12 + $0x118] sm:$0xff]  }
 0x476   :  { %8636 = vmatpush1.bf16.msra.mxu0 %v11571_v50  ;;  %10136 = vmatpush3.bf16.msra.mxu1 %v11585_v45  ;;  %v11634_v50 = vld [vmem:[#allocation12 + $0x160] sm:$0xff]  }
 0x477   :  { %8637 = vmatprep.subr.bf16.mxu0 %v11578_v19  ;;  %10143 = vmatprep.subr.bf16.mxu1 %v11610_v22  ;;  %v11635_v45 = vld [vmem:[#allocation12 + $0x120] sm:$0xff]   ;;  %v11636_v22 = vld [vmem:[#allocation12 + $0x168] sm:$0xff]  }
 0x479   :  { %9102 = vmatmul.mubr.bf16.vlgmr.msra.gmra.mrb[8].mxu1 %v8672_v32 }
 0x47a   :  { %8638 = vmatpush1.bf16.msra.mxu0 %v11576_v42  ;;  %10144 = vmatpush3.bf16.msra.mxu1 %v11611_v6 }
 0x47b   :  { %8639 = vmatprep.subr.bf16.mxu0 %v11583_v24  ;;  %10145 = vmatprep.subr.bf16.mxu1 %v11612_v15  ;;  %v11637_v24 = vld [vmem:[#allocation12 + $0x128] sm:$0xff]   ;;  %v11638_v15 = vld [vmem:[#allocation12 + $0x170] sm:$0xff]  }
 0x47e   :  { %8640 = vmatpush1.bf16.msra.mxu0 %v11581_v57  ;;  %10146 = vmatpush3.bf16.msra.mxu1 %v11613_v29  ;;  %v11639_v57 = vld [vmem:[#allocation12 + $0x130] sm:$0xff]   ;;  %v11640_v29 = vld [vmem:[#allocation12 + $0x178] sm:$0xff]  }
 0x47f   :  { %8641 = vmatprep.subr.bf16.mxu0 %v11588_v5  ;;  %10147 = vmatprep.subr.bf16.mxu1 %v11614_v3  ;;  %v11641_v5 = vld [vmem:[#allocation12 + $0x138] sm:$0xff]   ;;  %v3227_v3 = vsub.s32 4, %v13207_v10 }
 0x482   :  { %8642 = vmatpush1.bf16.msra.mxu0 %v11586_v14  ;;  %10148 = vmatpush3.bf16.msra.mxu1 %v11615_v41  ;;  %v3231_v14 = vsub.s32 5, %v13207_v10  ;;  %v3228_v41 = vrot.slane %v11678_v51, %v3227_v3 }
 0x483   :  { %8643 = vmatprep.subr.bf16.mxu0 %v11591_v55  ;;  %10149 = vmatprep.subr.bf16.mxu1 %v11616_v44 }
 0x484   :  { %v3232_v55 = vrot.slane %v11678_v51, %v3231_v14 }
 0x486   :  { %8644 = vmatpush1.bf16.msra.mxu0 %v11589_v0  ;;  %10150 = vmatpush3.bf16.msra.mxu1 %v11617_v53 }
 0x487   :  { %8645 = vmatprep.subr.bf16.mxu0 %v11594_v30  ;;  %10151 = vmatprep.subr.bf16.mxu1 %v11618_v38 }
 0x48a   :  { %8646 = vmatpush1.bf16.msra.mxu0 %v11592_v11  ;;  %10152 = vmatpush3.bf16.msra.mxu1 %v11619_v52 }
 0x48b   :  { %8647 = vmatprep.subr.bf16.mxu0 %v11597_v63  ;;  %10153 = vmatprep.subr.bf16.mxu1 %v11620_v12 }
 0x48e   :  { %8648 = vmatpush1.bf16.msra.mxu0 %v11595_v34  ;;  %10154 = vmatpush3.bf16.msra.mxu1 %v11621_v21 }
 0x48f   :  { %8649 = vmatprep.subr.bf16.mxu0 %v11600_v25  ;;  %10155 = vmatprep.subr.bf16.mxu1 %v11622_v17 }
 0x492   :  { %8650 = vmatpush1.bf16.msra.mxu0 %v11598_v2  ;;  %10156 = vmatpush3.bf16.msra.mxu1 %v11623_v33 }
 0x493   :  { %8651 = vmatprep.subr.bf16.mxu0 %v11603_v49  ;;  %10157 = vmatprep.subr.bf16.mxu1 %v11624_v23 }
 0x496   :  { %8652 = vmatpush1.bf16.msra.mxu0 %v11601_v43  ;;  %10158 = vmatpush3.bf16.msra.mxu1 %v11625_v56  ;;  %v10072_v43 = vld [vmem:[#allocation13] ss:$0 sm:$0xff] }
 0x497   :  { %8653 = vmatprep.subr.bf16.mxu0 %v11606_v62  ;;  %10165 = vmatprep.subr.bf16.mxu1 %v11626_v60 }
 0x49a   :  { %8654 = vmatpush1.bf16.msra.mxu0 %v11604_v54 }
 0x49b   :  { %8655 = vmatprep.subr.bf16.mxu0 %v11609_v39 }
 0x49e   :  { %8656 = vmatpush1.bf16.msra.mxu0 %v11607_v59 }
 0x4a1   :  { %8658 = vmatmul.mubr.bf16.vlgmr.msra.gmra.mrb[4].mxu0 %v13187_v13  ;;  %v3219_v13 = vsub.s32 2, %v13207_v10 }
 0x4a3   :  { %v3220_v27 = vrot.slane %v11678_v51, %v3219_v13 }
 0x52c   :  { %v8290_v7 = vpop.f32.mrb[4].mxu1 }
 0x52d   :  { %v10191_v31 = vadd.f32 %v8290_v7, %v3220_v27  ;;  %v8292_v47 = vpop.f32.mrb[5].mxu1 }
 0x52e   :  { %v10192_v26 = vadd.f32 %v8292_v47, %v3224_v48  ;;  %v8294_v58 = vpop.f32.mrb[6].mxu1 }
 0x52f   :  { %11646 = vtanh.f32 %v10191_v31  ;;  %v8295_v36 = vpop.f32.mrb[7].mxu1 }
 0x530   :  { %11648 = vtanh.f32 %v10192_v26 }
 0x539   :  { %v11647_v18 = vpop.eup %11646 }
 0x53a   :  { %v11649_v46 = vpop.eup %11648  ;;  %v8674_v28 = vpack.c.bf16 %v11647_v18, %v11647_v18 }
 0x53b   :  { %v8675_v16 = vpack.c.bf16 %v11649_v46, %v11649_v46 }
 0x53d   :  { %9141 = vmatprep.mubr.bf16.mxu1 %v8675_v16 }
 0x53e   :  { %9142 = vmatmul.mubr.bf16.vlgmr.msra.gmra.mrb[12].mxu1 %v8674_v28 }
 0x53f   :  { %10166 = vmatpush3.bf16.msra.mxu1 %v11627_v35 }
 0x540   :  { %10167 = vmatprep.subr.bf16.mxu1 %v11628_v8 }
 0x543   :  { %10168 = vmatpush3.bf16.msra.mxu1 %v11629_v37 }
 0x544   :  { %10169 = vmatprep.subr.bf16.mxu1 %v11630_v20 }
 0x547   :  { %10170 = vmatpush3.bf16.msra.mxu1 %v11631_v61 }
 0x548   :  { %10171 = vmatprep.subr.bf16.mxu1 %v11632_v4 }
 0x54b   :  { %10172 = vmatpush3.bf16.msra.mxu1 %v11633_v1 }
 0x54c   :  { %v10137_v19 = vpop.f32.mrb[8].mxu1  ;;  %10173 = vmatprep.subr.bf16.mxu1 %v11634_v50 }
 0x54d   :  { %v10138_v40 = vpop.f32.mrb[9].mxu1 }
 0x54e   :  { %v10139_v42 = vadd.f32 %v10138_v40, %v10137_v19  ;;  %v10140_v6 = vpop.f32.mrb[10].mxu1 }
 0x54f   :  { %v10141_v32 = vpop.f32.mrb[11].mxu1  ;;  %10174 = vmatpush3.bf16.msra.mxu1 %v11635_v45 }
 0x550   :  { %10175 = vmatprep.subr.bf16.mxu1 %v11636_v22  ;;  %v9104_v10 = vadd.f32 %v10139_v42, %v10072_v43 }
 0x553   :  { %10176 = vmatpush3.bf16.msra.mxu1 %v11637_v24 }
 0x554   :  { %10177 = vmatprep.subr.bf16.mxu1 %v11638_v15 }
 0x557   :  { %10178 = vmatpush3.bf16.msra.mxu1 %v11639_v57 }
 0x558   :  { %10179 = vmatprep.subr.bf16.mxu1 %v11640_v29 }
 0x55b   :  { %10180 = vmatpush3.bf16.msra.mxu1 %v11641_v5 }
 0x574   :  { %v8659_v44 = vpop.f32.mrb[4].mxu0 }
 0x575   :  { %v10193_v0 = vadd.f32 %v8659_v44, %v3228_v41  ;;  %v8661_v53 = vpop.f32.mrb[5].mxu0 }
 0x576   :  { %v10194_v30 = vadd.f32 %v8661_v53, %v3232_v55  ;;  %v8663_v11 = vpop.f32.mrb[6].mxu0 }
 0x577   :  { %11650 = vtanh.f32 %v10193_v0  ;;  %v8664_v63 = vpop.f32.mrb[7].mxu0 }
 0x578   :  { %11652 = vtanh.f32 %v10194_v30 }
 0x581   :  { %v11651_v34 = vpop.eup %11650 }
 0x582   :  { %v11653_v25 = vpop.eup %11652  ;;  %v8676_v49 = vpack.c.bf16 %v11651_v34, %v11651_v34 }
 0x583   :  { %v8677_v2 = vpack.c.bf16 %v11653_v25, %v11653_v25 }
 0x585   :  { %9181 = vmatprep.mubr.bf16.mxu1 %v8677_v2 }
 0x586   :  { %9182 = vmatmul.mubr.bf16.vlgmr.msra.gmra.mrb[16].mxu1 %v8676_v49 }
 0x611   :  { %v10159_v62 = vpop.f32.mrb[12].mxu1 }
 0x612   :  { %v10160_v54 = vpop.f32.mrb[13].mxu1 }
 0x613   :  { %v10161_v39 = vadd.f32 %v10160_v54, %v10159_v62  ;;  %v10162_v59 = vpop.f32.mrb[14].mxu1 }
 0x614   :  { %v10163_v38 = vpop.f32.mrb[15].mxu1 }
 0x615   :  { %v9144_v52 = vadd.f32 %v10161_v39, %v9104_v10 }
 0x659   :  { %v10181_v12 = vpop.f32.mrb[16].mxu1 }
 0x65a   :  { %v10182_v21 = vpop.f32.mrb[17].mxu1 }
 0x65b   :  { %v10183_v17 = vadd.f32 %v10182_v21, %v10181_v12  ;;  %v10184_v33 = vpop.f32.mrb[18].mxu1 }
 0x65c   :  { %v10185_v23 = vpop.f32.mrb[19].mxu1 }
 0x65d   :  { %v9184_v56 = vadd.f32 %v10183_v17, %v9144_v52 }
 0x65f   :  { %9189 = vst [vmem:[#allocation15] sm:$0xff] %v9184_v56 }
 0x660   :  { %11822 = shalt.err (!%p11819_p10)
}
 0x661   :  { %s11823_s23 = scalar_lea.hbm %s13261_s6, 128 }
 0x662   :  { %p11824_p11 = scmp.ne.s32.totalorder %s13261_s6, %s11823_s23  ;;  %p11827_p12 = scmp.lt.u32.totalorder %s11823_s23, %s13261_s6 }
 0x664   :  { %p11829_p13 = pnand %p11827_p12, %p11824_p11 }
 0x666   :  { %11832 = shalt.err (!%p11829_p13)
}
 0x667   :  { %9199 = dma.vmem_to_hbm [thread:$0]  %s9197_s0, 128, %s13261_s6, [#allocation6]  }
 0x668   :  { %11841 = dma.done.wait [#allocation6], 128  }
 0x669   :  { %11842 = vsyncadd [#allocation6], 4294967168 }
 0x66a   :  { %9203 = vsyncpa [#allocation5], 1 }
 0x66b   :  { %9204 = vsyncpa [#allocation8], 1 }
 0x66c   :  { %9205 = vsyncpa [#allocation11], 1 }
 0x66d   :  { %9206 = vsyncpa [#allocation14], 1 }
 0x66e   :  { %9207 = vsyncpa [#allocation6], 1 }

</bundles_post_ra>
